<compile_context>
chip_gen: v7x
topology: tpu7x:2x2x1
jax: 0.10.0
libtpu: 0.0.40
codegen_flags: <defaults>
</compile_context>

<pallas_src>
import math

import jax
import jax.numpy as jnp
from jax.experimental import pallas as pl
from jax.experimental.pallas import tpu as pltpu

L = 20           # encoder window
STRIDE = L // 2  # encoder hop


# ----------------------------- pallas plumbing -----------------------------

def _full_spec(shape):
    # whole-array block (block_shape == full shape waives the (8,128) rule)
    return pl.BlockSpec(shape, lambda *_: (0,) * len(shape))


def _pcall(kernel, inputs, out_shape, smem_idx=(), scratch_shapes=()):
    """grid=(1,) pallas_call with whole-array VMEM blocks (+ optional SMEM scalars)."""
    inputs = [jnp.asarray(a, jnp.float32) for a in inputs]
    in_specs = [
        pl.BlockSpec(memory_space=pltpu.MemorySpace.SMEM) if i in smem_idx
        else _full_spec(a.shape)
        for i, a in enumerate(inputs)
    ]
    multi = isinstance(out_shape, (tuple, list))
    if multi:
        out_shapes = tuple(out_shape)
        out_specs = tuple(_full_spec(s.shape) for s in out_shapes)
    else:
        out_shapes = out_shape
        out_specs = _full_spec(out_shape.shape)
    return pl.pallas_call(
        kernel,
        out_shape=out_shapes,
        grid=(1,),
        in_specs=in_specs,
        out_specs=out_specs,
        scratch_shapes=list(scratch_shapes),
    )(*inputs)


# ------------------------ in-kernel value helpers --------------------------

def _ln_rows(x, g, b, eps=1e-5):
    mu = jnp.mean(x, axis=-1, keepdims=True)
    var = jnp.mean(jnp.square(x - mu), axis=-1, keepdims=True)
    return (x - mu) * jax.lax.rsqrt(var + eps) * g + b


def _prelu(x, a):
    return jnp.where(x >= 0.0, x, a * x)


def _frames_from_halves(xh):
    # xh: (T+1, STRIDE)  ->  frames (T, L);  frame t = [half_t ; half_{t+1}]
    return jnp.concatenate([xh[:-1, :], xh[1:, :]], axis=1)


def _maxpool3_rows(h):
    # MaxPool1d(kernel=3, stride=3) over rows, fused in-kernel (static unroll).
    M, _ = h.shape
    t3 = M // 3
    rows = [
        jnp.maximum(jnp.maximum(h[3 * i:3 * i + 1, :], h[3 * i + 1:3 * i + 2, :]),
                    h[3 * i + 2:3 * i + 3, :])
        for i in range(t3)
    ]
    return rows[0] if t3 == 1 else jnp.concatenate(rows, axis=0)


def _resblock(x, W1, b1, a1, W2, b2, a2, Wd=None):
    # conv1x1 -> BN(folded) -> PReLU -> conv1x1 -> BN(folded) -> +res -> PReLU
    h = _prelu(jnp.dot(x, W1, preferred_element_type=jnp.float32) + b1, a1)
    h2 = jnp.dot(h, W2, preferred_element_type=jnp.float32) + b2
    res = x if Wd is None else jnp.dot(x, Wd, preferred_element_type=jnp.float32)
    return _prelu(h2 + res, a2)


# ------------------------------ fused kernels ------------------------------

def _mix_frontend_kernel(xh_ref, encW, encb, lng, lnb, projW, projb,
                         w_ref, y_ref):
    """Encoder(+ReLU) -> x3 channel concat -> ChannelwiseLayerNorm -> 1x1 proj."""
    frames = _frames_from_halves(xh_ref[...])                       # (T, L)
    w = jnp.maximum(
        jnp.dot(frames, encW[...], preferred_element_type=jnp.float32) + encb[...],
        0.0)                                                        # (T, N)
    w_ref[...] = w
    y3 = jnp.concatenate([w, w, w], axis=1)                         # (T, 3N)
    yn = _ln_rows(y3, lng[...], lnb[...])
    y_ref[...] = jnp.dot(yn, projW[...], preferred_element_type=jnp.float32) + projb[...]


def _aux_kernel(ah_ref, encW, encb, lng, lnb, projW, projb,
                r1W1, r1b1, r1W2, r1b2,
                r2W1, r2b1, r2W2, r2b2, r2Wd,
                r3W1, r3b1, r3W2, r3b2,
                outW, outb, predW, predb, scal,
                emb_ref, pred_ref):
    """Whole speaker path: encoder -> LN -> proj -> 3x(ResBlock+MaxPool) ->
       out conv -> mean embedding (/aux_T) -> speaker prediction head."""
    frames = _frames_from_halves(ah_ref[...])
    w = jnp.maximum(
        jnp.dot(frames, encW[...], preferred_element_type=jnp.float32) + encb[...],
        0.0)
    h = jnp.concatenate([w, w, w], axis=1)
    h = _ln_rows(h, lng[...], lnb[...])
    h = jnp.dot(h, projW[...], preferred_element_type=jnp.float32) + projb[...]
    h = _maxpool3_rows(_resblock(h, r1W1[...], r1b1[...], scal[0],
                                 r1W2[...], r1b2[...], scal[1]))
    h = _maxpool3_rows(_resblock(h, r2W1[...], r2b1[...], scal[2],
                                 r2W2[...], r2b2[...], scal[3], r2Wd[...]))
    h = _maxpool3_rows(_resblock(h, r3W1[...], r3b1[...], scal[4],
                                 r3W2[...], r3b2[...], scal[5]))
    e = jnp.dot(h, outW[...], preferred_element_type=jnp.float32) + outb[...]
    emb = jnp.sum(e, axis=0, keepdims=True) / scal[6]               # (1, D)
    emb_ref[...] = emb
    pred_ref[...] = jnp.dot(emb, predW[...], preferred_element_type=jnp.float32) + predb[...]


def _c1x1_kernel(y_ref, av_ref, wy, wa, b, o_ref):
    """conv1x1 over concat([y, broadcast(aux_vec)]) == y@Wy + aux_vec@Wa + b."""
    o_ref[...] = (jnp.dot(y_ref[...], wy[...], preferred_element_type=jnp.float32)
                  + jnp.dot(av_ref[...], wa[...], preferred_element_type=jnp.float32)
                  + b[...])


def _mask_decode_kernel(y_ref, mW, mb, w_ref, dW, o_ref):
    """m = relu(y@mW+mb); S = w*m; frames = S@dW; dense overlap-add (stride=L/2)."""
    m = jnp.maximum(
        jnp.dot(y_ref[...], mW[...], preferred_element_type=jnp.float32) + mb[...],
        0.0)
    s = w_ref[...] * m
    frames = jnp.dot(s, dW[...], preferred_element_type=jnp.float32)   # (T, L)
    T = frames.shape[0]
    A = frames[:, :STRIDE]
    B = frames[:, STRIDE:]
    parts = [A[0:1, :]]
    if T > 1:
        parts.append(A[1:, :] + B[:-1, :])
    parts.append(B[T - 1:T, :])
    o_ref[...] = jnp.concatenate(parts, axis=0)                        # (T+1, STRIDE)


def _make_bilstm_kernel(with_out):
    """BiLSTM block: full recurrence inside the kernel (statically unrolled),
       + Linear + LayerNorm + residual; optionally + PReLU + output 1x1 conv."""

    def kernel(*refs):
        if with_out:
            (x_ref, wif, whf, bfr, wib, whb, bbr,
             wlin, blin, g, be, wout, bout, scal, o_ref) = refs
        else:
            (x_ref, wif, whf, bfr, wib, whb, bbr,
             wlin, blin, g, be, o_ref) = refs

        Ts, B, _ = x_ref.shape
        H = whf.shape[0]

        # weights stay resident in VMEM / vregs across the whole recurrence
        Wif, Whf, Bf = wif[...], whf[...], bfr[...]
        Wib, Whb, Bb = wib[...], whb[...], bbr[...]
        Wl, Bl, G, Be = wlin[...], blin[...], g[...], be[...]
        if with_out:
            Wo, Bo = wout[...], bout[...]
            alpha = scal[0]

        def step(x_t, h, c, Wi, Wh, Bg):
            gates = (jnp.dot(x_t, Wi, preferred_element_type=jnp.float32)
                     + jnp.dot(h, Wh, preferred_element_type=jnp.float32) + Bg)
            gi, gf, gg, go = jnp.split(gates, 4, axis=-1)
            c = jax.nn.sigmoid(gf) * c + jax.nn.sigmoid(gi) * jnp.tanh(gg)
            h = jax.nn.sigmoid(go) * jnp.tanh(c)
            return h, c

        zeros = jnp.zeros((B, H), jnp.float32)
        xs = [x_ref[t] for t in range(Ts)]

        # forward direction (statically unrolled -- Ts is tiny here).
        # TODO(synk): for long sequences switch to lax.fori_loop + VMEM scratch.
        h, c = zeros, zeros
        hf = []
        for t in range(Ts):
            h, c = step(xs[t], h, c, Wif, Whf, Bf)
            hf.append(h)

        # backward direction + projection + LayerNorm + residual (+ out conv)
        h, c = zeros, zeros
        for j in range(Ts):
            t = Ts - 1 - j
            h, c = step(xs[t], h, c, Wib, Whb, Bb)
            hcat = jnp.concatenate([hf[t], h], axis=-1)                # (B, 2H)
            proj = jnp.dot(hcat, Wl, preferred_element_type=jnp.float32) + Bl
            ln = _ln_rows(proj, G, Be)
            res = xs[t] + ln
            if with_out:
                res = _prelu(res, alpha)
                res = jnp.dot(res, Wo, preferred_element_type=jnp.float32) + Bo
            o_ref[t] = res

    return kernel


# ------------------------------ kernel wrappers -----------------------------

def mix_frontend(xh, p):
    Tn = xh.shape[0] - 1
    N = p["enc"]["W"].shape[1]
    O = p["proj_W"].shape[1]
    inputs = [xh, p["enc"]["W"], p["enc"]["b"], p["ln_g"], p["ln_b"],
              p["proj_W"], p["proj_b"]]
    outs = (jax.ShapeDtypeStruct((Tn, N), jnp.float32),
            jax.ShapeDtypeStruct((Tn, O), jnp.float32))
    return _pcall(_mix_frontend_kernel, inputs, outs)


def _fold_bn(p):
    # BatchNorm1d folded in eval mode: x@W*scale + shift == x@(W*scale) + shift
    q = {"W1": p["W1"] * p["s1"], "b1": p["t1"],
         "W2": p["W2"] * p["s2"], "b2": p["t2"],
         "a1": p["a1"], "a2": p["a2"]}
    if "Wd" in p:
        q["Wd"] = p["Wd"]
    return q


def aux_path(ah, p, aux_len):
    spk = p["spk"]
    r1 = _fold_bn(spk["rb1"])
    r2 = _fold_bn(spk["rb2"])
    r3 = _fold_bn(spk["rb3"])
    aux_T = ((jnp.asarray(aux_len, jnp.int32) - L) // STRIDE + 1) // 3 // 3 // 3
    scal = jnp.stack(
        [jnp.asarray(v, jnp.float32) for v in
         (r1["a1"], r1["a2"], r2["a1"], r2["a2"], r3["a1"], r3["a2"])]
        + [aux_T.astype(jnp.float32)])
    inputs = [ah, p["enc"]["W"], p["enc"]["b"],
              spk["ln_g"], spk["ln_b"], spk["proj_W"], spk["proj_b"],
              r1["W1"], r1["b1"], r1["W2"], r1["b2"],
              r2["W1"], r2["b1"], r2["W2"], r2["b2"], r2["Wd"],
              r3["W1"], r3["b1"], r3["W2"], r3["b2"],
              spk["out_W"], spk["out_b"], p["pred_W"], p["pred_b"], scal]
    D = spk["out_W"].shape[1]
    ns = p["pred_W"].shape[1]
    outs = (jax.ShapeDtypeStruct((1, D), jnp.float32),
            jax.ShapeDtypeStruct((1, ns), jnp.float32))
    return _pcall(_aux_kernel, inputs, outs, smem_idx=(len(inputs) - 1,))


def c1x1_apply(y, aux_vec, p):
    O = y.shape[1]
    Wy = p["c1x1_W"][:O, :]
    Wa = p["c1x1_W"][O:, :]
    outs = jax.ShapeDtypeStruct((y.shape[0], p["c1x1_W"].shape[1]), jnp.float32)
    return _pcall(_c1x1_kernel, [y, aux_vec, Wy, Wa, p["c1x1_b"]], outs)


def bilstm_block(x_tm, pf, pb, W_lin, b_lin, gamma, beta,
                 out_alpha=None, out_W=None, out_b=None):
    """x_tm: (Ts, B, C) time-major.  Returns (Ts, B, Cout)."""
    Ts, B, C = x_tm.shape
    with_out = out_W is not None
    inputs = [x_tm, pf["Wih"], pf["Whh"], pf["b"],
              pb["Wih"], pb["Whh"], pb["b"],
              W_lin, b_lin, gamma, beta]
    smem_idx = ()
    if with_out:
        inputs += [out_W, out_b,
                   jnp.reshape(jnp.asarray(out_alpha, jnp.float32), (1,))]
        smem_idx = (len(inputs) - 1,)
    Cout = out_W.shape[1] if with_out else C
    outs = jax.ShapeDtypeStruct((Ts, B, Cout), jnp.float32)
    return _pcall(_make_bilstm_kernel(with_out), inputs, outs, smem_idx=smem_idx)


def mask_decode(y, w, p):
    T = y.shape[0]
    outs = jax.ShapeDtypeStruct((T + 1, STRIDE), jnp.float32)
    return _pcall(_mask_decode_kernel,
                  [y, p["mask_W"], p["mask_b"], w, p["dec"]["W"]], outs)


def dprnn_apply(y, p, K=8):
    """DualPathRNN(O,H,O,num_speakers=1): segment -> intra BiLSTM block ->
       inter BiLSTM block (+PReLU+1x1 conv) -> dense overlap-add.  (T,O)->(T,O)."""
    T, C = y.shape
    hop = K // 2
    if T <= K:
        T_pad = K
    else:
        T_pad = K + hop * int(math.ceil((T - K) / hop))
    n_chunks = T_pad // hop
    Sg = n_chunks - 1

    # dense segmentation: seg[s] = ypad[s*hop : s*hop + K] = [chunk_s ; chunk_{s+1}]
    ypad = jnp.pad(y, ((0, T_pad - T), (0, 0)))
    chunks = ypad.reshape(n_chunks, hop, C)
    seg = jnp.concatenate([chunks[:-1], chunks[1:]], axis=1)        # (Sg, K, C)

    # intra-chunk block (time=K, batch=Sg), time-major input
    x_intra = jnp.swapaxes(seg, 0, 1)                               # (K, Sg, C)
    h_intra = bilstm_block(x_intra, p["intra_f"], p["intra_bwd"],
                           p["intra_W"], p["intra_b"], p["intra_g"], p["intra_be"])

    # inter-chunk block (time=Sg, batch=K), with PReLU + out 1x1 conv fused
    x_inter = jnp.swapaxes(h_intra, 0, 1)                           # (Sg, K, C)
    seg_out = bilstm_block(x_inter, p["inter_f"], p["inter_bwd"],
                           p["inter_W"], p["inter_b"], p["inter_g"], p["inter_be"],
                           out_alpha=p["out_alpha"], out_W=p["out_W"], out_b=p["out_b"])

    # dense overlap-add (hop = K/2 -> every frame covered by <= 2 segments)
    A = seg_out[:, :hop, :].reshape(Sg * hop, C)
    Bh = seg_out[:, hop:, :].reshape(Sg * hop, C)
    z = jnp.zeros((hop, C), jnp.float32)
    out = jnp.concatenate([A, z], axis=0) + jnp.concatenate([z, Bh], axis=0)
    # TODO(synk): verify vs PyTorch DPRNN _over_add whether the overlapped region
    # should be averaged; kept as a plain sum to match the previous port.
    return out[:T]


# ------------------------------ full forward -------------------------------

def spex_plus_dprnn_forward(params, x, aux, aux_len):
    if x.ndim == 1:
        x = x[None, :]
    if aux.ndim == 1:
        aux = aux[None, :]
    assert x.shape[0] == 1 and aux.shape[0] == 1, "reference forward supports batch=1"
    xs = x[0].astype(jnp.float32)
    auxs = aux[0].astype(jnp.float32)

    S = xs.shape[0]
    T = (S - L) // STRIDE + 1
    xlen2 = (T + 1) * STRIDE                 # == (T-1)*STRIDE + L  (<= S)
    xh = xs[:xlen2].reshape(T + 1, STRIDE)   # half-frame slab (dense, no gather)

    Sa = auxs.shape[0]
    Ta = (Sa - L) // STRIDE + 1
    alen2 = (Ta + 1) * STRIDE
    ah = auxs[:alen2].reshape(Ta + 1, STRIDE)

    # The reference's w1/w2/w3 (and aux streams) are numerically identical, so
    # each path is computed once and reused (dedup per performance review).
    w, y = mix_frontend(xh, params)                    # (T, N), (T, O)
    aux_vec, pred = aux_path(ah, params, aux_len)      # (1, D), (1, num_spks)
    y = c1x1_apply(y, aux_vec, params)                 # (T, O)
    y = dprnn_apply(y, params["dprnn"])                # (T, O)
    out2d = mask_decode(y, w, params)                  # (T+1, STRIDE)

    d = out2d.reshape(-1) + params["dec"]["b"][0]      # (xlen2,)
    d1 = d[None, :]
    d23 = d[: min(xlen2, S)][None, :]                  # decoder(S)[: , :xlen1]
    return d1, d23, d23, pred


# --------------------------- deterministic init ----------------------------

class KeyGen:
    def __init__(self, key):
        self._key = key

    def __call__(self):
        self._key, sub = jax.random.split(self._key)
        return sub


def nrm(k, shape, scale=0.1):
    return scale * jax.random.normal(k, shape, jnp.float32)


def init_resblock(kg, cin, cout):
    # BatchNorm1d in eval mode (running_mean=0, running_var=1) -> scale/shift.
    bn_scale = jnp.ones((1, cout), jnp.float32) / jnp.sqrt(1.0 + 1e-5)
    p = {
        "W1": nrm(kg(), (cin, cout)),
        "s1": bn_scale, "t1": 0.02 * jax.random.normal(kg(), (1, cout), jnp.float32),
        "a1": jnp.asarray(0.25, jnp.float32),
        "W2": nrm(kg(), (cout, cout)),
        "s2": bn_scale, "t2": 0.02 * jax.random.normal(kg(), (1, cout), jnp.float32),
        "a2": jnp.asarray(0.25, jnp.float32),
    }
    if cin != cout:
        p["Wd"] = nrm(kg(), (cin, cout))
    return p


def init_lstm(kg, I, H):
    return {"Wih": nrm(kg(), (I, 4 * H)),
            "Whh": nrm(kg(), (H, 4 * H)),
            "b": 0.01 * jax.random.normal(kg(), (1, 4 * H), jnp.float32)}


def init_params(key, num_spks=4, N=16, O=16, P=32, D=16, H=8):
    kg = KeyGen(key)
    p = {}
    p["enc"] = {"W": nrm(kg(), (L, N)), "b": jnp.zeros((1, N), jnp.float32)}
    p["ln_g"] = jnp.ones((1, 3 * N), jnp.float32)
    p["ln_b"] = jnp.zeros((1, 3 * N), jnp.float32)
    p["proj_W"] = nrm(kg(), (3 * N, O)); p["proj_b"] = jnp.zeros((1, O), jnp.float32)
    p["mask_W"] = nrm(kg(), (O, N)); p["mask_b"] = jnp.zeros((1, N), jnp.float32)
    p["dec"] = {"W": nrm(kg(), (N, L)), "b": jnp.zeros((1,), jnp.float32)}
    p["spk"] = {
        "ln_g": jnp.ones((1, 3 * N), jnp.float32),
        "ln_b": jnp.zeros((1, 3 * N), jnp.float32),
        "proj_W": nrm(kg(), (3 * N, O)), "proj_b": jnp.zeros((1, O), jnp.float32),
        "rb1": init_resblock(kg, O, O),
        "rb2": init_resblock(kg, O, P),
        "rb3": init_resblock(kg, P, P),
        "out_W": nrm(kg(), (P, D)), "out_b": jnp.zeros((1, D), jnp.float32),
    }
    p["pred_W"] = nrm(kg(), (D, num_spks))
    p["pred_b"] = jnp.zeros((1, num_spks), jnp.float32)
    p["c1x1_W"] = nrm(kg(), (O + D, O)); p["c1x1_b"] = jnp.zeros((1, O), jnp.float32)
    p["dprnn"] = {
        "intra_f": init_lstm(kg, O, H), "intra_bwd": init_lstm(kg, O, H),
        "intra_W": nrm(kg(), (2 * H, O)), "intra_b": jnp.zeros((1, O), jnp.float32),
        "intra_g": jnp.ones((1, O), jnp.float32), "intra_be": jnp.zeros((1, O), jnp.float32),
        "inter_f": init_lstm(kg, O, H), "inter_bwd": init_lstm(kg, O, H),
        "inter_W": nrm(kg(), (2 * H, O)), "inter_b": jnp.zeros((1, O), jnp.float32),
        "inter_g": jnp.ones((1, O), jnp.float32), "inter_be": jnp.zeros((1, O), jnp.float32),
        "out_alpha": jnp.asarray(0.25, jnp.float32),
        "out_W": nrm(kg(), (O, O)), "out_b": jnp.zeros((1, O), jnp.float32),
    }
    return p


# ---------------------------------- main -----------------------------------

if __name__ == "__main__":
    key = jax.random.PRNGKey(0)
    kx, ka, kp = jax.random.split(key, 3)

    S_x = 180     # (S_x - L) % STRIDE == 0  ->  T = 17, decoder length 180
    S_aux = 290   # aux frames 28 -> //3//3//3 = 1 after the three maxpools
    num_spks = 4

    x = 0.1 * jax.random.normal(kx, (1, S_x), jnp.float32)
    aux = 0.1 * jax.random.normal(ka, (1, S_aux), jnp.float32)
    aux_len = jnp.asarray(S_aux, jnp.int32)

    params = init_params(kp, num_spks=num_spks)
    fwd = jax.jit(spex_plus_dprnn_forward)
    outs = jax.block_until_ready(fwd(params, x, aux, aux_len))

    d1, d2, d3, pred = outs
    assert d1.shape == (1, S_x) and d2.shape == (1, S_x) and d3.shape == (1, S_x)
    assert pred.shape == (1, num_spks)
    assert all(bool(jnp.all(jnp.isfinite(o))) for o in (d1, d2, d3, pred))
    print("KERNEL_OK")
</pallas_src>

<mosaic_0001>
module attributes {stable_mosaic.version = 11 : i64} {
  func.func @_mix_frontend_kernel(%arg0: i32, %arg1: memref<18x10xf32, #tpu.memory_space<vmem>>, %arg2: memref<20x16xf32, #tpu.memory_space<vmem>>, %arg3: memref<1x16xf32, #tpu.memory_space<vmem>>, %arg4: memref<1x48xf32, #tpu.memory_space<vmem>>, %arg5: memref<1x48xf32, #tpu.memory_space<vmem>>, %arg6: memref<48x16xf32, #tpu.memory_space<vmem>>, %arg7: memref<1x16xf32, #tpu.memory_space<vmem>>, %arg8: memref<17x16xf32, #tpu.memory_space<vmem>>, %arg9: memref<17x16xf32, #tpu.memory_space<vmem>>) attributes {dimension_semantics = [#tpu.dimension_semantics<arbitrary>], iteration_bounds = array<i64: 1>, scalar_prefetch = 0 : i64, scratch_operands = 0 : i64, tpu.core_type = #tpu.core_type<tc>, window_params = [{pipeline_mode = #tpu.pipeline_mode<synchronous>, transform_indices = @transform_0, window_bounds = array<i64: 18, 10>}, {pipeline_mode = #tpu.pipeline_mode<synchronous>, transform_indices = @transform_1, window_bounds = array<i64: 20, 16>}, {pipeline_mode = #tpu.pipeline_mode<synchronous>, transform_indices = @transform_2, window_bounds = array<i64: 1, 16>}, {pipeline_mode = #tpu.pipeline_mode<synchronous>, transform_indices = @transform_3, window_bounds = array<i64: 1, 48>}, {pipeline_mode = #tpu.pipeline_mode<synchronous>, transform_indices = @transform_4, window_bounds = array<i64: 1, 48>}, {pipeline_mode = #tpu.pipeline_mode<synchronous>, transform_indices = @transform_5, window_bounds = array<i64: 48, 16>}, {pipeline_mode = #tpu.pipeline_mode<synchronous>, transform_indices = @transform_6, window_bounds = array<i64: 1, 16>}, {pipeline_mode = #tpu.pipeline_mode<synchronous>, transform_indices = @transform_7, window_bounds = array<i64: 17, 16>}, {pipeline_mode = #tpu.pipeline_mode<synchronous>, transform_indices = @transform_8, window_bounds = array<i64: 17, 16>}]} {
    %c0 = arith.constant 0 : index
    %c0_0 = arith.constant 0 : index
    %0 = vector.load %arg1[%c0, %c0_0] : memref<18x10xf32, #tpu.memory_space<vmem>>, vector<18x10xf32>
    %1 = vector.extract_strided_slice %0 {offsets = [0, 0], sizes = [17, 10], strides = [1, 1]} : vector<18x10xf32> to vector<17x10xf32>
    %2 = vector.extract_strided_slice %0 {offsets = [1, 0], sizes = [17, 10], strides = [1, 1]} : vector<18x10xf32> to vector<17x10xf32>
    %3 = tpu.concatenate %1, %2 in 1 : vector<17x10xf32>, vector<17x10xf32> -> vector<17x20xf32>
    %c0_1 = arith.constant 0 : index
    %c0_2 = arith.constant 0 : index
    %4 = vector.load %arg2[%c0_1, %c0_2] : memref<20x16xf32, #tpu.memory_space<vmem>>, vector<20x16xf32>
    %cst = arith.constant dense<0.000000e+00> : vector<17x16xf32>
    %5 = tpu.matmul %3, %4, %cst {dimension_numbers = #tpu.dot_dimension_numbers<[1], [0], [0], [1], [0, 0, 1, 1], [], []>} : vector<17x20xf32>, vector<20x16xf32>, vector<17x16xf32> -> vector<17x16xf32>
    %c0_3 = arith.constant 0 : index
    %c0_4 = arith.constant 0 : index
    %6 = vector.load %arg3[%c0_3, %c0_4] : memref<1x16xf32, #tpu.memory_space<vmem>>, vector<1x16xf32>
    %7 = vector.broadcast %6 : vector<1x16xf32> to vector<17x16xf32>
    %8 = arith.addf %5, %7 : vector<17x16xf32>
    %cst_5 = arith.constant 0.000000e+00 : f32
    %9 = vector.broadcast %cst_5 : f32 to vector<17x16xf32>
    %10 = arith.maximumf %8, %9 : vector<17x16xf32>
    %c0_6 = arith.constant 0 : index
    %c0_7 = arith.constant 0 : index
    %11 = vector.load %arg8[%c0_6, %c0_7] : memref<17x16xf32, #tpu.memory_space<vmem>>, vector<17x16xf32>
    tpu.vector_store %arg8[%c0_6, %c0_7], %10 {strides = array<i32>} : memref<17x16xf32, #tpu.memory_space<vmem>>, vector<17x16xf32>,
    %12 = tpu.concatenate %10, %10, %10 in 1 : vector<17x16xf32>, vector<17x16xf32>, vector<17x16xf32> -> vector<17x48xf32>
    %c0_8 = arith.constant 0 : index
    %c0_9 = arith.constant 0 : index
    %13 = vector.load %arg4[%c0_8, %c0_9] : memref<1x48xf32, #tpu.memory_space<vmem>>, vector<1x48xf32>
    %c0_10 = arith.constant 0 : index
    %c0_11 = arith.constant 0 : index
    %14 = vector.load %arg5[%c0_10, %c0_11] : memref<1x48xf32, #tpu.memory_space<vmem>>, vector<1x48xf32>
    %cst_12 = arith.constant dense<0.000000e+00> : vector<17xf32>
    %15 = vector.multi_reduction <add>, %12, %cst_12 [1] : vector<17x48xf32> to vector<17xf32>
    %16 = vector.shape_cast %15 : vector<17xf32> to vector<17x1xf32>
    %cst_13 = arith.constant 4.800000e+01 : f32
    %17 = vector.broadcast %cst_13 : f32 to vector<17x1xf32>
    %18 = arith.divf %16, %17 : vector<17x1xf32>
    %19 = vector.broadcast %18 : vector<17x1xf32> to vector<17x48xf32>
    %20 = arith.subf %12, %19 : vector<17x48xf32>
    %21 = arith.mulf %20, %20 : vector<17x48xf32>
    %cst_14 = arith.constant dense<0.000000e+00> : vector<17xf32>
    %22 = vector.multi_reduction <add>, %21, %cst_14 [1] : vector<17x48xf32> to vector<17xf32>
    %23 = vector.shape_cast %22 : vector<17xf32> to vector<17x1xf32>
    %cst_15 = arith.constant 4.800000e+01 : f32
    %24 = vector.broadcast %cst_15 : f32 to vector<17x1xf32>
    %25 = arith.divf %23, %24 : vector<17x1xf32>
    %26 = vector.broadcast %18 : vector<17x1xf32> to vector<17x48xf32>
    %27 = arith.subf %12, %26 : vector<17x48xf32>
    %cst_16 = arith.constant 9.99999974E-6 : f32
    %28 = vector.broadcast %cst_16 : f32 to vector<17x1xf32>
    %29 = arith.addf %25, %28 : vector<17x1xf32>
    %30 = math.rsqrt %29 : vector<17x1xf32>
    %31 = vector.broadcast %30 : vector<17x1xf32> to vector<17x48xf32>
    %32 = arith.mulf %27, %31 : vector<17x48xf32>
    %33 = vector.broadcast %13 : vector<1x48xf32> to vector<17x48xf32>
    %34 = arith.mulf %32, %33 : vector<17x48xf32>
    %35 = vector.broadcast %14 : vector<1x48xf32> to vector<17x48xf32>
    %36 = arith.addf %34, %35 : vector<17x48xf32>
    %c0_17 = arith.constant 0 : index
    %c0_18 = arith.constant 0 : index
    %37 = vector.load %arg6[%c0_17, %c0_18] : memref<48x16xf32, #tpu.memory_space<vmem>>, vector<48x16xf32>
    %cst_19 = arith.constant dense<0.000000e+00> : vector<17x16xf32>
    %38 = tpu.matmul %36, %37, %cst_19 {dimension_numbers = #tpu.dot_dimension_numbers<[1], [0], [0], [1], [0, 0, 1, 1], [], []>} : vector<17x48xf32>, vector<48x16xf32>, vector<17x16xf32> -> vector<17x16xf32>
    %c0_20 = arith.constant 0 : index
    %c0_21 = arith.constant 0 : index
    %39 = vector.load %arg7[%c0_20, %c0_21] : memref<1x16xf32, #tpu.memory_space<vmem>>, vector<1x16xf32>
    %40 = vector.broadcast %39 : vector<1x16xf32> to vector<17x16xf32>
    %41 = arith.addf %38, %40 : vector<17x16xf32>
    %c0_22 = arith.constant 0 : index
    %c0_23 = arith.constant 0 : index
    %42 = vector.load %arg9[%c0_22, %c0_23] : memref<17x16xf32, #tpu.memory_space<vmem>>, vector<17x16xf32>
    tpu.vector_store %arg9[%c0_22, %c0_23], %41 {strides = array<i32>} : memref<17x16xf32, #tpu.memory_space<vmem>>, vector<17x16xf32>,
    return
  }
  func.func @transform_0(%arg0: i32) -> (i32, i32) {
    %c0_i32 = arith.constant 0 : i32
    %c0_i32_0 = arith.constant 0 : i32
    %c0_i32_1 = arith.constant 0 : i32
    return %c0_i32, %c0_i32_0 : i32, i32
  }
  func.func @transform_1(%arg0: i32) -> (i32, i32) {
    %c0_i32 = arith.constant 0 : i32
    %c0_i32_0 = arith.constant 0 : i32
    %c0_i32_1 = arith.constant 0 : i32
    return %c0_i32, %c0_i32_0 : i32, i32
  }
  func.func @transform_2(%arg0: i32) -> (i32, i32) {
    %c0_i32 = arith.constant 0 : i32
    %c0_i32_0 = arith.constant 0 : i32
    %c0_i32_1 = arith.constant 0 : i32
    return %c0_i32, %c0_i32_0 : i32, i32
  }
  func.func @transform_3(%arg0: i32) -> (i32, i32) {
    %c0_i32 = arith.constant 0 : i32
    %c0_i32_0 = arith.constant 0 : i32
    %c0_i32_1 = arith.constant 0 : i32
    return %c0_i32, %c0_i32_0 : i32, i32
  }
  func.func @transform_4(%arg0: i32) -> (i32, i32) {
    %c0_i32 = arith.constant 0 : i32
    %c0_i32_0 = arith.constant 0 : i32
    %c0_i32_1 = arith.constant 0 : i32
    return %c0_i32, %c0_i32_0 : i32, i32
  }
  func.func @transform_5(%arg0: i32) -> (i32, i32) {
    %c0_i32 = arith.constant 0 : i32
    %c0_i32_0 = arith.constant 0 : i32
    %c0_i32_1 = arith.constant 0 : i32
    return %c0_i32, %c0_i32_0 : i32, i32
  }
  func.func @transform_6(%arg0: i32) -> (i32, i32) {
    %c0_i32 = arith.constant 0 : i32
    %c0_i32_0 = arith.constant 0 : i32
    %c0_i32_1 = arith.constant 0 : i32
    return %c0_i32, %c0_i32_0 : i32, i32
  }
  func.func @transform_7(%arg0: i32) -> (i32, i32) {
    %c0_i32 = arith.constant 0 : i32
    %c0_i32_0 = arith.constant 0 : i32
    %c0_i32_1 = arith.constant 0 : i32
    return %c0_i32, %c0_i32_0 : i32, i32
  }
  func.func @transform_8(%arg0: i32) -> (i32, i32) {
    %c0_i32 = arith.constant 0 : i32
    %c0_i32_0 = arith.constant 0 : i32
    %c0_i32_1 = arith.constant 0 : i32
    return %c0_i32, %c0_i32_0 : i32, i32
  }
}

module attributes {stable_mosaic.version = 11 : i64} {
  func.func @_aux_kernel(%arg0: i32, %arg1: memref<29x10xf32, #tpu.memory_space<vmem>>, %arg2: memref<20x16xf32, #tpu.memory_space<vmem>>, %arg3: memref<1x16xf32, #tpu.memory_space<vmem>>, %arg4: memref<1x48xf32, #tpu.memory_space<vmem>>, %arg5: memref<1x48xf32, #tpu.memory_space<vmem>>, %arg6: memref<48x16xf32, #tpu.memory_space<vmem>>, %arg7: memref<1x16xf32, #tpu.memory_space<vmem>>, %arg8: memref<16x16xf32, #tpu.memory_space<vmem>>, %arg9: memref<1x16xf32, #tpu.memory_space<vmem>>, %arg10: memref<16x16xf32, #tpu.memory_space<vmem>>, %arg11: memref<1x16xf32, #tpu.memory_space<vmem>>, %arg12: memref<16x32xf32, #tpu.memory_space<vmem>>, %arg13: memref<1x32xf32, #tpu.memory_space<vmem>>, %arg14: memref<32x32xf32, #tpu.memory_space<vmem>>, %arg15: memref<1x32xf32, #tpu.memory_space<vmem>>, %arg16: memref<16x32xf32, #tpu.memory_space<vmem>>, %arg17: memref<32x32xf32, #tpu.memory_space<vmem>>, %arg18: memref<1x32xf32, #tpu.memory_space<vmem>>, %arg19: memref<32x32xf32, #tpu.memory_space<vmem>>, %arg20: memref<1x32xf32, #tpu.memory_space<vmem>>, %arg21: memref<32x16xf32, #tpu.memory_space<vmem>>, %arg22: memref<1x16xf32, #tpu.memory_space<vmem>>, %arg23: memref<16x4xf32, #tpu.memory_space<vmem>>, %arg24: memref<1x4xf32, #tpu.memory_space<vmem>>, %arg25: memref<7xf32, #tpu.memory_space<smem>>, %arg26: memref<1x16xf32, #tpu.memory_space<vmem>>, %arg27: memref<1x4xf32, #tpu.memory_space<vmem>>) attributes {dimension_semantics = [#tpu.dimension_semantics<arbitrary>], iteration_bounds = array<i64: 1>, scalar_prefetch = 0 : i64, scratch_operands = 0 : i64, tpu.core_type = #tpu.core_type<tc>, window_params = [{pipeline_mode = #tpu.pipeline_mode<synchronous>, transform_indices = @transform_0, window_bounds = array<i64: 29, 10>}, {pipeline_mode = #tpu.pipeline_mode<synchronous>, transform_indices = @transform_1, window_bounds = array<i64: 20, 16>}, {pipeline_mode = #tpu.pipeline_mode<synchronous>, transform_indices = @transform_2, window_bounds = array<i64: 1, 16>}, {pipeline_mode = #tpu.pipeline_mode<synchronous>, transform_indices = @transform_3, window_bounds = array<i64: 1, 48>}, {pipeline_mode = #tpu.pipeline_mode<synchronous>, transform_indices = @transform_4, window_bounds = array<i64: 1, 48>}, {pipeline_mode = #tpu.pipeline_mode<synchronous>, transform_indices = @transform_5, window_bounds = array<i64: 48, 16>}, {pipeline_mode = #tpu.pipeline_mode<synchronous>, transform_indices = @transform_6, window_bounds = array<i64: 1, 16>}, {pipeline_mode = #tpu.pipeline_mode<synchronous>, transform_indices = @transform_7, window_bounds = array<i64: 16, 16>}, {pipeline_mode = #tpu.pipeline_mode<synchronous>, transform_indices = @transform_8, window_bounds = array<i64: 1, 16>}, {pipeline_mode = #tpu.pipeline_mode<synchronous>, transform_indices = @transform_9, window_bounds = array<i64: 16, 16>}, {pipeline_mode = #tpu.pipeline_mode<synchronous>, transform_indices = @transform_10, window_bounds = array<i64: 1, 16>}, {pipeline_mode = #tpu.pipeline_mode<synchronous>, transform_indices = @transform_11, window_bounds = array<i64: 16, 32>}, {pipeline_mode = #tpu.pipeline_mode<synchronous>, transform_indices = @transform_12, window_bounds = array<i64: 1, 32>}, {pipeline_mode = #tpu.pipeline_mode<synchronous>, transform_indices = @transform_13, window_bounds = array<i64: 32, 32>}, {pipeline_mode = #tpu.pipeline_mode<synchronous>, transform_indices = @transform_14, window_bounds = array<i64: 1, 32>}, {pipeline_mode = #tpu.pipeline_mode<synchronous>, transform_indices = @transform_15, window_bounds = array<i64: 16, 32>}, {pipeline_mode = #tpu.pipeline_mode<synchronous>, transform_indices = @transform_16, window_bounds = array<i64: 32, 32>}, {pipeline_mode = #tpu.pipeline_mode<synchronous>, transform_indices = @transform_17, window_bounds = array<i64: 1, 32>}, {pipeline_mode = #tpu.pipeline_mode<synchronous>, transform_indices = @transform_18, window_bounds = array<i64: 32, 32>}, {pipeline_mode = #tpu.pipeline_mode<synchronous>, transform_indices = @transform_19, window_bounds = array<i64: 1, 32>}, {pipeline_mode = #tpu.pipeline_mode<synchronous>, transform_indices = @transform_20, window_bounds = array<i64: 32, 16>}, {pipeline_mode = #tpu.pipeline_mode<synchronous>, transform_indices = @transform_21, window_bounds = array<i64: 1, 16>}, {pipeline_mode = #tpu.pipeline_mode<synchronous>, transform_indices = @transform_22, window_bounds = array<i64: 16, 4>}, {pipeline_mode = #tpu.pipeline_mode<synchronous>, transform_indices = @transform_23, window_bounds = array<i64: 1, 4>}, {transform_indices = @transform_24, window_bounds = array<i64: 7>}, {pipeline_mode = #tpu.pipeline_mode<synchronous>, transform_indices = @transform_25, window_bounds = array<i64: 1, 16>}, {pipeline_mode = #tpu.pipeline_mode<synchronous>, transform_indices = @transform_26, window_bounds = array<i64: 1, 4>}]} {
    %c0 = arith.constant 0 : index
    %c0_0 = arith.constant 0 : index
    %0 = vector.load %arg1[%c0, %c0_0] : memref<29x10xf32, #tpu.memory_space<vmem>>, vector<29x10xf32>
    %1 = vector.extract_strided_slice %0 {offsets = [0, 0], sizes = [28, 10], strides = [1, 1]} : vector<29x10xf32> to vector<28x10xf32>
    %2 = vector.extract_strided_slice %0 {offsets = [1, 0], sizes = [28, 10], strides = [1, 1]} : vector<29x10xf32> to vector<28x10xf32>
    %3 = tpu.concatenate %1, %2 in 1 : vector<28x10xf32>, vector<28x10xf32> -> vector<28x20xf32>
    %c0_1 = arith.constant 0 : index
    %c0_2 = arith.constant 0 : index
    %4 = vector.load %arg2[%c0_1, %c0_2] : memref<20x16xf32, #tpu.memory_space<vmem>>, vector<20x16xf32>
    %cst = arith.constant dense<0.000000e+00> : vector<28x16xf32>
    %5 = tpu.matmul %3, %4, %cst {dimension_numbers = #tpu.dot_dimension_numbers<[1], [0], [0], [1], [0, 0, 1, 1], [], []>} : vector<28x20xf32>, vector<20x16xf32>, vector<28x16xf32> -> vector<28x16xf32>
    %c0_3 = arith.constant 0 : index
    %c0_4 = arith.constant 0 : index
    %6 = vector.load %arg3[%c0_3, %c0_4] : memref<1x16xf32, #tpu.memory_space<vmem>>, vector<1x16xf32>
    %7 = vector.broadcast %6 : vector<1x16xf32> to vector<28x16xf32>
    %8 = arith.addf %5, %7 : vector<28x16xf32>
    %cst_5 = arith.constant 0.000000e+00 : f32
    %9 = vector.broadcast %cst_5 : f32 to vector<28x16xf32>
    %10 = arith.maximumf %8, %9 : vector<28x16xf32>
    %11 = tpu.concatenate %10, %10, %10 in 1 : vector<28x16xf32>, vector<28x16xf32>, vector<28x16xf32> -> vector<28x48xf32>
    %c0_6 = arith.constant 0 : index
    %c0_7 = arith.constant 0 : index
    %12 = vector.load %arg4[%c0_6, %c0_7] : memref<1x48xf32, #tpu.memory_space<vmem>>, vector<1x48xf32>
    %c0_8 = arith.constant 0 : index
    %c0_9 = arith.constant 0 : index
    %13 = vector.load %arg5[%c0_8, %c0_9] : memref<1x48xf32, #tpu.memory_space<vmem>>, vector<1x48xf32>
    %cst_10 = arith.constant dense<0.000000e+00> : vector<28xf32>
    %14 = vector.multi_reduction <add>, %11, %cst_10 [1] : vector<28x48xf32> to vector<28xf32>
    %15 = vector.shape_cast %14 : vector<28xf32> to vector<28x1xf32>
    %cst_11 = arith.constant 4.800000e+01 : f32
    %16 = vector.broadcast %cst_11 : f32 to vector<28x1xf32>
    %17 = arith.divf %15, %16 : vector<28x1xf32>
    %18 = vector.broadcast %17 : vector<28x1xf32> to vector<28x48xf32>
    %19 = arith.subf %11, %18 : vector<28x48xf32>
    %20 = arith.mulf %19, %19 : vector<28x48xf32>
    %cst_12 = arith.constant dense<0.000000e+00> : vector<28xf32>
    %21 = vector.multi_reduction <add>, %20, %cst_12 [1] : vector<28x48xf32> to vector<28xf32>
    %22 = vector.shape_cast %21 : vector<28xf32> to vector<28x1xf32>
    %cst_13 = arith.constant 4.800000e+01 : f32
    %23 = vector.broadcast %cst_13 : f32 to vector<28x1xf32>
    %24 = arith.divf %22, %23 : vector<28x1xf32>
    %25 = vector.broadcast %17 : vector<28x1xf32> to vector<28x48xf32>
    %26 = arith.subf %11, %25 : vector<28x48xf32>
    %cst_14 = arith.constant 9.99999974E-6 : f32
    %27 = vector.broadcast %cst_14 : f32 to vector<28x1xf32>
    %28 = arith.addf %24, %27 : vector<28x1xf32>
    %29 = math.rsqrt %28 : vector<28x1xf32>
    %30 = vector.broadcast %29 : vector<28x1xf32> to vector<28x48xf32>
    %31 = arith.mulf %26, %30 : vector<28x48xf32>
    %32 = vector.broadcast %12 : vector<1x48xf32> to vector<28x48xf32>
    %33 = arith.mulf %31, %32 : vector<28x48xf32>
    %34 = vector.broadcast %13 : vector<1x48xf32> to vector<28x48xf32>
    %35 = arith.addf %33, %34 : vector<28x48xf32>
    %c0_15 = arith.constant 0 : index
    %c0_16 = arith.constant 0 : index
    %36 = vector.load %arg6[%c0_15, %c0_16] : memref<48x16xf32, #tpu.memory_space<vmem>>, vector<48x16xf32>
    %cst_17 = arith.constant dense<0.000000e+00> : vector<28x16xf32>
    %37 = tpu.matmul %35, %36, %cst_17 {dimension_numbers = #tpu.dot_dimension_numbers<[1], [0], [0], [1], [0, 0, 1, 1], [], []>} : vector<28x48xf32>, vector<48x16xf32>, vector<28x16xf32> -> vector<28x16xf32>
    %c0_18 = arith.constant 0 : index
    %c0_19 = arith.constant 0 : index
    %38 = vector.load %arg7[%c0_18, %c0_19] : memref<1x16xf32, #tpu.memory_space<vmem>>, vector<1x16xf32>
    %39 = vector.broadcast %38 : vector<1x16xf32> to vector<28x16xf32>
    %40 = arith.addf %37, %39 : vector<28x16xf32>
    %c0_20 = arith.constant 0 : index
    %c0_21 = arith.constant 0 : index
    %41 = vector.load %arg8[%c0_20, %c0_21] : memref<16x16xf32, #tpu.memory_space<vmem>>, vector<16x16xf32>
    %c0_22 = arith.constant 0 : index
    %c0_23 = arith.constant 0 : index
    %42 = vector.load %arg9[%c0_22, %c0_23] : memref<1x16xf32, #tpu.memory_space<vmem>>, vector<1x16xf32>
    %c0_24 = arith.constant 0 : index
    %43 = memref.load %arg25[%c0_24] : memref<7xf32, #tpu.memory_space<smem>>
    %c0_25 = arith.constant 0 : index
    %c0_26 = arith.constant 0 : index
    %44 = vector.load %arg10[%c0_25, %c0_26] : memref<16x16xf32, #tpu.memory_space<vmem>>, vector<16x16xf32>
    %c0_27 = arith.constant 0 : index
    %c0_28 = arith.constant 0 : index
    %45 = vector.load %arg11[%c0_27, %c0_28] : memref<1x16xf32, #tpu.memory_space<vmem>>, vector<1x16xf32>
    %c1 = arith.constant 1 : index
    %46 = memref.load %arg25[%c1] : memref<7xf32, #tpu.memory_space<smem>>
    %cst_29 = arith.constant dense<0.000000e+00> : vector<28x16xf32>
    %47 = tpu.matmul %40, %41, %cst_29 {dimension_numbers = #tpu.dot_dimension_numbers<[1], [0], [0], [1], [0, 0, 1, 1], [], []>} : vector<28x16xf32>, vector<16x16xf32>, vector<28x16xf32> -> vector<28x16xf32>
    %48 = vector.broadcast %42 : vector<1x16xf32> to vector<28x16xf32>
    %49 = arith.addf %47, %48 : vector<28x16xf32>
    %cst_30 = arith.constant 0.000000e+00 : f32
    %50 = vector.broadcast %cst_30 : f32 to vector<28x16xf32>
    %51 = arith.cmpf oge, %49, %50 : vector<28x16xf32>
    %52 = vector.broadcast %43 : f32 to vector<28x16xf32>
    %53 = arith.mulf %52, %49 : vector<28x16xf32>
    %54 = arith.select %51, %49, %53 : vector<28x16xi1>, vector<28x16xf32>
    %cst_31 = arith.constant dense<0.000000e+00> : vector<28x16xf32>
    %55 = tpu.matmul %54, %44, %cst_31 {dimension_numbers = #tpu.dot_dimension_numbers<[1], [0], [0], [1], [0, 0, 1, 1], [], []>} : vector<28x16xf32>, vector<16x16xf32>, vector<28x16xf32> -> vector<28x16xf32>
    %56 = vector.broadcast %45 : vector<1x16xf32> to vector<28x16xf32>
    %57 = arith.addf %55, %56 : vector<28x16xf32>
    %58 = arith.addf %57, %40 : vector<28x16xf32>
    %cst_32 = arith.constant 0.000000e+00 : f32
    %59 = vector.broadcast %cst_32 : f32 to vector<28x16xf32>
    %60 = arith.cmpf oge, %58, %59 : vector<28x16xf32>
    %61 = vector.broadcast %46 : f32 to vector<28x16xf32>
    %62 = arith.mulf %61, %58 : vector<28x16xf32>
    %63 = arith.select %60, %58, %62 : vector<28x16xi1>, vector<28x16xf32>
    %64 = vector.extract_strided_slice %63 {offsets = [0, 0], sizes = [1, 16], strides = [1, 1]} : vector<28x16xf32> to vector<1x16xf32>
    %65 = vector.extract_strided_slice %63 {offsets = [1, 0], sizes = [1, 16], strides = [1, 1]} : vector<28x16xf32> to vector<1x16xf32>
    %66 = arith.maximumf %64, %65 : vector<1x16xf32>
    %67 = vector.extract_strided_slice %63 {offsets = [2, 0], sizes = [1, 16], strides = [1, 1]} : vector<28x16xf32> to vector<1x16xf32>
    %68 = arith.maximumf %66, %67 : vector<1x16xf32>
    %69 = vector.extract_strided_slice %63 {offsets = [3, 0], sizes = [1, 16], strides = [1, 1]} : vector<28x16xf32> to vector<1x16xf32>
    %70 = vector.extract_strided_slice %63 {offsets = [4, 0], sizes = [1, 16], strides = [1, 1]} : vector<28x16xf32> to vector<1x16xf32>
    %71 = arith.maximumf %69, %70 : vector<1x16xf32>
    %72 = vector.extract_strided_slice %63 {offsets = [5, 0], sizes = [1, 16], strides = [1, 1]} : vector<28x16xf32> to vector<1x16xf32>
    %73 = arith.maximumf %71, %72 : vector<1x16xf32>
    %74 = vector.extract_strided_slice %63 {offsets = [6, 0], sizes = [1, 16], strides = [1, 1]} : vector<28x16xf32> to vector<1x16xf32>
    %75 = vector.extract_strided_slice %63 {offsets = [7, 0], sizes = [1, 16], strides = [1, 1]} : vector<28x16xf32> to vector<1x16xf32>
    %76 = arith.maximumf %74, %75 : vector<1x16xf32>
    %77 = vector.extract_strided_slice %63 {offsets = [8, 0], sizes = [1, 16], strides = [1, 1]} : vector<28x16xf32> to vector<1x16xf32>
    %78 = arith.maximumf %76, %77 : vector<1x16xf32>
    %79 = vector.extract_strided_slice %63 {offsets = [9, 0], sizes = [1, 16], strides = [1, 1]} : vector<28x16xf32> to vector<1x16xf32>
    %80 = vector.extract_strided_slice %63 {offsets = [10, 0], sizes = [1, 16], strides = [1, 1]} : vector<28x16xf32> to vector<1x16xf32>
    %81 = arith.maximumf %79, %80 : vector<1x16xf32>
    %82 = vector.extract_strided_slice %63 {offsets = [11, 0], sizes = [1, 16], strides = [1, 1]} : vector<28x16xf32> to vector<1x16xf32>
    %83 = arith.maximumf %81, %82 : vector<1x16xf32>
    %84 = vector.extract_strided_slice %63 {offsets = [12, 0], sizes = [1, 16], strides = [1, 1]} : vector<28x16xf32> to vector<1x16xf32>
    %85 = vector.extract_strided_slice %63 {offsets = [13, 0], sizes = [1, 16], strides = [1, 1]} : vector<28x16xf32> to vector<1x16xf32>
    %86 = arith.maximumf %84, %85 : vector<1x16xf32>
    %87 = vector.extract_strided_slice %63 {offsets = [14, 0], sizes = [1, 16], strides = [1, 1]} : vector<28x16xf32> to vector<1x16xf32>
    %88 = arith.maximumf %86, %87 : vector<1x16xf32>
    %89 = vector.extract_strided_slice %63 {offsets = [15, 0], sizes = [1, 16], strides = [1, 1]} : vector<28x16xf32> to vector<1x16xf32>
    %90 = vector.extract_strided_slice %63 {offsets = [16, 0], sizes = [1, 16], strides = [1, 1]} : vector<28x16xf32> to vector<1x16xf32>
    %91 = arith.maximumf %89, %90 : vector<1x16xf32>
    %92 = vector.extract_strided_slice %63 {offsets = [17, 0], sizes = [1, 16], strides = [1, 1]} : vector<28x16xf32> to vector<1x16xf32>
    %93 = arith.maximumf %91, %92 : vector<1x16xf32>
    %94 = vector.extract_strided_slice %63 {offsets = [18, 0], sizes = [1, 16], strides = [1, 1]} : vector<28x16xf32> to vector<1x16xf32>
    %95 = vector.extract_strided_slice %63 {offsets = [19, 0], sizes = [1, 16], strides = [1, 1]} : vector<28x16xf32> to vector<1x16xf32>
    %96 = arith.maximumf %94, %95 : vector<1x16xf32>
    %97 = vector.extract_strided_slice %63 {offsets = [20, 0], sizes = [1, 16], strides = [1, 1]} : vector<28x16xf32> to vector<1x16xf32>
    %98 = arith.maximumf %96, %97 : vector<1x16xf32>
    %99 = vector.extract_strided_slice %63 {offsets = [21, 0], sizes = [1, 16], strides = [1, 1]} : vector<28x16xf32> to vector<1x16xf32>
    %100 = vector.extract_strided_slice %63 {offsets = [22, 0], sizes = [1, 16], strides = [1, 1]} : vector<28x16xf32> to vector<1x16xf32>
    %101 = arith.maximumf %99, %100 : vector<1x16xf32>
    %102 = vector.extract_strided_slice %63 {offsets = [23, 0], sizes = [1, 16], strides = [1, 1]} : vector<28x16xf32> to vector<1x16xf32>
    %103 = arith.maximumf %101, %102 : vector<1x16xf32>
    %104 = vector.extract_strided_slice %63 {offsets = [24, 0], sizes = [1, 16], strides = [1, 1]} : vector<28x16xf32> to vector<1x16xf32>
    %105 = vector.extract_strided_slice %63 {offsets = [25, 0], sizes = [1, 16], strides = [1, 1]} : vector<28x16xf32> to vector<1x16xf32>
    %106 = arith.maximumf %104, %105 : vector<1x16xf32>
    %107 = vector.extract_strided_slice %63 {offsets = [26, 0], sizes = [1, 16], strides = [1, 1]} : vector<28x16xf32> to vector<1x16xf32>
    %108 = arith.maximumf %106, %107 : vector<1x16xf32>
    %109 = tpu.concatenate %68, %73, %78, %83, %88, %93, %98, %103, %108 in 0 : vector<1x16xf32>, vector<1x16xf32>, vector<1x16xf32>, vector<1x16xf32>, vector<1x16xf32>, vector<1x16xf32>, vector<1x16xf32>, vector<1x16xf32>, vector<1x16xf32> -> vector<9x16xf32>
    %c0_33 = arith.constant 0 : index
    %c0_34 = arith.constant 0 : index
    %110 = vector.load %arg12[%c0_33, %c0_34] : memref<16x32xf32, #tpu.memory_space<vmem>>, vector<16x32xf32>
    %c0_35 = arith.constant 0 : index
    %c0_36 = arith.constant 0 : index
    %111 = vector.load %arg13[%c0_35, %c0_36] : memref<1x32xf32, #tpu.memory_space<vmem>>, vector<1x32xf32>
    %c2 = arith.constant 2 : index
    %112 = memref.load %arg25[%c2] : memref<7xf32, #tpu.memory_space<smem>>
    %c0_37 = arith.constant 0 : index
    %c0_38 = arith.constant 0 : index
    %113 = vector.load %arg14[%c0_37, %c0_38] : memref<32x32xf32, #tpu.memory_space<vmem>>, vector<32x32xf32>
    %c0_39 = arith.constant 0 : index
    %c0_40 = arith.constant 0 : index
    %114 = vector.load %arg15[%c0_39, %c0_40] : memref<1x32xf32, #tpu.memory_space<vmem>>, vector<1x32xf32>
    %c3 = arith.constant 3 : index
    %115 = memref.load %arg25[%c3] : memref<7xf32, #tpu.memory_space<smem>>
    %c0_41 = arith.constant 0 : index
    %c0_42 = arith.constant 0 : index
    %116 = vector.load %arg16[%c0_41, %c0_42] : memref<16x32xf32, #tpu.memory_space<vmem>>, vector<16x32xf32>
    %cst_43 = arith.constant dense<0.000000e+00> : vector<9x32xf32>
    %117 = tpu.matmul %109, %110, %cst_43 {dimension_numbers = #tpu.dot_dimension_numbers<[1], [0], [0], [1], [0, 0, 1, 1], [], []>} : vector<9x16xf32>, vector<16x32xf32>, vector<9x32xf32> -> vector<9x32xf32>
    %118 = vector.broadcast %111 : vector<1x32xf32> to vector<9x32xf32>
    %119 = arith.addf %117, %118 : vector<9x32xf32>
    %cst_44 = arith.constant 0.000000e+00 : f32
    %120 = vector.broadcast %cst_44 : f32 to vector<9x32xf32>
    %121 = arith.cmpf oge, %119, %120 : vector<9x32xf32>
    %122 = vector.broadcast %112 : f32 to vector<9x32xf32>
    %123 = arith.mulf %122, %119 : vector<9x32xf32>
    %124 = arith.select %121, %119, %123 : vector<9x32xi1>, vector<9x32xf32>
    %cst_45 = arith.constant dense<0.000000e+00> : vector<9x32xf32>
    %125 = tpu.matmul %124, %113, %cst_45 {dimension_numbers = #tpu.dot_dimension_numbers<[1], [0], [0], [1], [0, 0, 1, 1], [], []>} : vector<9x32xf32>, vector<32x32xf32>, vector<9x32xf32> -> vector<9x32xf32>
    %126 = vector.broadcast %114 : vector<1x32xf32> to vector<9x32xf32>
    %127 = arith.addf %125, %126 : vector<9x32xf32>
    %cst_46 = arith.constant dense<0.000000e+00> : vector<9x32xf32>
    %128 = tpu.matmul %109, %116, %cst_46 {dimension_numbers = #tpu.dot_dimension_numbers<[1], [0], [0], [1], [0, 0, 1, 1], [], []>} : vector<9x16xf32>, vector<16x32xf32>, vector<9x32xf32> -> vector<9x32xf32>
    %129 = arith.addf %127, %128 : vector<9x32xf32>
    %cst_47 = arith.constant 0.000000e+00 : f32
    %130 = vector.broadcast %cst_47 : f32 to vector<9x32xf32>
    %131 = arith.cmpf oge, %129, %130 : vector<9x32xf32>
    %132 = vector.broadcast %115 : f32 to vector<9x32xf32>
    %133 = arith.mulf %132, %129 : vector<9x32xf32>
    %134 = arith.select %131, %129, %133 : vector<9x32xi1>, vector<9x32xf32>
    %135 = vector.extract_strided_slice %134 {offsets = [0, 0], sizes = [1, 32], strides = [1, 1]} : vector<9x32xf32> to vector<1x32xf32>
    %136 = vector.extract_strided_slice %134 {offsets = [1, 0], sizes = [1, 32], strides = [1, 1]} : vector<9x32xf32> to vector<1x32xf32>
    %137 = arith.maximumf %135, %136 : vector<1x32xf32>
    %138 = vector.extract_strided_slice %134 {offsets = [2, 0], sizes = [1, 32], strides = [1, 1]} : vector<9x32xf32> to vector<1x32xf32>
    %139 = arith.maximumf %137, %138 : vector<1x32xf32>
    %140 = vector.extract_strided_slice %134 {offsets = [3, 0], sizes = [1, 32], strides = [1, 1]} : vector<9x32xf32> to vector<1x32xf32>
    %141 = vector.extract_strided_slice %134 {offsets = [4, 0], sizes = [1, 32], strides = [1, 1]} : vector<9x32xf32> to vector<1x32xf32>
    %142 = arith.maximumf %140, %141 : vector<1x32xf32>
    %143 = vector.extract_strided_slice %134 {offsets = [5, 0], sizes = [1, 32], strides = [1, 1]} : vector<9x32xf32> to vector<1x32xf32>
    %144 = arith.maximumf %142, %143 : vector<1x32xf32>
    %145 = vector.extract_strided_slice %134 {offsets = [6, 0], sizes = [1, 32], strides = [1, 1]} : vector<9x32xf32> to vector<1x32xf32>
    %146 = vector.extract_strided_slice %134 {offsets = [7, 0], sizes = [1, 32], strides = [1, 1]} : vector<9x32xf32> to vector<1x32xf32>
    %147 = arith.maximumf %145, %146 : vector<1x32xf32>
    %148 = vector.extract_strided_slice %134 {offsets = [8, 0], sizes = [1, 32], strides = [1, 1]} : vector<9x32xf32> to vector<1x32xf32>
    %149 = arith.maximumf %147, %148 : vector<1x32xf32>
    %150 = tpu.concatenate %139, %144, %149 in 0 : vector<1x32xf32>, vector<1x32xf32>, vector<1x32xf32> -> vector<3x32xf32>
    %c0_48 = arith.constant 0 : index
    %c0_49 = arith.constant 0 : index
    %151 = vector.load %arg17[%c0_48, %c0_49] : memref<32x32xf32, #tpu.memory_space<vmem>>, vector<32x32xf32>
    %c0_50 = arith.constant 0 : index
    %c0_51 = arith.constant 0 : index
    %152 = vector.load %arg18[%c0_50, %c0_51] : memref<1x32xf32, #tpu.memory_space<vmem>>, vector<1x32xf32>
    %c4 = arith.constant 4 : index
    %153 = memref.load %arg25[%c4] : memref<7xf32, #tpu.memory_space<smem>>
    %c0_52 = arith.constant 0 : index
    %c0_53 = arith.constant 0 : index
    %154 = vector.load %arg19[%c0_52, %c0_53] : memref<32x32xf32, #tpu.memory_space<vmem>>, vector<32x32xf32>
    %c0_54 = arith.constant 0 : index
    %c0_55 = arith.constant 0 : index
    %155 = vector.load %arg20[%c0_54, %c0_55] : memref<1x32xf32, #tpu.memory_space<vmem>>, vector<1x32xf32>
    %c5 = arith.constant 5 : index
    %156 = memref.load %arg25[%c5] : memref<7xf32, #tpu.memory_space<smem>>
    %cst_56 = arith.constant dense<0.000000e+00> : vector<3x32xf32>
    %157 = tpu.matmul %150, %151, %cst_56 {dimension_numbers = #tpu.dot_dimension_numbers<[1], [0], [0], [1], [0, 0, 1, 1], [], []>} : vector<3x32xf32>, vector<32x32xf32>, vector<3x32xf32> -> vector<3x32xf32>
    %158 = vector.broadcast %152 : vector<1x32xf32> to vector<3x32xf32>
    %159 = arith.addf %157, %158 : vector<3x32xf32>
    %cst_57 = arith.constant 0.000000e+00 : f32
    %160 = vector.broadcast %cst_57 : f32 to vector<3x32xf32>
    %161 = arith.cmpf oge, %159, %160 : vector<3x32xf32>
    %162 = vector.broadcast %153 : f32 to vector<3x32xf32>
    %163 = arith.mulf %162, %159 : vector<3x32xf32>
    %164 = arith.select %161, %159, %163 : vector<3x32xi1>, vector<3x32xf32>
    %cst_58 = arith.constant dense<0.000000e+00> : vector<3x32xf32>
    %165 = tpu.matmul %164, %154, %cst_58 {dimension_numbers = #tpu.dot_dimension_numbers<[1], [0], [0], [1], [0, 0, 1, 1], [], []>} : vector<3x32xf32>, vector<32x32xf32>, vector<3x32xf32> -> vector<3x32xf32>
    %166 = vector.broadcast %155 : vector<1x32xf32> to vector<3x32xf32>
    %167 = arith.addf %165, %166 : vector<3x32xf32>
    %168 = arith.addf %167, %150 : vector<3x32xf32>
    %cst_59 = arith.constant 0.000000e+00 : f32
    %169 = vector.broadcast %cst_59 : f32 to vector<3x32xf32>
    %170 = arith.cmpf oge, %168, %169 : vector<3x32xf32>
    %171 = vector.broadcast %156 : f32 to vector<3x32xf32>
    %172 = arith.mulf %171, %168 : vector<3x32xf32>
    %173 = arith.select %170, %168, %172 : vector<3x32xi1>, vector<3x32xf32>
    %174 = vector.extract_strided_slice %173 {offsets = [0, 0], sizes = [1, 32], strides = [1, 1]} : vector<3x32xf32> to vector<1x32xf32>
    %175 = vector.extract_strided_slice %173 {offsets = [1, 0], sizes = [1, 32], strides = [1, 1]} : vector<3x32xf32> to vector<1x32xf32>
    %176 = arith.maximumf %174, %175 : vector<1x32xf32>
    %177 = vector.extract_strided_slice %173 {offsets = [2, 0], sizes = [1, 32], strides = [1, 1]} : vector<3x32xf32> to vector<1x32xf32>
    %178 = arith.maximumf %176, %177 : vector<1x32xf32>
    %c0_60 = arith.constant 0 : index
    %c0_61 = arith.constant 0 : index
    %179 = vector.load %arg21[%c0_60, %c0_61] : memref<32x16xf32, #tpu.memory_space<vmem>>, vector<32x16xf32>
    %cst_62 = arith.constant dense<0.000000e+00> : vector<1x16xf32>
    %180 = tpu.matmul %178, %179, %cst_62 {dimension_numbers = #tpu.dot_dimension_numbers<[1], [0], [0], [1], [0, 0, 1, 1], [], []>} : vector<1x32xf32>, vector<32x16xf32>, vector<1x16xf32> -> vector<1x16xf32>
    %c0_63 = arith.constant 0 : index
    %c0_64 = arith.constant 0 : index
    %181 = vector.load %arg22[%c0_63, %c0_64] : memref<1x16xf32, #tpu.memory_space<vmem>>, vector<1x16xf32>
    %182 = arith.addf %180, %181 : vector<1x16xf32>
    %cst_65 = arith.constant dense<0.000000e+00> : vector<16xf32>
    %183 = vector.multi_reduction <add>, %182, %cst_65 [0] : vector<1x16xf32> to vector<16xf32>
    %184 = vector.shape_cast %183 : vector<16xf32> to vector<1x16xf32>
    %c6 = arith.constant 6 : index
    %185 = memref.load %arg25[%c6] : memref<7xf32, #tpu.memory_space<smem>>
    %186 = vector.broadcast %185 : f32 to vector<1x16xf32>
    %187 = arith.divf %184, %186 : vector<1x16xf32>
    %c0_66 = arith.constant 0 : index
    %c0_67 = arith.constant 0 : index
    %188 = vector.load %arg26[%c0_66, %c0_67] : memref<1x16xf32, #tpu.memory_space<vmem>>, vector<1x16xf32>
    tpu.vector_store %arg26[%c0_66, %c0_67], %187 {strides = array<i32>} : memref<1x16xf32, #tpu.memory_space<vmem>>, vector<1x16xf32>,
    %c0_68 = arith.constant 0 : index
    %c0_69 = arith.constant 0 : index
    %189 = vector.load %arg23[%c0_68, %c0_69] : memref<16x4xf32, #tpu.memory_space<vmem>>, vector<16x4xf32>
    %cst_70 = arith.constant dense<0.000000e+00> : vector<1x4xf32>
    %190 = tpu.matmul %187, %189, %cst_70 {dimension_numbers = #tpu.dot_dimension_numbers<[1], [0], [0], [1], [0, 0, 1, 1], [], []>} : vector<1x16xf32>, vector<16x4xf32>, vector<1x4xf32> -> vector<1x4xf32>
    %c0_71 = arith.constant 0 : index
    %c0_72 = arith.constant 0 : index
    %191 = vector.load %arg24[%c0_71, %c0_72] : memref<1x4xf32, #tpu.memory_space<vmem>>, vector<1x4xf32>
    %192 = arith.addf %190, %191 : vector<1x4xf32>
    %c0_73 = arith.constant 0 : index
    %c0_74 = arith.constant 0 : index
    %193 = vector.load %arg27[%c0_73, %c0_74] : memref<1x4xf32, #tpu.memory_space<vmem>>, vector<1x4xf32>
    tpu.vector_store %arg27[%c0_73, %c0_74], %192 {strides = array<i32>} : memref<1x4xf32, #tpu.memory_space<vmem>>, vector<1x4xf32>,
    return
  }
  func.func @transform_0(%arg0: i32) -> (i32, i32) {
    %c0_i32 = arith.constant 0 : i32
    %c0_i32_0 = arith.constant 0 : i32
    %c0_i32_1 = arith.constant 0 : i32
    return %c0_i32, %c0_i32_0 : i32, i32
  }
  func.func @transform_1(%arg0: i32) -> (i32, i32) {
    %c0_i32 = arith.constant 0 : i32
    %c0_i32_0 = arith.constant 0 : i32
    %c0_i32_1 = arith.constant 0 : i32
    return %c0_i32, %c0_i32_0 : i32, i32
  }
  func.func @transform_2(%arg0: i32) -> (i32, i32) {
    %c0_i32 = arith.constant 0 : i32
    %c0_i32_0 = arith.constant 0 : i32
    %c0_i32_1 = arith.constant 0 : i32
    return %c0_i32, %c0_i32_0 : i32, i32
  }
  func.func @transform_3(%arg0: i32) -> (i32, i32) {
    %c0_i32 = arith.constant 0 : i32
    %c0_i32_0 = arith.constant 0 : i32
    %c0_i32_1 = arith.constant 0 : i32
    return %c0_i32, %c0_i32_0 : i32, i32
  }
  func.func @transform_4(%arg0: i32) -> (i32, i32) {
    %c0_i32 = arith.constant 0 : i32
    %c0_i32_0 = arith.constant 0 : i32
    %c0_i32_1 = arith.constant 0 : i32
    return %c0_i32, %c0_i32_0 : i32, i32
  }
  func.func @transform_5(%arg0: i32) -> (i32, i32) {
    %c0_i32 = arith.constant 0 : i32
    %c0_i32_0 = arith.constant 0 : i32
    %c0_i32_1 = arith.constant 0 : i32
    return %c0_i32, %c0_i32_0 : i32, i32
  }
  func.func @transform_6(%arg0: i32) -> (i32, i32) {
    %c0_i32 = arith.constant 0 : i32
    %c0_i32_0 = arith.constant 0 : i32
    %c0_i32_1 = arith.constant 0 : i32
    return %c0_i32, %c0_i32_0 : i32, i32
  }
  func.func @transform_7(%arg0: i32) -> (i32, i32) {
    %c0_i32 = arith.constant 0 : i32
    %c0_i32_0 = arith.constant 0 : i32
    %c0_i32_1 = arith.constant 0 : i32
    return %c0_i32, %c0_i32_0 : i32, i32
  }
  func.func @transform_8(%arg0: i32) -> (i32, i32) {
    %c0_i32 = arith.constant 0 : i32
    %c0_i32_0 = arith.constant 0 : i32
    %c0_i32_1 = arith.constant 0 : i32
    return %c0_i32, %c0_i32_0 : i32, i32
  }
  func.func @transform_9(%arg0: i32) -> (i32, i32) {
    %c0_i32 = arith.constant 0 : i32
    %c0_i32_0 = arith.constant 0 : i32
    %c0_i32_1 = arith.constant 0 : i32
    return %c0_i32, %c0_i32_0 : i32, i32
  }
  func.func @transform_10(%arg0: i32) -> (i32, i32) {
    %c0_i32 = arith.constant 0 : i32
    %c0_i32_0 = arith.constant 0 : i32
    %c0_i32_1 = arith.constant 0 : i32
    return %c0_i32, %c0_i32_0 : i32, i32
  }
  func.func @transform_11(%arg0: i32) -> (i32, i32) {
    %c0_i32 = arith.constant 0 : i32
    %c0_i32_0 = arith.constant 0 : i32
    %c0_i32_1 = arith.constant 0 : i32
    return %c0_i32, %c0_i32_0 : i32, i32
  }
  func.func @transform_12(%arg0: i32) -> (i32, i32) {
    %c0_i32 = arith.constant 0 : i32
    %c0_i32_0 = arith.constant 0 : i32
    %c0_i32_1 = arith.constant 0 : i32
    return %c0_i32, %c0_i32_0 : i32, i32
  }
  func.func @transform_13(%arg0: i32) -> (i32, i32) {
    %c0_i32 = arith.constant 0 : i32
    %c0_i32_0 = arith.constant 0 : i32
    %c0_i32_1 = arith.constant 0 : i32
    return %c0_i32, %c0_i32_0 : i32, i32
  }
  func.func @transform_14(%arg0: i32) -> (i32, i32) {
    %c0_i32 = arith.constant 0 : i32
    %c0_i32_0 = arith.constant 0 : i32
    %c0_i32_1 = arith.constant 0 : i32
    return %c0_i32, %c0_i32_0 : i32, i32
  }
  func.func @transform_15(%arg0: i32) -> (i32, i32) {
    %c0_i32 = arith.constant 0 : i32
    %c0_i32_0 = arith.constant 0 : i32
    %c0_i32_1 = arith.constant 0 : i32
    return %c0_i32, %c0_i32_0 : i32, i32
  }
  func.func @transform_16(%arg0: i32) -> (i32, i32) {
    %c0_i32 = arith.constant 0 : i32
    %c0_i32_0 = arith.constant 0 : i32
    %c0_i32_1 = arith.constant 0 : i32
    return %c0_i32, %c0_i32_0 : i32, i32
  }
  func.func @transform_17(%arg0: i32) -> (i32, i32) {
    %c0_i32 = arith.constant 0 : i32
    %c0_i32_0 = arith.constant 0 : i32
    %c0_i32_1 = arith.constant 0 : i32
    return %c0_i32, %c0_i32_0 : i32, i32
  }
  func.func @transform_18(%arg0: i32) -> (i32, i32) {
    %c0_i32 = arith.constant 0 : i32
    %c0_i32_0 = arith.constant 0 : i32
    %c0_i32_1 = arith.constant 0 : i32
    return %c0_i32, %c0_i32_0 : i32, i32
  }
  func.func @transform_19(%arg0: i32) -> (i32, i32) {
    %c0_i32 = arith.constant 0 : i32
    %c0_i32_0 = arith.constant 0 : i32
    %c0_i32_1 = arith.constant 0 : i32
    return %c0_i32, %c0_i32_0 : i32, i32
  }
  func.func @transform_20(%arg0: i32) -> (i32, i32) {
    %c0_i32 = arith.constant 0 : i32
    %c0_i32_0 = arith.constant 0 : i32
    %c0_i32_1 = arith.constant 0 : i32
    return %c0_i32, %c0_i32_0 : i32, i32
  }
  func.func @transform_21(%arg0: i32) -> (i32, i32) {
    %c0_i32 = arith.constant 0 : i32
    %c0_i32_0 = arith.constant 0 : i32
    %c0_i32_1 = arith.constant 0 : i32
    return %c0_i32, %c0_i32_0 : i32, i32
  }
  func.func @transform_22(%arg0: i32) -> (i32, i32) {
    %c0_i32 = arith.constant 0 : i32
    %c0_i32_0 = arith.constant 0 : i32
    %c0_i32_1 = arith.constant 0 : i32
    return %c0_i32, %c0_i32_0 : i32, i32
  }
  func.func @transform_23(%arg0: i32) -> (i32, i32) {
    %c0_i32 = arith.constant 0 : i32
    %c0_i32_0 = arith.constant 0 : i32
    %c0_i32_1 = arith.constant 0 : i32
    return %c0_i32, %c0_i32_0 : i32, i32
  }
  func.func @transform_24(%arg0: i32) -> i32 {
    %c0_i32 = arith.constant 0 : i32
    %c0_i32_0 = arith.constant 0 : i32
    return %c0_i32 : i32
  }
  func.func @transform_25(%arg0: i32) -> (i32, i32) {
    %c0_i32 = arith.constant 0 : i32
    %c0_i32_0 = arith.constant 0 : i32
    %c0_i32_1 = arith.constant 0 : i32
    return %c0_i32, %c0_i32_0 : i32, i32
  }
  func.func @transform_26(%arg0: i32) -> (i32, i32) {
    %c0_i32 = arith.constant 0 : i32
    %c0_i32_0 = arith.constant 0 : i32
    %c0_i32_1 = arith.constant 0 : i32
    return %c0_i32, %c0_i32_0 : i32, i32
  }
}

module attributes {stable_mosaic.version = 11 : i64} {
  func.func @_c1x1_kernel(%arg0: i32, %arg1: memref<17x16xf32, #tpu.memory_space<vmem>>, %arg2: memref<1x16xf32, #tpu.memory_space<vmem>>, %arg3: memref<16x16xf32, #tpu.memory_space<vmem>>, %arg4: memref<16x16xf32, #tpu.memory_space<vmem>>, %arg5: memref<1x16xf32, #tpu.memory_space<vmem>>, %arg6: memref<17x16xf32, #tpu.memory_space<vmem>>) attributes {dimension_semantics = [#tpu.dimension_semantics<arbitrary>], iteration_bounds = array<i64: 1>, scalar_prefetch = 0 : i64, scratch_operands = 0 : i64, tpu.core_type = #tpu.core_type<tc>, window_params = [{pipeline_mode = #tpu.pipeline_mode<synchronous>, transform_indices = @transform_0, window_bounds = array<i64: 17, 16>}, {pipeline_mode = #tpu.pipeline_mode<synchronous>, transform_indices = @transform_1, window_bounds = array<i64: 1, 16>}, {pipeline_mode = #tpu.pipeline_mode<synchronous>, transform_indices = @transform_2, window_bounds = array<i64: 16, 16>}, {pipeline_mode = #tpu.pipeline_mode<synchronous>, transform_indices = @transform_3, window_bounds = array<i64: 16, 16>}, {pipeline_mode = #tpu.pipeline_mode<synchronous>, transform_indices = @transform_4, window_bounds = array<i64: 1, 16>}, {pipeline_mode = #tpu.pipeline_mode<synchronous>, transform_indices = @transform_5, window_bounds = array<i64: 17, 16>}]} {
    %c0 = arith.constant 0 : index
    %c0_0 = arith.constant 0 : index
    %0 = vector.load %arg1[%c0, %c0_0] : memref<17x16xf32, #tpu.memory_space<vmem>>, vector<17x16xf32>
    %c0_1 = arith.constant 0 : index
    %c0_2 = arith.constant 0 : index
    %1 = vector.load %arg3[%c0_1, %c0_2] : memref<16x16xf32, #tpu.memory_space<vmem>>, vector<16x16xf32>
    %cst = arith.constant dense<0.000000e+00> : vector<17x16xf32>
    %2 = tpu.matmul %0, %1, %cst {dimension_numbers = #tpu.dot_dimension_numbers<[1], [0], [0], [1], [0, 0, 1, 1], [], []>} : vector<17x16xf32>, vector<16x16xf32>, vector<17x16xf32> -> vector<17x16xf32>
    %c0_3 = arith.constant 0 : index
    %c0_4 = arith.constant 0 : index
    %3 = vector.load %arg2[%c0_3, %c0_4] : memref<1x16xf32, #tpu.memory_space<vmem>>, vector<1x16xf32>
    %c0_5 = arith.constant 0 : index
    %c0_6 = arith.constant 0 : index
    %4 = vector.load %arg4[%c0_5, %c0_6] : memref<16x16xf32, #tpu.memory_space<vmem>>, vector<16x16xf32>
    %cst_7 = arith.constant dense<0.000000e+00> : vector<1x16xf32>
    %5 = tpu.matmul %3, %4, %cst_7 {dimension_numbers = #tpu.dot_dimension_numbers<[1], [0], [0], [1], [0, 0, 1, 1], [], []>} : vector<1x16xf32>, vector<16x16xf32>, vector<1x16xf32> -> vector<1x16xf32>
    %6 = vector.broadcast %5 : vector<1x16xf32> to vector<17x16xf32>
    %7 = arith.addf %2, %6 : vector<17x16xf32>
    %c0_8 = arith.constant 0 : index
    %c0_9 = arith.constant 0 : index
    %8 = vector.load %arg5[%c0_8, %c0_9] : memref<1x16xf32, #tpu.memory_space<vmem>>, vector<1x16xf32>
    %9 = vector.broadcast %8 : vector<1x16xf32> to vector<17x16xf32>
    %10 = arith.addf %7, %9 : vector<17x16xf32>
    %c0_10 = arith.constant 0 : index
    %c0_11 = arith.constant 0 : index
    %11 = vector.load %arg6[%c0_10, %c0_11] : memref<17x16xf32, #tpu.memory_space<vmem>>, vector<17x16xf32>
    tpu.vector_store %arg6[%c0_10, %c0_11], %10 {strides = array<i32>} : memref<17x16xf32, #tpu.memory_space<vmem>>, vector<17x16xf32>,
    return
  }
  func.func @transform_0(%arg0: i32) -> (i32, i32) {
    %c0_i32 = arith.constant 0 : i32
    %c0_i32_0 = arith.constant 0 : i32
    %c0_i32_1 = arith.constant 0 : i32
    return %c0_i32, %c0_i32_0 : i32, i32
  }
  func.func @transform_1(%arg0: i32) -> (i32, i32) {
    %c0_i32 = arith.constant 0 : i32
    %c0_i32_0 = arith.constant 0 : i32
    %c0_i32_1 = arith.constant 0 : i32
    return %c0_i32, %c0_i32_0 : i32, i32
  }
  func.func @transform_2(%arg0: i32) -> (i32, i32) {
    %c0_i32 = arith.constant 0 : i32
    %c0_i32_0 = arith.constant 0 : i32
    %c0_i32_1 = arith.constant 0 : i32
    return %c0_i32, %c0_i32_0 : i32, i32
  }
  func.func @transform_3(%arg0: i32) -> (i32, i32) {
    %c0_i32 = arith.constant 0 : i32
    %c0_i32_0 = arith.constant 0 : i32
    %c0_i32_1 = arith.constant 0 : i32
    return %c0_i32, %c0_i32_0 : i32, i32
  }
  func.func @transform_4(%arg0: i32) -> (i32, i32) {
    %c0_i32 = arith.constant 0 : i32
    %c0_i32_0 = arith.constant 0 : i32
    %c0_i32_1 = arith.constant 0 : i32
    return %c0_i32, %c0_i32_0 : i32, i32
  }
  func.func @transform_5(%arg0: i32) -> (i32, i32) {
    %c0_i32 = arith.constant 0 : i32
    %c0_i32_0 = arith.constant 0 : i32
    %c0_i32_1 = arith.constant 0 : i32
    return %c0_i32, %c0_i32_0 : i32, i32
  }
}

module attributes {stable_mosaic.version = 11 : i64} {
  func.func @kernel(%arg0: i32, %arg1: memref<8x4x16xf32, #tpu.memory_space<vmem>>, %arg2: memref<16x32xf32, #tpu.memory_space<vmem>>, %arg3: memref<8x32xf32, #tpu.memory_space<vmem>>, %arg4: memref<1x32xf32, #tpu.memory_space<vmem>>, %arg5: memref<16x32xf32, #tpu.memory_space<vmem>>, %arg6: memref<8x32xf32, #tpu.memory_space<vmem>>, %arg7: memref<1x32xf32, #tpu.memory_space<vmem>>, %arg8: memref<16x16xf32, #tpu.memory_space<vmem>>, %arg9: memref<1x16xf32, #tpu.memory_space<vmem>>, %arg10: memref<1x16xf32, #tpu.memory_space<vmem>>, %arg11: memref<1x16xf32, #tpu.memory_space<vmem>>, %arg12: memref<8x4x16xf32, #tpu.memory_space<vmem>>) attributes {dimension_semantics = [#tpu.dimension_semantics<arbitrary>], iteration_bounds = array<i64: 1>, scalar_prefetch = 0 : i64, scratch_operands = 0 : i64, tpu.core_type = #tpu.core_type<tc>, window_params = [{pipeline_mode = #tpu.pipeline_mode<synchronous>, transform_indices = @transform_0, window_bounds = array<i64: 8, 4, 16>}, {pipeline_mode = #tpu.pipeline_mode<synchronous>, transform_indices = @transform_1, window_bounds = array<i64: 16, 32>}, {pipeline_mode = #tpu.pipeline_mode<synchronous>, transform_indices = @transform_2, window_bounds = array<i64: 8, 32>}, {pipeline_mode = #tpu.pipeline_mode<synchronous>, transform_indices = @transform_3, window_bounds = array<i64: 1, 32>}, {pipeline_mode = #tpu.pipeline_mode<synchronous>, transform_indices = @transform_4, window_bounds = array<i64: 16, 32>}, {pipeline_mode = #tpu.pipeline_mode<synchronous>, transform_indices = @transform_5, window_bounds = array<i64: 8, 32>}, {pipeline_mode = #tpu.pipeline_mode<synchronous>, transform_indices = @transform_6, window_bounds = array<i64: 1, 32>}, {pipeline_mode = #tpu.pipeline_mode<synchronous>, transform_indices = @transform_7, window_bounds = array<i64: 16, 16>}, {pipeline_mode = #tpu.pipeline_mode<synchronous>, transform_indices = @transform_8, window_bounds = array<i64: 1, 16>}, {pipeline_mode = #tpu.pipeline_mode<synchronous>, transform_indices = @transform_9, window_bounds = array<i64: 1, 16>}, {pipeline_mode = #tpu.pipeline_mode<synchronous>, transform_indices = @transform_10, window_bounds = array<i64: 1, 16>}, {pipeline_mode = #tpu.pipeline_mode<synchronous>, transform_indices = @transform_11, window_bounds = array<i64: 8, 4, 16>}]} {
    %c0 = arith.constant 0 : index
    %c0_0 = arith.constant 0 : index
    %0 = vector.load %arg2[%c0, %c0_0] : memref<16x32xf32, #tpu.memory_space<vmem>>, vector<16x32xf32>
    %c0_1 = arith.constant 0 : index
    %c0_2 = arith.constant 0 : index
    %1 = vector.load %arg3[%c0_1, %c0_2] : memref<8x32xf32, #tpu.memory_space<vmem>>, vector<8x32xf32>
    %c0_3 = arith.constant 0 : index
    %c0_4 = arith.constant 0 : index
    %2 = vector.load %arg4[%c0_3, %c0_4] : memref<1x32xf32, #tpu.memory_space<vmem>>, vector<1x32xf32>
    %c0_5 = arith.constant 0 : index
    %c0_6 = arith.constant 0 : index
    %3 = vector.load %arg5[%c0_5, %c0_6] : memref<16x32xf32, #tpu.memory_space<vmem>>, vector<16x32xf32>
    %c0_7 = arith.constant 0 : index
    %c0_8 = arith.constant 0 : index
    %4 = vector.load %arg6[%c0_7, %c0_8] : memref<8x32xf32, #tpu.memory_space<vmem>>, vector<8x32xf32>
    %c0_9 = arith.constant 0 : index
    %c0_10 = arith.constant 0 : index
    %5 = vector.load %arg7[%c0_9, %c0_10] : memref<1x32xf32, #tpu.memory_space<vmem>>, vector<1x32xf32>
    %c0_11 = arith.constant 0 : index
    %c0_12 = arith.constant 0 : index
    %6 = vector.load %arg8[%c0_11, %c0_12] : memref<16x16xf32, #tpu.memory_space<vmem>>, vector<16x16xf32>
    %c0_13 = arith.constant 0 : index
    %c0_14 = arith.constant 0 : index
    %7 = vector.load %arg9[%c0_13, %c0_14] : memref<1x16xf32, #tpu.memory_space<vmem>>, vector<1x16xf32>
    %c0_15 = arith.constant 0 : index
    %c0_16 = arith.constant 0 : index
    %8 = vector.load %arg10[%c0_15, %c0_16] : memref<1x16xf32, #tpu.memory_space<vmem>>, vector<1x16xf32>
    %c0_17 = arith.constant 0 : index
    %c0_18 = arith.constant 0 : index
    %9 = vector.load %arg11[%c0_17, %c0_18] : memref<1x16xf32, #tpu.memory_space<vmem>>, vector<1x16xf32>
    %cst = arith.constant 0.000000e+00 : f32
    %10 = vector.broadcast %cst : f32 to vector<4x8xf32>
    %c0_19 = arith.constant 0 : index
    %c0_20 = arith.constant 0 : index
    %c0_21 = arith.constant 0 : index
    %11 = vector.load %arg1[%c0_19, %c0_20, %c0_21] : memref<8x4x16xf32, #tpu.memory_space<vmem>>, vector<1x4x16xf32>
    %12 = vector.shape_cast %11 : vector<1x4x16xf32> to vector<4x16xf32>
    %c1 = arith.constant 1 : index
    %c0_22 = arith.constant 0 : index
    %c0_23 = arith.constant 0 : index
    %13 = vector.load %arg1[%c1, %c0_22, %c0_23] : memref<8x4x16xf32, #tpu.memory_space<vmem>>, vector<1x4x16xf32>
    %14 = vector.shape_cast %13 : vector<1x4x16xf32> to vector<4x16xf32>
    %c2 = arith.constant 2 : index
    %c0_24 = arith.constant 0 : index
    %c0_25 = arith.constant 0 : index
    %15 = vector.load %arg1[%c2, %c0_24, %c0_25] : memref<8x4x16xf32, #tpu.memory_space<vmem>>, vector<1x4x16xf32>
    %16 = vector.shape_cast %15 : vector<1x4x16xf32> to vector<4x16xf32>
    %c3 = arith.constant 3 : index
    %c0_26 = arith.constant 0 : index
    %c0_27 = arith.constant 0 : index
    %17 = vector.load %arg1[%c3, %c0_26, %c0_27] : memref<8x4x16xf32, #tpu.memory_space<vmem>>, vector<1x4x16xf32>
    %18 = vector.shape_cast %17 : vector<1x4x16xf32> to vector<4x16xf32>
    %c4 = arith.constant 4 : index
    %c0_28 = arith.constant 0 : index
    %c0_29 = arith.constant 0 : index
    %19 = vector.load %arg1[%c4, %c0_28, %c0_29] : memref<8x4x16xf32, #tpu.memory_space<vmem>>, vector<1x4x16xf32>
    %20 = vector.shape_cast %19 : vector<1x4x16xf32> to vector<4x16xf32>
    %c5 = arith.constant 5 : index
    %c0_30 = arith.constant 0 : index
    %c0_31 = arith.constant 0 : index
    %21 = vector.load %arg1[%c5, %c0_30, %c0_31] : memref<8x4x16xf32, #tpu.memory_space<vmem>>, vector<1x4x16xf32>
    %22 = vector.shape_cast %21 : vector<1x4x16xf32> to vector<4x16xf32>
    %c6 = arith.constant 6 : index
    %c0_32 = arith.constant 0 : index
    %c0_33 = arith.constant 0 : index
    %23 = vector.load %arg1[%c6, %c0_32, %c0_33] : memref<8x4x16xf32, #tpu.memory_space<vmem>>, vector<1x4x16xf32>
    %24 = vector.shape_cast %23 : vector<1x4x16xf32> to vector<4x16xf32>
    %c7 = arith.constant 7 : index
    %c0_34 = arith.constant 0 : index
    %c0_35 = arith.constant 0 : index
    %25 = vector.load %arg1[%c7, %c0_34, %c0_35] : memref<8x4x16xf32, #tpu.memory_space<vmem>>, vector<1x4x16xf32>
    %26 = vector.shape_cast %25 : vector<1x4x16xf32> to vector<4x16xf32>
    %cst_36 = arith.constant dense<0.000000e+00> : vector<4x32xf32>
    %27 = tpu.matmul %12, %0, %cst_36 {dimension_numbers = #tpu.dot_dimension_numbers<[1], [0], [0], [1], [0, 0, 1, 1], [], []>} : vector<4x16xf32>, vector<16x32xf32>, vector<4x32xf32> -> vector<4x32xf32>
    %cst_37 = arith.constant dense<0.000000e+00> : vector<4x32xf32>
    %28 = tpu.matmul %10, %1, %cst_37 {dimension_numbers = #tpu.dot_dimension_numbers<[1], [0], [0], [1], [0, 0, 1, 1], [], []>} : vector<4x8xf32>, vector<8x32xf32>, vector<4x32xf32> -> vector<4x32xf32>
    %29 = arith.addf %27, %28 : vector<4x32xf32>
    %30 = vector.broadcast %2 : vector<1x32xf32> to vector<4x32xf32>
    %31 = arith.addf %29, %30 : vector<4x32xf32>
    %32 = vector.extract_strided_slice %31 {offsets = [0, 0], sizes = [4, 8], strides = [1, 1]} : vector<4x32xf32> to vector<4x8xf32>
    %33 = vector.extract_strided_slice %31 {offsets = [0, 8], sizes = [4, 8], strides = [1, 1]} : vector<4x32xf32> to vector<4x8xf32>
    %34 = vector.extract_strided_slice %31 {offsets = [0, 16], sizes = [4, 8], strides = [1, 1]} : vector<4x32xf32> to vector<4x8xf32>
    %35 = vector.extract_strided_slice %31 {offsets = [0, 24], sizes = [4, 8], strides = [1, 1]} : vector<4x32xf32> to vector<4x8xf32>
    %36 = arith.negf %33 : vector<4x8xf32>
    %37 = math.exp %36 : vector<4x8xf32>
    %cst_38 = arith.constant 1.000000e+00 : f32
    %38 = vector.broadcast %cst_38 : f32 to vector<4x8xf32>
    %39 = arith.addf %38, %37 : vector<4x8xf32>
    %40 = arith.divf %38, %39 : vector<4x8xf32>
    %41 = arith.mulf %40, %10 : vector<4x8xf32>
    %42 = arith.negf %32 : vector<4x8xf32>
    %43 = math.exp %42 : vector<4x8xf32>
    %cst_39 = arith.constant 1.000000e+00 : f32
    %44 = vector.broadcast %cst_39 : f32 to vector<4x8xf32>
    %45 = arith.addf %44, %43 : vector<4x8xf32>
    %46 = arith.divf %44, %45 : vector<4x8xf32>
    %47 = math.tanh %34 : vector<4x8xf32>
    %48 = arith.mulf %46, %47 : vector<4x8xf32>
    %49 = arith.addf %41, %48 : vector<4x8xf32>
    %50 = arith.negf %35 : vector<4x8xf32>
    %51 = math.exp %50 : vector<4x8xf32>
    %cst_40 = arith.constant 1.000000e+00 : f32
    %52 = vector.broadcast %cst_40 : f32 to vector<4x8xf32>
    %53 = arith.addf %52, %51 : vector<4x8xf32>
    %54 = arith.divf %52, %53 : vector<4x8xf32>
    %55 = math.tanh %49 : vector<4x8xf32>
    %56 = arith.mulf %54, %55 : vector<4x8xf32>
    %cst_41 = arith.constant dense<0.000000e+00> : vector<4x32xf32>
    %57 = tpu.matmul %14, %0, %cst_41 {dimension_numbers = #tpu.dot_dimension_numbers<[1], [0], [0], [1], [0, 0, 1, 1], [], []>} : vector<4x16xf32>, vector<16x32xf32>, vector<4x32xf32> -> vector<4x32xf32>
    %cst_42 = arith.constant dense<0.000000e+00> : vector<4x32xf32>
    %58 = tpu.matmul %56, %1, %cst_42 {dimension_numbers = #tpu.dot_dimension_numbers<[1], [0], [0], [1], [0, 0, 1, 1], [], []>} : vector<4x8xf32>, vector<8x32xf32>, vector<4x32xf32> -> vector<4x32xf32>
    %59 = arith.addf %57, %58 : vector<4x32xf32>
    %60 = vector.broadcast %2 : vector<1x32xf32> to vector<4x32xf32>
    %61 = arith.addf %59, %60 : vector<4x32xf32>
    %62 = vector.extract_strided_slice %61 {offsets = [0, 0], sizes = [4, 8], strides = [1, 1]} : vector<4x32xf32> to vector<4x8xf32>
    %63 = vector.extract_strided_slice %61 {offsets = [0, 8], sizes = [4, 8], strides = [1, 1]} : vector<4x32xf32> to vector<4x8xf32>
    %64 = vector.extract_strided_slice %61 {offsets = [0, 16], sizes = [4, 8], strides = [1, 1]} : vector<4x32xf32> to vector<4x8xf32>
    %65 = vector.extract_strided_slice %61 {offsets = [0, 24], sizes = [4, 8], strides = [1, 1]} : vector<4x32xf32> to vector<4x8xf32>
    %66 = arith.negf %63 : vector<4x8xf32>
    %67 = math.exp %66 : vector<4x8xf32>
    %cst_43 = arith.constant 1.000000e+00 : f32
    %68 = vector.broadcast %cst_43 : f32 to vector<4x8xf32>
    %69 = arith.addf %68, %67 : vector<4x8xf32>
    %70 = arith.divf %68, %69 : vector<4x8xf32>
    %71 = arith.mulf %70, %49 : vector<4x8xf32>
    %72 = arith.negf %62 : vector<4x8xf32>
    %73 = math.exp %72 : vector<4x8xf32>
    %cst_44 = arith.constant 1.000000e+00 : f32
    %74 = vector.broadcast %cst_44 : f32 to vector<4x8xf32>
    %75 = arith.addf %74, %73 : vector<4x8xf32>
    %76 = arith.divf %74, %75 : vector<4x8xf32>
    %77 = math.tanh %64 : vector<4x8xf32>
    %78 = arith.mulf %76, %77 : vector<4x8xf32>
    %79 = arith.addf %71, %78 : vector<4x8xf32>
    %80 = arith.negf %65 : vector<4x8xf32>
    %81 = math.exp %80 : vector<4x8xf32>
    %cst_45 = arith.constant 1.000000e+00 : f32
    %82 = vector.broadcast %cst_45 : f32 to vector<4x8xf32>
    %83 = arith.addf %82, %81 : vector<4x8xf32>
    %84 = arith.divf %82, %83 : vector<4x8xf32>
    %85 = math.tanh %79 : vector<4x8xf32>
    %86 = arith.mulf %84, %85 : vector<4x8xf32>
    %cst_46 = arith.constant dense<0.000000e+00> : vector<4x32xf32>
    %87 = tpu.matmul %16, %0, %cst_46 {dimension_numbers = #tpu.dot_dimension_numbers<[1], [0], [0], [1], [0, 0, 1, 1], [], []>} : vector<4x16xf32>, vector<16x32xf32>, vector<4x32xf32> -> vector<4x32xf32>
    %cst_47 = arith.constant dense<0.000000e+00> : vector<4x32xf32>
    %88 = tpu.matmul %86, %1, %cst_47 {dimension_numbers = #tpu.dot_dimension_numbers<[1], [0], [0], [1], [0, 0, 1, 1], [], []>} : vector<4x8xf32>, vector<8x32xf32>, vector<4x32xf32> -> vector<4x32xf32>
    %89 = arith.addf %87, %88 : vector<4x32xf32>
    %90 = vector.broadcast %2 : vector<1x32xf32> to vector<4x32xf32>
    %91 = arith.addf %89, %90 : vector<4x32xf32>
    %92 = vector.extract_strided_slice %91 {offsets = [0, 0], sizes = [4, 8], strides = [1, 1]} : vector<4x32xf32> to vector<4x8xf32>
    %93 = vector.extract_strided_slice %91 {offsets = [0, 8], sizes = [4, 8], strides = [1, 1]} : vector<4x32xf32> to vector<4x8xf32>
    %94 = vector.extract_strided_slice %91 {offsets = [0, 16], sizes = [4, 8], strides = [1, 1]} : vector<4x32xf32> to vector<4x8xf32>
    %95 = vector.extract_strided_slice %91 {offsets = [0, 24], sizes = [4, 8], strides = [1, 1]} : vector<4x32xf32> to vector<4x8xf32>
    %96 = arith.negf %93 : vector<4x8xf32>
    %97 = math.exp %96 : vector<4x8xf32>
    %cst_48 = arith.constant 1.000000e+00 : f32
    %98 = vector.broadcast %cst_48 : f32 to vector<4x8xf32>
    %99 = arith.addf %98, %97 : vector<4x8xf32>
    %100 = arith.divf %98, %99 : vector<4x8xf32>
    %101 = arith.mulf %100, %79 : vector<4x8xf32>
    %102 = arith.negf %92 : vector<4x8xf32>
    %103 = math.exp %102 : vector<4x8xf32>
    %cst_49 = arith.constant 1.000000e+00 : f32
    %104 = vector.broadcast %cst_49 : f32 to vector<4x8xf32>
    %105 = arith.addf %104, %103 : vector<4x8xf32>
    %106 = arith.divf %104, %105 : vector<4x8xf32>
    %107 = math.tanh %94 : vector<4x8xf32>
    %108 = arith.mulf %106, %107 : vector<4x8xf32>
    %109 = arith.addf %101, %108 : vector<4x8xf32>
    %110 = arith.negf %95 : vector<4x8xf32>
    %111 = math.exp %110 : vector<4x8xf32>
    %cst_50 = arith.constant 1.000000e+00 : f32
    %112 = vector.broadcast %cst_50 : f32 to vector<4x8xf32>
    %113 = arith.addf %112, %111 : vector<4x8xf32>
    %114 = arith.divf %112, %113 : vector<4x8xf32>
    %115 = math.tanh %109 : vector<4x8xf32>
    %116 = arith.mulf %114, %115 : vector<4x8xf32>
    %cst_51 = arith.constant dense<0.000000e+00> : vector<4x32xf32>
    %117 = tpu.matmul %18, %0, %cst_51 {dimension_numbers = #tpu.dot_dimension_numbers<[1], [0], [0], [1], [0, 0, 1, 1], [], []>} : vector<4x16xf32>, vector<16x32xf32>, vector<4x32xf32> -> vector<4x32xf32>
    %cst_52 = arith.constant dense<0.000000e+00> : vector<4x32xf32>
    %118 = tpu.matmul %116, %1, %cst_52 {dimension_numbers = #tpu.dot_dimension_numbers<[1], [0], [0], [1], [0, 0, 1, 1], [], []>} : vector<4x8xf32>, vector<8x32xf32>, vector<4x32xf32> -> vector<4x32xf32>
    %119 = arith.addf %117, %118 : vector<4x32xf32>
    %120 = vector.broadcast %2 : vector<1x32xf32> to vector<4x32xf32>
    %121 = arith.addf %119, %120 : vector<4x32xf32>
    %122 = vector.extract_strided_slice %121 {offsets = [0, 0], sizes = [4, 8], strides = [1, 1]} : vector<4x32xf32> to vector<4x8xf32>
    %123 = vector.extract_strided_slice %121 {offsets = [0, 8], sizes = [4, 8], strides = [1, 1]} : vector<4x32xf32> to vector<4x8xf32>
    %124 = vector.extract_strided_slice %121 {offsets = [0, 16], sizes = [4, 8], strides = [1, 1]} : vector<4x32xf32> to vector<4x8xf32>
    %125 = vector.extract_strided_slice %121 {offsets = [0, 24], sizes = [4, 8], strides = [1, 1]} : vector<4x32xf32> to vector<4x8xf32>
    %126 = arith.negf %123 : vector<4x8xf32>
    %127 = math.exp %126 : vector<4x8xf32>
    %cst_53 = arith.constant 1.000000e+00 : f32
    %128 = vector.broadcast %cst_53 : f32 to vector<4x8xf32>
    %129 = arith.addf %128, %127 : vector<4x8xf32>
    %130 = arith.divf %128, %129 : vector<4x8xf32>
    %131 = arith.mulf %130, %109 : vector<4x8xf32>
    %132 = arith.negf %122 : vector<4x8xf32>
    %133 = math.exp %132 : vector<4x8xf32>
    %cst_54 = arith.constant 1.000000e+00 : f32
    %134 = vector.broadcast %cst_54 : f32 to vector<4x8xf32>
    %135 = arith.addf %134, %133 : vector<4x8xf32>
    %136 = arith.divf %134, %135 : vector<4x8xf32>
    %137 = math.tanh %124 : vector<4x8xf32>
    %138 = arith.mulf %136, %137 : vector<4x8xf32>
    %139 = arith.addf %131, %138 : vector<4x8xf32>
    %140 = arith.negf %125 : vector<4x8xf32>
    %141 = math.exp %140 : vector<4x8xf32>
    %cst_55 = arith.constant 1.000000e+00 : f32
    %142 = vector.broadcast %cst_55 : f32 to vector<4x8xf32>
    %143 = arith.addf %142, %141 : vector<4x8xf32>
    %144 = arith.divf %142, %143 : vector<4x8xf32>
    %145 = math.tanh %139 : vector<4x8xf32>
    %146 = arith.mulf %144, %145 : vector<4x8xf32>
    %cst_56 = arith.constant dense<0.000000e+00> : vector<4x32xf32>
    %147 = tpu.matmul %20, %0, %cst_56 {dimension_numbers = #tpu.dot_dimension_numbers<[1], [0], [0], [1], [0, 0, 1, 1], [], []>} : vector<4x16xf32>, vector<16x32xf32>, vector<4x32xf32> -> vector<4x32xf32>
    %cst_57 = arith.constant dense<0.000000e+00> : vector<4x32xf32>
    %148 = tpu.matmul %146, %1, %cst_57 {dimension_numbers = #tpu.dot_dimension_numbers<[1], [0], [0], [1], [0, 0, 1, 1], [], []>} : vector<4x8xf32>, vector<8x32xf32>, vector<4x32xf32> -> vector<4x32xf32>
    %149 = arith.addf %147, %148 : vector<4x32xf32>
    %150 = vector.broadcast %2 : vector<1x32xf32> to vector<4x32xf32>
    %151 = arith.addf %149, %150 : vector<4x32xf32>
    %152 = vector.extract_strided_slice %151 {offsets = [0, 0], sizes = [4, 8], strides = [1, 1]} : vector<4x32xf32> to vector<4x8xf32>
    %153 = vector.extract_strided_slice %151 {offsets = [0, 8], sizes = [4, 8], strides = [1, 1]} : vector<4x32xf32> to vector<4x8xf32>
    %154 = vector.extract_strided_slice %151 {offsets = [0, 16], sizes = [4, 8], strides = [1, 1]} : vector<4x32xf32> to vector<4x8xf32>
    %155 = vector.extract_strided_slice %151 {offsets = [0, 24], sizes = [4, 8], strides = [1, 1]} : vector<4x32xf32> to vector<4x8xf32>
    %156 = arith.negf %153 : vector<4x8xf32>
    %157 = math.exp %156 : vector<4x8xf32>
    %cst_58 = arith.constant 1.000000e+00 : f32
    %158 = vector.broadcast %cst_58 : f32 to vector<4x8xf32>
    %159 = arith.addf %158, %157 : vector<4x8xf32>
    %160 = arith.divf %158, %159 : vector<4x8xf32>
    %161 = arith.mulf %160, %139 : vector<4x8xf32>
    %162 = arith.negf %152 : vector<4x8xf32>
    %163 = math.exp %162 : vector<4x8xf32>
    %cst_59 = arith.constant 1.000000e+00 : f32
    %164 = vector.broadcast %cst_59 : f32 to vector<4x8xf32>
    %165 = arith.addf %164, %163 : vector<4x8xf32>
    %166 = arith.divf %164, %165 : vector<4x8xf32>
    %167 = math.tanh %154 : vector<4x8xf32>
    %168 = arith.mulf %166, %167 : vector<4x8xf32>
    %169 = arith.addf %161, %168 : vector<4x8xf32>
    %170 = arith.negf %155 : vector<4x8xf32>
    %171 = math.exp %170 : vector<4x8xf32>
    %cst_60 = arith.constant 1.000000e+00 : f32
    %172 = vector.broadcast %cst_60 : f32 to vector<4x8xf32>
    %173 = arith.addf %172, %171 : vector<4x8xf32>
    %174 = arith.divf %172, %173 : vector<4x8xf32>
    %175 = math.tanh %169 : vector<4x8xf32>
    %176 = arith.mulf %174, %175 : vector<4x8xf32>
    %cst_61 = arith.constant dense<0.000000e+00> : vector<4x32xf32>
    %177 = tpu.matmul %22, %0, %cst_61 {dimension_numbers = #tpu.dot_dimension_numbers<[1], [0], [0], [1], [0, 0, 1, 1], [], []>} : vector<4x16xf32>, vector<16x32xf32>, vector<4x32xf32> -> vector<4x32xf32>
    %cst_62 = arith.constant dense<0.000000e+00> : vector<4x32xf32>
    %178 = tpu.matmul %176, %1, %cst_62 {dimension_numbers = #tpu.dot_dimension_numbers<[1], [0], [0], [1], [0, 0, 1, 1], [], []>} : vector<4x8xf32>, vector<8x32xf32>, vector<4x32xf32> -> vector<4x32xf32>
    %179 = arith.addf %177, %178 : vector<4x32xf32>
    %180 = vector.broadcast %2 : vector<1x32xf32> to vector<4x32xf32>
    %181 = arith.addf %179, %180 : vector<4x32xf32>
    %182 = vector.extract_strided_slice %181 {offsets = [0, 0], sizes = [4, 8], strides = [1, 1]} : vector<4x32xf32> to vector<4x8xf32>
    %183 = vector.extract_strided_slice %181 {offsets = [0, 8], sizes = [4, 8], strides = [1, 1]} : vector<4x32xf32> to vector<4x8xf32>
    %184 = vector.extract_strided_slice %181 {offsets = [0, 16], sizes = [4, 8], strides = [1, 1]} : vector<4x32xf32> to vector<4x8xf32>
    %185 = vector.extract_strided_slice %181 {offsets = [0, 24], sizes = [4, 8], strides = [1, 1]} : vector<4x32xf32> to vector<4x8xf32>
    %186 = arith.negf %183 : vector<4x8xf32>
    %187 = math.exp %186 : vector<4x8xf32>
    %cst_63 = arith.constant 1.000000e+00 : f32
    %188 = vector.broadcast %cst_63 : f32 to vector<4x8xf32>
    %189 = arith.addf %188, %187 : vector<4x8xf32>
    %190 = arith.divf %188, %189 : vector<4x8xf32>
    %191 = arith.mulf %190, %169 : vector<4x8xf32>
    %192 = arith.negf %182 : vector<4x8xf32>
    %193 = math.exp %192 : vector<4x8xf32>
    %cst_64 = arith.constant 1.000000e+00 : f32
    %194 = vector.broadcast %cst_64 : f32 to vector<4x8xf32>
    %195 = arith.addf %194, %193 : vector<4x8xf32>
    %196 = arith.divf %194, %195 : vector<4x8xf32>
    %197 = math.tanh %184 : vector<4x8xf32>
    %198 = arith.mulf %196, %197 : vector<4x8xf32>
    %199 = arith.addf %191, %198 : vector<4x8xf32>
    %200 = arith.negf %185 : vector<4x8xf32>
    %201 = math.exp %200 : vector<4x8xf32>
    %cst_65 = arith.constant 1.000000e+00 : f32
    %202 = vector.broadcast %cst_65 : f32 to vector<4x8xf32>
    %203 = arith.addf %202, %201 : vector<4x8xf32>
    %204 = arith.divf %202, %203 : vector<4x8xf32>
    %205 = math.tanh %199 : vector<4x8xf32>
    %206 = arith.mulf %204, %205 : vector<4x8xf32>
    %cst_66 = arith.constant dense<0.000000e+00> : vector<4x32xf32>
    %207 = tpu.matmul %24, %0, %cst_66 {dimension_numbers = #tpu.dot_dimension_numbers<[1], [0], [0], [1], [0, 0, 1, 1], [], []>} : vector<4x16xf32>, vector<16x32xf32>, vector<4x32xf32> -> vector<4x32xf32>
    %cst_67 = arith.constant dense<0.000000e+00> : vector<4x32xf32>
    %208 = tpu.matmul %206, %1, %cst_67 {dimension_numbers = #tpu.dot_dimension_numbers<[1], [0], [0], [1], [0, 0, 1, 1], [], []>} : vector<4x8xf32>, vector<8x32xf32>, vector<4x32xf32> -> vector<4x32xf32>
    %209 = arith.addf %207, %208 : vector<4x32xf32>
    %210 = vector.broadcast %2 : vector<1x32xf32> to vector<4x32xf32>
    %211 = arith.addf %209, %210 : vector<4x32xf32>
    %212 = vector.extract_strided_slice %211 {offsets = [0, 0], sizes = [4, 8], strides = [1, 1]} : vector<4x32xf32> to vector<4x8xf32>
    %213 = vector.extract_strided_slice %211 {offsets = [0, 8], sizes = [4, 8], strides = [1, 1]} : vector<4x32xf32> to vector<4x8xf32>
    %214 = vector.extract_strided_slice %211 {offsets = [0, 16], sizes = [4, 8], strides = [1, 1]} : vector<4x32xf32> to vector<4x8xf32>
    %215 = vector.extract_strided_slice %211 {offsets = [0, 24], sizes = [4, 8], strides = [1, 1]} : vector<4x32xf32> to vector<4x8xf32>
    %216 = arith.negf %213 : vector<4x8xf32>
    %217 = math.exp %216 : vector<4x8xf32>
    %cst_68 = arith.constant 1.000000e+00 : f32
    %218 = vector.broadcast %cst_68 : f32 to vector<4x8xf32>
    %219 = arith.addf %218, %217 : vector<4x8xf32>
    %220 = arith.divf %218, %219 : vector<4x8xf32>
    %221 = arith.mulf %220, %199 : vector<4x8xf32>
    %222 = arith.negf %212 : vector<4x8xf32>
    %223 = math.exp %222 : vector<4x8xf32>
    %cst_69 = arith.constant 1.000000e+00 : f32
    %224 = vector.broadcast %cst_69 : f32 to vector<4x8xf32>
    %225 = arith.addf %224, %223 : vector<4x8xf32>
    %226 = arith.divf %224, %225 : vector<4x8xf32>
    %227 = math.tanh %214 : vector<4x8xf32>
    %228 = arith.mulf %226, %227 : vector<4x8xf32>
    %229 = arith.addf %221, %228 : vector<4x8xf32>
    %230 = arith.negf %215 : vector<4x8xf32>
    %231 = math.exp %230 : vector<4x8xf32>
    %cst_70 = arith.constant 1.000000e+00 : f32
    %232 = vector.broadcast %cst_70 : f32 to vector<4x8xf32>
    %233 = arith.addf %232, %231 : vector<4x8xf32>
    %234 = arith.divf %232, %233 : vector<4x8xf32>
    %235 = math.tanh %229 : vector<4x8xf32>
    %236 = arith.mulf %234, %235 : vector<4x8xf32>
    %cst_71 = arith.constant dense<0.000000e+00> : vector<4x32xf32>
    %237 = tpu.matmul %26, %0, %cst_71 {dimension_numbers = #tpu.dot_dimension_numbers<[1], [0], [0], [1], [0, 0, 1, 1], [], []>} : vector<4x16xf32>, vector<16x32xf32>, vector<4x32xf32> -> vector<4x32xf32>
    %cst_72 = arith.constant dense<0.000000e+00> : vector<4x32xf32>
    %238 = tpu.matmul %236, %1, %cst_72 {dimension_numbers = #tpu.dot_dimension_numbers<[1], [0], [0], [1], [0, 0, 1, 1], [], []>} : vector<4x8xf32>, vector<8x32xf32>, vector<4x32xf32> -> vector<4x32xf32>
    %239 = arith.addf %237, %238 : vector<4x32xf32>
    %240 = vector.broadcast %2 : vector<1x32xf32> to vector<4x32xf32>
    %241 = arith.addf %239, %240 : vector<4x32xf32>
    %242 = vector.extract_strided_slice %241 {offsets = [0, 0], sizes = [4, 8], strides = [1, 1]} : vector<4x32xf32> to vector<4x8xf32>
    %243 = vector.extract_strided_slice %241 {offsets = [0, 8], sizes = [4, 8], strides = [1, 1]} : vector<4x32xf32> to vector<4x8xf32>
    %244 = vector.extract_strided_slice %241 {offsets = [0, 16], sizes = [4, 8], strides = [1, 1]} : vector<4x32xf32> to vector<4x8xf32>
    %245 = vector.extract_strided_slice %241 {offsets = [0, 24], sizes = [4, 8], strides = [1, 1]} : vector<4x32xf32> to vector<4x8xf32>
    %246 = arith.negf %243 : vector<4x8xf32>
    %247 = math.exp %246 : vector<4x8xf32>
    %cst_73 = arith.constant 1.000000e+00 : f32
    %248 = vector.broadcast %cst_73 : f32 to vector<4x8xf32>
    %249 = arith.addf %248, %247 : vector<4x8xf32>
    %250 = arith.divf %248, %249 : vector<4x8xf32>
    %251 = arith.mulf %250, %229 : vector<4x8xf32>
    %252 = arith.negf %242 : vector<4x8xf32>
    %253 = math.exp %252 : vector<4x8xf32>
    %cst_74 = arith.constant 1.000000e+00 : f32
    %254 = vector.broadcast %cst_74 : f32 to vector<4x8xf32>
    %255 = arith.addf %254, %253 : vector<4x8xf32>
    %256 = arith.divf %254, %255 : vector<4x8xf32>
    %257 = math.tanh %244 : vector<4x8xf32>
    %258 = arith.mulf %256, %257 : vector<4x8xf32>
    %259 = arith.addf %251, %258 : vector<4x8xf32>
    %260 = arith.negf %245 : vector<4x8xf32>
    %261 = math.exp %260 : vector<4x8xf32>
    %cst_75 = arith.constant 1.000000e+00 : f32
    %262 = vector.broadcast %cst_75 : f32 to vector<4x8xf32>
    %263 = arith.addf %262, %261 : vector<4x8xf32>
    %264 = arith.divf %262, %263 : vector<4x8xf32>
    %265 = math.tanh %259 : vector<4x8xf32>
    %266 = arith.mulf %264, %265 : vector<4x8xf32>
    %cst_76 = arith.constant dense<0.000000e+00> : vector<4x32xf32>
    %267 = tpu.matmul %26, %3, %cst_76 {dimension_numbers = #tpu.dot_dimension_numbers<[1], [0], [0], [1], [0, 0, 1, 1], [], []>} : vector<4x16xf32>, vector<16x32xf32>, vector<4x32xf32> -> vector<4x32xf32>
    %cst_77 = arith.constant dense<0.000000e+00> : vector<4x32xf32>
    %268 = tpu.matmul %10, %4, %cst_77 {dimension_numbers = #tpu.dot_dimension_numbers<[1], [0], [0], [1], [0, 0, 1, 1], [], []>} : vector<4x8xf32>, vector<8x32xf32>, vector<4x32xf32> -> vector<4x32xf32>
    %269 = arith.addf %267, %268 : vector<4x32xf32>
    %270 = vector.broadcast %5 : vector<1x32xf32> to vector<4x32xf32>
    %271 = arith.addf %269, %270 : vector<4x32xf32>
    %272 = vector.extract_strided_slice %271 {offsets = [0, 0], sizes = [4, 8], strides = [1, 1]} : vector<4x32xf32> to vector<4x8xf32>
    %273 = vector.extract_strided_slice %271 {offsets = [0, 8], sizes = [4, 8], strides = [1, 1]} : vector<4x32xf32> to vector<4x8xf32>
    %274 = vector.extract_strided_slice %271 {offsets = [0, 16], sizes = [4, 8], strides = [1, 1]} : vector<4x32xf32> to vector<4x8xf32>
    %275 = vector.extract_strided_slice %271 {offsets = [0, 24], sizes = [4, 8], strides = [1, 1]} : vector<4x32xf32> to vector<4x8xf32>
    %276 = arith.negf %273 : vector<4x8xf32>
    %277 = math.exp %276 : vector<4x8xf32>
    %cst_78 = arith.constant 1.000000e+00 : f32
    %278 = vector.broadcast %cst_78 : f32 to vector<4x8xf32>
    %279 = arith.addf %278, %277 : vector<4x8xf32>
    %280 = arith.divf %278, %279 : vector<4x8xf32>
    %281 = arith.mulf %280, %10 : vector<4x8xf32>
    %282 = arith.negf %272 : vector<4x8xf32>
    %283 = math.exp %282 : vector<4x8xf32>
    %cst_79 = arith.constant 1.000000e+00 : f32
    %284 = vector.broadcast %cst_79 : f32 to vector<4x8xf32>
    %285 = arith.addf %284, %283 : vector<4x8xf32>
    %286 = arith.divf %284, %285 : vector<4x8xf32>
    %287 = math.tanh %274 : vector<4x8xf32>
    %288 = arith.mulf %286, %287 : vector<4x8xf32>
    %289 = arith.addf %281, %288 : vector<4x8xf32>
    %290 = arith.negf %275 : vector<4x8xf32>
    %291 = math.exp %290 : vector<4x8xf32>
    %cst_80 = arith.constant 1.000000e+00 : f32
    %292 = vector.broadcast %cst_80 : f32 to vector<4x8xf32>
    %293 = arith.addf %292, %291 : vector<4x8xf32>
    %294 = arith.divf %292, %293 : vector<4x8xf32>
    %295 = math.tanh %289 : vector<4x8xf32>
    %296 = arith.mulf %294, %295 : vector<4x8xf32>
    %297 = tpu.concatenate %266, %296 in 1 : vector<4x8xf32>, vector<4x8xf32> -> vector<4x16xf32>
    %cst_81 = arith.constant dense<0.000000e+00> : vector<4x16xf32>
    %298 = tpu.matmul %297, %6, %cst_81 {dimension_numbers = #tpu.dot_dimension_numbers<[1], [0], [0], [1], [0, 0, 1, 1], [], []>} : vector<4x16xf32>, vector<16x16xf32>, vector<4x16xf32> -> vector<4x16xf32>
    %299 = vector.broadcast %7 : vector<1x16xf32> to vector<4x16xf32>
    %300 = arith.addf %298, %299 : vector<4x16xf32>
    %cst_82 = arith.constant dense<0.000000e+00> : vector<4xf32>
    %301 = vector.multi_reduction <add>, %300, %cst_82 [1] : vector<4x16xf32> to vector<4xf32>
    %302 = vector.shape_cast %301 : vector<4xf32> to vector<4x1xf32>
    %cst_83 = arith.constant 1.600000e+01 : f32
    %303 = vector.broadcast %cst_83 : f32 to vector<4x1xf32>
    %304 = arith.divf %302, %303 : vector<4x1xf32>
    %305 = vector.broadcast %304 : vector<4x1xf32> to vector<4x16xf32>
    %306 = arith.subf %300, %305 : vector<4x16xf32>
    %307 = arith.mulf %306, %306 : vector<4x16xf32>
    %cst_84 = arith.constant dense<0.000000e+00> : vector<4xf32>
    %308 = vector.multi_reduction <add>, %307, %cst_84 [1] : vector<4x16xf32> to vector<4xf32>
    %309 = vector.shape_cast %308 : vector<4xf32> to vector<4x1xf32>
    %cst_85 = arith.constant 1.600000e+01 : f32
    %310 = vector.broadcast %cst_85 : f32 to vector<4x1xf32>
    %311 = arith.divf %309, %310 : vector<4x1xf32>
    %312 = vector.broadcast %304 : vector<4x1xf32> to vector<4x16xf32>
    %313 = arith.subf %300, %312 : vector<4x16xf32>
    %cst_86 = arith.constant 9.99999974E-6 : f32
    %314 = vector.broadcast %cst_86 : f32 to vector<4x1xf32>
    %315 = arith.addf %311, %314 : vector<4x1xf32>
    %316 = math.rsqrt %315 : vector<4x1xf32>
    %317 = vector.broadcast %316 : vector<4x1xf32> to vector<4x16xf32>
    %318 = arith.mulf %313, %317 : vector<4x16xf32>
    %319 = vector.broadcast %8 : vector<1x16xf32> to vector<4x16xf32>
    %320 = arith.mulf %318, %319 : vector<4x16xf32>
    %321 = vector.broadcast %9 : vector<1x16xf32> to vector<4x16xf32>
    %322 = arith.addf %320, %321 : vector<4x16xf32>
    %323 = arith.addf %26, %322 : vector<4x16xf32>
    %c7_87 = arith.constant 7 : index
    %c0_88 = arith.constant 0 : index
    %c0_89 = arith.constant 0 : index
    %324 = vector.load %arg12[%c7_87, %c0_88, %c0_89] : memref<8x4x16xf32, #tpu.memory_space<vmem>>, vector<1x4x16xf32>
    %325 = vector.shape_cast %324 : vector<1x4x16xf32> to vector<4x16xf32>
    %326 = vector.shape_cast %323 : vector<4x16xf32> to vector<1x4x16xf32>
    tpu.vector_store %arg12[%c7_87, %c0_88, %c0_89], %326 {strides = array<i32>} : memref<8x4x16xf32, #tpu.memory_space<vmem>>, vector<1x4x16xf32>,
    %cst_90 = arith.constant dense<0.000000e+00> : vector<4x32xf32>
    %327 = tpu.matmul %24, %3, %cst_90 {dimension_numbers = #tpu.dot_dimension_numbers<[1], [0], [0], [1], [0, 0, 1, 1], [], []>} : vector<4x16xf32>, vector<16x32xf32>, vector<4x32xf32> -> vector<4x32xf32>
    %cst_91 = arith.constant dense<0.000000e+00> : vector<4x32xf32>
    %328 = tpu.matmul %296, %4, %cst_91 {dimension_numbers = #tpu.dot_dimension_numbers<[1], [0], [0], [1], [0, 0, 1, 1], [], []>} : vector<4x8xf32>, vector<8x32xf32>, vector<4x32xf32> -> vector<4x32xf32>
    %329 = arith.addf %327, %328 : vector<4x32xf32>
    %330 = vector.broadcast %5 : vector<1x32xf32> to vector<4x32xf32>
    %331 = arith.addf %329, %330 : vector<4x32xf32>
    %332 = vector.extract_strided_slice %331 {offsets = [0, 0], sizes = [4, 8], strides = [1, 1]} : vector<4x32xf32> to vector<4x8xf32>
    %333 = vector.extract_strided_slice %331 {offsets = [0, 8], sizes = [4, 8], strides = [1, 1]} : vector<4x32xf32> to vector<4x8xf32>
    %334 = vector.extract_strided_slice %331 {offsets = [0, 16], sizes = [4, 8], strides = [1, 1]} : vector<4x32xf32> to vector<4x8xf32>
    %335 = vector.extract_strided_slice %331 {offsets = [0, 24], sizes = [4, 8], strides = [1, 1]} : vector<4x32xf32> to vector<4x8xf32>
    %336 = arith.negf %333 : vector<4x8xf32>
    %337 = math.exp %336 : vector<4x8xf32>
    %cst_92 = arith.constant 1.000000e+00 : f32
    %338 = vector.broadcast %cst_92 : f32 to vector<4x8xf32>
    %339 = arith.addf %338, %337 : vector<4x8xf32>
    %340 = arith.divf %338, %339 : vector<4x8xf32>
    %341 = arith.mulf %340, %289 : vector<4x8xf32>
    %342 = arith.negf %332 : vector<4x8xf32>
    %343 = math.exp %342 : vector<4x8xf32>
    %cst_93 = arith.constant 1.000000e+00 : f32
    %344 = vector.broadcast %cst_93 : f32 to vector<4x8xf32>
    %345 = arith.addf %344, %343 : vector<4x8xf32>
    %346 = arith.divf %344, %345 : vector<4x8xf32>
    %347 = math.tanh %334 : vector<4x8xf32>
    %348 = arith.mulf %346, %347 : vector<4x8xf32>
    %349 = arith.addf %341, %348 : vector<4x8xf32>
    %350 = arith.negf %335 : vector<4x8xf32>
    %351 = math.exp %350 : vector<4x8xf32>
    %cst_94 = arith.constant 1.000000e+00 : f32
    %352 = vector.broadcast %cst_94 : f32 to vector<4x8xf32>
    %353 = arith.addf %352, %351 : vector<4x8xf32>
    %354 = arith.divf %352, %353 : vector<4x8xf32>
    %355 = math.tanh %349 : vector<4x8xf32>
    %356 = arith.mulf %354, %355 : vector<4x8xf32>
    %357 = tpu.concatenate %236, %356 in 1 : vector<4x8xf32>, vector<4x8xf32> -> vector<4x16xf32>
    %cst_95 = arith.constant dense<0.000000e+00> : vector<4x16xf32>
    %358 = tpu.matmul %357, %6, %cst_95 {dimension_numbers = #tpu.dot_dimension_numbers<[1], [0], [0], [1], [0, 0, 1, 1], [], []>} : vector<4x16xf32>, vector<16x16xf32>, vector<4x16xf32> -> vector<4x16xf32>
    %359 = vector.broadcast %7 : vector<1x16xf32> to vector<4x16xf32>
    %360 = arith.addf %358, %359 : vector<4x16xf32>
    %cst_96 = arith.constant dense<0.000000e+00> : vector<4xf32>
    %361 = vector.multi_reduction <add>, %360, %cst_96 [1] : vector<4x16xf32> to vector<4xf32>
    %362 = vector.shape_cast %361 : vector<4xf32> to vector<4x1xf32>
    %cst_97 = arith.constant 1.600000e+01 : f32
    %363 = vector.broadcast %cst_97 : f32 to vector<4x1xf32>
    %364 = arith.divf %362, %363 : vector<4x1xf32>
    %365 = vector.broadcast %364 : vector<4x1xf32> to vector<4x16xf32>
    %366 = arith.subf %360, %365 : vector<4x16xf32>
    %367 = arith.mulf %366, %366 : vector<4x16xf32>
    %cst_98 = arith.constant dense<0.000000e+00> : vector<4xf32>
    %368 = vector.multi_reduction <add>, %367, %cst_98 [1] : vector<4x16xf32> to vector<4xf32>
    %369 = vector.shape_cast %368 : vector<4xf32> to vector<4x1xf32>
    %cst_99 = arith.constant 1.600000e+01 : f32
    %370 = vector.broadcast %cst_99 : f32 to vector<4x1xf32>
    %371 = arith.divf %369, %370 : vector<4x1xf32>
    %372 = vector.broadcast %364 : vector<4x1xf32> to vector<4x16xf32>
    %373 = arith.subf %360, %372 : vector<4x16xf32>
    %cst_100 = arith.constant 9.99999974E-6 : f32
    %374 = vector.broadcast %cst_100 : f32 to vector<4x1xf32>
    %375 = arith.addf %371, %374 : vector<4x1xf32>
    %376 = math.rsqrt %375 : vector<4x1xf32>
    %377 = vector.broadcast %376 : vector<4x1xf32> to vector<4x16xf32>
    %378 = arith.mulf %373, %377 : vector<4x16xf32>
    %379 = vector.broadcast %8 : vector<1x16xf32> to vector<4x16xf32>
    %380 = arith.mulf %378, %379 : vector<4x16xf32>
    %381 = vector.broadcast %9 : vector<1x16xf32> to vector<4x16xf32>
    %382 = arith.addf %380, %381 : vector<4x16xf32>
    %383 = arith.addf %24, %382 : vector<4x16xf32>
    %c6_101 = arith.constant 6 : index
    %c0_102 = arith.constant 0 : index
    %c0_103 = arith.constant 0 : index
    %384 = vector.load %arg12[%c6_101, %c0_102, %c0_103] : memref<8x4x16xf32, #tpu.memory_space<vmem>>, vector<1x4x16xf32>
    %385 = vector.shape_cast %384 : vector<1x4x16xf32> to vector<4x16xf32>
    %386 = vector.shape_cast %383 : vector<4x16xf32> to vector<1x4x16xf32>
    tpu.vector_store %arg12[%c6_101, %c0_102, %c0_103], %386 {strides = array<i32>} : memref<8x4x16xf32, #tpu.memory_space<vmem>>, vector<1x4x16xf32>,
    %cst_104 = arith.constant dense<0.000000e+00> : vector<4x32xf32>
    %387 = tpu.matmul %22, %3, %cst_104 {dimension_numbers = #tpu.dot_dimension_numbers<[1], [0], [0], [1], [0, 0, 1, 1], [], []>} : vector<4x16xf32>, vector<16x32xf32>, vector<4x32xf32> -> vector<4x32xf32>
    %cst_105 = arith.constant dense<0.000000e+00> : vector<4x32xf32>
    %388 = tpu.matmul %356, %4, %cst_105 {dimension_numbers = #tpu.dot_dimension_numbers<[1], [0], [0], [1], [0, 0, 1, 1], [], []>} : vector<4x8xf32>, vector<8x32xf32>, vector<4x32xf32> -> vector<4x32xf32>
    %389 = arith.addf %387, %388 : vector<4x32xf32>
    %390 = vector.broadcast %5 : vector<1x32xf32> to vector<4x32xf32>
    %391 = arith.addf %389, %390 : vector<4x32xf32>
    %392 = vector.extract_strided_slice %391 {offsets = [0, 0], sizes = [4, 8], strides = [1, 1]} : vector<4x32xf32> to vector<4x8xf32>
    %393 = vector.extract_strided_slice %391 {offsets = [0, 8], sizes = [4, 8], strides = [1, 1]} : vector<4x32xf32> to vector<4x8xf32>
    %394 = vector.extract_strided_slice %391 {offsets = [0, 16], sizes = [4, 8], strides = [1, 1]} : vector<4x32xf32> to vector<4x8xf32>
    %395 = vector.extract_strided_slice %391 {offsets = [0, 24], sizes = [4, 8], strides = [1, 1]} : vector<4x32xf32> to vector<4x8xf32>
    %396 = arith.negf %393 : vector<4x8xf32>
    %397 = math.exp %396 : vector<4x8xf32>
    %cst_106 = arith.constant 1.000000e+00 : f32
    %398 = vector.broadcast %cst_106 : f32 to vector<4x8xf32>
    %399 = arith.addf %398, %397 : vector<4x8xf32>
    %400 = arith.divf %398, %399 : vector<4x8xf32>
    %401 = arith.mulf %400, %349 : vector<4x8xf32>
    %402 = arith.negf %392 : vector<4x8xf32>
    %403 = math.exp %402 : vector<4x8xf32>
    %cst_107 = arith.constant 1.000000e+00 : f32
    %404 = vector.broadcast %cst_107 : f32 to vector<4x8xf32>
    %405 = arith.addf %404, %403 : vector<4x8xf32>
    %406 = arith.divf %404, %405 : vector<4x8xf32>
    %407 = math.tanh %394 : vector<4x8xf32>
    %408 = arith.mulf %406, %407 : vector<4x8xf32>
    %409 = arith.addf %401, %408 : vector<4x8xf32>
    %410 = arith.negf %395 : vector<4x8xf32>
    %411 = math.exp %410 : vector<4x8xf32>
    %cst_108 = arith.constant 1.000000e+00 : f32
    %412 = vector.broadcast %cst_108 : f32 to vector<4x8xf32>
    %413 = arith.addf %412, %411 : vector<4x8xf32>
    %414 = arith.divf %412, %413 : vector<4x8xf32>
    %415 = math.tanh %409 : vector<4x8xf32>
    %416 = arith.mulf %414, %415 : vector<4x8xf32>
    %417 = tpu.concatenate %206, %416 in 1 : vector<4x8xf32>, vector<4x8xf32> -> vector<4x16xf32>
    %cst_109 = arith.constant dense<0.000000e+00> : vector<4x16xf32>
    %418 = tpu.matmul %417, %6, %cst_109 {dimension_numbers = #tpu.dot_dimension_numbers<[1], [0], [0], [1], [0, 0, 1, 1], [], []>} : vector<4x16xf32>, vector<16x16xf32>, vector<4x16xf32> -> vector<4x16xf32>
    %419 = vector.broadcast %7 : vector<1x16xf32> to vector<4x16xf32>
    %420 = arith.addf %418, %419 : vector<4x16xf32>
    %cst_110 = arith.constant dense<0.000000e+00> : vector<4xf32>
    %421 = vector.multi_reduction <add>, %420, %cst_110 [1] : vector<4x16xf32> to vector<4xf32>
    %422 = vector.shape_cast %421 : vector<4xf32> to vector<4x1xf32>
    %cst_111 = arith.constant 1.600000e+01 : f32
    %423 = vector.broadcast %cst_111 : f32 to vector<4x1xf32>
    %424 = arith.divf %422, %423 : vector<4x1xf32>
    %425 = vector.broadcast %424 : vector<4x1xf32> to vector<4x16xf32>
    %426 = arith.subf %420, %425 : vector<4x16xf32>
    %427 = arith.mulf %426, %426 : vector<4x16xf32>
    %cst_112 = arith.constant dense<0.000000e+00> : vector<4xf32>
    %428 = vector.multi_reduction <add>, %427, %cst_112 [1] : vector<4x16xf32> to vector<4xf32>
    %429 = vector.shape_cast %428 : vector<4xf32> to vector<4x1xf32>
    %cst_113 = arith.constant 1.600000e+01 : f32
    %430 = vector.broadcast %cst_113 : f32 to vector<4x1xf32>
    %431 = arith.divf %429, %430 : vector<4x1xf32>
    %432 = vector.broadcast %424 : vector<4x1xf32> to vector<4x16xf32>
    %433 = arith.subf %420, %432 : vector<4x16xf32>
    %cst_114 = arith.constant 9.99999974E-6 : f32
    %434 = vector.broadcast %cst_114 : f32 to vector<4x1xf32>
    %435 = arith.addf %431, %434 : vector<4x1xf32>
    %436 = math.rsqrt %435 : vector<4x1xf32>
    %437 = vector.broadcast %436 : vector<4x1xf32> to vector<4x16xf32>
    %438 = arith.mulf %433, %437 : vector<4x16xf32>
    %439 = vector.broadcast %8 : vector<1x16xf32> to vector<4x16xf32>
    %440 = arith.mulf %438, %439 : vector<4x16xf32>
    %441 = vector.broadcast %9 : vector<1x16xf32> to vector<4x16xf32>
    %442 = arith.addf %440, %441 : vector<4x16xf32>
    %443 = arith.addf %22, %442 : vector<4x16xf32>
    %c5_115 = arith.constant 5 : index
    %c0_116 = arith.constant 0 : index
    %c0_117 = arith.constant 0 : index
    %444 = vector.load %arg12[%c5_115, %c0_116, %c0_117] : memref<8x4x16xf32, #tpu.memory_space<vmem>>, vector<1x4x16xf32>
    %445 = vector.shape_cast %444 : vector<1x4x16xf32> to vector<4x16xf32>
    %446 = vector.shape_cast %443 : vector<4x16xf32> to vector<1x4x16xf32>
    tpu.vector_store %arg12[%c5_115, %c0_116, %c0_117], %446 {strides = array<i32>} : memref<8x4x16xf32, #tpu.memory_space<vmem>>, vector<1x4x16xf32>,
    %cst_118 = arith.constant dense<0.000000e+00> : vector<4x32xf32>
    %447 = tpu.matmul %20, %3, %cst_118 {dimension_numbers = #tpu.dot_dimension_numbers<[1], [0], [0], [1], [0, 0, 1, 1], [], []>} : vector<4x16xf32>, vector<16x32xf32>, vector<4x32xf32> -> vector<4x32xf32>
    %cst_119 = arith.constant dense<0.000000e+00> : vector<4x32xf32>
    %448 = tpu.matmul %416, %4, %cst_119 {dimension_numbers = #tpu.dot_dimension_numbers<[1], [0], [0], [1], [0, 0, 1, 1], [], []>} : vector<4x8xf32>, vector<8x32xf32>, vector<4x32xf32> -> vector<4x32xf32>
    %449 = arith.addf %447, %448 : vector<4x32xf32>
    %450 = vector.broadcast %5 : vector<1x32xf32> to vector<4x32xf32>
    %451 = arith.addf %449, %450 : vector<4x32xf32>
    %452 = vector.extract_strided_slice %451 {offsets = [0, 0], sizes = [4, 8], strides = [1, 1]} : vector<4x32xf32> to vector<4x8xf32>
    %453 = vector.extract_strided_slice %451 {offsets = [0, 8], sizes = [4, 8], strides = [1, 1]} : vector<4x32xf32> to vector<4x8xf32>
    %454 = vector.extract_strided_slice %451 {offsets = [0, 16], sizes = [4, 8], strides = [1, 1]} : vector<4x32xf32> to vector<4x8xf32>
    %455 = vector.extract_strided_slice %451 {offsets = [0, 24], sizes = [4, 8], strides = [1, 1]} : vector<4x32xf32> to vector<4x8xf32>
    %456 = arith.negf %453 : vector<4x8xf32>
    %457 = math.exp %456 : vector<4x8xf32>
    %cst_120 = arith.constant 1.000000e+00 : f32
    %458 = vector.broadcast %cst_120 : f32 to vector<4x8xf32>
    %459 = arith.addf %458, %457 : vector<4x8xf32>
    %460 = arith.divf %458, %459 : vector<4x8xf32>
    %461 = arith.mulf %460, %409 : vector<4x8xf32>
    %462 = arith.negf %452 : vector<4x8xf32>
    %463 = math.exp %462 : vector<4x8xf32>
    %cst_121 = arith.constant 1.000000e+00 : f32
    %464 = vector.broadcast %cst_121 : f32 to vector<4x8xf32>
    %465 = arith.addf %464, %463 : vector<4x8xf32>
    %466 = arith.divf %464, %465 : vector<4x8xf32>
    %467 = math.tanh %454 : vector<4x8xf32>
    %468 = arith.mulf %466, %467 : vector<4x8xf32>
    %469 = arith.addf %461, %468 : vector<4x8xf32>
    %470 = arith.negf %455 : vector<4x8xf32>
    %471 = math.exp %470 : vector<4x8xf32>
    %cst_122 = arith.constant 1.000000e+00 : f32
    %472 = vector.broadcast %cst_122 : f32 to vector<4x8xf32>
    %473 = arith.addf %472, %471 : vector<4x8xf32>
    %474 = arith.divf %472, %473 : vector<4x8xf32>
    %475 = math.tanh %469 : vector<4x8xf32>
    %476 = arith.mulf %474, %475 : vector<4x8xf32>
    %477 = tpu.concatenate %176, %476 in 1 : vector<4x8xf32>, vector<4x8xf32> -> vector<4x16xf32>
    %cst_123 = arith.constant dense<0.000000e+00> : vector<4x16xf32>
    %478 = tpu.matmul %477, %6, %cst_123 {dimension_numbers = #tpu.dot_dimension_numbers<[1], [0], [0], [1], [0, 0, 1, 1], [], []>} : vector<4x16xf32>, vector<16x16xf32>, vector<4x16xf32> -> vector<4x16xf32>
    %479 = vector.broadcast %7 : vector<1x16xf32> to vector<4x16xf32>
    %480 = arith.addf %478, %479 : vector<4x16xf32>
    %cst_124 = arith.constant dense<0.000000e+00> : vector<4xf32>
    %481 = vector.multi_reduction <add>, %480, %cst_124 [1] : vector<4x16xf32> to vector<4xf32>
    %482 = vector.shape_cast %481 : vector<4xf32> to vector<4x1xf32>
    %cst_125 = arith.constant 1.600000e+01 : f32
    %483 = vector.broadcast %cst_125 : f32 to vector<4x1xf32>
    %484 = arith.divf %482, %483 : vector<4x1xf32>
    %485 = vector.broadcast %484 : vector<4x1xf32> to vector<4x16xf32>
    %486 = arith.subf %480, %485 : vector<4x16xf32>
    %487 = arith.mulf %486, %486 : vector<4x16xf32>
    %cst_126 = arith.constant dense<0.000000e+00> : vector<4xf32>
    %488 = vector.multi_reduction <add>, %487, %cst_126 [1] : vector<4x16xf32> to vector<4xf32>
    %489 = vector.shape_cast %488 : vector<4xf32> to vector<4x1xf32>
    %cst_127 = arith.constant 1.600000e+01 : f32
    %490 = vector.broadcast %cst_127 : f32 to vector<4x1xf32>
    %491 = arith.divf %489, %490 : vector<4x1xf32>
    %492 = vector.broadcast %484 : vector<4x1xf32> to vector<4x16xf32>
    %493 = arith.subf %480, %492 : vector<4x16xf32>
    %cst_128 = arith.constant 9.99999974E-6 : f32
    %494 = vector.broadcast %cst_128 : f32 to vector<4x1xf32>
    %495 = arith.addf %491, %494 : vector<4x1xf32>
    %496 = math.rsqrt %495 : vector<4x1xf32>
    %497 = vector.broadcast %496 : vector<4x1xf32> to vector<4x16xf32>
    %498 = arith.mulf %493, %497 : vector<4x16xf32>
    %499 = vector.broadcast %8 : vector<1x16xf32> to vector<4x16xf32>
    %500 = arith.mulf %498, %499 : vector<4x16xf32>
    %501 = vector.broadcast %9 : vector<1x16xf32> to vector<4x16xf32>
    %502 = arith.addf %500, %501 : vector<4x16xf32>
    %503 = arith.addf %20, %502 : vector<4x16xf32>
    %c4_129 = arith.constant 4 : index
    %c0_130 = arith.constant 0 : index
    %c0_131 = arith.constant 0 : index
    %504 = vector.load %arg12[%c4_129, %c0_130, %c0_131] : memref<8x4x16xf32, #tpu.memory_space<vmem>>, vector<1x4x16xf32>
    %505 = vector.shape_cast %504 : vector<1x4x16xf32> to vector<4x16xf32>
    %506 = vector.shape_cast %503 : vector<4x16xf32> to vector<1x4x16xf32>
    tpu.vector_store %arg12[%c4_129, %c0_130, %c0_131], %506 {strides = array<i32>} : memref<8x4x16xf32, #tpu.memory_space<vmem>>, vector<1x4x16xf32>,
    %cst_132 = arith.constant dense<0.000000e+00> : vector<4x32xf32>
    %507 = tpu.matmul %18, %3, %cst_132 {dimension_numbers = #tpu.dot_dimension_numbers<[1], [0], [0], [1], [0, 0, 1, 1], [], []>} : vector<4x16xf32>, vector<16x32xf32>, vector<4x32xf32> -> vector<4x32xf32>
    %cst_133 = arith.constant dense<0.000000e+00> : vector<4x32xf32>
    %508 = tpu.matmul %476, %4, %cst_133 {dimension_numbers = #tpu.dot_dimension_numbers<[1], [0], [0], [1], [0, 0, 1, 1], [], []>} : vector<4x8xf32>, vector<8x32xf32>, vector<4x32xf32> -> vector<4x32xf32>
    %509 = arith.addf %507, %508 : vector<4x32xf32>
    %510 = vector.broadcast %5 : vector<1x32xf32> to vector<4x32xf32>
    %511 = arith.addf %509, %510 : vector<4x32xf32>
    %512 = vector.extract_strided_slice %511 {offsets = [0, 0], sizes = [4, 8], strides = [1, 1]} : vector<4x32xf32> to vector<4x8xf32>
    %513 = vector.extract_strided_slice %511 {offsets = [0, 8], sizes = [4, 8], strides = [1, 1]} : vector<4x32xf32> to vector<4x8xf32>
    %514 = vector.extract_strided_slice %511 {offsets = [0, 16], sizes = [4, 8], strides = [1, 1]} : vector<4x32xf32> to vector<4x8xf32>
    %515 = vector.extract_strided_slice %511 {offsets = [0, 24], sizes = [4, 8], strides = [1, 1]} : vector<4x32xf32> to vector<4x8xf32>
    %516 = arith.negf %513 : vector<4x8xf32>
    %517 = math.exp %516 : vector<4x8xf32>
    %cst_134 = arith.constant 1.000000e+00 : f32
    %518 = vector.broadcast %cst_134 : f32 to vector<4x8xf32>
    %519 = arith.addf %518, %517 : vector<4x8xf32>
    %520 = arith.divf %518, %519 : vector<4x8xf32>
    %521 = arith.mulf %520, %469 : vector<4x8xf32>
    %522 = arith.negf %512 : vector<4x8xf32>
    %523 = math.exp %522 : vector<4x8xf32>
    %cst_135 = arith.constant 1.000000e+00 : f32
    %524 = vector.broadcast %cst_135 : f32 to vector<4x8xf32>
    %525 = arith.addf %524, %523 : vector<4x8xf32>
    %526 = arith.divf %524, %525 : vector<4x8xf32>
    %527 = math.tanh %514 : vector<4x8xf32>
    %528 = arith.mulf %526, %527 : vector<4x8xf32>
    %529 = arith.addf %521, %528 : vector<4x8xf32>
    %530 = arith.negf %515 : vector<4x8xf32>
    %531 = math.exp %530 : vector<4x8xf32>
    %cst_136 = arith.constant 1.000000e+00 : f32
    %532 = vector.broadcast %cst_136 : f32 to vector<4x8xf32>
    %533 = arith.addf %532, %531 : vector<4x8xf32>
    %534 = arith.divf %532, %533 : vector<4x8xf32>
    %535 = math.tanh %529 : vector<4x8xf32>
    %536 = arith.mulf %534, %535 : vector<4x8xf32>
    %537 = tpu.concatenate %146, %536 in 1 : vector<4x8xf32>, vector<4x8xf32> -> vector<4x16xf32>
    %cst_137 = arith.constant dense<0.000000e+00> : vector<4x16xf32>
    %538 = tpu.matmul %537, %6, %cst_137 {dimension_numbers = #tpu.dot_dimension_numbers<[1], [0], [0], [1], [0, 0, 1, 1], [], []>} : vector<4x16xf32>, vector<16x16xf32>, vector<4x16xf32> -> vector<4x16xf32>
    %539 = vector.broadcast %7 : vector<1x16xf32> to vector<4x16xf32>
    %540 = arith.addf %538, %539 : vector<4x16xf32>
    %cst_138 = arith.constant dense<0.000000e+00> : vector<4xf32>
    %541 = vector.multi_reduction <add>, %540, %cst_138 [1] : vector<4x16xf32> to vector<4xf32>
    %542 = vector.shape_cast %541 : vector<4xf32> to vector<4x1xf32>
    %cst_139 = arith.constant 1.600000e+01 : f32
    %543 = vector.broadcast %cst_139 : f32 to vector<4x1xf32>
    %544 = arith.divf %542, %543 : vector<4x1xf32>
    %545 = vector.broadcast %544 : vector<4x1xf32> to vector<4x16xf32>
    %546 = arith.subf %540, %545 : vector<4x16xf32>
    %547 = arith.mulf %546, %546 : vector<4x16xf32>
    %cst_140 = arith.constant dense<0.000000e+00> : vector<4xf32>
    %548 = vector.multi_reduction <add>, %547, %cst_140 [1] : vector<4x16xf32> to vector<4xf32>
    %549 = vector.shape_cast %548 : vector<4xf32> to vector<4x1xf32>
    %cst_141 = arith.constant 1.600000e+01 : f32
    %550 = vector.broadcast %cst_141 : f32 to vector<4x1xf32>
    %551 = arith.divf %549, %550 : vector<4x1xf32>
    %552 = vector.broadcast %544 : vector<4x1xf32> to vector<4x16xf32>
    %553 = arith.subf %540, %552 : vector<4x16xf32>
    %cst_142 = arith.constant 9.99999974E-6 : f32
    %554 = vector.broadcast %cst_142 : f32 to vector<4x1xf32>
    %555 = arith.addf %551, %554 : vector<4x1xf32>
    %556 = math.rsqrt %555 : vector<4x1xf32>
    %557 = vector.broadcast %556 : vector<4x1xf32> to vector<4x16xf32>
    %558 = arith.mulf %553, %557 : vector<4x16xf32>
    %559 = vector.broadcast %8 : vector<1x16xf32> to vector<4x16xf32>
    %560 = arith.mulf %558, %559 : vector<4x16xf32>
    %561 = vector.broadcast %9 : vector<1x16xf32> to vector<4x16xf32>
    %562 = arith.addf %560, %561 : vector<4x16xf32>
    %563 = arith.addf %18, %562 : vector<4x16xf32>
    %c3_143 = arith.constant 3 : index
    %c0_144 = arith.constant 0 : index
    %c0_145 = arith.constant 0 : index
    %564 = vector.load %arg12[%c3_143, %c0_144, %c0_145] : memref<8x4x16xf32, #tpu.memory_space<vmem>>, vector<1x4x16xf32>
    %565 = vector.shape_cast %564 : vector<1x4x16xf32> to vector<4x16xf32>
    %566 = vector.shape_cast %563 : vector<4x16xf32> to vector<1x4x16xf32>
    tpu.vector_store %arg12[%c3_143, %c0_144, %c0_145], %566 {strides = array<i32>} : memref<8x4x16xf32, #tpu.memory_space<vmem>>, vector<1x4x16xf32>,
    %cst_146 = arith.constant dense<0.000000e+00> : vector<4x32xf32>
    %567 = tpu.matmul %16, %3, %cst_146 {dimension_numbers = #tpu.dot_dimension_numbers<[1], [0], [0], [1], [0, 0, 1, 1], [], []>} : vector<4x16xf32>, vector<16x32xf32>, vector<4x32xf32> -> vector<4x32xf32>
    %cst_147 = arith.constant dense<0.000000e+00> : vector<4x32xf32>
    %568 = tpu.matmul %536, %4, %cst_147 {dimension_numbers = #tpu.dot_dimension_numbers<[1], [0], [0], [1], [0, 0, 1, 1], [], []>} : vector<4x8xf32>, vector<8x32xf32>, vector<4x32xf32> -> vector<4x32xf32>
    %569 = arith.addf %567, %568 : vector<4x32xf32>
    %570 = vector.broadcast %5 : vector<1x32xf32> to vector<4x32xf32>
    %571 = arith.addf %569, %570 : vector<4x32xf32>
    %572 = vector.extract_strided_slice %571 {offsets = [0, 0], sizes = [4, 8], strides = [1, 1]} : vector<4x32xf32> to vector<4x8xf32>
    %573 = vector.extract_strided_slice %571 {offsets = [0, 8], sizes = [4, 8], strides = [1, 1]} : vector<4x32xf32> to vector<4x8xf32>
    %574 = vector.extract_strided_slice %571 {offsets = [0, 16], sizes = [4, 8], strides = [1, 1]} : vector<4x32xf32> to vector<4x8xf32>
    %575 = vector.extract_strided_slice %571 {offsets = [0, 24], sizes = [4, 8], strides = [1, 1]} : vector<4x32xf32> to vector<4x8xf32>
    %576 = arith.negf %573 : vector<4x8xf32>
    %577 = math.exp %576 : vector<4x8xf32>
    %cst_148 = arith.constant 1.000000e+00 : f32
    %578 = vector.broadcast %cst_148 : f32 to vector<4x8xf32>
    %579 = arith.addf %578, %577 : vector<4x8xf32>
    %580 = arith.divf %578, %579 : vector<4x8xf32>
    %581 = arith.mulf %580, %529 : vector<4x8xf32>
    %582 = arith.negf %572 : vector<4x8xf32>
    %583 = math.exp %582 : vector<4x8xf32>
    %cst_149 = arith.constant 1.000000e+00 : f32
    %584 = vector.broadcast %cst_149 : f32 to vector<4x8xf32>
    %585 = arith.addf %584, %583 : vector<4x8xf32>
    %586 = arith.divf %584, %585 : vector<4x8xf32>
    %587 = math.tanh %574 : vector<4x8xf32>
    %588 = arith.mulf %586, %587 : vector<4x8xf32>
    %589 = arith.addf %581, %588 : vector<4x8xf32>
    %590 = arith.negf %575 : vector<4x8xf32>
    %591 = math.exp %590 : vector<4x8xf32>
    %cst_150 = arith.constant 1.000000e+00 : f32
    %592 = vector.broadcast %cst_150 : f32 to vector<4x8xf32>
    %593 = arith.addf %592, %591 : vector<4x8xf32>
    %594 = arith.divf %592, %593 : vector<4x8xf32>
    %595 = math.tanh %589 : vector<4x8xf32>
    %596 = arith.mulf %594, %595 : vector<4x8xf32>
    %597 = tpu.concatenate %116, %596 in 1 : vector<4x8xf32>, vector<4x8xf32> -> vector<4x16xf32>
    %cst_151 = arith.constant dense<0.000000e+00> : vector<4x16xf32>
    %598 = tpu.matmul %597, %6, %cst_151 {dimension_numbers = #tpu.dot_dimension_numbers<[1], [0], [0], [1], [0, 0, 1, 1], [], []>} : vector<4x16xf32>, vector<16x16xf32>, vector<4x16xf32> -> vector<4x16xf32>
    %599 = vector.broadcast %7 : vector<1x16xf32> to vector<4x16xf32>
    %600 = arith.addf %598, %599 : vector<4x16xf32>
    %cst_152 = arith.constant dense<0.000000e+00> : vector<4xf32>
    %601 = vector.multi_reduction <add>, %600, %cst_152 [1] : vector<4x16xf32> to vector<4xf32>
    %602 = vector.shape_cast %601 : vector<4xf32> to vector<4x1xf32>
    %cst_153 = arith.constant 1.600000e+01 : f32
    %603 = vector.broadcast %cst_153 : f32 to vector<4x1xf32>
    %604 = arith.divf %602, %603 : vector<4x1xf32>
    %605 = vector.broadcast %604 : vector<4x1xf32> to vector<4x16xf32>
    %606 = arith.subf %600, %605 : vector<4x16xf32>
    %607 = arith.mulf %606, %606 : vector<4x16xf32>
    %cst_154 = arith.constant dense<0.000000e+00> : vector<4xf32>
    %608 = vector.multi_reduction <add>, %607, %cst_154 [1] : vector<4x16xf32> to vector<4xf32>
    %609 = vector.shape_cast %608 : vector<4xf32> to vector<4x1xf32>
    %cst_155 = arith.constant 1.600000e+01 : f32
    %610 = vector.broadcast %cst_155 : f32 to vector<4x1xf32>
    %611 = arith.divf %609, %610 : vector<4x1xf32>
    %612 = vector.broadcast %604 : vector<4x1xf32> to vector<4x16xf32>
    %613 = arith.subf %600, %612 : vector<4x16xf32>
    %cst_156 = arith.constant 9.99999974E-6 : f32
    %614 = vector.broadcast %cst_156 : f32 to vector<4x1xf32>
    %615 = arith.addf %611, %614 : vector<4x1xf32>
    %616 = math.rsqrt %615 : vector<4x1xf32>
    %617 = vector.broadcast %616 : vector<4x1xf32> to vector<4x16xf32>
    %618 = arith.mulf %613, %617 : vector<4x16xf32>
    %619 = vector.broadcast %8 : vector<1x16xf32> to vector<4x16xf32>
    %620 = arith.mulf %618, %619 : vector<4x16xf32>
    %621 = vector.broadcast %9 : vector<1x16xf32> to vector<4x16xf32>
    %622 = arith.addf %620, %621 : vector<4x16xf32>
    %623 = arith.addf %16, %622 : vector<4x16xf32>
    %c2_157 = arith.constant 2 : index
    %c0_158 = arith.constant 0 : index
    %c0_159 = arith.constant 0 : index
    %624 = vector.load %arg12[%c2_157, %c0_158, %c0_159] : memref<8x4x16xf32, #tpu.memory_space<vmem>>, vector<1x4x16xf32>
    %625 = vector.shape_cast %624 : vector<1x4x16xf32> to vector<4x16xf32>
    %626 = vector.shape_cast %623 : vector<4x16xf32> to vector<1x4x16xf32>
    tpu.vector_store %arg12[%c2_157, %c0_158, %c0_159], %626 {strides = array<i32>} : memref<8x4x16xf32, #tpu.memory_space<vmem>>, vector<1x4x16xf32>,
    %cst_160 = arith.constant dense<0.000000e+00> : vector<4x32xf32>
    %627 = tpu.matmul %14, %3, %cst_160 {dimension_numbers = #tpu.dot_dimension_numbers<[1], [0], [0], [1], [0, 0, 1, 1], [], []>} : vector<4x16xf32>, vector<16x32xf32>, vector<4x32xf32> -> vector<4x32xf32>
    %cst_161 = arith.constant dense<0.000000e+00> : vector<4x32xf32>
    %628 = tpu.matmul %596, %4, %cst_161 {dimension_numbers = #tpu.dot_dimension_numbers<[1], [0], [0], [1], [0, 0, 1, 1], [], []>} : vector<4x8xf32>, vector<8x32xf32>, vector<4x32xf32> -> vector<4x32xf32>
    %629 = arith.addf %627, %628 : vector<4x32xf32>
    %630 = vector.broadcast %5 : vector<1x32xf32> to vector<4x32xf32>
    %631 = arith.addf %629, %630 : vector<4x32xf32>
    %632 = vector.extract_strided_slice %631 {offsets = [0, 0], sizes = [4, 8], strides = [1, 1]} : vector<4x32xf32> to vector<4x8xf32>
    %633 = vector.extract_strided_slice %631 {offsets = [0, 8], sizes = [4, 8], strides = [1, 1]} : vector<4x32xf32> to vector<4x8xf32>
    %634 = vector.extract_strided_slice %631 {offsets = [0, 16], sizes = [4, 8], strides = [1, 1]} : vector<4x32xf32> to vector<4x8xf32>
    %635 = vector.extract_strided_slice %631 {offsets = [0, 24], sizes = [4, 8], strides = [1, 1]} : vector<4x32xf32> to vector<4x8xf32>
    %636 = arith.negf %633 : vector<4x8xf32>
    %637 = math.exp %636 : vector<4x8xf32>
    %cst_162 = arith.constant 1.000000e+00 : f32
    %638 = vector.broadcast %cst_162 : f32 to vector<4x8xf32>
    %639 = arith.addf %638, %637 : vector<4x8xf32>
    %640 = arith.divf %638, %639 : vector<4x8xf32>
    %641 = arith.mulf %640, %589 : vector<4x8xf32>
    %642 = arith.negf %632 : vector<4x8xf32>
    %643 = math.exp %642 : vector<4x8xf32>
    %cst_163 = arith.constant 1.000000e+00 : f32
    %644 = vector.broadcast %cst_163 : f32 to vector<4x8xf32>
    %645 = arith.addf %644, %643 : vector<4x8xf32>
    %646 = arith.divf %644, %645 : vector<4x8xf32>
    %647 = math.tanh %634 : vector<4x8xf32>
    %648 = arith.mulf %646, %647 : vector<4x8xf32>
    %649 = arith.addf %641, %648 : vector<4x8xf32>
    %650 = arith.negf %635 : vector<4x8xf32>
    %651 = math.exp %650 : vector<4x8xf32>
    %cst_164 = arith.constant 1.000000e+00 : f32
    %652 = vector.broadcast %cst_164 : f32 to vector<4x8xf32>
    %653 = arith.addf %652, %651 : vector<4x8xf32>
    %654 = arith.divf %652, %653 : vector<4x8xf32>
    %655 = math.tanh %649 : vector<4x8xf32>
    %656 = arith.mulf %654, %655 : vector<4x8xf32>
    %657 = tpu.concatenate %86, %656 in 1 : vector<4x8xf32>, vector<4x8xf32> -> vector<4x16xf32>
    %cst_165 = arith.constant dense<0.000000e+00> : vector<4x16xf32>
    %658 = tpu.matmul %657, %6, %cst_165 {dimension_numbers = #tpu.dot_dimension_numbers<[1], [0], [0], [1], [0, 0, 1, 1], [], []>} : vector<4x16xf32>, vector<16x16xf32>, vector<4x16xf32> -> vector<4x16xf32>
    %659 = vector.broadcast %7 : vector<1x16xf32> to vector<4x16xf32>
    %660 = arith.addf %658, %659 : vector<4x16xf32>
    %cst_166 = arith.constant dense<0.000000e+00> : vector<4xf32>
    %661 = vector.multi_reduction <add>, %660, %cst_166 [1] : vector<4x16xf32> to vector<4xf32>
    %662 = vector.shape_cast %661 : vector<4xf32> to vector<4x1xf32>
    %cst_167 = arith.constant 1.600000e+01 : f32
    %663 = vector.broadcast %cst_167 : f32 to vector<4x1xf32>
    %664 = arith.divf %662, %663 : vector<4x1xf32>
    %665 = vector.broadcast %664 : vector<4x1xf32> to vector<4x16xf32>
    %666 = arith.subf %660, %665 : vector<4x16xf32>
    %667 = arith.mulf %666, %666 : vector<4x16xf32>
    %cst_168 = arith.constant dense<0.000000e+00> : vector<4xf32>
    %668 = vector.multi_reduction <add>, %667, %cst_168 [1] : vector<4x16xf32> to vector<4xf32>
    %669 = vector.shape_cast %668 : vector<4xf32> to vector<4x1xf32>
    %cst_169 = arith.constant 1.600000e+01 : f32
    %670 = vector.broadcast %cst_169 : f32 to vector<4x1xf32>
    %671 = arith.divf %669, %670 : vector<4x1xf32>
    %672 = vector.broadcast %664 : vector<4x1xf32> to vector<4x16xf32>
    %673 = arith.subf %660, %672 : vector<4x16xf32>
    %cst_170 = arith.constant 9.99999974E-6 : f32
    %674 = vector.broadcast %cst_170 : f32 to vector<4x1xf32>
    %675 = arith.addf %671, %674 : vector<4x1xf32>
    %676 = math.rsqrt %675 : vector<4x1xf32>
    %677 = vector.broadcast %676 : vector<4x1xf32> to vector<4x16xf32>
    %678 = arith.mulf %673, %677 : vector<4x16xf32>
    %679 = vector.broadcast %8 : vector<1x16xf32> to vector<4x16xf32>
    %680 = arith.mulf %678, %679 : vector<4x16xf32>
    %681 = vector.broadcast %9 : vector<1x16xf32> to vector<4x16xf32>
    %682 = arith.addf %680, %681 : vector<4x16xf32>
    %683 = arith.addf %14, %682 : vector<4x16xf32>
    %c1_171 = arith.constant 1 : index
    %c0_172 = arith.constant 0 : index
    %c0_173 = arith.constant 0 : index
    %684 = vector.load %arg12[%c1_171, %c0_172, %c0_173] : memref<8x4x16xf32, #tpu.memory_space<vmem>>, vector<1x4x16xf32>
    %685 = vector.shape_cast %684 : vector<1x4x16xf32> to vector<4x16xf32>
    %686 = vector.shape_cast %683 : vector<4x16xf32> to vector<1x4x16xf32>
    tpu.vector_store %arg12[%c1_171, %c0_172, %c0_173], %686 {strides = array<i32>} : memref<8x4x16xf32, #tpu.memory_space<vmem>>, vector<1x4x16xf32>,
    %cst_174 = arith.constant dense<0.000000e+00> : vector<4x32xf32>
    %687 = tpu.matmul %12, %3, %cst_174 {dimension_numbers = #tpu.dot_dimension_numbers<[1], [0], [0], [1], [0, 0, 1, 1], [], []>} : vector<4x16xf32>, vector<16x32xf32>, vector<4x32xf32> -> vector<4x32xf32>
    %cst_175 = arith.constant dense<0.000000e+00> : vector<4x32xf32>
    %688 = tpu.matmul %656, %4, %cst_175 {dimension_numbers = #tpu.dot_dimension_numbers<[1], [0], [0], [1], [0, 0, 1, 1], [], []>} : vector<4x8xf32>, vector<8x32xf32>, vector<4x32xf32> -> vector<4x32xf32>
    %689 = arith.addf %687, %688 : vector<4x32xf32>
    %690 = vector.broadcast %5 : vector<1x32xf32> to vector<4x32xf32>
    %691 = arith.addf %689, %690 : vector<4x32xf32>
    %692 = vector.extract_strided_slice %691 {offsets = [0, 0], sizes = [4, 8], strides = [1, 1]} : vector<4x32xf32> to vector<4x8xf32>
    %693 = vector.extract_strided_slice %691 {offsets = [0, 8], sizes = [4, 8], strides = [1, 1]} : vector<4x32xf32> to vector<4x8xf32>
    %694 = vector.extract_strided_slice %691 {offsets = [0, 16], sizes = [4, 8], strides = [1, 1]} : vector<4x32xf32> to vector<4x8xf32>
    %695 = vector.extract_strided_slice %691 {offsets = [0, 24], sizes = [4, 8], strides = [1, 1]} : vector<4x32xf32> to vector<4x8xf32>
    %696 = arith.negf %693 : vector<4x8xf32>
    %697 = math.exp %696 : vector<4x8xf32>
    %cst_176 = arith.constant 1.000000e+00 : f32
    %698 = vector.broadcast %cst_176 : f32 to vector<4x8xf32>
    %699 = arith.addf %698, %697 : vector<4x8xf32>
    %700 = arith.divf %698, %699 : vector<4x8xf32>
    %701 = arith.mulf %700, %649 : vector<4x8xf32>
    %702 = arith.negf %692 : vector<4x8xf32>
    %703 = math.exp %702 : vector<4x8xf32>
    %cst_177 = arith.constant 1.000000e+00 : f32
    %704 = vector.broadcast %cst_177 : f32 to vector<4x8xf32>
    %705 = arith.addf %704, %703 : vector<4x8xf32>
    %706 = arith.divf %704, %705 : vector<4x8xf32>
    %707 = math.tanh %694 : vector<4x8xf32>
    %708 = arith.mulf %706, %707 : vector<4x8xf32>
    %709 = arith.addf %701, %708 : vector<4x8xf32>
    %710 = arith.negf %695 : vector<4x8xf32>
    %711 = math.exp %710 : vector<4x8xf32>
    %cst_178 = arith.constant 1.000000e+00 : f32
    %712 = vector.broadcast %cst_178 : f32 to vector<4x8xf32>
    %713 = arith.addf %712, %711 : vector<4x8xf32>
    %714 = arith.divf %712, %713 : vector<4x8xf32>
    %715 = math.tanh %709 : vector<4x8xf32>
    %716 = arith.mulf %714, %715 : vector<4x8xf32>
    %717 = tpu.concatenate %56, %716 in 1 : vector<4x8xf32>, vector<4x8xf32> -> vector<4x16xf32>
    %cst_179 = arith.constant dense<0.000000e+00> : vector<4x16xf32>
    %718 = tpu.matmul %717, %6, %cst_179 {dimension_numbers = #tpu.dot_dimension_numbers<[1], [0], [0], [1], [0, 0, 1, 1], [], []>} : vector<4x16xf32>, vector<16x16xf32>, vector<4x16xf32> -> vector<4x16xf32>
    %719 = vector.broadcast %7 : vector<1x16xf32> to vector<4x16xf32>
    %720 = arith.addf %718, %719 : vector<4x16xf32>
    %cst_180 = arith.constant dense<0.000000e+00> : vector<4xf32>
    %721 = vector.multi_reduction <add>, %720, %cst_180 [1] : vector<4x16xf32> to vector<4xf32>
    %722 = vector.shape_cast %721 : vector<4xf32> to vector<4x1xf32>
    %cst_181 = arith.constant 1.600000e+01 : f32
    %723 = vector.broadcast %cst_181 : f32 to vector<4x1xf32>
    %724 = arith.divf %722, %723 : vector<4x1xf32>
    %725 = vector.broadcast %724 : vector<4x1xf32> to vector<4x16xf32>
    %726 = arith.subf %720, %725 : vector<4x16xf32>
    %727 = arith.mulf %726, %726 : vector<4x16xf32>
    %cst_182 = arith.constant dense<0.000000e+00> : vector<4xf32>
    %728 = vector.multi_reduction <add>, %727, %cst_182 [1] : vector<4x16xf32> to vector<4xf32>
    %729 = vector.shape_cast %728 : vector<4xf32> to vector<4x1xf32>
    %cst_183 = arith.constant 1.600000e+01 : f32
    %730 = vector.broadcast %cst_183 : f32 to vector<4x1xf32>
    %731 = arith.divf %729, %730 : vector<4x1xf32>
    %732 = vector.broadcast %724 : vector<4x1xf32> to vector<4x16xf32>
    %733 = arith.subf %720, %732 : vector<4x16xf32>
    %cst_184 = arith.constant 9.99999974E-6 : f32
    %734 = vector.broadcast %cst_184 : f32 to vector<4x1xf32>
    %735 = arith.addf %731, %734 : vector<4x1xf32>
    %736 = math.rsqrt %735 : vector<4x1xf32>
    %737 = vector.broadcast %736 : vector<4x1xf32> to vector<4x16xf32>
    %738 = arith.mulf %733, %737 : vector<4x16xf32>
    %739 = vector.broadcast %8 : vector<1x16xf32> to vector<4x16xf32>
    %740 = arith.mulf %738, %739 : vector<4x16xf32>
    %741 = vector.broadcast %9 : vector<1x16xf32> to vector<4x16xf32>
    %742 = arith.addf %740, %741 : vector<4x16xf32>
    %743 = arith.addf %12, %742 : vector<4x16xf32>
    %c0_185 = arith.constant 0 : index
    %c0_186 = arith.constant 0 : index
    %c0_187 = arith.constant 0 : index
    %744 = vector.load %arg12[%c0_185, %c0_186, %c0_187] : memref<8x4x16xf32, #tpu.memory_space<vmem>>, vector<1x4x16xf32>
    %745 = vector.shape_cast %744 : vector<1x4x16xf32> to vector<4x16xf32>
    %746 = vector.shape_cast %743 : vector<4x16xf32> to vector<1x4x16xf32>
    tpu.vector_store %arg12[%c0_185, %c0_186, %c0_187], %746 {strides = array<i32>} : memref<8x4x16xf32, #tpu.memory_space<vmem>>, vector<1x4x16xf32>,
    return
  }
  func.func @transform_0(%arg0: i32) -> (i32, i32, i32) {
    %c0_i32 = arith.constant 0 : i32
    %c0_i32_0 = arith.constant 0 : i32
    %c0_i32_1 = arith.constant 0 : i32
    %c0_i32_2 = arith.constant 0 : i32
    return %c0_i32, %c0_i32_0, %c0_i32_1 : i32, i32, i32
  }
  func.func @transform_1(%arg0: i32) -> (i32, i32) {
    %c0_i32 = arith.constant 0 : i32
    %c0_i32_0 = arith.constant 0 : i32
    %c0_i32_1 = arith.constant 0 : i32
    return %c0_i32, %c0_i32_0 : i32, i32
  }
  func.func @transform_2(%arg0: i32) -> (i32, i32) {
    %c0_i32 = arith.constant 0 : i32
    %c0_i32_0 = arith.constant 0 : i32
    %c0_i32_1 = arith.constant 0 : i32
    return %c0_i32, %c0_i32_0 : i32, i32
  }
  func.func @transform_3(%arg0: i32) -> (i32, i32) {
    %c0_i32 = arith.constant 0 : i32
    %c0_i32_0 = arith.constant 0 : i32
    %c0_i32_1 = arith.constant 0 : i32
    return %c0_i32, %c0_i32_0 : i32, i32
  }
  func.func @transform_4(%arg0: i32) -> (i32, i32) {
    %c0_i32 = arith.constant 0 : i32
    %c0_i32_0 = arith.constant 0 : i32
    %c0_i32_1 = arith.constant 0 : i32
    return %c0_i32, %c0_i32_0 : i32, i32
  }
  func.func @transform_5(%arg0: i32) -> (i32, i32) {
    %c0_i32 = arith.constant 0 : i32
    %c0_i32_0 = arith.constant 0 : i32
    %c0_i32_1 = arith.constant 0 : i32
    return %c0_i32, %c0_i32_0 : i32, i32
  }
  func.func @transform_6(%arg0: i32) -> (i32, i32) {
    %c0_i32 = arith.constant 0 : i32
    %c0_i32_0 = arith.constant 0 : i32
    %c0_i32_1 = arith.constant 0 : i32
    return %c0_i32, %c0_i32_0 : i32, i32
  }
  func.func @transform_7(%arg0: i32) -> (i32, i32) {
    %c0_i32 = arith.constant 0 : i32
    %c0_i32_0 = arith.constant 0 : i32
    %c0_i32_1 = arith.constant 0 : i32
    return %c0_i32, %c0_i32_0 : i32, i32
  }
  func.func @transform_8(%arg0: i32) -> (i32, i32) {
    %c0_i32 = arith.constant 0 : i32
    %c0_i32_0 = arith.constant 0 : i32
    %c0_i32_1 = arith.constant 0 : i32
    return %c0_i32, %c0_i32_0 : i32, i32
  }
  func.func @transform_9(%arg0: i32) -> (i32, i32) {
    %c0_i32 = arith.constant 0 : i32
    %c0_i32_0 = arith.constant 0 : i32
    %c0_i32_1 = arith.constant 0 : i32
    return %c0_i32, %c0_i32_0 : i32, i32
  }
  func.func @transform_10(%arg0: i32) -> (i32, i32) {
    %c0_i32 = arith.constant 0 : i32
    %c0_i32_0 = arith.constant 0 : i32
    %c0_i32_1 = arith.constant 0 : i32
    return %c0_i32, %c0_i32_0 : i32, i32
  }
  func.func @transform_11(%arg0: i32) -> (i32, i32, i32) {
    %c0_i32 = arith.constant 0 : i32
    %c0_i32_0 = arith.constant 0 : i32
    %c0_i32_1 = arith.constant 0 : i32
    %c0_i32_2 = arith.constant 0 : i32
    return %c0_i32, %c0_i32_0, %c0_i32_1 : i32, i32, i32
  }
}

module attributes {stable_mosaic.version = 11 : i64} {
  func.func @kernel(%arg0: i32, %arg1: memref<4x8x16xf32, #tpu.memory_space<vmem>>, %arg2: memref<16x32xf32, #tpu.memory_space<vmem>>, %arg3: memref<8x32xf32, #tpu.memory_space<vmem>>, %arg4: memref<1x32xf32, #tpu.memory_space<vmem>>, %arg5: memref<16x32xf32, #tpu.memory_space<vmem>>, %arg6: memref<8x32xf32, #tpu.memory_space<vmem>>, %arg7: memref<1x32xf32, #tpu.memory_space<vmem>>, %arg8: memref<16x16xf32, #tpu.memory_space<vmem>>, %arg9: memref<1x16xf32, #tpu.memory_space<vmem>>, %arg10: memref<1x16xf32, #tpu.memory_space<vmem>>, %arg11: memref<1x16xf32, #tpu.memory_space<vmem>>, %arg12: memref<16x16xf32, #tpu.memory_space<vmem>>, %arg13: memref<1x16xf32, #tpu.memory_space<vmem>>, %arg14: memref<1xf32, #tpu.memory_space<smem>>, %arg15: memref<4x8x16xf32, #tpu.memory_space<vmem>>) attributes {dimension_semantics = [#tpu.dimension_semantics<arbitrary>], iteration_bounds = array<i64: 1>, scalar_prefetch = 0 : i64, scratch_operands = 0 : i64, tpu.core_type = #tpu.core_type<tc>, window_params = [{pipeline_mode = #tpu.pipeline_mode<synchronous>, transform_indices = @transform_0, window_bounds = array<i64: 4, 8, 16>}, {pipeline_mode = #tpu.pipeline_mode<synchronous>, transform_indices = @transform_1, window_bounds = array<i64: 16, 32>}, {pipeline_mode = #tpu.pipeline_mode<synchronous>, transform_indices = @transform_2, window_bounds = array<i64: 8, 32>}, {pipeline_mode = #tpu.pipeline_mode<synchronous>, transform_indices = @transform_3, window_bounds = array<i64: 1, 32>}, {pipeline_mode = #tpu.pipeline_mode<synchronous>, transform_indices = @transform_4, window_bounds = array<i64: 16, 32>}, {pipeline_mode = #tpu.pipeline_mode<synchronous>, transform_indices = @transform_5, window_bounds = array<i64: 8, 32>}, {pipeline_mode = #tpu.pipeline_mode<synchronous>, transform_indices = @transform_6, window_bounds = array<i64: 1, 32>}, {pipeline_mode = #tpu.pipeline_mode<synchronous>, transform_indices = @transform_7, window_bounds = array<i64: 16, 16>}, {pipeline_mode = #tpu.pipeline_mode<synchronous>, transform_indices = @transform_8, window_bounds = array<i64: 1, 16>}, {pipeline_mode = #tpu.pipeline_mode<synchronous>, transform_indices = @transform_9, window_bounds = array<i64: 1, 16>}, {pipeline_mode = #tpu.pipeline_mode<synchronous>, transform_indices = @transform_10, window_bounds = array<i64: 1, 16>}, {pipeline_mode = #tpu.pipeline_mode<synchronous>, transform_indices = @transform_11, window_bounds = array<i64: 16, 16>}, {pipeline_mode = #tpu.pipeline_mode<synchronous>, transform_indices = @transform_12, window_bounds = array<i64: 1, 16>}, {transform_indices = @transform_13, window_bounds = array<i64: 1>}, {pipeline_mode = #tpu.pipeline_mode<synchronous>, transform_indices = @transform_14, window_bounds = array<i64: 4, 8, 16>}]} {
    %c0 = arith.constant 0 : index
    %c0_0 = arith.constant 0 : index
    %0 = vector.load %arg2[%c0, %c0_0] : memref<16x32xf32, #tpu.memory_space<vmem>>, vector<16x32xf32>
    %c0_1 = arith.constant 0 : index
    %c0_2 = arith.constant 0 : index
    %1 = vector.load %arg3[%c0_1, %c0_2] : memref<8x32xf32, #tpu.memory_space<vmem>>, vector<8x32xf32>
    %c0_3 = arith.constant 0 : index
    %c0_4 = arith.constant 0 : index
    %2 = vector.load %arg4[%c0_3, %c0_4] : memref<1x32xf32, #tpu.memory_space<vmem>>, vector<1x32xf32>
    %c0_5 = arith.constant 0 : index
    %c0_6 = arith.constant 0 : index
    %3 = vector.load %arg5[%c0_5, %c0_6] : memref<16x32xf32, #tpu.memory_space<vmem>>, vector<16x32xf32>
    %c0_7 = arith.constant 0 : index
    %c0_8 = arith.constant 0 : index
    %4 = vector.load %arg6[%c0_7, %c0_8] : memref<8x32xf32, #tpu.memory_space<vmem>>, vector<8x32xf32>
    %c0_9 = arith.constant 0 : index
    %c0_10 = arith.constant 0 : index
    %5 = vector.load %arg7[%c0_9, %c0_10] : memref<1x32xf32, #tpu.memory_space<vmem>>, vector<1x32xf32>
    %c0_11 = arith.constant 0 : index
    %c0_12 = arith.constant 0 : index
    %6 = vector.load %arg8[%c0_11, %c0_12] : memref<16x16xf32, #tpu.memory_space<vmem>>, vector<16x16xf32>
    %c0_13 = arith.constant 0 : index
    %c0_14 = arith.constant 0 : index
    %7 = vector.load %arg9[%c0_13, %c0_14] : memref<1x16xf32, #tpu.memory_space<vmem>>, vector<1x16xf32>
    %c0_15 = arith.constant 0 : index
    %c0_16 = arith.constant 0 : index
    %8 = vector.load %arg10[%c0_15, %c0_16] : memref<1x16xf32, #tpu.memory_space<vmem>>, vector<1x16xf32>
    %c0_17 = arith.constant 0 : index
    %c0_18 = arith.constant 0 : index
    %9 = vector.load %arg11[%c0_17, %c0_18] : memref<1x16xf32, #tpu.memory_space<vmem>>, vector<1x16xf32>
    %c0_19 = arith.constant 0 : index
    %c0_20 = arith.constant 0 : index
    %10 = vector.load %arg12[%c0_19, %c0_20] : memref<16x16xf32, #tpu.memory_space<vmem>>, vector<16x16xf32>
    %c0_21 = arith.constant 0 : index
    %c0_22 = arith.constant 0 : index
    %11 = vector.load %arg13[%c0_21, %c0_22] : memref<1x16xf32, #tpu.memory_space<vmem>>, vector<1x16xf32>
    %c0_23 = arith.constant 0 : index
    %12 = memref.load %arg14[%c0_23] : memref<1xf32, #tpu.memory_space<smem>>
    %cst = arith.constant 0.000000e+00 : f32
    %13 = vector.broadcast %cst : f32 to vector<8x8xf32>
    %c0_24 = arith.constant 0 : index
    %c0_25 = arith.constant 0 : index
    %c0_26 = arith.constant 0 : index
    %14 = vector.load %arg1[%c0_24, %c0_25, %c0_26] : memref<4x8x16xf32, #tpu.memory_space<vmem>>, vector<1x8x16xf32>
    %15 = vector.shape_cast %14 : vector<1x8x16xf32> to vector<8x16xf32>
    %c1 = arith.constant 1 : index
    %c0_27 = arith.constant 0 : index
    %c0_28 = arith.constant 0 : index
    %16 = vector.load %arg1[%c1, %c0_27, %c0_28] : memref<4x8x16xf32, #tpu.memory_space<vmem>>, vector<1x8x16xf32>
    %17 = vector.shape_cast %16 : vector<1x8x16xf32> to vector<8x16xf32>
    %c2 = arith.constant 2 : index
    %c0_29 = arith.constant 0 : index
    %c0_30 = arith.constant 0 : index
    %18 = vector.load %arg1[%c2, %c0_29, %c0_30] : memref<4x8x16xf32, #tpu.memory_space<vmem>>, vector<1x8x16xf32>
    %19 = vector.shape_cast %18 : vector<1x8x16xf32> to vector<8x16xf32>
    %c3 = arith.constant 3 : index
    %c0_31 = arith.constant 0 : index
    %c0_32 = arith.constant 0 : index
    %20 = vector.load %arg1[%c3, %c0_31, %c0_32] : memref<4x8x16xf32, #tpu.memory_space<vmem>>, vector<1x8x16xf32>
    %21 = vector.shape_cast %20 : vector<1x8x16xf32> to vector<8x16xf32>
    %cst_33 = arith.constant dense<0.000000e+00> : vector<8x32xf32>
    %22 = tpu.matmul %15, %0, %cst_33 {dimension_numbers = #tpu.dot_dimension_numbers<[1], [0], [0], [1], [0, 0, 1, 1], [], []>} : vector<8x16xf32>, vector<16x32xf32>, vector<8x32xf32> -> vector<8x32xf32>
    %cst_34 = arith.constant dense<0.000000e+00> : vector<8x32xf32>
    %23 = tpu.matmul %13, %1, %cst_34 {dimension_numbers = #tpu.dot_dimension_numbers<[1], [0], [0], [1], [0, 0, 1, 1], [], []>} : vector<8x8xf32>, vector<8x32xf32>, vector<8x32xf32> -> vector<8x32xf32>
    %24 = arith.addf %22, %23 : vector<8x32xf32>
    %25 = vector.broadcast %2 : vector<1x32xf32> to vector<8x32xf32>
    %26 = arith.addf %24, %25 : vector<8x32xf32>
    %27 = vector.extract_strided_slice %26 {offsets = [0, 0], sizes = [8, 8], strides = [1, 1]} : vector<8x32xf32> to vector<8x8xf32>
    %28 = vector.extract_strided_slice %26 {offsets = [0, 8], sizes = [8, 8], strides = [1, 1]} : vector<8x32xf32> to vector<8x8xf32>
    %29 = vector.extract_strided_slice %26 {offsets = [0, 16], sizes = [8, 8], strides = [1, 1]} : vector<8x32xf32> to vector<8x8xf32>
    %30 = vector.extract_strided_slice %26 {offsets = [0, 24], sizes = [8, 8], strides = [1, 1]} : vector<8x32xf32> to vector<8x8xf32>
    %31 = arith.negf %28 : vector<8x8xf32>
    %32 = math.exp %31 : vector<8x8xf32>
    %cst_35 = arith.constant 1.000000e+00 : f32
    %33 = vector.broadcast %cst_35 : f32 to vector<8x8xf32>
    %34 = arith.addf %33, %32 : vector<8x8xf32>
    %35 = arith.divf %33, %34 : vector<8x8xf32>
    %36 = arith.mulf %35, %13 : vector<8x8xf32>
    %37 = arith.negf %27 : vector<8x8xf32>
    %38 = math.exp %37 : vector<8x8xf32>
    %cst_36 = arith.constant 1.000000e+00 : f32
    %39 = vector.broadcast %cst_36 : f32 to vector<8x8xf32>
    %40 = arith.addf %39, %38 : vector<8x8xf32>
    %41 = arith.divf %39, %40 : vector<8x8xf32>
    %42 = math.tanh %29 : vector<8x8xf32>
    %43 = arith.mulf %41, %42 : vector<8x8xf32>
    %44 = arith.addf %36, %43 : vector<8x8xf32>
    %45 = arith.negf %30 : vector<8x8xf32>
    %46 = math.exp %45 : vector<8x8xf32>
    %cst_37 = arith.constant 1.000000e+00 : f32
    %47 = vector.broadcast %cst_37 : f32 to vector<8x8xf32>
    %48 = arith.addf %47, %46 : vector<8x8xf32>
    %49 = arith.divf %47, %48 : vector<8x8xf32>
    %50 = math.tanh %44 : vector<8x8xf32>
    %51 = arith.mulf %49, %50 : vector<8x8xf32>
    %cst_38 = arith.constant dense<0.000000e+00> : vector<8x32xf32>
    %52 = tpu.matmul %17, %0, %cst_38 {dimension_numbers = #tpu.dot_dimension_numbers<[1], [0], [0], [1], [0, 0, 1, 1], [], []>} : vector<8x16xf32>, vector<16x32xf32>, vector<8x32xf32> -> vector<8x32xf32>
    %cst_39 = arith.constant dense<0.000000e+00> : vector<8x32xf32>
    %53 = tpu.matmul %51, %1, %cst_39 {dimension_numbers = #tpu.dot_dimension_numbers<[1], [0], [0], [1], [0, 0, 1, 1], [], []>} : vector<8x8xf32>, vector<8x32xf32>, vector<8x32xf32> -> vector<8x32xf32>
    %54 = arith.addf %52, %53 : vector<8x32xf32>
    %55 = vector.broadcast %2 : vector<1x32xf32> to vector<8x32xf32>
    %56 = arith.addf %54, %55 : vector<8x32xf32>
    %57 = vector.extract_strided_slice %56 {offsets = [0, 0], sizes = [8, 8], strides = [1, 1]} : vector<8x32xf32> to vector<8x8xf32>
    %58 = vector.extract_strided_slice %56 {offsets = [0, 8], sizes = [8, 8], strides = [1, 1]} : vector<8x32xf32> to vector<8x8xf32>
    %59 = vector.extract_strided_slice %56 {offsets = [0, 16], sizes = [8, 8], strides = [1, 1]} : vector<8x32xf32> to vector<8x8xf32>
    %60 = vector.extract_strided_slice %56 {offsets = [0, 24], sizes = [8, 8], strides = [1, 1]} : vector<8x32xf32> to vector<8x8xf32>
    %61 = arith.negf %58 : vector<8x8xf32>
    %62 = math.exp %61 : vector<8x8xf32>
    %cst_40 = arith.constant 1.000000e+00 : f32
    %63 = vector.broadcast %cst_40 : f32 to vector<8x8xf32>
    %64 = arith.addf %63, %62 : vector<8x8xf32>
    %65 = arith.divf %63, %64 : vector<8x8xf32>
    %66 = arith.mulf %65, %44 : vector<8x8xf32>
    %67 = arith.negf %57 : vector<8x8xf32>
    %68 = math.exp %67 : vector<8x8xf32>
    %cst_41 = arith.constant 1.000000e+00 : f32
    %69 = vector.broadcast %cst_41 : f32 to vector<8x8xf32>
    %70 = arith.addf %69, %68 : vector<8x8xf32>
    %71 = arith.divf %69, %70 : vector<8x8xf32>
    %72 = math.tanh %59 : vector<8x8xf32>
    %73 = arith.mulf %71, %72 : vector<8x8xf32>
    %74 = arith.addf %66, %73 : vector<8x8xf32>
    %75 = arith.negf %60 : vector<8x8xf32>
    %76 = math.exp %75 : vector<8x8xf32>
    %cst_42 = arith.constant 1.000000e+00 : f32
    %77 = vector.broadcast %cst_42 : f32 to vector<8x8xf32>
    %78 = arith.addf %77, %76 : vector<8x8xf32>
    %79 = arith.divf %77, %78 : vector<8x8xf32>
    %80 = math.tanh %74 : vector<8x8xf32>
    %81 = arith.mulf %79, %80 : vector<8x8xf32>
    %cst_43 = arith.constant dense<0.000000e+00> : vector<8x32xf32>
    %82 = tpu.matmul %19, %0, %cst_43 {dimension_numbers = #tpu.dot_dimension_numbers<[1], [0], [0], [1], [0, 0, 1, 1], [], []>} : vector<8x16xf32>, vector<16x32xf32>, vector<8x32xf32> -> vector<8x32xf32>
    %cst_44 = arith.constant dense<0.000000e+00> : vector<8x32xf32>
    %83 = tpu.matmul %81, %1, %cst_44 {dimension_numbers = #tpu.dot_dimension_numbers<[1], [0], [0], [1], [0, 0, 1, 1], [], []>} : vector<8x8xf32>, vector<8x32xf32>, vector<8x32xf32> -> vector<8x32xf32>
    %84 = arith.addf %82, %83 : vector<8x32xf32>
    %85 = vector.broadcast %2 : vector<1x32xf32> to vector<8x32xf32>
    %86 = arith.addf %84, %85 : vector<8x32xf32>
    %87 = vector.extract_strided_slice %86 {offsets = [0, 0], sizes = [8, 8], strides = [1, 1]} : vector<8x32xf32> to vector<8x8xf32>
    %88 = vector.extract_strided_slice %86 {offsets = [0, 8], sizes = [8, 8], strides = [1, 1]} : vector<8x32xf32> to vector<8x8xf32>
    %89 = vector.extract_strided_slice %86 {offsets = [0, 16], sizes = [8, 8], strides = [1, 1]} : vector<8x32xf32> to vector<8x8xf32>
    %90 = vector.extract_strided_slice %86 {offsets = [0, 24], sizes = [8, 8], strides = [1, 1]} : vector<8x32xf32> to vector<8x8xf32>
    %91 = arith.negf %88 : vector<8x8xf32>
    %92 = math.exp %91 : vector<8x8xf32>
    %cst_45 = arith.constant 1.000000e+00 : f32
    %93 = vector.broadcast %cst_45 : f32 to vector<8x8xf32>
    %94 = arith.addf %93, %92 : vector<8x8xf32>
    %95 = arith.divf %93, %94 : vector<8x8xf32>
    %96 = arith.mulf %95, %74 : vector<8x8xf32>
    %97 = arith.negf %87 : vector<8x8xf32>
    %98 = math.exp %97 : vector<8x8xf32>
    %cst_46 = arith.constant 1.000000e+00 : f32
    %99 = vector.broadcast %cst_46 : f32 to vector<8x8xf32>
    %100 = arith.addf %99, %98 : vector<8x8xf32>
    %101 = arith.divf %99, %100 : vector<8x8xf32>
    %102 = math.tanh %89 : vector<8x8xf32>
    %103 = arith.mulf %101, %102 : vector<8x8xf32>
    %104 = arith.addf %96, %103 : vector<8x8xf32>
    %105 = arith.negf %90 : vector<8x8xf32>
    %106 = math.exp %105 : vector<8x8xf32>
    %cst_47 = arith.constant 1.000000e+00 : f32
    %107 = vector.broadcast %cst_47 : f32 to vector<8x8xf32>
    %108 = arith.addf %107, %106 : vector<8x8xf32>
    %109 = arith.divf %107, %108 : vector<8x8xf32>
    %110 = math.tanh %104 : vector<8x8xf32>
    %111 = arith.mulf %109, %110 : vector<8x8xf32>
    %cst_48 = arith.constant dense<0.000000e+00> : vector<8x32xf32>
    %112 = tpu.matmul %21, %0, %cst_48 {dimension_numbers = #tpu.dot_dimension_numbers<[1], [0], [0], [1], [0, 0, 1, 1], [], []>} : vector<8x16xf32>, vector<16x32xf32>, vector<8x32xf32> -> vector<8x32xf32>
    %cst_49 = arith.constant dense<0.000000e+00> : vector<8x32xf32>
    %113 = tpu.matmul %111, %1, %cst_49 {dimension_numbers = #tpu.dot_dimension_numbers<[1], [0], [0], [1], [0, 0, 1, 1], [], []>} : vector<8x8xf32>, vector<8x32xf32>, vector<8x32xf32> -> vector<8x32xf32>
    %114 = arith.addf %112, %113 : vector<8x32xf32>
    %115 = vector.broadcast %2 : vector<1x32xf32> to vector<8x32xf32>
    %116 = arith.addf %114, %115 : vector<8x32xf32>
    %117 = vector.extract_strided_slice %116 {offsets = [0, 0], sizes = [8, 8], strides = [1, 1]} : vector<8x32xf32> to vector<8x8xf32>
    %118 = vector.extract_strided_slice %116 {offsets = [0, 8], sizes = [8, 8], strides = [1, 1]} : vector<8x32xf32> to vector<8x8xf32>
    %119 = vector.extract_strided_slice %116 {offsets = [0, 16], sizes = [8, 8], strides = [1, 1]} : vector<8x32xf32> to vector<8x8xf32>
    %120 = vector.extract_strided_slice %116 {offsets = [0, 24], sizes = [8, 8], strides = [1, 1]} : vector<8x32xf32> to vector<8x8xf32>
    %121 = arith.negf %118 : vector<8x8xf32>
    %122 = math.exp %121 : vector<8x8xf32>
    %cst_50 = arith.constant 1.000000e+00 : f32
    %123 = vector.broadcast %cst_50 : f32 to vector<8x8xf32>
    %124 = arith.addf %123, %122 : vector<8x8xf32>
    %125 = arith.divf %123, %124 : vector<8x8xf32>
    %126 = arith.mulf %125, %104 : vector<8x8xf32>
    %127 = arith.negf %117 : vector<8x8xf32>
    %128 = math.exp %127 : vector<8x8xf32>
    %cst_51 = arith.constant 1.000000e+00 : f32
    %129 = vector.broadcast %cst_51 : f32 to vector<8x8xf32>
    %130 = arith.addf %129, %128 : vector<8x8xf32>
    %131 = arith.divf %129, %130 : vector<8x8xf32>
    %132 = math.tanh %119 : vector<8x8xf32>
    %133 = arith.mulf %131, %132 : vector<8x8xf32>
    %134 = arith.addf %126, %133 : vector<8x8xf32>
    %135 = arith.negf %120 : vector<8x8xf32>
    %136 = math.exp %135 : vector<8x8xf32>
    %cst_52 = arith.constant 1.000000e+00 : f32
    %137 = vector.broadcast %cst_52 : f32 to vector<8x8xf32>
    %138 = arith.addf %137, %136 : vector<8x8xf32>
    %139 = arith.divf %137, %138 : vector<8x8xf32>
    %140 = math.tanh %134 : vector<8x8xf32>
    %141 = arith.mulf %139, %140 : vector<8x8xf32>
    %cst_53 = arith.constant dense<0.000000e+00> : vector<8x32xf32>
    %142 = tpu.matmul %21, %3, %cst_53 {dimension_numbers = #tpu.dot_dimension_numbers<[1], [0], [0], [1], [0, 0, 1, 1], [], []>} : vector<8x16xf32>, vector<16x32xf32>, vector<8x32xf32> -> vector<8x32xf32>
    %cst_54 = arith.constant dense<0.000000e+00> : vector<8x32xf32>
    %143 = tpu.matmul %13, %4, %cst_54 {dimension_numbers = #tpu.dot_dimension_numbers<[1], [0], [0], [1], [0, 0, 1, 1], [], []>} : vector<8x8xf32>, vector<8x32xf32>, vector<8x32xf32> -> vector<8x32xf32>
    %144 = arith.addf %142, %143 : vector<8x32xf32>
    %145 = vector.broadcast %5 : vector<1x32xf32> to vector<8x32xf32>
    %146 = arith.addf %144, %145 : vector<8x32xf32>
    %147 = vector.extract_strided_slice %146 {offsets = [0, 0], sizes = [8, 8], strides = [1, 1]} : vector<8x32xf32> to vector<8x8xf32>
    %148 = vector.extract_strided_slice %146 {offsets = [0, 8], sizes = [8, 8], strides = [1, 1]} : vector<8x32xf32> to vector<8x8xf32>
    %149 = vector.extract_strided_slice %146 {offsets = [0, 16], sizes = [8, 8], strides = [1, 1]} : vector<8x32xf32> to vector<8x8xf32>
    %150 = vector.extract_strided_slice %146 {offsets = [0, 24], sizes = [8, 8], strides = [1, 1]} : vector<8x32xf32> to vector<8x8xf32>
    %151 = arith.negf %148 : vector<8x8xf32>
    %152 = math.exp %151 : vector<8x8xf32>
    %cst_55 = arith.constant 1.000000e+00 : f32
    %153 = vector.broadcast %cst_55 : f32 to vector<8x8xf32>
    %154 = arith.addf %153, %152 : vector<8x8xf32>
    %155 = arith.divf %153, %154 : vector<8x8xf32>
    %156 = arith.mulf %155, %13 : vector<8x8xf32>
    %157 = arith.negf %147 : vector<8x8xf32>
    %158 = math.exp %157 : vector<8x8xf32>
    %cst_56 = arith.constant 1.000000e+00 : f32
    %159 = vector.broadcast %cst_56 : f32 to vector<8x8xf32>
    %160 = arith.addf %159, %158 : vector<8x8xf32>
    %161 = arith.divf %159, %160 : vector<8x8xf32>
    %162 = math.tanh %149 : vector<8x8xf32>
    %163 = arith.mulf %161, %162 : vector<8x8xf32>
    %164 = arith.addf %156, %163 : vector<8x8xf32>
    %165 = arith.negf %150 : vector<8x8xf32>
    %166 = math.exp %165 : vector<8x8xf32>
    %cst_57 = arith.constant 1.000000e+00 : f32
    %167 = vector.broadcast %cst_57 : f32 to vector<8x8xf32>
    %168 = arith.addf %167, %166 : vector<8x8xf32>
    %169 = arith.divf %167, %168 : vector<8x8xf32>
    %170 = math.tanh %164 : vector<8x8xf32>
    %171 = arith.mulf %169, %170 : vector<8x8xf32>
    %172 = tpu.concatenate %141, %171 in 1 : vector<8x8xf32>, vector<8x8xf32> -> vector<8x16xf32>
    %cst_58 = arith.constant dense<0.000000e+00> : vector<8x16xf32>
    %173 = tpu.matmul %172, %6, %cst_58 {dimension_numbers = #tpu.dot_dimension_numbers<[1], [0], [0], [1], [0, 0, 1, 1], [], []>} : vector<8x16xf32>, vector<16x16xf32>, vector<8x16xf32> -> vector<8x16xf32>
    %174 = vector.broadcast %7 : vector<1x16xf32> to vector<8x16xf32>
    %175 = arith.addf %173, %174 : vector<8x16xf32>
    %cst_59 = arith.constant dense<0.000000e+00> : vector<8xf32>
    %176 = vector.multi_reduction <add>, %175, %cst_59 [1] : vector<8x16xf32> to vector<8xf32>
    %177 = vector.shape_cast %176 : vector<8xf32> to vector<8x1xf32>
    %cst_60 = arith.constant 1.600000e+01 : f32
    %178 = vector.broadcast %cst_60 : f32 to vector<8x1xf32>
    %179 = arith.divf %177, %178 : vector<8x1xf32>
    %180 = vector.broadcast %179 : vector<8x1xf32> to vector<8x16xf32>
    %181 = arith.subf %175, %180 : vector<8x16xf32>
    %182 = arith.mulf %181, %181 : vector<8x16xf32>
    %cst_61 = arith.constant dense<0.000000e+00> : vector<8xf32>
    %183 = vector.multi_reduction <add>, %182, %cst_61 [1] : vector<8x16xf32> to vector<8xf32>
    %184 = vector.shape_cast %183 : vector<8xf32> to vector<8x1xf32>
    %cst_62 = arith.constant 1.600000e+01 : f32
    %185 = vector.broadcast %cst_62 : f32 to vector<8x1xf32>
    %186 = arith.divf %184, %185 : vector<8x1xf32>
    %187 = vector.broadcast %179 : vector<8x1xf32> to vector<8x16xf32>
    %188 = arith.subf %175, %187 : vector<8x16xf32>
    %cst_63 = arith.constant 9.99999974E-6 : f32
    %189 = vector.broadcast %cst_63 : f32 to vector<8x1xf32>
    %190 = arith.addf %186, %189 : vector<8x1xf32>
    %191 = math.rsqrt %190 : vector<8x1xf32>
    %192 = vector.broadcast %191 : vector<8x1xf32> to vector<8x16xf32>
    %193 = arith.mulf %188, %192 : vector<8x16xf32>
    %194 = vector.broadcast %8 : vector<1x16xf32> to vector<8x16xf32>
    %195 = arith.mulf %193, %194 : vector<8x16xf32>
    %196 = vector.broadcast %9 : vector<1x16xf32> to vector<8x16xf32>
    %197 = arith.addf %195, %196 : vector<8x16xf32>
    %198 = arith.addf %21, %197 : vector<8x16xf32>
    %cst_64 = arith.constant 0.000000e+00 : f32
    %199 = vector.broadcast %cst_64 : f32 to vector<8x16xf32>
    %200 = arith.cmpf oge, %198, %199 : vector<8x16xf32>
    %201 = vector.broadcast %12 : f32 to vector<8x16xf32>
    %202 = arith.mulf %201, %198 : vector<8x16xf32>
    %203 = arith.select %200, %198, %202 : vector<8x16xi1>, vector<8x16xf32>
    %cst_65 = arith.constant dense<0.000000e+00> : vector<8x16xf32>
    %204 = tpu.matmul %203, %10, %cst_65 {dimension_numbers = #tpu.dot_dimension_numbers<[1], [0], [0], [1], [0, 0, 1, 1], [], []>} : vector<8x16xf32>, vector<16x16xf32>, vector<8x16xf32> -> vector<8x16xf32>
    %205 = vector.broadcast %11 : vector<1x16xf32> to vector<8x16xf32>
    %206 = arith.addf %204, %205 : vector<8x16xf32>
    %c3_66 = arith.constant 3 : index
    %c0_67 = arith.constant 0 : index
    %c0_68 = arith.constant 0 : index
    %207 = vector.load %arg15[%c3_66, %c0_67, %c0_68] : memref<4x8x16xf32, #tpu.memory_space<vmem>>, vector<1x8x16xf32>
    %208 = vector.shape_cast %207 : vector<1x8x16xf32> to vector<8x16xf32>
    %209 = vector.shape_cast %206 : vector<8x16xf32> to vector<1x8x16xf32>
    tpu.vector_store %arg15[%c3_66, %c0_67, %c0_68], %209 {strides = array<i32>} : memref<4x8x16xf32, #tpu.memory_space<vmem>>, vector<1x8x16xf32>,
    %cst_69 = arith.constant dense<0.000000e+00> : vector<8x32xf32>
    %210 = tpu.matmul %19, %3, %cst_69 {dimension_numbers = #tpu.dot_dimension_numbers<[1], [0], [0], [1], [0, 0, 1, 1], [], []>} : vector<8x16xf32>, vector<16x32xf32>, vector<8x32xf32> -> vector<8x32xf32>
    %cst_70 = arith.constant dense<0.000000e+00> : vector<8x32xf32>
    %211 = tpu.matmul %171, %4, %cst_70 {dimension_numbers = #tpu.dot_dimension_numbers<[1], [0], [0], [1], [0, 0, 1, 1], [], []>} : vector<8x8xf32>, vector<8x32xf32>, vector<8x32xf32> -> vector<8x32xf32>
    %212 = arith.addf %210, %211 : vector<8x32xf32>
    %213 = vector.broadcast %5 : vector<1x32xf32> to vector<8x32xf32>
    %214 = arith.addf %212, %213 : vector<8x32xf32>
    %215 = vector.extract_strided_slice %214 {offsets = [0, 0], sizes = [8, 8], strides = [1, 1]} : vector<8x32xf32> to vector<8x8xf32>
    %216 = vector.extract_strided_slice %214 {offsets = [0, 8], sizes = [8, 8], strides = [1, 1]} : vector<8x32xf32> to vector<8x8xf32>
    %217 = vector.extract_strided_slice %214 {offsets = [0, 16], sizes = [8, 8], strides = [1, 1]} : vector<8x32xf32> to vector<8x8xf32>
    %218 = vector.extract_strided_slice %214 {offsets = [0, 24], sizes = [8, 8], strides = [1, 1]} : vector<8x32xf32> to vector<8x8xf32>
    %219 = arith.negf %216 : vector<8x8xf32>
    %220 = math.exp %219 : vector<8x8xf32>
    %cst_71 = arith.constant 1.000000e+00 : f32
    %221 = vector.broadcast %cst_71 : f32 to vector<8x8xf32>
    %222 = arith.addf %221, %220 : vector<8x8xf32>
    %223 = arith.divf %221, %222 : vector<8x8xf32>
    %224 = arith.mulf %223, %164 : vector<8x8xf32>
    %225 = arith.negf %215 : vector<8x8xf32>
    %226 = math.exp %225 : vector<8x8xf32>
    %cst_72 = arith.constant 1.000000e+00 : f32
    %227 = vector.broadcast %cst_72 : f32 to vector<8x8xf32>
    %228 = arith.addf %227, %226 : vector<8x8xf32>
    %229 = arith.divf %227, %228 : vector<8x8xf32>
    %230 = math.tanh %217 : vector<8x8xf32>
    %231 = arith.mulf %229, %230 : vector<8x8xf32>
    %232 = arith.addf %224, %231 : vector<8x8xf32>
    %233 = arith.negf %218 : vector<8x8xf32>
    %234 = math.exp %233 : vector<8x8xf32>
    %cst_73 = arith.constant 1.000000e+00 : f32
    %235 = vector.broadcast %cst_73 : f32 to vector<8x8xf32>
    %236 = arith.addf %235, %234 : vector<8x8xf32>
    %237 = arith.divf %235, %236 : vector<8x8xf32>
    %238 = math.tanh %232 : vector<8x8xf32>
    %239 = arith.mulf %237, %238 : vector<8x8xf32>
    %240 = tpu.concatenate %111, %239 in 1 : vector<8x8xf32>, vector<8x8xf32> -> vector<8x16xf32>
    %cst_74 = arith.constant dense<0.000000e+00> : vector<8x16xf32>
    %241 = tpu.matmul %240, %6, %cst_74 {dimension_numbers = #tpu.dot_dimension_numbers<[1], [0], [0], [1], [0, 0, 1, 1], [], []>} : vector<8x16xf32>, vector<16x16xf32>, vector<8x16xf32> -> vector<8x16xf32>
    %242 = vector.broadcast %7 : vector<1x16xf32> to vector<8x16xf32>
    %243 = arith.addf %241, %242 : vector<8x16xf32>
    %cst_75 = arith.constant dense<0.000000e+00> : vector<8xf32>
    %244 = vector.multi_reduction <add>, %243, %cst_75 [1] : vector<8x16xf32> to vector<8xf32>
    %245 = vector.shape_cast %244 : vector<8xf32> to vector<8x1xf32>
    %cst_76 = arith.constant 1.600000e+01 : f32
    %246 = vector.broadcast %cst_76 : f32 to vector<8x1xf32>
    %247 = arith.divf %245, %246 : vector<8x1xf32>
    %248 = vector.broadcast %247 : vector<8x1xf32> to vector<8x16xf32>
    %249 = arith.subf %243, %248 : vector<8x16xf32>
    %250 = arith.mulf %249, %249 : vector<8x16xf32>
    %cst_77 = arith.constant dense<0.000000e+00> : vector<8xf32>
    %251 = vector.multi_reduction <add>, %250, %cst_77 [1] : vector<8x16xf32> to vector<8xf32>
    %252 = vector.shape_cast %251 : vector<8xf32> to vector<8x1xf32>
    %cst_78 = arith.constant 1.600000e+01 : f32
    %253 = vector.broadcast %cst_78 : f32 to vector<8x1xf32>
    %254 = arith.divf %252, %253 : vector<8x1xf32>
    %255 = vector.broadcast %247 : vector<8x1xf32> to vector<8x16xf32>
    %256 = arith.subf %243, %255 : vector<8x16xf32>
    %cst_79 = arith.constant 9.99999974E-6 : f32
    %257 = vector.broadcast %cst_79 : f32 to vector<8x1xf32>
    %258 = arith.addf %254, %257 : vector<8x1xf32>
    %259 = math.rsqrt %258 : vector<8x1xf32>
    %260 = vector.broadcast %259 : vector<8x1xf32> to vector<8x16xf32>
    %261 = arith.mulf %256, %260 : vector<8x16xf32>
    %262 = vector.broadcast %8 : vector<1x16xf32> to vector<8x16xf32>
    %263 = arith.mulf %261, %262 : vector<8x16xf32>
    %264 = vector.broadcast %9 : vector<1x16xf32> to vector<8x16xf32>
    %265 = arith.addf %263, %264 : vector<8x16xf32>
    %266 = arith.addf %19, %265 : vector<8x16xf32>
    %cst_80 = arith.constant 0.000000e+00 : f32
    %267 = vector.broadcast %cst_80 : f32 to vector<8x16xf32>
    %268 = arith.cmpf oge, %266, %267 : vector<8x16xf32>
    %269 = vector.broadcast %12 : f32 to vector<8x16xf32>
    %270 = arith.mulf %269, %266 : vector<8x16xf32>
    %271 = arith.select %268, %266, %270 : vector<8x16xi1>, vector<8x16xf32>
    %cst_81 = arith.constant dense<0.000000e+00> : vector<8x16xf32>
    %272 = tpu.matmul %271, %10, %cst_81 {dimension_numbers = #tpu.dot_dimension_numbers<[1], [0], [0], [1], [0, 0, 1, 1], [], []>} : vector<8x16xf32>, vector<16x16xf32>, vector<8x16xf32> -> vector<8x16xf32>
    %273 = vector.broadcast %11 : vector<1x16xf32> to vector<8x16xf32>
    %274 = arith.addf %272, %273 : vector<8x16xf32>
    %c2_82 = arith.constant 2 : index
    %c0_83 = arith.constant 0 : index
    %c0_84 = arith.constant 0 : index
    %275 = vector.load %arg15[%c2_82, %c0_83, %c0_84] : memref<4x8x16xf32, #tpu.memory_space<vmem>>, vector<1x8x16xf32>
    %276 = vector.shape_cast %275 : vector<1x8x16xf32> to vector<8x16xf32>
    %277 = vector.shape_cast %274 : vector<8x16xf32> to vector<1x8x16xf32>
    tpu.vector_store %arg15[%c2_82, %c0_83, %c0_84], %277 {strides = array<i32>} : memref<4x8x16xf32, #tpu.memory_space<vmem>>, vector<1x8x16xf32>,
    %cst_85 = arith.constant dense<0.000000e+00> : vector<8x32xf32>
    %278 = tpu.matmul %17, %3, %cst_85 {dimension_numbers = #tpu.dot_dimension_numbers<[1], [0], [0], [1], [0, 0, 1, 1], [], []>} : vector<8x16xf32>, vector<16x32xf32>, vector<8x32xf32> -> vector<8x32xf32>
    %cst_86 = arith.constant dense<0.000000e+00> : vector<8x32xf32>
    %279 = tpu.matmul %239, %4, %cst_86 {dimension_numbers = #tpu.dot_dimension_numbers<[1], [0], [0], [1], [0, 0, 1, 1], [], []>} : vector<8x8xf32>, vector<8x32xf32>, vector<8x32xf32> -> vector<8x32xf32>
    %280 = arith.addf %278, %279 : vector<8x32xf32>
    %281 = vector.broadcast %5 : vector<1x32xf32> to vector<8x32xf32>
    %282 = arith.addf %280, %281 : vector<8x32xf32>
    %283 = vector.extract_strided_slice %282 {offsets = [0, 0], sizes = [8, 8], strides = [1, 1]} : vector<8x32xf32> to vector<8x8xf32>
    %284 = vector.extract_strided_slice %282 {offsets = [0, 8], sizes = [8, 8], strides = [1, 1]} : vector<8x32xf32> to vector<8x8xf32>
    %285 = vector.extract_strided_slice %282 {offsets = [0, 16], sizes = [8, 8], strides = [1, 1]} : vector<8x32xf32> to vector<8x8xf32>
    %286 = vector.extract_strided_slice %282 {offsets = [0, 24], sizes = [8, 8], strides = [1, 1]} : vector<8x32xf32> to vector<8x8xf32>
    %287 = arith.negf %284 : vector<8x8xf32>
    %288 = math.exp %287 : vector<8x8xf32>
    %cst_87 = arith.constant 1.000000e+00 : f32
    %289 = vector.broadcast %cst_87 : f32 to vector<8x8xf32>
    %290 = arith.addf %289, %288 : vector<8x8xf32>
    %291 = arith.divf %289, %290 : vector<8x8xf32>
    %292 = arith.mulf %291, %232 : vector<8x8xf32>
    %293 = arith.negf %283 : vector<8x8xf32>
    %294 = math.exp %293 : vector<8x8xf32>
    %cst_88 = arith.constant 1.000000e+00 : f32
    %295 = vector.broadcast %cst_88 : f32 to vector<8x8xf32>
    %296 = arith.addf %295, %294 : vector<8x8xf32>
    %297 = arith.divf %295, %296 : vector<8x8xf32>
    %298 = math.tanh %285 : vector<8x8xf32>
    %299 = arith.mulf %297, %298 : vector<8x8xf32>
    %300 = arith.addf %292, %299 : vector<8x8xf32>
    %301 = arith.negf %286 : vector<8x8xf32>
    %302 = math.exp %301 : vector<8x8xf32>
    %cst_89 = arith.constant 1.000000e+00 : f32
    %303 = vector.broadcast %cst_89 : f32 to vector<8x8xf32>
    %304 = arith.addf %303, %302 : vector<8x8xf32>
    %305 = arith.divf %303, %304 : vector<8x8xf32>
    %306 = math.tanh %300 : vector<8x8xf32>
    %307 = arith.mulf %305, %306 : vector<8x8xf32>
    %308 = tpu.concatenate %81, %307 in 1 : vector<8x8xf32>, vector<8x8xf32> -> vector<8x16xf32>
    %cst_90 = arith.constant dense<0.000000e+00> : vector<8x16xf32>
    %309 = tpu.matmul %308, %6, %cst_90 {dimension_numbers = #tpu.dot_dimension_numbers<[1], [0], [0], [1], [0, 0, 1, 1], [], []>} : vector<8x16xf32>, vector<16x16xf32>, vector<8x16xf32> -> vector<8x16xf32>
    %310 = vector.broadcast %7 : vector<1x16xf32> to vector<8x16xf32>
    %311 = arith.addf %309, %310 : vector<8x16xf32>
    %cst_91 = arith.constant dense<0.000000e+00> : vector<8xf32>
    %312 = vector.multi_reduction <add>, %311, %cst_91 [1] : vector<8x16xf32> to vector<8xf32>
    %313 = vector.shape_cast %312 : vector<8xf32> to vector<8x1xf32>
    %cst_92 = arith.constant 1.600000e+01 : f32
    %314 = vector.broadcast %cst_92 : f32 to vector<8x1xf32>
    %315 = arith.divf %313, %314 : vector<8x1xf32>
    %316 = vector.broadcast %315 : vector<8x1xf32> to vector<8x16xf32>
    %317 = arith.subf %311, %316 : vector<8x16xf32>
    %318 = arith.mulf %317, %317 : vector<8x16xf32>
    %cst_93 = arith.constant dense<0.000000e+00> : vector<8xf32>
    %319 = vector.multi_reduction <add>, %318, %cst_93 [1] : vector<8x16xf32> to vector<8xf32>
    %320 = vector.shape_cast %319 : vector<8xf32> to vector<8x1xf32>
    %cst_94 = arith.constant 1.600000e+01 : f32
    %321 = vector.broadcast %cst_94 : f32 to vector<8x1xf32>
    %322 = arith.divf %320, %321 : vector<8x1xf32>
    %323 = vector.broadcast %315 : vector<8x1xf32> to vector<8x16xf32>
    %324 = arith.subf %311, %323 : vector<8x16xf32>
    %cst_95 = arith.constant 9.99999974E-6 : f32
    %325 = vector.broadcast %cst_95 : f32 to vector<8x1xf32>
    %326 = arith.addf %322, %325 : vector<8x1xf32>
    %327 = math.rsqrt %326 : vector<8x1xf32>
    %328 = vector.broadcast %327 : vector<8x1xf32> to vector<8x16xf32>
    %329 = arith.mulf %324, %328 : vector<8x16xf32>
    %330 = vector.broadcast %8 : vector<1x16xf32> to vector<8x16xf32>
    %331 = arith.mulf %329, %330 : vector<8x16xf32>
    %332 = vector.broadcast %9 : vector<1x16xf32> to vector<8x16xf32>
    %333 = arith.addf %331, %332 : vector<8x16xf32>
    %334 = arith.addf %17, %333 : vector<8x16xf32>
    %cst_96 = arith.constant 0.000000e+00 : f32
    %335 = vector.broadcast %cst_96 : f32 to vector<8x16xf32>
    %336 = arith.cmpf oge, %334, %335 : vector<8x16xf32>
    %337 = vector.broadcast %12 : f32 to vector<8x16xf32>
    %338 = arith.mulf %337, %334 : vector<8x16xf32>
    %339 = arith.select %336, %334, %338 : vector<8x16xi1>, vector<8x16xf32>
    %cst_97 = arith.constant dense<0.000000e+00> : vector<8x16xf32>
    %340 = tpu.matmul %339, %10, %cst_97 {dimension_numbers = #tpu.dot_dimension_numbers<[1], [0], [0], [1], [0, 0, 1, 1], [], []>} : vector<8x16xf32>, vector<16x16xf32>, vector<8x16xf32> -> vector<8x16xf32>
    %341 = vector.broadcast %11 : vector<1x16xf32> to vector<8x16xf32>
    %342 = arith.addf %340, %341 : vector<8x16xf32>
    %c1_98 = arith.constant 1 : index
    %c0_99 = arith.constant 0 : index
    %c0_100 = arith.constant 0 : index
    %343 = vector.load %arg15[%c1_98, %c0_99, %c0_100] : memref<4x8x16xf32, #tpu.memory_space<vmem>>, vector<1x8x16xf32>
    %344 = vector.shape_cast %343 : vector<1x8x16xf32> to vector<8x16xf32>
    %345 = vector.shape_cast %342 : vector<8x16xf32> to vector<1x8x16xf32>
    tpu.vector_store %arg15[%c1_98, %c0_99, %c0_100], %345 {strides = array<i32>} : memref<4x8x16xf32, #tpu.memory_space<vmem>>, vector<1x8x16xf32>,
    %cst_101 = arith.constant dense<0.000000e+00> : vector<8x32xf32>
    %346 = tpu.matmul %15, %3, %cst_101 {dimension_numbers = #tpu.dot_dimension_numbers<[1], [0], [0], [1], [0, 0, 1, 1], [], []>} : vector<8x16xf32>, vector<16x32xf32>, vector<8x32xf32> -> vector<8x32xf32>
    %cst_102 = arith.constant dense<0.000000e+00> : vector<8x32xf32>
    %347 = tpu.matmul %307, %4, %cst_102 {dimension_numbers = #tpu.dot_dimension_numbers<[1], [0], [0], [1], [0, 0, 1, 1], [], []>} : vector<8x8xf32>, vector<8x32xf32>, vector<8x32xf32> -> vector<8x32xf32>
    %348 = arith.addf %346, %347 : vector<8x32xf32>
    %349 = vector.broadcast %5 : vector<1x32xf32> to vector<8x32xf32>
    %350 = arith.addf %348, %349 : vector<8x32xf32>
    %351 = vector.extract_strided_slice %350 {offsets = [0, 0], sizes = [8, 8], strides = [1, 1]} : vector<8x32xf32> to vector<8x8xf32>
    %352 = vector.extract_strided_slice %350 {offsets = [0, 8], sizes = [8, 8], strides = [1, 1]} : vector<8x32xf32> to vector<8x8xf32>
    %353 = vector.extract_strided_slice %350 {offsets = [0, 16], sizes = [8, 8], strides = [1, 1]} : vector<8x32xf32> to vector<8x8xf32>
    %354 = vector.extract_strided_slice %350 {offsets = [0, 24], sizes = [8, 8], strides = [1, 1]} : vector<8x32xf32> to vector<8x8xf32>
    %355 = arith.negf %352 : vector<8x8xf32>
    %356 = math.exp %355 : vector<8x8xf32>
    %cst_103 = arith.constant 1.000000e+00 : f32
    %357 = vector.broadcast %cst_103 : f32 to vector<8x8xf32>
    %358 = arith.addf %357, %356 : vector<8x8xf32>
    %359 = arith.divf %357, %358 : vector<8x8xf32>
    %360 = arith.mulf %359, %300 : vector<8x8xf32>
    %361 = arith.negf %351 : vector<8x8xf32>
    %362 = math.exp %361 : vector<8x8xf32>
    %cst_104 = arith.constant 1.000000e+00 : f32
    %363 = vector.broadcast %cst_104 : f32 to vector<8x8xf32>
    %364 = arith.addf %363, %362 : vector<8x8xf32>
    %365 = arith.divf %363, %364 : vector<8x8xf32>
    %366 = math.tanh %353 : vector<8x8xf32>
    %367 = arith.mulf %365, %366 : vector<8x8xf32>
    %368 = arith.addf %360, %367 : vector<8x8xf32>
    %369 = arith.negf %354 : vector<8x8xf32>
    %370 = math.exp %369 : vector<8x8xf32>
    %cst_105 = arith.constant 1.000000e+00 : f32
    %371 = vector.broadcast %cst_105 : f32 to vector<8x8xf32>
    %372 = arith.addf %371, %370 : vector<8x8xf32>
    %373 = arith.divf %371, %372 : vector<8x8xf32>
    %374 = math.tanh %368 : vector<8x8xf32>
    %375 = arith.mulf %373, %374 : vector<8x8xf32>
    %376 = tpu.concatenate %51, %375 in 1 : vector<8x8xf32>, vector<8x8xf32> -> vector<8x16xf32>
    %cst_106 = arith.constant dense<0.000000e+00> : vector<8x16xf32>
    %377 = tpu.matmul %376, %6, %cst_106 {dimension_numbers = #tpu.dot_dimension_numbers<[1], [0], [0], [1], [0, 0, 1, 1], [], []>} : vector<8x16xf32>, vector<16x16xf32>, vector<8x16xf32> -> vector<8x16xf32>
    %378 = vector.broadcast %7 : vector<1x16xf32> to vector<8x16xf32>
    %379 = arith.addf %377, %378 : vector<8x16xf32>
    %cst_107 = arith.constant dense<0.000000e+00> : vector<8xf32>
    %380 = vector.multi_reduction <add>, %379, %cst_107 [1] : vector<8x16xf32> to vector<8xf32>
    %381 = vector.shape_cast %380 : vector<8xf32> to vector<8x1xf32>
    %cst_108 = arith.constant 1.600000e+01 : f32
    %382 = vector.broadcast %cst_108 : f32 to vector<8x1xf32>
    %383 = arith.divf %381, %382 : vector<8x1xf32>
    %384 = vector.broadcast %383 : vector<8x1xf32> to vector<8x16xf32>
    %385 = arith.subf %379, %384 : vector<8x16xf32>
    %386 = arith.mulf %385, %385 : vector<8x16xf32>
    %cst_109 = arith.constant dense<0.000000e+00> : vector<8xf32>
    %387 = vector.multi_reduction <add>, %386, %cst_109 [1] : vector<8x16xf32> to vector<8xf32>
    %388 = vector.shape_cast %387 : vector<8xf32> to vector<8x1xf32>
    %cst_110 = arith.constant 1.600000e+01 : f32
    %389 = vector.broadcast %cst_110 : f32 to vector<8x1xf32>
    %390 = arith.divf %388, %389 : vector<8x1xf32>
    %391 = vector.broadcast %383 : vector<8x1xf32> to vector<8x16xf32>
    %392 = arith.subf %379, %391 : vector<8x16xf32>
    %cst_111 = arith.constant 9.99999974E-6 : f32
    %393 = vector.broadcast %cst_111 : f32 to vector<8x1xf32>
    %394 = arith.addf %390, %393 : vector<8x1xf32>
    %395 = math.rsqrt %394 : vector<8x1xf32>
    %396 = vector.broadcast %395 : vector<8x1xf32> to vector<8x16xf32>
    %397 = arith.mulf %392, %396 : vector<8x16xf32>
    %398 = vector.broadcast %8 : vector<1x16xf32> to vector<8x16xf32>
    %399 = arith.mulf %397, %398 : vector<8x16xf32>
    %400 = vector.broadcast %9 : vector<1x16xf32> to vector<8x16xf32>
    %401 = arith.addf %399, %400 : vector<8x16xf32>
    %402 = arith.addf %15, %401 : vector<8x16xf32>
    %cst_112 = arith.constant 0.000000e+00 : f32
    %403 = vector.broadcast %cst_112 : f32 to vector<8x16xf32>
    %404 = arith.cmpf oge, %402, %403 : vector<8x16xf32>
    %405 = vector.broadcast %12 : f32 to vector<8x16xf32>
    %406 = arith.mulf %405, %402 : vector<8x16xf32>
    %407 = arith.select %404, %402, %406 : vector<8x16xi1>, vector<8x16xf32>
    %cst_113 = arith.constant dense<0.000000e+00> : vector<8x16xf32>
    %408 = tpu.matmul %407, %10, %cst_113 {dimension_numbers = #tpu.dot_dimension_numbers<[1], [0], [0], [1], [0, 0, 1, 1], [], []>} : vector<8x16xf32>, vector<16x16xf32>, vector<8x16xf32> -> vector<8x16xf32>
    %409 = vector.broadcast %11 : vector<1x16xf32> to vector<8x16xf32>
    %410 = arith.addf %408, %409 : vector<8x16xf32>
    %c0_114 = arith.constant 0 : index
    %c0_115 = arith.constant 0 : index
    %c0_116 = arith.constant 0 : index
    %411 = vector.load %arg15[%c0_114, %c0_115, %c0_116] : memref<4x8x16xf32, #tpu.memory_space<vmem>>, vector<1x8x16xf32>
    %412 = vector.shape_cast %411 : vector<1x8x16xf32> to vector<8x16xf32>
    %413 = vector.shape_cast %410 : vector<8x16xf32> to vector<1x8x16xf32>
    tpu.vector_store %arg15[%c0_114, %c0_115, %c0_116], %413 {strides = array<i32>} : memref<4x8x16xf32, #tpu.memory_space<vmem>>, vector<1x8x16xf32>,
    return
  }
  func.func @transform_0(%arg0: i32) -> (i32, i32, i32) {
    %c0_i32 = arith.constant 0 : i32
    %c0_i32_0 = arith.constant 0 : i32
    %c0_i32_1 = arith.constant 0 : i32
    %c0_i32_2 = arith.constant 0 : i32
    return %c0_i32, %c0_i32_0, %c0_i32_1 : i32, i32, i32
  }
  func.func @transform_1(%arg0: i32) -> (i32, i32) {
    %c0_i32 = arith.constant 0 : i32
    %c0_i32_0 = arith.constant 0 : i32
    %c0_i32_1 = arith.constant 0 : i32
    return %c0_i32, %c0_i32_0 : i32, i32
  }
  func.func @transform_2(%arg0: i32) -> (i32, i32) {
    %c0_i32 = arith.constant 0 : i32
    %c0_i32_0 = arith.constant 0 : i32
    %c0_i32_1 = arith.constant 0 : i32
    return %c0_i32, %c0_i32_0 : i32, i32
  }
  func.func @transform_3(%arg0: i32) -> (i32, i32) {
    %c0_i32 = arith.constant 0 : i32
    %c0_i32_0 = arith.constant 0 : i32
    %c0_i32_1 = arith.constant 0 : i32
    return %c0_i32, %c0_i32_0 : i32, i32
  }
  func.func @transform_4(%arg0: i32) -> (i32, i32) {
    %c0_i32 = arith.constant 0 : i32
    %c0_i32_0 = arith.constant 0 : i32
    %c0_i32_1 = arith.constant 0 : i32
    return %c0_i32, %c0_i32_0 : i32, i32
  }
  func.func @transform_5(%arg0: i32) -> (i32, i32) {
    %c0_i32 = arith.constant 0 : i32
    %c0_i32_0 = arith.constant 0 : i32
    %c0_i32_1 = arith.constant 0 : i32
    return %c0_i32, %c0_i32_0 : i32, i32
  }
  func.func @transform_6(%arg0: i32) -> (i32, i32) {
    %c0_i32 = arith.constant 0 : i32
    %c0_i32_0 = arith.constant 0 : i32
    %c0_i32_1 = arith.constant 0 : i32
    return %c0_i32, %c0_i32_0 : i32, i32
  }
  func.func @transform_7(%arg0: i32) -> (i32, i32) {
    %c0_i32 = arith.constant 0 : i32
    %c0_i32_0 = arith.constant 0 : i32
    %c0_i32_1 = arith.constant 0 : i32
    return %c0_i32, %c0_i32_0 : i32, i32
  }
  func.func @transform_8(%arg0: i32) -> (i32, i32) {
    %c0_i32 = arith.constant 0 : i32
    %c0_i32_0 = arith.constant 0 : i32
    %c0_i32_1 = arith.constant 0 : i32
    return %c0_i32, %c0_i32_0 : i32, i32
  }
  func.func @transform_9(%arg0: i32) -> (i32, i32) {
    %c0_i32 = arith.constant 0 : i32
    %c0_i32_0 = arith.constant 0 : i32
    %c0_i32_1 = arith.constant 0 : i32
    return %c0_i32, %c0_i32_0 : i32, i32
  }
  func.func @transform_10(%arg0: i32) -> (i32, i32) {
    %c0_i32 = arith.constant 0 : i32
    %c0_i32_0 = arith.constant 0 : i32
    %c0_i32_1 = arith.constant 0 : i32
    return %c0_i32, %c0_i32_0 : i32, i32
  }
  func.func @transform_11(%arg0: i32) -> (i32, i32) {
    %c0_i32 = arith.constant 0 : i32
    %c0_i32_0 = arith.constant 0 : i32
    %c0_i32_1 = arith.constant 0 : i32
    return %c0_i32, %c0_i32_0 : i32, i32
  }
  func.func @transform_12(%arg0: i32) -> (i32, i32) {
    %c0_i32 = arith.constant 0 : i32
    %c0_i32_0 = arith.constant 0 : i32
    %c0_i32_1 = arith.constant 0 : i32
    return %c0_i32, %c0_i32_0 : i32, i32
  }
  func.func @transform_13(%arg0: i32) -> i32 {
    %c0_i32 = arith.constant 0 : i32
    %c0_i32_0 = arith.constant 0 : i32
    return %c0_i32 : i32
  }
  func.func @transform_14(%arg0: i32) -> (i32, i32, i32) {
    %c0_i32 = arith.constant 0 : i32
    %c0_i32_0 = arith.constant 0 : i32
    %c0_i32_1 = arith.constant 0 : i32
    %c0_i32_2 = arith.constant 0 : i32
    return %c0_i32, %c0_i32_0, %c0_i32_1 : i32, i32, i32
  }
}

module attributes {stable_mosaic.version = 11 : i64} {
  func.func @_mask_decode_kernel(%arg0: i32, %arg1: memref<17x16xf32, #tpu.memory_space<vmem>>, %arg2: memref<16x16xf32, #tpu.memory_space<vmem>>, %arg3: memref<1x16xf32, #tpu.memory_space<vmem>>, %arg4: memref<17x16xf32, #tpu.memory_space<vmem>>, %arg5: memref<16x20xf32, #tpu.memory_space<vmem>>, %arg6: memref<18x10xf32, #tpu.memory_space<vmem>>) attributes {dimension_semantics = [#tpu.dimension_semantics<arbitrary>], iteration_bounds = array<i64: 1>, scalar_prefetch = 0 : i64, scratch_operands = 0 : i64, tpu.core_type = #tpu.core_type<tc>, window_params = [{pipeline_mode = #tpu.pipeline_mode<synchronous>, transform_indices = @transform_0, window_bounds = array<i64: 17, 16>}, {pipeline_mode = #tpu.pipeline_mode<synchronous>, transform_indices = @transform_1, window_bounds = array<i64: 16, 16>}, {pipeline_mode = #tpu.pipeline_mode<synchronous>, transform_indices = @transform_2, window_bounds = array<i64: 1, 16>}, {pipeline_mode = #tpu.pipeline_mode<synchronous>, transform_indices = @transform_3, window_bounds = array<i64: 17, 16>}, {pipeline_mode = #tpu.pipeline_mode<synchronous>, transform_indices = @transform_4, window_bounds = array<i64: 16, 20>}, {pipeline_mode = #tpu.pipeline_mode<synchronous>, transform_indices = @transform_5, window_bounds = array<i64: 18, 10>}]} {
    %c0 = arith.constant 0 : index
    %c0_0 = arith.constant 0 : index
    %0 = vector.load %arg1[%c0, %c0_0] : memref<17x16xf32, #tpu.memory_space<vmem>>, vector<17x16xf32>
    %c0_1 = arith.constant 0 : index
    %c0_2 = arith.constant 0 : index
    %1 = vector.load %arg2[%c0_1, %c0_2] : memref<16x16xf32, #tpu.memory_space<vmem>>, vector<16x16xf32>
    %cst = arith.constant dense<0.000000e+00> : vector<17x16xf32>
    %2 = tpu.matmul %0, %1, %cst {dimension_numbers = #tpu.dot_dimension_numbers<[1], [0], [0], [1], [0, 0, 1, 1], [], []>} : vector<17x16xf32>, vector<16x16xf32>, vector<17x16xf32> -> vector<17x16xf32>
    %c0_3 = arith.constant 0 : index
    %c0_4 = arith.constant 0 : index
    %3 = vector.load %arg3[%c0_3, %c0_4] : memref<1x16xf32, #tpu.memory_space<vmem>>, vector<1x16xf32>
    %4 = vector.broadcast %3 : vector<1x16xf32> to vector<17x16xf32>
    %5 = arith.addf %2, %4 : vector<17x16xf32>
    %cst_5 = arith.constant 0.000000e+00 : f32
    %6 = vector.broadcast %cst_5 : f32 to vector<17x16xf32>
    %7 = arith.maximumf %5, %6 : vector<17x16xf32>
    %c0_6 = arith.constant 0 : index
    %c0_7 = arith.constant 0 : index
    %8 = vector.load %arg4[%c0_6, %c0_7] : memref<17x16xf32, #tpu.memory_space<vmem>>, vector<17x16xf32>
    %9 = arith.mulf %8, %7 : vector<17x16xf32>
    %c0_8 = arith.constant 0 : index
    %c0_9 = arith.constant 0 : index
    %10 = vector.load %arg5[%c0_8, %c0_9] : memref<16x20xf32, #tpu.memory_space<vmem>>, vector<16x20xf32>
    %cst_10 = arith.constant dense<0.000000e+00> : vector<17x20xf32>
    %11 = tpu.matmul %9, %10, %cst_10 {dimension_numbers = #tpu.dot_dimension_numbers<[1], [0], [0], [1], [0, 0, 1, 1], [], []>} : vector<17x16xf32>, vector<16x20xf32>, vector<17x20xf32> -> vector<17x20xf32>
    %12 = vector.extract_strided_slice %11 {offsets = [0, 0], sizes = [17, 10], strides = [1, 1]} : vector<17x20xf32> to vector<17x10xf32>
    %13 = vector.extract_strided_slice %11 {offsets = [0, 10], sizes = [17, 10], strides = [1, 1]} : vector<17x20xf32> to vector<17x10xf32>
    %14 = vector.extract_strided_slice %12 {offsets = [0, 0], sizes = [1, 10], strides = [1, 1]} : vector<17x10xf32> to vector<1x10xf32>
    %15 = vector.extract_strided_slice %12 {offsets = [1, 0], sizes = [16, 10], strides = [1, 1]} : vector<17x10xf32> to vector<16x10xf32>
    %16 = vector.extract_strided_slice %13 {offsets = [0, 0], sizes = [16, 10], strides = [1, 1]} : vector<17x10xf32> to vector<16x10xf32>
    %17 = arith.addf %15, %16 : vector<16x10xf32>
    %18 = vector.extract_strided_slice %13 {offsets = [16, 0], sizes = [1, 10], strides = [1, 1]} : vector<17x10xf32> to vector<1x10xf32>
    %19 = tpu.concatenate %14, %17, %18 in 0 : vector<1x10xf32>, vector<16x10xf32>, vector<1x10xf32> -> vector<18x10xf32>
    %c0_11 = arith.constant 0 : index
    %c0_12 = arith.constant 0 : index
    %20 = vector.load %arg6[%c0_11, %c0_12] : memref<18x10xf32, #tpu.memory_space<vmem>>, vector<18x10xf32>
    tpu.vector_store %arg6[%c0_11, %c0_12], %19 {strides = array<i32>} : memref<18x10xf32, #tpu.memory_space<vmem>>, vector<18x10xf32>,
    return
  }
  func.func @transform_0(%arg0: i32) -> (i32, i32) {
    %c0_i32 = arith.constant 0 : i32
    %c0_i32_0 = arith.constant 0 : i32
    %c0_i32_1 = arith.constant 0 : i32
    return %c0_i32, %c0_i32_0 : i32, i32
  }
  func.func @transform_1(%arg0: i32) -> (i32, i32) {
    %c0_i32 = arith.constant 0 : i32
    %c0_i32_0 = arith.constant 0 : i32
    %c0_i32_1 = arith.constant 0 : i32
    return %c0_i32, %c0_i32_0 : i32, i32
  }
  func.func @transform_2(%arg0: i32) -> (i32, i32) {
    %c0_i32 = arith.constant 0 : i32
    %c0_i32_0 = arith.constant 0 : i32
    %c0_i32_1 = arith.constant 0 : i32
    return %c0_i32, %c0_i32_0 : i32, i32
  }
  func.func @transform_3(%arg0: i32) -> (i32, i32) {
    %c0_i32 = arith.constant 0 : i32
    %c0_i32_0 = arith.constant 0 : i32
    %c0_i32_1 = arith.constant 0 : i32
    return %c0_i32, %c0_i32_0 : i32, i32
  }
  func.func @transform_4(%arg0: i32) -> (i32, i32) {
    %c0_i32 = arith.constant 0 : i32
    %c0_i32_0 = arith.constant 0 : i32
    %c0_i32_1 = arith.constant 0 : i32
    return %c0_i32, %c0_i32_0 : i32, i32
  }
  func.func @transform_5(%arg0: i32) -> (i32, i32) {
    %c0_i32 = arith.constant 0 : i32
    %c0_i32_0 = arith.constant 0 : i32
    %c0_i32_1 = arith.constant 0 : i32
    return %c0_i32, %c0_i32_0 : i32, i32
  }
}

</mosaic_0001>

<bundles_post_ra>
// kernel: squeeze.4
= control target key start
LH: loop header
LB: loop body
LE: loop exit
PB: predicated region body
PF: predicated region fallthrough
CT: control target
= control target key end

     0   :  { %vm183_vm0 = vcmask 982016   ;;  %s266_s8 = smov 126   ;;  %vm197_vm1 = vcmask 998400   ;;  %s267_s9 = smov 8   ;;  %vm7_vm2 = vcmask 80896   ;;  %vm187_vm3 = vcmask 64512   ;;  %s426_s0 = inlined_call_operand.vmem [shape: f32[290], index: 0, kind: input, shape index: {}]   ;;  %s427_s1 = inlined_call_operand.vmem [shape: f32[29,10], index: 1, kind: output, shape index: {}]  }
   0x1   :  { %v4_v0 = vld [vmem:[%s426_s0] sm:$0xf]  ;;  %s265_s0 = smov 118   ;;  %s268_s10 = smov 124   ;;  %vm190_vm4 = vcmask 80960   ;;  %vm201_vm5 = vcmask 48128  }
   0x2   :  { %5 = vst [vmem:[#allocation0] sm:$0xf] %v4_v0  ;;  %s269_s11 = smov 6   ;;  %s270_s12 = smov 116   ;;  %vm204_vm6 = vcmask 80944  }
   0x3   :  { %s271_s13 = smov 114   ;;  %s272_s14 = smov 108  }
   0x4   :  { %s273_s15 = smov 106   ;;  %s274_s16 = smov 104  }
   0x5   :  { %s275_s17 = smov 98   ;;  %s276_s18 = smov 96  }
   0x6   :  { %s277_s19 = smov 88   ;;  %s278_s20 = smov 86  }
   0x7   :  { %s279_s21 = smov 78   ;;  %s280_s22 = smov 76  }
   0x8   :  { %s281_s23 = smov 68   ;;  %s282_s24 = smov 66  }
   0x9   :  { %v23_v1 = vld [vmem:[#allocation0] sm:$0x1]   ;;  %v10_v2 = vld [vmem:[#allocation0 + $0x1] sm:$0x1]   ;;  %v17_v6 = vld [vmem:[#allocation0 + $0x2] sm:$0x1]  }
   0xa   :  { %v180_v3 = vld [vmem:[#allocation0] sm:$0x1]   ;;  %24 = vrot.lane.b32.xlu0 %v23_v1, %s265_s0  ;;  %11 = vrot.lane.b32.xlu1 %v10_v2, %s266_s8  ;;  %v182_v4 = vld [vmem:[#allocation0 + $0x1] sm:$0x1]   ;;  %v196_v8 = vld [vmem:[#allocation0 + $0x2] sm:$0x1]  }
   0xb   :  { %v184_v5 = vsel %vm183_vm0, %v182_v4, %v180_v3  ;;  %v194_v7 = vld [vmem:[#allocation0 + $0x1] sm:$0x1]   ;;  %v37_v11 = vld [vmem:[#allocation0 + $0x2] sm:$0x1]   ;;  %v43_v12 = vld [vmem:[#allocation0] sm:$0x1]  }
   0xc   :  { %v198_v9 = vsel %vm197_vm1, %v196_v8, %v194_v7  ;;  %v30_v10 = vld [vmem:[#allocation0 + $0x1] sm:$0x1]   ;;  %v57_v14 = vld [vmem:[#allocation0 + $0x2] sm:$0x1]   ;;  %v63_v15 = vld [vmem:[#allocation0] sm:$0x1]  }
   0xd   :  { %v50_v13 = vld [vmem:[#allocation0 + $0x1] sm:$0x1]   ;;  %v76_v17 = vld [vmem:[#allocation0] sm:$0x1]   ;;  %s283_s25 = smov 58   ;;  %s284_s26 = smov 56  }
   0xe   :  { %185 = vrot.lane.b32.xlu0 %v184_v5, %s267_s9  ;;  %18 = vrot.lane.b32.xlu1 %v17_v6, %s268_s10  ;;  %v70_v16 = vld [vmem:[#allocation0 + $0x1] sm:$0x1]   ;;  %v89_v19 = vld [vmem:[#allocation0] sm:$0x1]   ;;  %s285_s29 = smov 48   ;;  %s286_s30 = smov 46  }
   0xf   :  { %v83_v18 = vld [vmem:[#allocation0 + $0x1] sm:$0x1]   ;;  %v102_v21 = vld [vmem:[#allocation0] sm:$0x1]   ;;  %s287_s2 = smov 38   ;;  %s288_s3 = smov 36  }
  0x10   :  { %v96_v20 = vld [vmem:[#allocation0 + $0x1] sm:$0x1]   ;;  %v115_v23 = vld [vmem:[#allocation0] sm:$0x1]   ;;  %s289_s4 = smov 28   ;;  %s290_s5 = smov 26  }
  0x11   :  { %v109_v22 = vld [vmem:[#allocation0 + $0x1] sm:$0x1]   ;;  %v128_v25 = vld [vmem:[#allocation0] sm:$0x1]   ;;  %s291_s6 = smov 18   ;;  %s292_s7 = smov 16  }
  0x12   :  { %199 = vrot.lane.b32.xlu0 %v198_v9, %s269_s11  ;;  %31 = vrot.lane.b32.xlu1 %v30_v10, %s270_s12  ;;  %v122_v24 = vld [vmem:[#allocation0 + $0x1] sm:$0x1]   ;;  %v6_v27 = vld [vmem:[#allocation0] sm:$0x1]  }
  0x13   :  { %v135_v26 = vld [vmem:[#allocation0 + $0x1] sm:$0x1]   ;;  %8 = vst.msk [vmem:[%s427_s1] sm:$0x1] %vm7_vm2, %v6_v27   ;;  %v141_v28 = vld [vmem:[#allocation0] sm:$0x1]  }
  0x14   :  { %v148_v29 = vld [vmem:[#allocation0 + $0x1] sm:$0x1]   ;;  %v154_v30 = vld [vmem:[#allocation0] sm:$0x1]  }
  0x15   :  { %v161_v31 = vld [vmem:[#allocation0 + $0x1] sm:$0x1]   ;;  %v167_v32 = vld [vmem:[#allocation0] sm:$0x1]  }
  0x16   :  { %38 = vrot.lane.b32.xlu0 %v37_v11, %s271_s13  ;;  %44 = vrot.lane.b32.xlu1 %v43_v12, %s272_s14  ;;  %v174_v33 = vld [vmem:[#allocation0 + $0x1] sm:$0x1]  }
  0x1a   :  { %51 = vrot.lane.b32.xlu0 %v50_v13, %s273_s15  ;;  %58 = vrot.lane.b32.xlu1 %v57_v14, %s274_s16 }
  0x1e   :  { %64 = vrot.lane.b32.xlu0 %v63_v15, %s275_s17  ;;  %71 = vrot.lane.b32.xlu1 %v70_v16, %s276_s18 }
  0x22   :  { %77 = vrot.lane.b32.xlu0 %v76_v17, %s277_s19  ;;  %84 = vrot.lane.b32.xlu1 %v83_v18, %s278_s20 }
  0x26   :  { %90 = vrot.lane.b32.xlu0 %v89_v19, %s279_s21  ;;  %97 = vrot.lane.b32.xlu1 %v96_v20, %s280_s22 }
  0x2a   :  { %103 = vrot.lane.b32.xlu0 %v102_v21, %s281_s23  ;;  %110 = vrot.lane.b32.xlu1 %v109_v22, %s282_s24 }
  0x2e   :  { %116 = vrot.lane.b32.xlu0 %v115_v23, %s283_s25  ;;  %123 = vrot.lane.b32.xlu1 %v122_v24, %s284_s26 }
  0x32   :  { %129 = vrot.lane.b32.xlu0 %v128_v25, %s285_s29  ;;  %136 = vrot.lane.b32.xlu1 %v135_v26, %s286_s30 }
  0x36   :  { %142 = vrot.lane.b32.xlu0 %v141_v28, %s287_s2  ;;  %149 = vrot.lane.b32.xlu1 %v148_v29, %s288_s3 }
  0x3a   :  { %155 = vrot.lane.b32.xlu0 %v154_v30, %s289_s4  ;;  %162 = vrot.lane.b32.xlu1 %v161_v31, %s290_s5 }
  0x3e   :  { %168 = vrot.lane.b32.xlu0 %v167_v32, %s291_s6  ;;  %175 = vrot.lane.b32.xlu1 %v174_v33, %s292_s7 }
  0x7c   :  { %v25_v34 = vpop.permute.xlu0 %24   ;;  %v12_v35 = vpop.permute.xlu1 %11  }
  0x7d   :  { %209 = vst.msk [vmem:[%s427_s1 + $0x1] sm:$0x1] %vm7_vm2, %v25_v34   ;;  %207 = vst.msk [vmem:[%s427_s1 + $0xd] sm:$0x1] %vm7_vm2, %v12_v35  }
  0x80   :  { %v186_v36 = vpop.permute.xlu0 %185   ;;  %v19_v37 = vpop.permute.xlu1 %18  }
  0x81   :  { %233 = vst.msk [vmem:[%s427_s1 + $0xc] sm:$0x1] %vm187_vm3, %v186_v36  }
  0x82   :  { %208 = vst.msk [vmem:[%s427_s1 + $0x1a] sm:$0x1] %vm7_vm2, %v19_v37  }
  0x83   :  { %234 = vst.msk [vmem:[%s427_s1 + $0xc] sm:$0x1] %vm190_vm4, %v186_v36  }
  0x84   :  { %v200_v38 = vpop.permute.xlu0 %199   ;;  %v32_v39 = vpop.permute.xlu1 %31  }
  0x85   :  { %235 = vst.msk [vmem:[%s427_s1 + $0x19] sm:$0x1] %vm201_vm5, %v200_v38  }
  0x86   :  { %210 = vst.msk [vmem:[%s427_s1 + $0xe] sm:$0x1] %vm7_vm2, %v32_v39  }
  0x87   :  { %236 = vst.msk [vmem:[%s427_s1 + $0x19] sm:$0x1] %vm204_vm6, %v200_v38  }
  0x88   :  { %v39_v40 = vpop.permute.xlu0 %38   ;;  %v45_v41 = vpop.permute.xlu1 %44  }
  0x89   :  { %211 = vst.msk [vmem:[%s427_s1 + $0x1b] sm:$0x1] %vm7_vm2, %v39_v40   ;;  %212 = vst.msk [vmem:[%s427_s1 + $0x2] sm:$0x1] %vm7_vm2, %v45_v41  }
  0x8c   :  { %v52_v42 = vpop.permute.xlu0 %51   ;;  %v59_v43 = vpop.permute.xlu1 %58  }
  0x8d   :  { %213 = vst.msk [vmem:[%s427_s1 + $0xf] sm:$0x1] %vm7_vm2, %v52_v42   ;;  %214 = vst.msk [vmem:[%s427_s1 + $0x1c] sm:$0x1] %vm7_vm2, %v59_v43  }
  0x90   :  { %v65_v44 = vpop.permute.xlu0 %64   ;;  %v72_v45 = vpop.permute.xlu1 %71  }
  0x91   :  { %215 = vst.msk [vmem:[%s427_s1 + $0x3] sm:$0x1] %vm7_vm2, %v65_v44   ;;  %216 = vst.msk [vmem:[%s427_s1 + $0x10] sm:$0x1] %vm7_vm2, %v72_v45  }
  0x94   :  { %v78_v46 = vpop.permute.xlu0 %77   ;;  %v85_v47 = vpop.permute.xlu1 %84  }
  0x95   :  { %217 = vst.msk [vmem:[%s427_s1 + $0x4] sm:$0x1] %vm7_vm2, %v78_v46   ;;  %218 = vst.msk [vmem:[%s427_s1 + $0x11] sm:$0x1] %vm7_vm2, %v85_v47  }
  0x98   :  { %v91_v48 = vpop.permute.xlu0 %90   ;;  %v98_v49 = vpop.permute.xlu1 %97  }
  0x99   :  { %219 = vst.msk [vmem:[%s427_s1 + $0x5] sm:$0x1] %vm7_vm2, %v91_v48   ;;  %220 = vst.msk [vmem:[%s427_s1 + $0x12] sm:$0x1] %vm7_vm2, %v98_v49  }
  0x9c   :  { %v104_v50 = vpop.permute.xlu0 %103   ;;  %v111_v51 = vpop.permute.xlu1 %110  }
  0x9d   :  { %221 = vst.msk [vmem:[%s427_s1 + $0x6] sm:$0x1] %vm7_vm2, %v104_v50   ;;  %222 = vst.msk [vmem:[%s427_s1 + $0x13] sm:$0x1] %vm7_vm2, %v111_v51  }
  0xa0   :  { %v117_v52 = vpop.permute.xlu0 %116   ;;  %v124_v53 = vpop.permute.xlu1 %123  }
  0xa1   :  { %223 = vst.msk [vmem:[%s427_s1 + $0x7] sm:$0x1] %vm7_vm2, %v117_v52   ;;  %224 = vst.msk [vmem:[%s427_s1 + $0x14] sm:$0x1] %vm7_vm2, %v124_v53  }
  0xa4   :  { %v130_v54 = vpop.permute.xlu0 %129   ;;  %v137_v55 = vpop.permute.xlu1 %136  }
  0xa5   :  { %225 = vst.msk [vmem:[%s427_s1 + $0x8] sm:$0x1] %vm7_vm2, %v130_v54   ;;  %226 = vst.msk [vmem:[%s427_s1 + $0x15] sm:$0x1] %vm7_vm2, %v137_v55  }
  0xa8   :  { %v143_v56 = vpop.permute.xlu0 %142   ;;  %v150_v57 = vpop.permute.xlu1 %149  }
  0xa9   :  { %227 = vst.msk [vmem:[%s427_s1 + $0x9] sm:$0x1] %vm7_vm2, %v143_v56   ;;  %228 = vst.msk [vmem:[%s427_s1 + $0x16] sm:$0x1] %vm7_vm2, %v150_v57  }
  0xac   :  { %v156_v58 = vpop.permute.xlu0 %155   ;;  %v163_v59 = vpop.permute.xlu1 %162  }
  0xad   :  { %229 = vst.msk [vmem:[%s427_s1 + $0xa] sm:$0x1] %vm7_vm2, %v156_v58   ;;  %230 = vst.msk [vmem:[%s427_s1 + $0x17] sm:$0x1] %vm7_vm2, %v163_v59  }
  0xb0   :  { %v169_v60 = vpop.permute.xlu0 %168   ;;  %v176_v61 = vpop.permute.xlu1 %175  }
  0xb1   :  { %231 = vst.msk [vmem:[%s427_s1 + $0xb] sm:$0x1] %vm7_vm2, %v169_v60   ;;  %232 = vst.msk [vmem:[%s427_s1 + $0x18] sm:$0x1] %vm7_vm2, %v176_v61  }

// kernel: squeeze.3
= control target key start
LH: loop header
LB: loop body
LE: loop exit
PB: predicated region body
PF: predicated region fallthrough
CT: control target
= control target key end

     0   :  { %s159_s8 = smov 118   ;;  %vm113_vm0 = vcmask 982016   ;;  %s160_s9 = smov 108   ;;  %vm7_vm1 = vcmask 80896   ;;  %vm117_vm2 = vcmask 64512   ;;  %vm120_vm3 = vcmask 80960   ;;  %s262_s0 = inlined_call_operand.vmem [shape: f32[180], index: 0, kind: input, shape index: {}]   ;;  %s263_s1 = inlined_call_operand.vmem [shape: f32[18,10], index: 1, kind: output, shape index: {}]  }
   0x1   :  { %v4_v0 = vld [vmem:[%s262_s0] sm:$0x3]  ;;  %s158_s0 = smov 126   ;;  %s161_s10 = smov 116  }
   0x2   :  { %5 = vst [vmem:[#allocation0] sm:$0x3] %v4_v0  ;;  %s162_s11 = smov 8   ;;  %s163_s12 = smov 106  }
   0x3   :  { %s164_s13 = smov 98   ;;  %s165_s14 = smov 96  }
   0x4   :  { %s166_s15 = smov 88   ;;  %s167_s16 = smov 86  }
   0x5   :  { %s168_s19 = smov 78   ;;  %s169_s20 = smov 68  }
   0x6   :  { %s170_s21 = smov 58   ;;  %s171_s22 = smov 48  }
   0x7   :  { %s172_s23 = smov 38   ;;  %s173_s24 = smov 28  }
   0x8   :  { %s174_s25 = smov 18  }
   0x9   :  { %v10_v1 = vld [vmem:[#allocation0 + $0x1] sm:$0x1]   ;;  %v16_v2 = vld [vmem:[#allocation0] sm:$0x1]  }
   0xa   :  { %11 = vrot.lane.b32.xlu0 %v10_v1, %s158_s0  ;;  %17 = vrot.lane.b32.xlu1 %v16_v2, %s159_s8  ;;  %v29_v3 = vld [vmem:[#allocation0] sm:$0x1]   ;;  %v23_v4 = vld [vmem:[#allocation0 + $0x1] sm:$0x1]  }
   0xb   :  { %v110_v5 = vld [vmem:[#allocation0] sm:$0x1]   ;;  %v112_v6 = vld [vmem:[#allocation0 + $0x1] sm:$0x1]  }
   0xc   :  { %v114_v7 = vsel %vm113_vm0, %v112_v6, %v110_v5  ;;  %v36_v8 = vld [vmem:[#allocation0 + $0x1] sm:$0x1]   ;;  %v42_v9 = vld [vmem:[#allocation0] sm:$0x1]  }
   0xd   :  { %v49_v10 = vld [vmem:[#allocation0 + $0x1] sm:$0x1]   ;;  %v55_v11 = vld [vmem:[#allocation0] sm:$0x1]  }
   0xe   :  { %30 = vrot.lane.b32.xlu0 %v29_v3, %s160_s9  ;;  %24 = vrot.lane.b32.xlu1 %v23_v4, %s161_s10  ;;  %v62_v12 = vld [vmem:[#allocation0 + $0x1] sm:$0x1]   ;;  %v68_v13 = vld [vmem:[#allocation0] sm:$0x1]  }
   0xf   :  { %v74_v14 = vld [vmem:[#allocation0] sm:$0x1]  }
  0x10   :  { %v6_v15 = vld [vmem:[#allocation0] sm:$0x1]  }
  0x11   :  { %8 = vst.msk [vmem:[%s263_s1] sm:$0x1] %vm7_vm1, %v6_v15   ;;  %v80_v16 = vld [vmem:[#allocation0] sm:$0x1]  }
  0x12   :  { %115 = vrot.lane.b32.xlu0 %v114_v7, %s162_s11  ;;  %37 = vrot.lane.b32.xlu1 %v36_v8, %s163_s12  ;;  %v86_v17 = vld [vmem:[#allocation0] sm:$0x1]  }
  0x13   :  { %v92_v18 = vld [vmem:[#allocation0] sm:$0x1]  }
  0x14   :  { %v98_v19 = vld [vmem:[#allocation0] sm:$0x1]  }
  0x15   :  { %v104_v20 = vld [vmem:[#allocation0] sm:$0x1]  }
  0x16   :  { %43 = vrot.lane.b32.xlu0 %v42_v9, %s164_s13  ;;  %50 = vrot.lane.b32.xlu1 %v49_v10, %s165_s14 }
  0x1a   :  { %56 = vrot.lane.b32.xlu0 %v55_v11, %s166_s15  ;;  %63 = vrot.lane.b32.xlu1 %v62_v12, %s167_s16 }
  0x1e   :  { %69 = vrot.lane.b32.xlu0 %v68_v13, %s168_s19  ;;  %75 = vrot.lane.b32.xlu1 %v74_v14, %s169_s20 }
  0x22   :  { %81 = vrot.lane.b32.xlu0 %v80_v16, %s170_s21  ;;  %87 = vrot.lane.b32.xlu1 %v86_v17, %s171_s22 }
  0x26   :  { %93 = vrot.lane.b32.xlu0 %v92_v18, %s172_s23  ;;  %99 = vrot.lane.b32.xlu1 %v98_v19, %s173_s24 }
  0x2a   :  { %105 = vrot.lane.b32.xlu0 %v104_v20, %s174_s25 }
  0x7c   :  { %v12_v21 = vpop.permute.xlu0 %11   ;;  %v18_v22 = vpop.permute.xlu1 %17  }
  0x7d   :  { %123 = vst.msk [vmem:[%s263_s1 + $0xd] sm:$0x1] %vm7_vm1, %v12_v21   ;;  %124 = vst.msk [vmem:[%s263_s1 + $0x1] sm:$0x1] %vm7_vm1, %v18_v22  }
  0x80   :  { %v31_v23 = vpop.permute.xlu0 %30   ;;  %v25_v24 = vpop.permute.xlu1 %24  }
  0x81   :  { %126 = vst.msk [vmem:[%s263_s1 + $0x2] sm:$0x1] %vm7_vm1, %v31_v23   ;;  %125 = vst.msk [vmem:[%s263_s1 + $0xe] sm:$0x1] %vm7_vm1, %v25_v24  }
  0x84   :  { %v116_v25 = vpop.permute.xlu0 %115   ;;  %v38_v26 = vpop.permute.xlu1 %37  }
  0x85   :  { %139 = vst.msk [vmem:[%s263_s1 + $0xc] sm:$0x1] %vm117_vm2, %v116_v25  }
  0x86   :  { %127 = vst.msk [vmem:[%s263_s1 + $0xf] sm:$0x1] %vm7_vm1, %v38_v26  }
  0x87   :  { %140 = vst.msk [vmem:[%s263_s1 + $0xc] sm:$0x1] %vm120_vm3, %v116_v25  }
  0x88   :  { %v44_v27 = vpop.permute.xlu0 %43   ;;  %v51_v28 = vpop.permute.xlu1 %50  }
  0x89   :  { %128 = vst.msk [vmem:[%s263_s1 + $0x3] sm:$0x1] %vm7_vm1, %v44_v27   ;;  %129 = vst.msk [vmem:[%s263_s1 + $0x10] sm:$0x1] %vm7_vm1, %v51_v28  }
  0x8c   :  { %v57_v29 = vpop.permute.xlu0 %56   ;;  %v64_v30 = vpop.permute.xlu1 %63  }
  0x8d   :  { %130 = vst.msk [vmem:[%s263_s1 + $0x4] sm:$0x1] %vm7_vm1, %v57_v29   ;;  %131 = vst.msk [vmem:[%s263_s1 + $0x11] sm:$0x1] %vm7_vm1, %v64_v30  }
  0x90   :  { %v70_v31 = vpop.permute.xlu0 %69   ;;  %v76_v32 = vpop.permute.xlu1 %75  }
  0x91   :  { %132 = vst.msk [vmem:[%s263_s1 + $0x5] sm:$0x1] %vm7_vm1, %v70_v31   ;;  %133 = vst.msk [vmem:[%s263_s1 + $0x6] sm:$0x1] %vm7_vm1, %v76_v32  }
  0x94   :  { %v82_v33 = vpop.permute.xlu0 %81   ;;  %v88_v34 = vpop.permute.xlu1 %87  }
  0x95   :  { %134 = vst.msk [vmem:[%s263_s1 + $0x7] sm:$0x1] %vm7_vm1, %v82_v33   ;;  %135 = vst.msk [vmem:[%s263_s1 + $0x8] sm:$0x1] %vm7_vm1, %v88_v34  }
  0x98   :  { %v94_v35 = vpop.permute.xlu0 %93   ;;  %v100_v36 = vpop.permute.xlu1 %99  }
  0x99   :  { %136 = vst.msk [vmem:[%s263_s1 + $0x9] sm:$0x1] %vm7_vm1, %v94_v35   ;;  %137 = vst.msk [vmem:[%s263_s1 + $0xa] sm:$0x1] %vm7_vm1, %v100_v36  }
  0x9c   :  { %v106_v37 = vpop.permute.xlu0 %105  }
  0x9d   :  { %138 = vst.msk [vmem:[%s263_s1 + $0xb] sm:$0x1] %vm7_vm1, %v106_v37  }

// kernel: spex_plus_dprnn_forward.8
= control target key start
LH: loop header
LB: loop body
LE: loop exit
PB: predicated region body
PF: predicated region fallthrough
CT: control target
= control target key end

     0   :  { %v257_v0 = vmov 0.0|0.0   ;;  %vm258_vm0 = vmmov 0   ;;  %v259_v6 = vmov 0.0   ;;  %vm28_vm1 = vcmask 130048   ;;  %s336_s3 = inlined_call_operand.vmem [shape: f32[16,16], index: 3, kind: input, shape index: {}]   ;;  %s337_s2 = inlined_call_operand.vmem [shape: f32[16,16], index: 2, kind: input, shape index: {}]   ;;  %s338_s1 = inlined_call_operand.vmem [shape: f32[1,16], index: 1, kind: input, shape index: {}]   ;;  %s339_s0 = inlined_call_operand.vmem [shape: f32[17,16], index: 0, kind: input, shape index: {}]   ;;  %s340_s4 = inlined_call_operand.vmem [shape: f32[1,16], index: 4, kind: input, shape index: {}]   ;;  %s341_s5 = inlined_call_operand.vmem [shape: f32[17,16], index: 5, kind: output, shape index: {}]  }
   0x1   :  { %246 = vmatprep.subr.bf16.mxu0 %v257_v0  ;;  %252 = vmatprep.subr.bf16.mxu1 %v257_v0  ;;  %v26_v1 = vld [vmem:[%s336_s3] sm:$0xff]  ;;  %v27_v2 = vld [vmem:[%s336_s3 + $0x8] sm:$0xff]  ;;  %v22_v11 = vld [vmem:[%s339_s0 + $0x10] sm:$0x1]  ;;  %v102_v12 = vlaneseq  ;;  %vm207_vm2 = vcmask 122880  }
   0x2   :  { %v23_v3 = vld [vmem:[%s337_s2] sm:$0xff]  ;;  %v247_v4 = vpack.c.bf16 %v27_v2, %v26_v1  ;;  %v24_v5 = vld [vmem:[%s337_s2 + $0x8] sm:$0xff]  ;;  %230 = vmatprep.mubr.msk.f32.mxu0 %vm258_vm0, %v259_v6  ;;  %240 = vmatprep.mubr.msk.f32.mxu1 %vm258_vm0, %v259_v6 }
   0x3   :  { %v250_v7 = vpack.c.bf16 %v24_v5, %v23_v3  ;;  %v25_v8 = vld [vmem:[%s338_s1] sm:$0x1]  ;;  %v21_v9 = vld [vmem:[%s339_s0 + $0x8] sm:$0xff]  ;;  %v103_v13 = vshrl.u32 %v102_v12, 7 }
   0x4   :  { %248 = vmatpush3.bf16.msra.mxu0 %v247_v4  ;;  %v20_v10 = vld [vmem:[%s339_s0] sm:$0xff] }
   0x5   :  { %253 = vmatpush3.bf16.msra.mxu1 %v250_v7  ;;  %249 = vmatprep.subr.bf16.mxu0 %v257_v0  ;;  %v104_v14 = vsub.s32 0, %v103_v13  ;;  %v217_v19 = vld [vmem:[%s340_s4] ss:$0 sm:$0xff] }
   0x7   :  { %231 = vmatmul.mubr.msk.f32.vlgmr.msra.gmra.mrb[0].mxu0 %vm28_vm1, %v25_v8 }
   0x8   :  { %241 = vmatmul.mubr.msk.f32.vlgmr.msra.gmra.mrb[0].mxu1 %vm28_vm1, %v21_v9  ;;  %251 = vmatpush3.bf16.msra.mxu0 %v250_v7 }
   0x9   :  { %237 = vmatprep.mubr.msk.f32.mxu0 %vm258_vm0, %v259_v6  ;;  %243 = vmatprep.mubr.msk.f32.mxu1 %vm258_vm0, %v259_v6 }
   0xb   :  { %238 = vmatmul.mubr.msk.f32.vlgmr.msra.gmra.mrb[2].mxu0 %vm28_vm1, %v20_v10 }
   0xc   :  { %244 = vmatmul.mubr.msk.f32.gmra.mrb[2].mxu1 %vm28_vm1, %v22_v11 }
  0xda   :  { %v98_v15 = vpop.f32.mrb[0].mxu0 }
  0xdb   :  { %v105_v16 = vrot.slane %v98_v15, %v104_v14  ;;  %v186_v17 = vpop.f32.mrb[0].mxu1  ;;  %v232_v18 = vpop.f32.mrb[1].mxu0 }
  0xdc   :  { %v242_v20 = vpop.f32.mrb[1].mxu1 }
  0xdd   :  { %v187_v21 = vadd.f32 %v186_v17, %v105_v16 }
  0xde   :  { %v181_v22 = vpop.f32.mrb[2].mxu0 }
  0xdf   :  { %v203_v23 = vadd.f32 %v217_v19, %v187_v21  ;;  %v182_v24 = vadd.f32 %v181_v22, %v105_v16  ;;  %v191_v25 = vpop.f32.mrb[2].mxu1  ;;  %v239_v26 = vpop.f32.mrb[3].mxu0 }
  0xe0   :  { %v192_v27 = vadd.f32 %v191_v25, %v105_v16  ;;  %v245_v28 = vpop.f32.mrb[3].mxu1 }
  0xe1   :  { %206 = vst.msk [vmem:[%s341_s5 + $0x8] sm:$0xff] %vm28_vm1, %v203_v23  ;;  %v202_v29 = vadd.f32 %v217_v19, %v182_v24 }
  0xe2   :  { %v204_v30 = vadd.f32 %v217_v19, %v192_v27 }
  0xe3   :  { %205 = vst.msk [vmem:[%s341_s5] sm:$0xff] %vm28_vm1, %v202_v29 }
  0xe4   :  { %208 = vst.msk [vmem:[%s341_s5 + $0x10] sm:$0x1] %vm207_vm2, %v204_v30 }

// kernel: spex_plus_dprnn_forward.6
= control target key start
LH: loop header
LB: loop body
LE: loop exit
PB: predicated region body
PF: predicated region fallthrough
CT: control target
= control target key end

     0   :  { %vm34_vm0 = vcmask 1046528   ;;  %v454_v3 = vmov 0.0|0.0   ;;  %vm455_vm1 = vmmov 0   ;;  %v456_v9 = vmov 0.0   ;;  %s458_s20 = smov 32   ;;  %s459_s21 = smov 16   ;;  %s611_s0 = inlined_call_operand.vmem [shape: f32[18,10], index: 0, kind: input, shape index: {}]   ;;  %s612_s1 = inlined_call_operand.vmem [shape: f32[20,16], index: 1, kind: input, shape index: {}]   ;;  %s613_s2 = inlined_call_operand.vmem [shape: f32[1,16], index: 2, kind: input, shape index: {}]   ;;  %s614_s7 = inlined_call_operand.vmem [shape: f32[17,16], index: 7, kind: output, shape index: {0}]   ;;  %s615_s5 = inlined_call_operand.vmem [shape: f32[48,16], index: 5, kind: input, shape index: {}]   ;;  %s616_s3 = inlined_call_operand.vmem [shape: f32[1,48], index: 3, kind: input, shape index: {}]   ;;  %s617_s4 = inlined_call_operand.vmem [shape: f32[1,48], index: 4, kind: input, shape index: {}]   ;;  %s618_s6 = inlined_call_operand.vmem [shape: f32[1,16], index: 6, kind: input, shape index: {}]   ;;  %s619_s8 = inlined_call_operand.vmem [shape: f32[17,16], index: 8, kind: output, shape index: {1}]  }
   0x1   :  { %v28_v0 = vld [vmem:[%s611_s0] sm:$0xff]  ;;  %v29_v1 = vld [vmem:[%s611_s0 + $0x8] sm:$0xff]  ;;  %v30_v2 = vld [vmem:[%s611_s0 + $0x10] sm:$0x3]  ;;  %430 = vmatprep.subr.bf16.mxu0 %v454_v3  ;;  %433 = vmatprep.subr.bf16.mxu1 %v454_v3  ;;  %s457_s0 = smov 10   ;;  %vm73_vm2 = vcmask 1043456  }
   0x2   :  { %v35_v4 = vrot.slane %v28_v0, 1  ;;  %v36_v5 = vrot.slane %v29_v1, 1  ;;  %v38_v6 = vrot.slane %v30_v2, 1  ;;  %v53_v7 = vld [vmem:[%s612_s1] sm:$0xff]  ;;  %v54_v8 = vld [vmem:[%s612_s1 + $0x8] sm:$0xff]  ;;  %400 = vmatprep.mubr.msk.f32.mxu0 %vm455_vm1, %v456_v9  ;;  %421 = vmatprep.mubr.msk.f32.mxu1 %vm455_vm1, %v456_v9  ;;  %vm49_vm3 = vcmask 80896  }
   0x3   :  { %v431_v10 = vpack.c.bf16 %v54_v8, %v53_v7  ;;  %v55_v13 = vld [vmem:[%s612_s1 + $0x10] sm:$0xf]  ;;  %vm63_vm4 = vcmask 162816   ;;  %v368_v20 = vld [vmem:[%s613_s2] ss:$0 sm:$0xff]  ;;  %vm160_vm5 = vcmask 130048  }
   0x4   :  { %v37_v11 = vsel %vm34_vm0, %v35_v4, %v36_v5  ;;  %44 = vrot.lane.b32.xlu1 %v38_v6, %s457_s0  ;;  %v39_v12 = vsel %vm34_vm0, %v36_v5, %v38_v6  ;;  %vm163_vm6 = vcmask 122880   ;;  %vm189_vm7 = vcmask 261120   ;;  %v255_v63 = vld [vmem:[%s615_s5] sm:$0xff]  ;;  %v258_v4 = vld [vmem:[%s615_s5 + $0x18] sm:$0xff]  ;;  %v260_v7 = vld [vmem:[%s615_s5 + $0x28] sm:$0xff] }
   0x5   :  { %40 = vrot.lane.b32.xlu0 %v37_v11, %s457_s0  ;;  %432 = vmatpush3.bf16.msra.mxu0 %v431_v10  ;;  %vm195_vm8 = vcmask 392192   ;;  %vm202_vm9 = vcmask 385024   ;;  %v259_v6 = vld [vmem:[%s615_s5 + $0x20] sm:$0xff] }
   0x6   :  { %398 = vmatprep.subr.mxu0 %v456_v9  ;;  %v440_v8 = vpack.c.bf16 %v260_v7, %v259_v6 }
   0x9   :  { %42 = vrot.lane.b32.xlu0 %v39_v12, %s457_s0  ;;  %399 = vmatpush3.msk.msra.mxu0 %vm73_vm2, %v55_v13 }
  0x76   :  { %v45_v17 = vpop.permute.xlu1 %44 }
  0x77   :  { %v41_v14 = vpop.permute.xlu0 %40  ;;  %v52_v19 = vsel %vm49_vm3, %v30_v2, %v45_v17  ;;  %v257_v2 = vld [vmem:[%s615_s5 + $0x10] sm:$0xff] }
  0x78   :  { %v50_v15 = vsel %vm49_vm3, %v28_v0, %v41_v14  ;;  %v256_v0 = vld [vmem:[%s615_s5 + $0x8] sm:$0xff]  ;;  %v437_v5 = vpack.c.bf16 %v258_v4, %v257_v2 }
  0x79   :  { %401 = vmatmul.mubr.msk.f32.vlgmr.msra.gmra.mrb[0].mxu0 %vm63_vm4, %v50_v15 }
  0x7a   :  { %403 = vmatprep.mubr.msk.f32.mxu0 %vm455_vm1, %v456_v9 }
  0x7b   :  { %v43_v16 = vpop.permute.xlu0 %42 }
  0x7c   :  { %v51_v18 = vsel %vm49_vm3, %v29_v1, %v43_v16  ;;  %v434_v1 = vpack.c.bf16 %v256_v0, %v255_v63 }
  0x7d   :  { %404 = vmatmul.mubr.msk.f32.gmra.mrb[2].mxu0 %vm63_vm4, %v51_v18 }
  0x7e   :  { %406 = vmatprep.mubr.msk.f32.mxu0 %vm455_vm1, %v456_v9  ;;  %435 = vmatpush3.bf16.msra.mxu1 %v434_v1 }
  0x7f   :  { %436 = vmatprep.subr.bf16.mxu1 %v454_v3 }
  0x81   :  { %407 = vmatmul.mubr.msk.f32.gmra.mrb[4].mxu0 %vm63_vm4, %v52_v19 }
  0x82   :  { %438 = vmatpush3.bf16.msra.mxu1 %v437_v5 }
  0x83   :  { %439 = vmatprep.subr.bf16.mxu1 %v454_v3  ;;  %v374_v3 = vld [vmem:[%s617_s4] ss:$0 sm:$0xff] }
  0x86   :  { %441 = vmatpush3.bf16.msra.mxu1 %v440_v8 }
 0x14c   :  { %v143_v21 = vpop.f32.mrb[0].mxu0 }
 0x14d   :  { %v144_v22 = vadd.f32 %v368_v20, %v143_v21  ;;  %v402_v23 = vpop.f32.mrb[1].mxu0 }
 0x14f   :  { %v157_v24 = vmax.f32 %v144_v22, 0.0 }
 0x150   :  { %v148_v25 = vpop.f32.mrb[2].mxu0 }
 0x151   :  { %161 = vst.msk [vmem:[%s614_s7] sm:$0xff] %vm160_vm5, %v157_v24  ;;  %v149_v26 = vadd.f32 %v368_v20, %v148_v25  ;;  %177 = vrot.lane.b32.xlu0 %v157_v24, %s458_s20  ;;  %168 = vrot.lane.b32.xlu1 %v157_v24, %s459_s21  ;;  %v405_v27 = vpop.f32.mrb[3].mxu0 }
 0x153   :  { %v158_v28 = vmax.f32 %v149_v26, 0.0 }
 0x154   :  { %v153_v29 = vpop.f32.mrb[4].mxu0 }
 0x155   :  { %162 = vst.msk [vmem:[%s614_s7 + $0x8] sm:$0xff] %vm160_vm5, %v158_v28  ;;  %v154_v30 = vadd.f32 %v368_v20, %v153_v29  ;;  %179 = vrot.lane.b32.xlu0 %v158_v28, %s458_s20  ;;  %170 = vrot.lane.b32.xlu1 %v158_v28, %s459_s21  ;;  %v408_v31 = vpop.f32.mrb[5].mxu0  ;;  %v373_v20 = vld [vmem:[%s616_s3] ss:$0 sm:$0xff] }
 0x157   :  { %v159_v32 = vmax.f32 %v154_v30, 0.0 }
 0x159   :  { %181 = vrot.lane.b32.xlu0 %v159_v32, %s458_s20  ;;  %172 = vrot.lane.b32.xlu1 %v159_v32, %s459_s21  ;;  %164 = vst.msk [vmem:[%s614_s7 + $0x10] sm:$0x1] %vm163_vm6, %v159_v32 }
 0x1c3   :  { %v169_v33 = vpop.permute.xlu1 %168  ;;  %v178_v34 = vpop.permute.xlu0 %177 }
 0x1c4   :  { %v186_v35 = vsel %vm160_vm5, %v157_v24, %v169_v33 }
 0x1c5   :  { %v190_v36 = vsel %vm189_vm7, %v186_v35, %v178_v34 }
 0x1c6   :  { %v196_v37 = vsel %vm195_vm8, %v190_v36, 0.0 }
 0x1c7   :  { %v171_v38 = vpop.permute.xlu1 %170  ;;  %197 = vadd.xlane.f32.xlu1 %v196_v37  ;;  %v180_v39 = vpop.permute.xlu0 %179 }
 0x1c8   :  { %v187_v40 = vsel %vm160_vm5, %v158_v28, %v171_v38 }
 0x1c9   :  { %v191_v41 = vsel %vm189_vm7, %v187_v40, %v180_v39 }
 0x1ca   :  { %v199_v42 = vsel %vm195_vm8, %v191_v41, 0.0 }
 0x1cb   :  { %v173_v43 = vpop.permute.xlu1 %172  ;;  %200 = vadd.xlane.f32.xlu0 %v199_v42  ;;  %v182_v44 = vpop.permute.xlu0 %181 }
 0x1cc   :  { %v188_v45 = vsel %vm160_vm5, %v159_v32, %v173_v43  ;;  %v375_v32 = vld [vmem:[%s618_s6] ss:$0 sm:$0xff] }
 0x1cd   :  { %v192_v46 = vsel %vm189_vm7, %v188_v45, %v182_v44 }
 0x1ce   :  { %v203_v47 = vsel %vm202_vm9, %v192_v46, 0.0 }
 0x1cf   :  { %204 = vadd.xlane.f32.xlu0 %v203_v47 }
 0x254   :  { %v198_v48 = vpop.xlane.xlu1 %197 }
 0x255   :  { %v207_v49 = vmul.f32 0.020833334, %v198_v48 }
 0x257   :  { %v210_v50 = vsub.f32 %v190_v36, %v207_v49 }
 0x258   :  { %v201_v51 = vpop.xlane.xlu0 %200 }
 0x259   :  { %v208_v52 = vmul.f32 0.020833334, %v201_v51  ;;  %v213_v53 = vmul.f32 %v210_v50, %v210_v50 }
 0x25b   :  { %v211_v54 = vsub.f32 %v191_v41, %v208_v52  ;;  %v216_v55 = vsel %vm195_vm8, %v213_v53, 0.0 }
 0x25c   :  { %217 = vadd.xlane.f32.xlu1 %v216_v55  ;;  %v205_v56 = vpop.xlane.xlu0 %204 }
 0x25d   :  { %v209_v57 = vmul.f32 0.020833334, %v205_v56  ;;  %v214_v58 = vmul.f32 %v211_v54, %v211_v54 }
 0x25f   :  { %v212_v59 = vsub.f32 %v192_v46, %v209_v57  ;;  %v219_v60 = vsel %vm195_vm8, %v214_v58, 0.0 }
 0x260   :  { %220 = vadd.xlane.f32.xlu0 %v219_v60 }
 0x261   :  { %v215_v61 = vmul.f32 %v212_v59, %v212_v59 }
 0x263   :  { %v222_v62 = vsel %vm202_vm9, %v215_v61, 0.0 }
 0x264   :  { %223 = vadd.xlane.f32.xlu1 %v222_v62 }
 0x2e9   :  { %v218_v10 = vpop.xlane.xlu1 %217 }
 0x2ea   :  { %v225_v11 = vmul.f32 0.020833334, %v218_v10 }
 0x2ec   :  { %v228_v12 = vadd.f32 1e-05, %v225_v11 }
 0x2ed   :  { %v221_v13 = vpop.xlane.xlu0 %220 }
 0x2ee   :  { %448 = vrsqrt.f32 %v228_v12  ;;  %v226_v14 = vmul.f32 0.020833334, %v221_v13 }
 0x2f0   :  { %v229_v15 = vadd.f32 1e-05, %v226_v14 }
 0x2f1   :  { %v224_v16 = vpop.xlane.xlu1 %223 }
 0x2f2   :  { %450 = vrsqrt.f32 %v229_v15  ;;  %v227_v17 = vmul.f32 0.020833334, %v224_v16 }
 0x2f4   :  { %v230_v18 = vadd.f32 1e-05, %v227_v17 }
 0x2f6   :  { %452 = vrsqrt.f32 %v230_v18 }
 0x2f8   :  { %v449_v19 = vpop.eup %448 }
 0x2f9   :  { %v234_v21 = vmul.f32 %v449_v19, %v210_v50 }
 0x2fb   :  { %v243_v22 = vmul.f32 %v373_v20, %v234_v21 }
 0x2fc   :  { %v451_v23 = vpop.eup %450 }
 0x2fd   :  { %v252_v24 = vadd.f32 %v374_v3, %v243_v22  ;;  %v235_v25 = vmul.f32 %v451_v23, %v211_v54 }
 0x2ff   :  { %422 = vmatmul.mubr.msk.f32.vlgmr.msra.gmra.mrb[0].mxu1 %vm195_vm8, %v252_v24  ;;  %v244_v26 = vmul.f32 %v373_v20, %v235_v25 }
 0x300   :  { %v453_v27 = vpop.eup %452  ;;  %424 = vmatprep.mubr.msk.f32.mxu1 %vm455_vm1, %v456_v9 }
 0x301   :  { %v253_v28 = vadd.f32 %v374_v3, %v244_v26  ;;  %v236_v29 = vmul.f32 %v453_v27, %v212_v59 }
 0x303   :  { %425 = vmatmul.mubr.msk.f32.gmra.mrb[2].mxu1 %vm195_vm8, %v253_v28  ;;  %v245_v30 = vmul.f32 %v373_v20, %v236_v29 }
 0x304   :  { %427 = vmatprep.mubr.msk.f32.mxu1 %vm455_vm1, %v456_v9 }
 0x305   :  { %v254_v31 = vadd.f32 %v374_v3, %v245_v30 }
 0x307   :  { %428 = vmatmul.mubr.msk.f32.gmra.mrb[4].mxu1 %vm195_vm8, %v254_v31 }
 0x3d2   :  { %v343_v33 = vpop.f32.mrb[0].mxu1 }
 0x3d3   :  { %v344_v34 = vadd.f32 %v375_v32, %v343_v33  ;;  %v423_v35 = vpop.f32.mrb[1].mxu1 }
 0x3d5   :  { %357 = vst.msk [vmem:[%s619_s8] sm:$0xff] %vm160_vm5, %v344_v34 }
 0x3d6   :  { %v348_v36 = vpop.f32.mrb[2].mxu1 }
 0x3d7   :  { %v349_v37 = vadd.f32 %v375_v32, %v348_v36  ;;  %v426_v38 = vpop.f32.mrb[3].mxu1 }
 0x3d9   :  { %358 = vst.msk [vmem:[%s619_s8 + $0x8] sm:$0xff] %vm160_vm5, %v349_v37 }
 0x3da   :  { %v353_v9 = vpop.f32.mrb[4].mxu1 }
 0x3db   :  { %v354_v39 = vadd.f32 %v375_v32, %v353_v9  ;;  %v429_v40 = vpop.f32.mrb[5].mxu1 }
 0x3dd   :  { %359 = vst.msk [vmem:[%s619_s8 + $0x10] sm:$0x1] %vm163_vm6, %v354_v39 }

// kernel: spex_plus_dprnn_forward.7
= control target key start
LH: loop header
LB: loop body
LE: loop exit
PB: predicated region body
PF: predicated region fallthrough
CT: control target
= control target key end

     0   :  { %s2160_s0 = inlined_call_operand.vmem [shape: f32[29,10], index: 0, kind: input, shape index: {}]   ;;  %s2161_s1 = inlined_call_operand.vmem [shape: f32[20,16], index: 1, kind: input, shape index: {}]   ;;  %s2162_s2 = inlined_call_operand.vmem [shape: f32[1,16], index: 2, kind: input, shape index: {}]   ;;  %s2163_s3 = inlined_call_operand.vmem [shape: f32[1,48], index: 3, kind: input, shape index: {}]   ;;  %s2164_s4 = inlined_call_operand.vmem [shape: f32[1,48], index: 4, kind: input, shape index: {}]   ;;  %s2165_s5 = inlined_call_operand.vmem [shape: f32[48,16], index: 5, kind: input, shape index: {}]   ;;  %s2166_s6 = inlined_call_operand.vmem [shape: f32[1,16], index: 6, kind: input, shape index: {}]   ;;  %s2167_s7 = inlined_call_operand.vmem [shape: f32[16,16], index: 7, kind: input, shape index: {}]   ;;  %s2168_s8 = inlined_call_operand.vmem [shape: f32[1,16], index: 8, kind: input, shape index: {}]   ;;  %s2169_s9 = inlined_call_operand.vmem [shape: f32[16,16], index: 9, kind: input, shape index: {}]   ;;  %s2170_s10 = inlined_call_operand.vmem [shape: f32[1,16], index: 10, kind: input, shape index: {}]   ;;  %s2171_s11 = inlined_call_operand.vmem [shape: f32[16,32], index: 11, kind: input, shape index: {}]   ;;  %s2172_s12 = inlined_call_operand.vmem [shape: f32[1,32], index: 12, kind: input, shape index: {}]   ;;  %s2173_s13 = inlined_call_operand.vmem [shape: f32[32,32], index: 13, kind: input, shape index: {}]   ;;  %s2174_s14 = inlined_call_operand.vmem [shape: f32[1,32], index: 14, kind: input, shape index: {}]   ;;  %s2175_s15 = inlined_call_operand.vmem [shape: f32[16,32], index: 15, kind: input, shape index: {}]   ;;  %s2176_s16 = inlined_call_operand.vmem [shape: f32[32,32], index: 16, kind: input, shape index: {}]   ;;  %s2177_s17 = inlined_call_operand.vmem [shape: f32[1,32], index: 17, kind: input, shape index: {}]   ;;  %s2178_s18 = inlined_call_operand.vmem [shape: f32[32,32], index: 18, kind: input, shape index: {}]   ;;  %s2179_s19 = inlined_call_operand.vmem [shape: f32[1,32], index: 19, kind: input, shape index: {}]   ;;  %s2180_s20 = inlined_call_operand.vmem [shape: f32[32,16], index: 20, kind: input, shape index: {}]   ;;  %s2181_s21 = inlined_call_operand.vmem [shape: f32[1,16], index: 21, kind: input, shape index: {}]   ;;  %s2182_s22 = inlined_call_operand.vmem [shape: f32[16,4], index: 22, kind: input, shape index: {}]   ;;  %s2183_s23 = inlined_call_operand.vmem [shape: f32[1,4], index: 23, kind: input, shape index: {}]   ;;  %s2184_s24 = inlined_call_operand.vmem [shape: f32[7], index: 24, kind: input, shape index: {}]   ;;  %s2185_s25 = inlined_call_operand.vmem [shape: f32[1,16], index: 25, kind: output, shape index: {0}]   ;;  %s2186_s26 = inlined_call_operand.hbm [shape: f32[1,4], index: 26, kind: output, shape index: {1}]  }
   0x1   :  { %2192 = sst [smem:[#allocation8_spill]] %s2160_s0 }
   0x2   :  { %2193 = sst [smem:[#allocation9_spill]] %s2161_s1 }
   0x3   :  { %2194 = sst [smem:[#allocation10_spill]] %s2162_s2 }
   0x4   :  { %2195 = sst [smem:[#allocation11_spill]] %s2163_s3 }
   0x5   :  { %2196 = sst [smem:[#allocation12_spill]] %s2164_s4 }
   0x6   :  { %2197 = sst [smem:[#allocation13_spill]] %s2165_s5 }
   0x7   :  { %2198 = sst [smem:[#allocation14_spill]] %s2166_s6 }
   0x8   :  { %2199 = sst [smem:[#allocation15_spill]] %s2167_s7 }
   0x9   :  { %2200 = sst [smem:[#allocation16_spill]] %s2168_s8 }
   0xa   :  { %2201 = sst [smem:[#allocation17_spill]] %s2169_s9 }
   0xb   :  { %2202 = sst [smem:[#allocation18_spill]] %s2170_s10 }
   0xc   :  { %32 = vsyncpa [#allocation4], 0 }
   0xd   :  { %33 = vsyncpa [#allocation3], 0  ;;  %s88_s7 = sshll.u32 %s2184_s24, 4  ;;  %s89_s7 = int_to_ptr.vmem [resolvable:$true] %s88_s7 }
   0xe   :  { %s1740_s28 = scalar_lea.vmem %s89_s7, 16  ;;  %p1745_p1 = scmp.lt.s32.totalorder %s89_s7, %s89_s7 }
   0xf   :  { %p1741_p0 = scmp.ne.s32.totalorder %s89_s7, %s1740_s28  ;;  %p1746_p2 = scmp.lt.s32.totalorder %s1740_s28, %s1740_s28 }
  0x11   :  { %p1747_p3 = por %p1746_p2, %p1745_p1 }
  0x13   :  { %p1748_p4 = pnand %p1747_p3, %p1741_p0 }
  0x15   :  { %1751 = shalt.err (!%p1748_p4)
}
  0x16   :  { %s1778_s8 = smov [#allocation2]  }
  0x17   :  { %91 = dma.vmem_to_smem %s89_s7, 16, %s1778_s8, [#allocation4]  }
  0x18   :  { %1774 = dma.done.wait [#allocation4], 16  }
  0x19   :  { %1775 = vsyncadd [#allocation4], 4294967280 }
  0x1a   :  { %95 = sfence }
  0x1b   :  { %s2203_s0 = sld [smem:[#allocation8_spill]]  ;;  %vm104_vm0 = vcmask 1046528   ;;  %s2204_s27 = sld [smem:[#allocation9_spill]]  ;;  %vm152_vm1 = vcmask 1043456   ;;  %vm124_vm2 = vcmask 80896   ;;  %vm139_vm3 = vcmask 162816  }
  0x1c   :  { %s1779_s28 = smov 10   ;;  %s2205_s9 = sld [smem:[#allocation10_spill]]  ;;  %vm273_vm4 = vcmask 130048   ;;  %vm278_vm5 = vcmask 261120   ;;  %vm285_vm6 = vcmask 392192   ;;  %vm295_vm7 = vcmask 388096  }
  0x1d   :  { %s1780_s30 = smov 16   ;;  %s1781_s24 = smov 32   ;;  %vm762_vm14 = vcmask 1040384   ;;  %vm764_vm15 = vcmask 1041408  }
  0x1e   :  { %s2206_s10 = sld [smem:[#allocation13_spill]]  ;;  %s2210_s4 = sld [smem:[#allocation14_spill]] }
  0x1f   :  { %s473_s2 = sld [smem:[#allocation2]]  ;;  %s2212_s6 = sld [smem:[#allocation16_spill]] }
  0x20   :  { %s1462_s7 = sld [smem:[#allocation2 + $0x2]] }
  0x21   :  { %v96_v0 = vld [vmem:[%s2203_s0] sm:$0xff]  ;;  %v97_v1 = vld [vmem:[%s2203_s0 + $0x8] sm:$0xff]  ;;  %v98_v2 = vld [vmem:[%s2203_s0 + $0x10] sm:$0xff] }
  0x22   :  { %v105_v3 = vrot.slane %v96_v0, 1  ;;  %v106_v4 = vrot.slane %v97_v1, 1  ;;  %v108_v5 = vrot.slane %v98_v2, 1  ;;  %v99_v6 = vld [vmem:[%s2203_s0 + $0x18] sm:$0x1f]  ;;  %v129_v7 = vld [vmem:[%s2204_s27] sm:$0xff] }
  0x23   :  { %v110_v8 = vrot.slane %v99_v6, 1  ;;  %v130_v9 = vld [vmem:[%s2204_s27 + $0x8] sm:$0xff]  ;;  %v131_v13 = vld [vmem:[%s2204_s27 + $0x10] sm:$0xf]  ;;  %v1438_v23 = vld [vmem:[%s2205_s9] ss:$0 sm:$0xff] }
  0x24   :  { %v107_v10 = vsel %vm104_vm0, %v105_v3, %v106_v4  ;;  %v1657_v11 = vpack.c.bf16 %v130_v9, %v129_v7  ;;  %v109_v14 = vsel %vm104_vm0, %v106_v4, %v108_v5  ;;  %s2209_s27 = sld [smem:[#allocation15_spill]]  ;;  %s2211_s9 = sld [smem:[#allocation17_spill]] }
  0x25   :  { %112 = vrot.lane.b32.xlu0 %v107_v10, %s1779_s28  ;;  %v111_v12 = vsel %vm104_vm0, %v108_v5, %v110_v8  ;;  %s1451_s0 = sld [smem:[#allocation2 + $0x1]] }
  0x26   :  { %116 = vrot.lane.b32.xlu1 %v111_v12, %s1779_s28  ;;  %1658 = vmatprep.subr.bf16.mxu0 %v1657_v11  ;;  %v360_v12 = vld [vmem:[%s2206_s10] sm:$0xff] }
  0x27   :  { %1660 = vmatpush3.bf16.msra.mxu0 %v1657_v11 }
  0x28   :  { %1546 = vmatprep.subr.msk.mxu0 %vm152_vm1, %v131_v13 }
  0x29   :  { %114 = vrot.lane.b32.xlu0 %v109_v14, %s1779_s28 }
  0x2a   :  { %118 = vrot.lane.b32.xlu1 %v110_v8, %s1779_s28 }
  0x2b   :  { %1547 = vmatpush3.msk.msra.mxu0 %vm152_vm1, %v131_v13  ;;  %v361_v13 = vld [vmem:[%s2206_s10 + $0x8] sm:$0xff] }
  0x2c   :  { %v1661_v14 = vpack.c.bf16 %v361_v13, %v360_v12 }
  0x2e   :  { %1662 = vmatprep.subr.bf16.mxu1 %v1661_v14 }
  0x2f   :  { %1664 = vmatpush3.bf16.msra.mxu1 %v1661_v14 }
  0x97   :  { %v113_v15 = vpop.permute.xlu0 %112 }
  0x98   :  { %v125_v16 = vsel %vm124_vm2, %v96_v0, %v113_v15  ;;  %v117_v17 = vpop.permute.xlu1 %116  ;;  %v362_v15 = vld [vmem:[%s2206_s10 + $0x10] sm:$0xff] }
  0x99   :  { %1548 = vmatprep.mubr.msk.f32.mxu0 %vm139_vm3, %v125_v16  ;;  %v127_v19 = vsel %vm124_vm2, %v98_v2, %v117_v17  ;;  %v363_v16 = vld [vmem:[%s2206_s10 + $0x18] sm:$0xff] }
  0x9a   :  { %v1665_v17 = vpack.c.bf16 %v363_v16, %v362_v15 }
  0x9b   :  { %v115_v18 = vpop.permute.xlu0 %114 }
  0x9c   :  { %v126_v20 = vsel %vm124_vm2, %v97_v1, %v115_v18  ;;  %v119_v21 = vpop.permute.xlu1 %118  ;;  %1666 = vmatprep.subr.bf16.mxu1 %v1665_v17  ;;  %v364_v18 = vld [vmem:[%s2206_s10 + $0x20] sm:$0xff] }
  0x9d   :  { %1549 = vmatmul.mubr.msk.f32.vlgmr.msra.gmra.mrb[0].mxu0 %vm139_vm3, %v126_v20  ;;  %v128_v22 = vsel %vm124_vm2, %v99_v6, %v119_v21  ;;  %1668 = vmatpush3.bf16.msra.mxu1 %v1665_v17 }
  0x9e   :  { %1551 = vmatprep.mubr.msk.f32.mxu0 %vm139_vm3, %v127_v19  ;;  %v365_v19 = vld [vmem:[%s2206_s10 + $0x28] sm:$0xff]  ;;  %s2208_s10 = sld [smem:[#allocation12_spill]] }
  0x9f   :  { %v1669_v20 = vpack.c.bf16 %v365_v19, %v364_v18 }
  0xa1   :  { %1552 = vmatmul.mubr.msk.f32.gmra.mrb[2].mxu0 %vm139_vm3, %v128_v22  ;;  %1670 = vmatprep.subr.bf16.mxu1 %v1669_v20  ;;  %vm766_vm3 = vcmask 1042432  }
  0xa2   :  { %1672 = vmatpush3.bf16.msra.mxu1 %v1669_v20  ;;  %v774_v20 = vld [vmem:[%s2171_s11] sm:$0xff] }
 0x170   :  { %v1550_v24 = vpop.f32.mrb[0].mxu0 }
 0x171   :  { %v228_v25 = vadd.f32 %v1550_v24, %v1438_v23  ;;  %v222_v26 = vpop.f32.mrb[1].mxu0 }
 0x172   :  { %v223_v27 = vadd.f32 %v1438_v23, %v222_v26 }
 0x173   :  { %v242_v28 = vmax.f32 %v228_v25, 0.0 }
 0x174   :  { %v241_v29 = vmax.f32 %v223_v27, 0.0  ;;  %v1553_v30 = vpop.f32.mrb[2].mxu0 }
 0x175   :  { %251 = vrot.lane.b32.xlu1 %v242_v28, %s1780_s30  ;;  %v238_v31 = vadd.f32 %v1553_v30, %v1438_v23  ;;  %v232_v32 = vpop.f32.mrb[3].mxu0 }
 0x176   :  { %249 = vrot.lane.b32.xlu0 %v241_v29, %s1780_s30  ;;  %v233_v33 = vadd.f32 %v1438_v23, %v232_v32 }
 0x177   :  { %v244_v34 = vmax.f32 %v238_v31, 0.0 }
 0x178   :  { %v243_v35 = vmax.f32 %v233_v33, 0.0 }
 0x179   :  { %263 = vrot.lane.b32.xlu1 %v242_v28, %s1781_s24 }
 0x17a   :  { %261 = vrot.lane.b32.xlu0 %v241_v29, %s1781_s24 }
 0x17d   :  { %255 = vrot.lane.b32.xlu1 %v244_v34, %s1780_s30 }
 0x17e   :  { %253 = vrot.lane.b32.xlu0 %v243_v35, %s1780_s30 }
 0x181   :  { %267 = vrot.lane.b32.xlu1 %v244_v34, %s1781_s24 }
 0x182   :  { %265 = vrot.lane.b32.xlu0 %v243_v35, %s1781_s24  ;;  %s2207_s24 = sld [smem:[#allocation11_spill]] }
 0x188   :  { %v1444_v33 = vld [vmem:[%s2207_s24] ss:$0 sm:$0xff]  ;;  %s2213_s24 = sld [smem:[#allocation18_spill]] }
 0x1e7   :  { %v252_v36 = vpop.permute.xlu1 %251 }
 0x1e8   :  { %v250_v37 = vpop.permute.xlu0 %249  ;;  %v275_v38 = vsel %vm273_vm4, %v242_v28, %v252_v36 }
 0x1e9   :  { %v274_v40 = vsel %vm273_vm4, %v241_v29, %v250_v37 }
 0x1eb   :  { %v264_v39 = vpop.permute.xlu1 %263 }
 0x1ec   :  { %v262_v41 = vpop.permute.xlu0 %261  ;;  %v280_v42 = vsel %vm278_vm5, %v275_v38, %v264_v39  ;;  %v1445_v38 = vld [vmem:[%s2208_s10] ss:$0 sm:$0xff] }
 0x1ed   :  { %v289_v43 = vsel %vm285_vm6, %v280_v42, 0.0  ;;  %v279_v44 = vsel %vm278_vm5, %v274_v40, %v262_v41 }
 0x1ee   :  { %290 = vadd.xlane.f32.xlu1 %v289_v43  ;;  %v286_v45 = vsel %vm285_vm6, %v279_v44, 0.0 }
 0x1ef   :  { %v256_v46 = vpop.permute.xlu1 %255  ;;  %287 = vadd.xlane.f32.xlu0 %v286_v45 }
 0x1f0   :  { %v254_v47 = vpop.permute.xlu0 %253  ;;  %v277_v52 = vsel %vm273_vm4, %v244_v34, %v256_v46 }
 0x1f1   :  { %v276_v48 = vsel %vm273_vm4, %v243_v35, %v254_v47 }
 0x1f3   :  { %v268_v49 = vpop.permute.xlu1 %267 }
 0x1f4   :  { %v266_v50 = vpop.permute.xlu0 %265  ;;  %v282_v54 = vsel %vm278_vm5, %v277_v52, %v268_v49  ;;  %v471_v52 = vld [vmem:[%s2209_s27 + $0x8] sm:$0xff] }
 0x1f5   :  { %v281_v51 = vsel %vm278_vm5, %v276_v48, %v266_v50  ;;  %v296_v55 = vsel %vm295_vm7, %v282_v54, 0.0 }
 0x1f6   :  { %v292_v53 = vsel %vm285_vm6, %v281_v51, 0.0 }
 0x1f7   :  { %293 = vadd.xlane.f32.xlu0 %v292_v53 }
 0x1fb   :  { %297 = vadd.xlane.f32.xlu0 %v296_v55 }
 0x27b   :  { %v291_v56 = vpop.xlane.xlu1 %290 }
 0x27c   :  { %v301_v57 = vmul.f32 0.020833334, %v291_v56  ;;  %v288_v58 = vpop.xlane.xlu0 %287 }
 0x27d   :  { %v300_v59 = vmul.f32 0.020833334, %v288_v58 }
 0x27e   :  { %v305_v60 = vsub.f32 %v280_v42, %v301_v57 }
 0x27f   :  { %v304_v61 = vsub.f32 %v279_v44, %v300_v59 }
 0x280   :  { %v309_v62 = vmul.f32 %v305_v60, %v305_v60 }
 0x281   :  { %v308_v63 = vmul.f32 %v304_v61, %v304_v61 }
 0x282   :  { %v315_v0 = vsel %vm285_vm6, %v309_v62, 0.0 }
 0x283   :  { %316 = vadd.xlane.f32.xlu0 %v315_v0  ;;  %v312_v1 = vsel %vm285_vm6, %v308_v63, 0.0  ;;  %v474_v63 = vld [vmem:[%s2211_s9] sm:$0xff]  ;;  %v475_v0 = vld [vmem:[%s2211_s9 + $0x8] sm:$0xff]  ;;  %s1473_s9 = sld [smem:[#allocation2 + $0x5]] }
 0x284   :  { %313 = vadd.xlane.f32.xlu1 %v312_v1  ;;  %v294_v2 = vpop.xlane.xlu0 %293  ;;  %v1677_v1 = vpack.c.bf16 %v475_v0, %v474_v63 }
 0x285   :  { %v302_v3 = vmul.f32 0.020833334, %v294_v2  ;;  %v1452_v2 = vld [vmem:[%s2212_s6] ss:$0 sm:$0xff] }
 0x286   :  { %1678 = vmatprep.subr.bf16.mxu1 %v1677_v1 }
 0x287   :  { %v306_v4 = vsub.f32 %v281_v51, %v302_v3  ;;  %v470_v51 = vld [vmem:[%s2209_s27] sm:$0xff]  ;;  %s1785_s27 = smov [#allocation5]  }
 0x288   :  { %v298_v5 = vpop.xlane.xlu0 %297  ;;  %v1673_v53 = vpack.c.bf16 %v471_v52, %v470_v51  ;;  %s1427_s3 = sshll.u32 %s1785_s27, 4  ;;  %s1428_s3 = int_to_ptr.vmem [resolvable:$true] %s1427_s3 }
 0x289   :  { %v303_v6 = vmul.f32 0.020833334, %v298_v5  ;;  %v310_v7 = vmul.f32 %v306_v4, %v306_v4  ;;  %p1757_p6 = scmp.lt.s32.totalorder %s1428_s3, %s1428_s3 }
 0x28a   :  { %1674 = vmatprep.subr.bf16.mxu0 %v1673_v53 }
 0x28b   :  { %v307_v8 = vsub.f32 %v282_v54, %v303_v6  ;;  %v318_v9 = vsel %vm285_vm6, %v310_v7, 0.0  ;;  %1676 = vmatpush3.bf16.msra.mxu0 %v1673_v53  ;;  %v1446_v54 = vld [vmem:[%s2210_s4] ss:$0 sm:$0xff] }
 0x28c   :  { %319 = vadd.xlane.f32.xlu1 %v318_v9 }
 0x28d   :  { %v311_v10 = vmul.f32 %v307_v8, %v307_v8 }
 0x28f   :  { %v321_v11 = vsel %vm295_vm7, %v311_v10, 0.0  ;;  %vm769_vm7 = vcmask 1044480  }
 0x290   :  { %322 = vadd.xlane.f32.xlu0 %v321_v11 }
 0x310   :  { %v317_v21 = vpop.xlane.xlu0 %316 }
 0x311   :  { %v325_v22 = vmul.f32 0.020833334, %v317_v21  ;;  %v314_v23 = vpop.xlane.xlu1 %313  ;;  %v775_v21 = vld [vmem:[%s2171_s11 + $0x8] sm:$0xff] }
 0x312   :  { %v324_v24 = vmul.f32 0.020833334, %v314_v23  ;;  %v778_v23 = vld [vmem:[%s2173_s13] sm:$0xff] }
 0x313   :  { %v329_v25 = vadd.f32 1e-05, %v325_v22  ;;  %v1681_v22 = vpack.c.bf16 %v775_v21, %v774_v20  ;;  %v785_v20 = vld [vmem:[%s2175_s15 + $0x8] sm:$0xff] }
 0x314   :  { %v328_v26 = vadd.f32 1e-05, %v324_v24  ;;  %v779_v24 = vld [vmem:[%s2173_s13 + $0x8] sm:$0xff] }
 0x315   :  { %1730 = vrsqrt.f32 %v329_v25  ;;  %1682 = vmatprep.subr.bf16.mxu0 %v1681_v22  ;;  %v1685_v25 = vpack.c.bf16 %v779_v24, %v778_v23  ;;  %v875_v24 = vstv %s1462_s7  ;;  %s1472_s7 = sld [smem:[#allocation2 + $0x4]] }
 0x316   :  { %1732 = vrsqrt.f32 %v328_v26  ;;  %v1457_v26 = vld [vmem:[%s2213_s24] ss:$0 sm:$0xff]  ;;  %s1463_s24 = sld [smem:[#allocation2 + $0x3]] }
 0x319   :  { %v320_v27 = vpop.xlane.xlu1 %319 }
 0x31a   :  { %v326_v28 = vmul.f32 0.020833334, %v320_v27 }
 0x31c   :  { %v330_v29 = vadd.f32 1e-05, %v326_v28 }
 0x31d   :  { %v323_v30 = vpop.xlane.xlu0 %322 }
 0x31e   :  { %1734 = vrsqrt.f32 %v330_v29  ;;  %v327_v31 = vmul.f32 0.020833334, %v323_v30  ;;  %v705_v30 = vstv %s1451_s0 }
 0x31f   :  { %v1731_v32 = vpop.eup %1730 }
 0x320   :  { %v1733_v34 = vpop.eup %1732  ;;  %v331_v35 = vadd.f32 1e-05, %v327_v31  ;;  %v337_v36 = vmul.f32 %v1731_v32, %v305_v60 }
 0x321   :  { %v336_v37 = vmul.f32 %v1733_v34, %v304_v61 }
 0x322   :  { %1736 = vrsqrt.f32 %v331_v35  ;;  %v347_v39 = vmul.f32 %v1444_v33, %v337_v36 }
 0x323   :  { %v346_v40 = vmul.f32 %v1444_v33, %v336_v37 }
 0x324   :  { %v357_v42 = vadd.f32 %v1445_v38, %v347_v39 }
 0x325   :  { %v356_v41 = vadd.f32 %v1445_v38, %v346_v40 }
 0x327   :  { %1566 = vmatprep.mubr.msk.f32.mxu1 %vm285_vm6, %v356_v41 }
 0x328   :  { %v1735_v43 = vpop.eup %1734  ;;  %1567 = vmatmul.mubr.msk.f32.vlgmr.msra.gmra.mrb[0].mxu1 %vm285_vm6, %v357_v42 }
 0x329   :  { %v338_v44 = vmul.f32 %v1735_v43, %v306_v4  ;;  %1680 = vmatpush3.bf16.msra.mxu1 %v1677_v1  ;;  %v585_v4 = vstv %s473_s2 }
 0x32a   :  { %1686 = vmatprep.subr.bf16.mxu1 %v1685_v25 }
 0x32b   :  { %v348_v45 = vmul.f32 %v1444_v33, %v338_v44 }
 0x32c   :  { %v1737_v46 = vpop.eup %1736 }
 0x32d   :  { %v358_v47 = vadd.f32 %v1445_v38, %v348_v45  ;;  %v339_v48 = vmul.f32 %v1737_v46, %v307_v8 }
 0x32f   :  { %1569 = vmatprep.mubr.msk.f32.mxu1 %vm285_vm6, %v358_v47  ;;  %v349_v49 = vmul.f32 %v1444_v33, %v339_v48 }
 0x331   :  { %v359_v50 = vadd.f32 %v1445_v38, %v349_v49 }
 0x333   :  { %1570 = vmatmul.mubr.msk.f32.gmra.mrb[2].mxu1 %vm285_vm6, %v359_v50 }
 0x3fb   :  { %v1568_v55 = vpop.f32.mrb[0].mxu1 }
 0x3fc   :  { %v451_v56 = vpop.f32.mrb[1].mxu1  ;;  %v457_v58 = vadd.f32 %v1568_v55, %v1446_v54 }
 0x3fd   :  { %v452_v57 = vadd.f32 %v1446_v54, %v451_v56 }
 0x3ff   :  { %1576 = vmatprep.mubr.msk.f32.mxu0 %vm273_vm4, %v452_v57 }
 0x400   :  { %1577 = vmatmul.mubr.msk.f32.vlgmr.msra.gmra.mrb[4].mxu0 %vm273_vm4, %v457_v58 }
 0x401   :  { %1684 = vmatpush3.bf16.msra.mxu0 %v1681_v22  ;;  %v1464_v22 = vld [vmem:[%s2172_s12] ss:$0 sm:$0xff] }
 0x406   :  { %v1571_v59 = vpop.f32.mrb[2].mxu1 }
 0x407   :  { %v461_v60 = vpop.f32.mrb[3].mxu1  ;;  %v2010_v62 = vadd.f32 %v1571_v59, %v1446_v54 }
 0x408   :  { %v2008_v61 = vadd.f32 %v1446_v54, %v461_v60 }
 0x40a   :  { %1579 = vmatprep.mubr.msk.f32.mxu0 %vm273_vm4, %v2008_v61 }
 0x40b   :  { %1580 = vmatmul.mubr.msk.f32.gmra.mrb[6].mxu0 %vm273_vm4, %v2010_v62 }
 0x4d3   :  { %v1578_v3 = vpop.f32.mrb[4].mxu0 }
 0x4d4   :  { %v568_v5 = vadd.f32 %v1578_v3, %v1452_v2  ;;  %v562_v6 = vpop.f32.mrb[5].mxu0 }
 0x4d5   :  { %v563_v7 = vadd.f32 %v1452_v2, %v562_v6 }
 0x4d6   :  { %v587_v8 = vmul.f32 %v585_v4, %v568_v5  ;;  %vm582_vm8 = vcmp.ge.f32.partialorder %v568_v5, 0.0 }
 0x4d7   :  { %vm581_vm9 = vcmp.ge.f32.partialorder %v563_v7, 0.0  ;;  %v586_v9 = vmul.f32 %v585_v4, %v563_v7 }
 0x4d8   :  { %v591_v11 = vsel %vm582_vm8, %v568_v5, %v587_v8  ;;  %vm771_vm8 = vcmask 1045504  }
 0x4d9   :  { %v590_v10 = vsel %vm581_vm9, %v563_v7, %v586_v9  ;;  %vm1783_vm9 = vmmov 0  }
 0x4da   :  { %1586 = vmatprep.mubr.msk.f32.mxu1 %vm273_vm4, %v590_v10 }
 0x4db   :  { %1587 = vmatmul.mubr.msk.f32.vlgmr.msra.gmra.mrb[4].mxu1 %vm273_vm4, %v591_v11 }
 0x4dc   :  { %1688 = vmatpush3.bf16.msra.mxu1 %v1685_v25 }
 0x4de   :  { %v1581_v12 = vpop.f32.mrb[6].mxu0 }
 0x4df   :  { %v578_v13 = vadd.f32 %v1581_v12, %v1452_v2  ;;  %v572_v14 = vpop.f32.mrb[7].mxu0 }
 0x4e0   :  { %v573_v15 = vadd.f32 %v1452_v2, %v572_v14 }
 0x4e1   :  { %v589_v16 = vmul.f32 %v585_v4, %v578_v13  ;;  %vm584_vm10 = vcmp.ge.f32.partialorder %v578_v13, 0.0 }
 0x4e2   :  { %vm583_vm11 = vcmp.ge.f32.partialorder %v573_v15, 0.0  ;;  %v588_v17 = vmul.f32 %v585_v4, %v573_v15 }
 0x4e3   :  { %v593_v19 = vsel %vm584_vm10, %v578_v13, %v589_v16  ;;  %v780_v16 = vld [vmem:[%s2173_s13 + $0x10] sm:$0xff] }
 0x4e4   :  { %v592_v18 = vsel %vm583_vm11, %v573_v15, %v588_v17  ;;  %v781_v17 = vld [vmem:[%s2173_s13 + $0x18] sm:$0xff] }
 0x4e5   :  { %1589 = vmatprep.mubr.msk.f32.mxu1 %vm273_vm4, %v592_v18  ;;  %v1689_v18 = vpack.c.bf16 %v781_v17, %v780_v16 }
 0x4e6   :  { %1590 = vmatmul.mubr.msk.f32.gmra.mrb[6].mxu1 %vm273_vm4, %v593_v19  ;;  %v784_v19 = vld [vmem:[%s2175_s15] sm:$0xff] }
 0x4e7   :  { %1690 = vmatprep.subr.bf16.mxu1 %v1689_v18  ;;  %v1693_v21 = vpack.c.bf16 %v785_v20, %v784_v19  ;;  %v1246_v19 = vstv %s1473_s9 }
 0x4e8   :  { %1692 = vmatpush3.bf16.msra.mxu1 %v1689_v18 }
 0x4e9   :  { %1694 = vmatprep.subr.bf16.mxu1 %v1693_v21 }
 0x5ae   :  { %v1588_v27 = vpop.f32.mrb[4].mxu1 }
 0x5af   :  { %v684_v28 = vadd.f32 %v1588_v27, %v1457_v26  ;;  %v678_v29 = vpop.f32.mrb[5].mxu1 }
 0x5b0   :  { %v679_v31 = vadd.f32 %v1457_v26, %v678_v29 }
 0x5b1   :  { %v698_v32 = vadd.f32 %v684_v28, %v457_v58 }
 0x5b2   :  { %v697_v33 = vadd.f32 %v679_v31, %v452_v57 }
 0x5b3   :  { %vm702_vm12 = vcmp.ge.f32.partialorder %v698_v32, 0.0  ;;  %v707_v34 = vmul.f32 %v705_v30, %v698_v32 }
 0x5b4   :  { %vm701_vm13 = vcmp.ge.f32.partialorder %v697_v33, 0.0  ;;  %v706_v35 = vmul.f32 %v705_v30, %v697_v33 }
 0x5b5   :  { %v711_v36 = vsel %vm702_vm12, %v698_v32, %v707_v34  ;;  %v1070_v32 = vld [vmem:[%s2176_s16] sm:$0xff] }
 0x5b6   :  { %v725_v37 = vrot.slane %v711_v36, 1  ;;  %v710_v38 = vsel %vm701_vm13, %v697_v33, %v706_v35  ;;  %v722_v41 = vrot.slane %v711_v36, 2  ;;  %v1071_v33 = vld [vmem:[%s2176_s16 + $0x8] sm:$0xff]  ;;  %v1782_v35 = vmov 0.0|0.0  }
 0x5b7   :  { %v715_v39 = vrot.slane %v710_v38, 1  ;;  %v718_v43 = vrot.slane %v710_v38, 2  ;;  %v1698_v34 = vpack.c.bf16 %v1071_v33, %v1070_v32  ;;  %1697 = vmatprep.subr.bf16.mxu0 %v1782_v35 }
 0x5b8   :  { %v727_v40 = vmax.f32 %v711_v36, %v725_v37  ;;  %v1073_v37 = vld [vmem:[%s2176_s16 + $0x18] sm:$0xff] }
 0x5b9   :  { %v717_v42 = vmax.f32 %v710_v38, %v715_v39  ;;  %v1591_v44 = vpop.f32.mrb[6].mxu1  ;;  %v1784_v39 = vmov 0.0  }
 0x5ba   :  { %v694_v45 = vadd.f32 %v1591_v44, %v1457_v26  ;;  %v688_v46 = vpop.f32.mrb[7].mxu1  ;;  %v728_v47 = vmax.f32 %v727_v40, %v722_v41  ;;  %v1467_v40 = vld [vmem:[%s2174_s14] ss:$0 sm:$0xff] }
 0x5bb   :  { %v720_v48 = vmax.f32 %v717_v42, %v718_v43  ;;  %v724_v49 = vmax.f32 %v717_v42, %v722_v41  ;;  %v689_v50 = vadd.f32 %v1457_v26, %v688_v46  ;;  %v1046_v42 = vstv %s1463_s24 }
 0x5bc   :  { %v700_v51 = vadd.f32 %v694_v45, %v2010_v62  ;;  %v752_v56 = vrot.slane %v728_v47, 6 }
 0x5bd   :  { %v746_v52 = vrot.slane %v720_v48, 2  ;;  %v749_v53 = vrot.slane %v724_v49, 4  ;;  %v699_v54 = vadd.f32 %v689_v50, %v2008_v61 }
 0x5be   :  { %vm704_vm2 = vcmp.ge.f32.partialorder %v700_v51, 0.0  ;;  %v709_v55 = vmul.f32 %v705_v30, %v700_v51 }
 0x5bf   :  { %v763_v57 = vsel %vm762_vm14, %v720_v48, %v746_v52  ;;  %vm703_vm6 = vcmp.ge.f32.partialorder %v699_v54, 0.0  ;;  %v708_v58 = vmul.f32 %v705_v30, %v699_v54 }
 0x5c0   :  { %v765_v59 = vsel %vm764_vm15, %v763_v57, %v749_v53  ;;  %v713_v60 = vsel %vm704_vm2, %v700_v51, %v709_v55  ;;  %v1077_v57 = vld [vmem:[%s2178_s18 + $0x8] sm:$0xff] }
 0x5c1   :  { %v712_v63 = vsel %vm703_vm6, %v699_v54, %v708_v58  ;;  %v767_v0 = vsel %vm766_vm3, %v765_v59, %v752_v56  ;;  %v739_v2 = vrot.slane %v713_v60, 1  ;;  %v742_v10 = vrot.slane %v713_v60, 2  ;;  %v1076_v56 = vld [vmem:[%s2178_s18] sm:$0xff] }
 0x5c2   :  { %v730_v1 = vrot.slane %v712_v63, 1  ;;  %v768_v62 = vsel %vm152_vm1, %v767_v0, %v728_v47  ;;  %v733_v61 = vrot.slane %v712_v63, 2 }
 0x5c3   :  { %v741_v7 = vmax.f32 %v713_v60, %v739_v2  ;;  %v1704_v60 = vpack.c.bf16 %v1077_v57, %v1076_v56 }
 0x5c4   :  { %v732_v3 = vmax.f32 %v711_v36, %v730_v1  ;;  %v736_v4 = vmax.f32 %v712_v63, %v730_v1  ;;  %v1072_v36 = vld [vmem:[%s2176_s16 + $0x10] sm:$0xff]  ;;  %s1479_s16 = sld [smem:[#allocation2 + $0x6]] }
 0x5c5   :  { %v744_v14 = vmax.f32 %v741_v7, %v742_v10  ;;  %v1701_v38 = vpack.c.bf16 %v1073_v37, %v1072_v36  ;;  %v1078_v1 = vld [vmem:[%s2178_s18 + $0x10] sm:$0xff]  ;;  %v1257_v10 = vld [vmem:[%s2180_s20 + $0x8] sm:$0xff]  ;;  %v1343_v37 = vld [vmem:[%s2183_s23] sm:$0x1] }
 0x5c6   :  { %v735_v5 = vmax.f32 %v732_v3, %v733_v61  ;;  %v737_v6 = vmax.f32 %v736_v4, %v733_v61  ;;  %v1474_v3 = vld [vmem:[%s2177_s17] ss:$0 sm:$0xff]  ;;  %v1162_v4 = vstv %s1472_s7  ;;  %s1756_s7 = scalar_lea.vmem %s1428_s3, 32 }
 0x5c8   :  { %v755_v8 = vrot.slane %v735_v5, 2  ;;  %v758_v9 = vrot.slane %v737_v6, 4  ;;  %v760_v11 = vrot.slane %v737_v6, 6 }
 0x5ca   :  { %v770_v12 = vsel %vm769_vm7, %v768_v62, %v755_v8  ;;  %v1079_v62 = vld [vmem:[%s2178_s18 + $0x18] sm:$0xff] }
 0x5cb   :  { %v772_v13 = vsel %vm771_vm8, %v770_v12, %v758_v9  ;;  %v1707_v2 = vpack.c.bf16 %v1079_v62, %v1078_v1  ;;  %v1256_v9 = vld [vmem:[%s2180_s20] sm:$0xff]  ;;  %v1258_v12 = vld [vmem:[%s2180_s20 + $0x10] sm:$0xff] }
 0x5cc   :  { %v773_v15 = vsel %vm104_vm0, %v772_v13, %v760_v11  ;;  %v1710_v11 = vpack.c.bf16 %v1257_v10, %v1256_v9  ;;  %v1259_v13 = vld [vmem:[%s2180_s20 + $0x18] sm:$0xff] }
 0x5cd   :  { %1596 = vmatprep.mubr.msk.f32.mxu0 %vm273_vm4, %v773_v15 }
 0x5ce   :  { %1597 = vmatmul.mubr.msk.f32.vlgmr.msra.gmra.mrb[8].mxu0 %vm273_vm4, %v744_v14 }
 0x5cf   :  { %1699 = vmatpush3.bf16.msra.mxu0 %v1698_v34  ;;  %1625 = vmatprep.mubr.msk.f32.mxu0 %vm1783_vm9, %v1784_v39 }
 0x5d0   :  { %1700 = vmatprep.subr.bf16.mxu0 %v1782_v35 }
 0x5d3   :  { %1702 = vmatpush3.bf16.msra.mxu0 %v1701_v38 }
 0x5d4   :  { %1703 = vmatprep.subr.bf16.mxu0 %v1782_v35 }
 0x6a1   :  { %v1598_v23 = vpop.f32.mrb[8].mxu0 }
 0x6a2   :  { %v870_v25 = vadd.f32 %v1598_v23, %v1464_v22  ;;  %v864_v26 = vpop.f32.mrb[9].mxu0 }
 0x6a3   :  { %v865_v27 = vadd.f32 %v1464_v22, %v864_v26 }
 0x6a4   :  { %v877_v28 = vmul.f32 %v875_v24, %v870_v25  ;;  %vm874_vm0 = vcmp.ge.f32.partialorder %v870_v25, 0.0 }
 0x6a5   :  { %vm873_vm1 = vcmp.ge.f32.partialorder %v865_v27, 0.0  ;;  %v876_v29 = vmul.f32 %v875_v24, %v865_v27 }
 0x6a6   :  { %v879_v31 = vsel %vm874_vm0, %v870_v25, %v877_v28  ;;  %v1342_v28 = vld [vmem:[%s2182_s22 + $0x8] sm:$0xff] }
 0x6a7   :  { %v878_v30 = vsel %vm873_vm1, %v865_v27, %v876_v29  ;;  %v1341_v27 = vld [vmem:[%s2182_s22] sm:$0xff] }
 0x6a8   :  { %1607 = vmatprep.mubr.msk.f32.mxu1 %vm278_vm5, %v878_v30  ;;  %v1716_v29 = vpack.c.bf16 %v1342_v28, %v1341_v27  ;;  %v1336_v30 = vstv %s1479_s16 }
 0x6a9   :  { %1608 = vmatmul.mubr.msk.f32.vlgmr.msra.gmra.mrb[8].mxu1 %vm278_vm5, %v879_v31  ;;  %1738 = vrcp.f32 %v1336_v30  ;;  %v1260_v31 = vld [vmem:[%s2181_s21] sm:$0x1]  ;;  %s1752_s21 = scalar_lea.vmem %s1428_s3, 16 }
 0x6aa   :  { %1696 = vmatpush3.bf16.msra.mxu1 %v1693_v21  ;;  %1614 = vmatprep.mubr.msk.f32.mxu1 %vm273_vm4, %v773_v15  ;;  %v1476_v15 = vld [vmem:[%s2179_s19] ss:$0 sm:$0xff]  ;;  %p1753_p5 = scmp.ne.s32.totalorder %s1428_s3, %s1752_s21  ;;  %p1758_p7 = scmp.lt.s32.totalorder %s1756_s7, %s1752_s21 }
 0x6ab   :  { %1709 = vmatprep.subr.bf16.mxu1 %v1782_v35 }
 0x6ac   :  { %p1759_p8 = por %p1758_p7, %p1757_p6 }
 0x6ae   :  { %p1760_p9 = pnand %p1759_p8, %p1753_p5 }
 0x6b1   :  { %1615 = vmatmul.mubr.msk.f32.vlgmr.msra.gmra.mrb[8].mxu1 %vm273_vm4, %v744_v14  ;;  %v1713_v14 = vpack.c.bf16 %v1259_v13, %v1258_v12 }
 0x6b2   :  { %1647 = vmatprep.mubr.msk.f32.mxu1 %vm1783_vm9, %v1784_v39  ;;  %1711 = vmatpush3.bf16.msra.mxu1 %v1710_v11 }
 0x6b3   :  { %1712 = vmatprep.subr.bf16.mxu1 %v1782_v35  ;;  %v1739_v32 = vpop.eup %1738 }
 0x6b6   :  { %1714 = vmatpush3.bf16.msra.mxu1 %v1713_v14 }
 0x784   :  { %v1616_v41 = vpop.f32.mrb[8].mxu1 }
 0x785   :  { %v1718_v43 = vadd.f32 %v1616_v41, %v1467_v40  ;;  %v1033_v44 = vpop.f32.mrb[9].mxu1 }
 0x786   :  { %v1719_v45 = vadd.f32 %v1467_v40, %v1033_v44 }
 0x787   :  { %vm1045_vm10 = vcmp.ge.f32.partialorder %v1718_v43, 0.0  ;;  %v1048_v46 = vmul.f32 %v1718_v43, %v1046_v42 }
 0x788   :  { %vm1044_vm11 = vcmp.ge.f32.partialorder %v1719_v45, 0.0  ;;  %v1047_v47 = vmul.f32 %v1719_v45, %v1046_v42 }
 0x789   :  { %v1050_v48 = vsel %vm1045_vm10, %v1718_v43, %v1048_v46 }
 0x78a   :  { %v1049_v49 = vsel %vm1044_vm11, %v1719_v45, %v1047_v47  ;;  %v1059_v51 = vrot.slane %v1050_v48, 2 }
 0x78b   :  { %v1052_v50 = vrot.slane %v1049_v49, 1  ;;  %v1055_v53 = vrot.slane %v1049_v49, 2 }
 0x78d   :  { %v1054_v52 = vmax.f32 %v1049_v49, %v1052_v50 }
 0x78f   :  { %v1057_v54 = vmax.f32 %v1054_v52, %v1055_v53  ;;  %v1061_v55 = vmax.f32 %v1054_v52, %v1059_v51 }
 0x791   :  { %v1063_v58 = vrot.slane %v1057_v54, 2  ;;  %v1066_v59 = vrot.slane %v1061_v55, 4 }
 0x793   :  { %v1068_v63 = vsel %vm762_vm14, %v1057_v54, %v1063_v58  ;;  %vm1417_vm14 = vcmask 24576  }
 0x794   :  { %v1069_v0 = vsel %vm764_vm15, %v1068_v63, %v1066_v59 }
 0x795   :  { %1626 = vmatmul.mubr.msk.f32.vlgmr.msra.gmra.mrb[10].mxu0 %vm278_vm5, %v1069_v0 }
 0x796   :  { %1705 = vmatpush3.bf16.msra.mxu0 %v1704_v60  ;;  %1636 = vmatprep.mubr.msk.f32.mxu0 %vm1783_vm9, %v1784_v39 }
 0x797   :  { %1706 = vmatprep.subr.bf16.mxu0 %v1782_v35 }
 0x79a   :  { %1708 = vmatpush3.bf16.msra.mxu0 %v1707_v2 }
 0x79b   :  { %1715 = vmatprep.subr.bf16.mxu0 %v1782_v35 }
 0x868   :  { %v1157_v61 = vpop.f32.mrb[10].mxu0 }
 0x869   :  { %v1158_v5 = vadd.f32 %v1474_v3, %v1157_v61  ;;  %v1627_v6 = vpop.f32.mrb[11].mxu0 }
 0x86b   :  { %vm1161_vm12 = vcmp.ge.f32.partialorder %v1158_v5, 0.0  ;;  %v1163_v7 = vmul.f32 %v1162_v4, %v1158_v5 }
 0x86d   :  { %v1164_v8 = vsel %vm1161_vm12, %v1158_v5, %v1163_v7 }
 0x86e   :  { %1637 = vmatmul.mubr.msk.f32.vlgmr.msra.gmra.mrb[12].mxu0 %vm278_vm5, %v1164_v8 }
 0x86f   :  { %1654 = vmatprep.mubr.msk.f32.mxu0 %vm1783_vm9, %v1784_v39  ;;  %1717 = vmatpush3.bf16.msra.mxu0 %v1716_v29 }
 0x941   :  { %v1240_v16 = vpop.f32.mrb[12].mxu0 }
 0x942   :  { %v1241_v17 = vadd.f32 %v1476_v15, %v1240_v16  ;;  %v1638_v18 = vpop.f32.mrb[13].mxu0 }
 0x944   :  { %v1244_v20 = vadd.f32 %v1241_v17, %v1069_v0 }
 0x946   :  { %vm1245_vm13 = vcmp.ge.f32.partialorder %v1244_v20, 0.0  ;;  %v1247_v21 = vmul.f32 %v1246_v19, %v1244_v20 }
 0x948   :  { %v1248_v22 = vsel %vm1245_vm13, %v1244_v20, %v1247_v21 }
 0x949   :  { %v1250_v23 = vrot.slane %v1248_v22, 1  ;;  %v1253_v25 = vrot.slane %v1248_v22, 2 }
 0x94b   :  { %v1252_v24 = vmax.f32 %v1248_v22, %v1250_v23 }
 0x94d   :  { %v1255_v26 = vmax.f32 %v1252_v24, %v1253_v25 }
 0x94f   :  { %1648 = vmatmul.mubr.msk.f32.vlgmr.msra.gmra.mrb[10].mxu1 %vm278_vm5, %v1255_v26  ;;  %vm1339_vm5 = vcmask 122880  }
 0xa22   :  { %v1330_v33 = vpop.f32.mrb[10].mxu1 }
 0xa23   :  { %v1331_v34 = vadd.f32 %v1330_v33, %v1260_v31  ;;  %v1649_v35 = vpop.f32.mrb[11].mxu1 }
 0xa25   :  { %v1338_v36 = vmul.f32 %v1739_v32, %v1331_v34 }
 0xa27   :  { %1340 = vst.msk [vmem:[%s2185_s25] sm:$0x1] %vm1339_vm5, %v1338_v36  ;;  %1655 = vmatmul.mubr.msk.f32.vlgmr.msra.gmra.mrb[14].mxu0 %vm273_vm4, %v1338_v36 }
 0xafa   :  { %v1413_v38 = vpop.f32.mrb[14].mxu0 }
 0xafb   :  { %v1414_v39 = vadd.f32 %v1413_v38, %v1343_v37  ;;  %v1656_v40 = vpop.f32.mrb[15].mxu0 }
 0xafd   :  { %1418 = vst.msk [vmem:[#allocation5] sm:$0x1] %vm1417_vm14, %v1414_v39 }
 0xafe   :  { %1763 = shalt.err (!%p1760_p9)
}
 0xaff   :  { %s1764_s23 = scalar_lea.hbm %s2186_s26, 16 }
 0xb00   :  { %p1765_p10 = scmp.ne.s32.totalorder %s2186_s26, %s1764_s23  ;;  %p1768_p11 = scmp.lt.u32.totalorder %s1764_s23, %s2186_s26 }
 0xb02   :  { %p1770_p12 = pnand %p1768_p11, %p1765_p10 }
 0xb04   :  { %1773 = shalt.err (!%p1770_p12)
}
 0xb05   :  { %1430 = dma.vmem_to_hbm [thread:$0]  %s1428_s3, 16, %s2186_s26, [#allocation3]  }
 0xb06   :  { %1776 = dma.done.wait [#allocation3], 16  }
 0xb07   :  { %1777 = vsyncadd [#allocation3], 4294967280 }
 0xb08   :  { %1436 = vsyncpa [#allocation3], 1 }
 0xb09   :  { %1437 = vsyncpa [#allocation4], 1 }

// kernel: spex_plus_dprnn_forward.11
= control target key start
LH: loop header
LB: loop body
LE: loop exit
PB: predicated region body
PF: predicated region fallthrough
CT: control target
= control target key end

     0   :  { %v309_v0 = vmov 0.0|0.0   ;;  %vm310_vm0 = vmmov 0   ;;  %v311_v3 = vmov 0.0   ;;  %vm32_vm1 = vcmask 130048   ;;  %s312_s11 = smov 118   ;;  %s400_s1 = inlined_call_operand.vmem [shape: f32[16,16], index: 1, kind: input, shape index: {}]   ;;  %s401_s0 = inlined_call_operand.vmem [shape: f32[17,16], index: 0, kind: input, shape index: {}]   ;;  %s402_s4 = inlined_call_operand.vmem [shape: f32[16,20], index: 4, kind: input, shape index: {}]   ;;  %s403_s2 = inlined_call_operand.vmem [shape: f32[1,16], index: 2, kind: input, shape index: {}]   ;;  %s404_s3 = inlined_call_operand.vmem [shape: f32[17,16], index: 3, kind: input, shape index: {}]   ;;  %s405_s5 = inlined_call_operand.vmem [shape: f32[18,10], index: 5, kind: output, shape index: {}]  }
   0x1   :  { %299 = vmatprep.subr.bf16.mxu0 %v309_v0  ;;  %v23_v1 = vld [vmem:[%s400_s1] sm:$0xff]  ;;  %v24_v2 = vld [vmem:[%s400_s1 + $0x8] sm:$0xff]  ;;  %277 = vmatprep.mubr.msk.f32.mxu0 %vm310_vm0, %v311_v3  ;;  %v22_v7 = vld [vmem:[%s401_s0 + $0x10] sm:$0x1]  ;;  %vm224_vm2 = vcmask 1040384   ;;  %vm247_vm3 = vcmask 80896  }
   0x2   :  { %v300_v4 = vpack.c.bf16 %v24_v2, %v23_v1  ;;  %302 = vmatprep.subr.bf16.mxu1 %v309_v0  ;;  %290 = vmatprep.mubr.msk.f32.mxu1 %vm310_vm0, %v311_v3  ;;  %v20_v5 = vld [vmem:[%s401_s0] sm:$0xff]  ;;  %v21_v6 = vld [vmem:[%s401_s0 + $0x8] sm:$0xff]  ;;  %v127_v27 = vld [vmem:[%s404_s3 + $0x10] sm:$0x1]  ;;  %vm250_vm4 = vcmask 74752  }
   0x3   :  { %v131_v8 = vld [vmem:[%s402_s4] sm:$0xff]  ;;  %v132_v9 = vld [vmem:[%s402_s4 + $0x8] sm:$0xff] }
   0x4   :  { %301 = vmatpush3.bf16.msra.mxu0 %v300_v4  ;;  %v303_v10 = vpack.c.bf16 %v132_v9, %v131_v8  ;;  %v256_v11 = vld [vmem:[%s403_s2] ss:$0 sm:$0xff]  ;;  %v126_v21 = vld [vmem:[%s404_s3 + $0x8] sm:$0xff] }
   0x5   :  { %v125_v15 = vld [vmem:[%s404_s3] sm:$0xff] }
   0x6   :  { %304 = vmatpush3.bf16.msra.mxu1 %v303_v10 }
   0x7   :  { %278 = vmatmul.mubr.msk.f32.vlgmr.msra.gmra.mrb[0].mxu0 %vm32_vm1, %v20_v5 }
   0x8   :  { %280 = vmatprep.mubr.msk.f32.mxu0 %vm310_vm0, %v311_v3 }
   0xb   :  { %281 = vmatmul.mubr.msk.f32.gmra.mrb[2].mxu0 %vm32_vm1, %v21_v6 }
   0xc   :  { %283 = vmatprep.mubr.msk.f32.mxu0 %vm310_vm0, %v311_v3 }
   0xf   :  { %284 = vmatmul.mubr.msk.f32.gmra.mrb[4].mxu0 %vm32_vm1, %v22_v7 }
  0xda   :  { %v108_v12 = vpop.f32.mrb[0].mxu0 }
  0xdb   :  { %v109_v13 = vadd.f32 %v256_v11, %v108_v12  ;;  %v279_v14 = vpop.f32.mrb[1].mxu0 }
  0xdd   :  { %v122_v16 = vmax.f32 %v109_v13, 0.0 }
  0xde   :  { %v113_v17 = vpop.f32.mrb[2].mxu0 }
  0xdf   :  { %v128_v18 = vmul.f32 %v125_v15, %v122_v16  ;;  %v114_v19 = vadd.f32 %v256_v11, %v113_v17  ;;  %v282_v20 = vpop.f32.mrb[3].mxu0 }
  0xe1   :  { %v123_v22 = vmax.f32 %v114_v19, 0.0  ;;  %291 = vmatmul.mubr.msk.f32.vlgmr.msra.gmra.mrb[0].mxu1 %vm32_vm1, %v128_v18 }
  0xe2   :  { %v118_v23 = vpop.f32.mrb[4].mxu0  ;;  %293 = vmatprep.mubr.msk.f32.mxu1 %vm310_vm0, %v311_v3 }
  0xe3   :  { %v129_v24 = vmul.f32 %v126_v21, %v123_v22  ;;  %v119_v25 = vadd.f32 %v256_v11, %v118_v23  ;;  %v285_v26 = vpop.f32.mrb[5].mxu0 }
  0xe5   :  { %v124_v28 = vmax.f32 %v119_v25, 0.0  ;;  %294 = vmatmul.mubr.msk.f32.gmra.mrb[2].mxu1 %vm32_vm1, %v129_v24 }
  0xe6   :  { %296 = vmatprep.mubr.msk.f32.mxu1 %vm310_vm0, %v311_v3 }
  0xe7   :  { %v130_v29 = vmul.f32 %v127_v27, %v124_v28 }
  0xe9   :  { %297 = vmatmul.mubr.msk.f32.gmra.mrb[4].mxu1 %vm32_vm1, %v130_v29 }
 0x1b4   :  { %v208_v30 = vpop.f32.mrb[0].mxu1 }
 0x1b5   :  { %v292_v31 = vpop.f32.mrb[1].mxu1  ;;  %v225_v32 = vrot.slane %v208_v30, 7 }
 0x1b7   :  { %228 = vrot.lane.b32.xlu0 %v225_v32, %s312_s11 }
 0x1b8   :  { %v213_v33 = vpop.f32.mrb[2].mxu1 }
 0x1b9   :  { %v226_v34 = vrot.slane %v213_v33, 7  ;;  %v295_v35 = vpop.f32.mrb[3].mxu1 }
 0x1bb   :  { %232 = vrot.lane.b32.xlu0 %v226_v34, %s312_s11  ;;  %v227_v36 = vsel %vm224_vm2, %v225_v32, %v226_v34 }
 0x1bc   :  { %230 = vrot.lane.b32.xlu1 %v227_v36, %s312_s11  ;;  %v218_v37 = vpop.f32.mrb[4].mxu1 }
 0x1bd   :  { %v241_v38 = vrot.slane %v218_v37, 7  ;;  %v298_v39 = vpop.f32.mrb[5].mxu1 }
 0x1c0   :  { %242 = vrot.lane.b32.xlu1 %v241_v38, %s312_s11 }
 0x229   :  { %v229_v40 = vpop.permute.xlu0 %228 }
 0x22a   :  { %v237_v41 = vadd.f32 %v229_v40, %v208_v30 }
 0x22c   :  { %v245_v42 = vsel %vm224_vm2, %v208_v30, %v237_v41 }
 0x22d   :  { %248 = vst.msk [vmem:[%s405_s5] sm:$0xff] %vm247_vm3, %v245_v42  ;;  %v233_v43 = vpop.permute.xlu0 %232 }
 0x22e   :  { %v231_v44 = vpop.permute.xlu1 %230  ;;  %v239_v46 = vadd.f32 %v233_v43, %v218_v37 }
 0x22f   :  { %v238_v45 = vadd.f32 %v231_v44, %v213_v33 }
 0x231   :  { %249 = vst.msk [vmem:[%s405_s5 + $0x8] sm:$0xff] %vm247_vm3, %v238_v45 }
 0x232   :  { %v243_v47 = vpop.permute.xlu1 %242 }
 0x233   :  { %v246_v48 = vsel %vm224_vm2, %v239_v46, %v243_v47 }
 0x234   :  { %251 = vst.msk [vmem:[%s405_s5 + $0x10] sm:$0x3] %vm250_vm4, %v246_v48 }

// kernel: spex_plus_dprnn_forward.10
= control target key start
LH: loop header
LB: loop body
LE: loop exit
PB: predicated region body
PF: predicated region fallthrough
CT: control target
= control target key end

     0   :  { %v2557_v0 = vmov 0.0|0.0   ;;  %v2558_v1 = vmov 0.0   ;;  %vm2559_vm0 = vmmov 0   ;;  %vm146_vm1 = vcmask 130048   ;;  %s2560_s21 = smov 112   ;;  %s2562_s24 = smov 16   ;;  %s2987_s1 = inlined_call_operand.vmem [shape: f32[16,32], index: 1, kind: input, shape index: {}]   ;;  %s2988_s2 = inlined_call_operand.vmem [shape: f32[8,32], index: 2, kind: input, shape index: {}]   ;;  %s2989_s0 = inlined_call_operand.vmem [shape: f32[4,8,16], index: 0, kind: input, shape index: {}]   ;;  %s2990_s3 = inlined_call_operand.vmem [shape: f32[1,32], index: 3, kind: input, shape index: {}]   ;;  %s2991_s4 = inlined_call_operand.vmem [shape: f32[16,32], index: 4, kind: input, shape index: {}]   ;;  %s2992_s5 = inlined_call_operand.vmem [shape: f32[8,32], index: 5, kind: input, shape index: {}]   ;;  %s2993_s6 = inlined_call_operand.vmem [shape: f32[1,32], index: 6, kind: input, shape index: {}]   ;;  %s2994_s7 = inlined_call_operand.vmem [shape: f32[16,16], index: 7, kind: input, shape index: {}]   ;;  %s2995_s8 = inlined_call_operand.vmem [shape: f32[1,16], index: 8, kind: input, shape index: {}]   ;;  %s2996_s11 = inlined_call_operand.vmem [shape: f32[16,16], index: 11, kind: input, shape index: {}]   ;;  %s2997_s9 = inlined_call_operand.vmem [shape: f32[1,16], index: 9, kind: input, shape index: {}]   ;;  %s2998_s10 = inlined_call_operand.vmem [shape: f32[1,16], index: 10, kind: input, shape index: {}]   ;;  %s2999_s13 = inlined_call_operand.<no memory space> [shape: f32[1], index: 13, kind: input, shape index: {}]   ;;  %s3000_s12 = inlined_call_operand.vmem [shape: f32[1,16], index: 12, kind: input, shape index: {}]   ;;  %s3001_s14 = inlined_call_operand.vmem [shape: f32[4,8,16], index: 14, kind: output, shape index: {}]  }
   0x1   :  { %2430 = vmatprep.subr.bf16.mxu1 %v2557_v0  ;;  %2278 = vmatprep.subr.mxu0 %v2558_v1  ;;  %v48_v2 = vld [vmem:[%s2987_s1] sm:$0xff]  ;;  %v49_v3 = vld [vmem:[%s2987_s1 + $0x8] sm:$0xff]  ;;  %s2563_s25 = smov 104   ;;  %vm72_vm2 = vcmask 64512   ;;  %v2713_v45 = vld [vmem:[%s2989_s0 + $0x10] sm:$0xff] }
   0x2   :  { %v2650_v4 = vld [vmem:[%s2988_s2] sm:$0xff]  ;;  %v2652_v5 = vpack.c.bf16 %v49_v3, %v48_v2  ;;  %2280 = vmatprep.mubr.msk.f32.mxu0 %vm2559_vm0, %v2558_v1  ;;  %2287 = vmatprep.mubr.msk.f32.mxu1 %vm2559_vm0, %v2558_v1  ;;  %v2689_v24 = vld [vmem:[%s2989_s0 + $0x8] sm:$0xff] }
   0x3   :  { %2279 = vmatpush3.msra.mxu0 %v2650_v4  ;;  %v2664_v6 = vld [vmem:[%s2989_s0] sm:$0xff] }
   0x4   :  { %2281 = vmatmul.mubr.f32.vlgmr.msra.gmra.mrb[0].mxu0 %v2558_v1  ;;  %2432 = vmatpush3.bf16.msra.mxu1 %v2652_v5  ;;  %v2681_v9 = vld [vmem:[%s2990_s3] ss:$0 sm:$0xff]  ;;  %s2561_s3 = smov 8  }
   0x5   :  { %2290 = vmatprep.subr.mxu0 %v2558_v1  ;;  %2433 = vmatprep.subr.bf16.mxu1 %v2557_v0 }
   0x6   :  { %2291 = vmatpush3.msra.mxu0 %v2650_v4  ;;  %2292 = vmatprep.mubr.msk.f32.mxu0 %vm2559_vm0, %v2558_v1 }
   0x7   :  { %2302 = vmatprep.subr.mxu0 %v2558_v1  ;;  %2288 = vmatmul.mubr.msk.f32.vlgmr.msra.gmra.mrb[0].mxu1 %vm146_vm1, %v2664_v6 }
   0x8   :  { %2435 = vmatpush3.bf16.msra.mxu1 %v2652_v5  ;;  %2299 = vmatprep.mubr.msk.f32.mxu1 %vm2559_vm0, %v2558_v1 }
   0x9   :  { %2436 = vmatprep.subr.bf16.mxu1 %v2557_v0 }
   0xb   :  { %2300 = vmatmul.mubr.msk.f32.vlgmr.msra.gmra.mrb[2].mxu1 %vm146_vm1, %v2689_v24 }
   0xc   :  { %2438 = vmatpush3.bf16.msra.mxu1 %v2652_v5  ;;  %2311 = vmatprep.mubr.msk.f32.mxu1 %vm2559_vm0, %v2558_v1 }
   0xd   :  { %2439 = vmatprep.subr.bf16.mxu1 %v2557_v0 }
   0xf   :  { %2312 = vmatmul.mubr.msk.f32.vlgmr.msra.gmra.mrb[4].mxu1 %vm146_vm1, %v2713_v45 }
  0x10   :  { %2441 = vmatpush3.bf16.msra.mxu1 %v2652_v5  ;;  %2323 = vmatprep.mubr.msk.f32.mxu1 %vm2559_vm0, %v2558_v1 }
  0x11   :  { %2442 = vmatprep.subr.bf16.mxu1 %v2557_v0 }
  0xd7   :  { %v142_v7 = vpop.f32.mrb[0].mxu0 }
  0xd8   :  { %v2282_v8 = vpop.f32.mrb[1].mxu0 }
  0xd9   :  { %v53_v8 = vld [vmem:[%s2991_s4 + $0x8] sm:$0xff] }
  0xda   :  { %v216_v10 = vpop.f32.mrb[0].mxu1 }
  0xdb   :  { %v217_v11 = vadd.f32 %v216_v10, %v142_v7  ;;  %v2289_v12 = vpop.f32.mrb[1].mxu1  ;;  %v52_v7 = vld [vmem:[%s2991_s4] sm:$0xff] }
  0xdc   :  { %v2753_v10 = vpack.c.bf16 %v53_v8, %v52_v7 }
  0xdd   :  { %v226_v13 = vadd.f32 %v2681_v9, %v217_v11 }
  0xde   :  { %v395_v28 = vpop.f32.mrb[2].mxu1 }
  0xdf   :  { %2485 = vtanh.f32 %v226_v13  ;;  %v2177_v15 = vmul.f32 -1.442695, %v226_v13  ;;  %v2301_v29 = vpop.f32.mrb[3].mxu1 }
  0xe1   :  { %2487 = vpow2.f32 %v2177_v15  ;;  %v2765_v15 = vld [vmem:[%s2992_s5] sm:$0xff] }
  0xe2   :  { %v568_v49 = vpop.f32.mrb[4].mxu1 }
  0xe3   :  { %v2313_v50 = vpop.f32.mrb[5].mxu1 }
  0xe9   :  { %v2486_v14 = vpop.eup %2485 }
  0xea   :  { %236 = vrot.lane.b32.xlu0 %v2486_v14, %s2560_s21 }
  0xeb   :  { %v2488_v16 = vpop.eup %2487 }
  0xec   :  { %v230_v17 = vadd.f32 1.0, %v2488_v16 }
  0xee   :  { %2489 = vrcp.f32 %v230_v17 }
  0xf8   :  { %v2490_v18 = vpop.eup %2489 }
  0xf9   :  { %v233_v21 = vmul.f32 0.0, %v2490_v18 }
 0x15c   :  { %v237_v19 = vpop.permute.xlu0 %236 }
 0x15d   :  { %v239_v20 = vmul.f32 %v2490_v18, %v237_v19 }
 0x15f   :  { %241 = vrot.lane.b32.xlu0 %v239_v20, %s2561_s3 }
 0x1d1   :  { %v242_v22 = vpop.permute.xlu0 %241 }
 0x1d2   :  { %v244_v23 = vadd.f32 %v242_v22, %v233_v21 }
 0x1d4   :  { %2491 = vtanh.f32 %v244_v23 }
 0x1de   :  { %v2492_v25 = vpop.eup %2491 }
 0x1df   :  { %247 = vrot.lane.b32.xlu1 %v2492_v25, %s2562_s24 }
 0x251   :  { %v248_v26 = vpop.permute.xlu1 %247 }
 0x252   :  { %v250_v27 = vmul.f32 %v2490_v18, %v248_v26 }
 0x254   :  { %252 = vrot.lane.b32.xlu1 %v250_v27, %s2563_s25 }
 0x2c6   :  { %v2699_v30 = vpop.permute.xlu1 %252 }
 0x2c7   :  { %2293 = vmatmul.mubr.msk.f32.vlgmr.msra.gmra.mrb[2].mxu0 %vm72_vm2, %v2699_v30 }
 0x2c8   :  { %2303 = vmatpush3.msra.mxu0 %v2650_v4  ;;  %2304 = vmatprep.mubr.msk.f32.mxu0 %vm2559_vm0, %v2558_v1 }
 0x2c9   :  { %2314 = vmatprep.subr.mxu0 %v2558_v1 }
 0x39a   :  { %v322_v31 = vpop.f32.mrb[2].mxu0 }
 0x39b   :  { %v396_v32 = vadd.f32 %v395_v28, %v322_v31  ;;  %v2294_v33 = vpop.f32.mrb[3].mxu0 }
 0x39d   :  { %v399_v34 = vadd.f32 %v2681_v9, %v396_v32 }
 0x39f   :  { %2493 = vtanh.f32 %v399_v34  ;;  %v2180_v36 = vmul.f32 -1.442695, %v399_v34 }
 0x3a1   :  { %2495 = vpow2.f32 %v2180_v36 }
 0x3a9   :  { %v2494_v35 = vpop.eup %2493 }
 0x3aa   :  { %409 = vrot.lane.b32.xlu0 %v2494_v35, %s2560_s21 }
 0x3ab   :  { %v2496_v37 = vpop.eup %2495 }
 0x3ac   :  { %v403_v38 = vadd.f32 1.0, %v2496_v37 }
 0x3ae   :  { %2497 = vrcp.f32 %v403_v38 }
 0x3b8   :  { %v2498_v39 = vpop.eup %2497 }
 0x3b9   :  { %v406_v42 = vmul.f32 %v2498_v39, %v244_v23  ;;  %v2782_v23 = vld [vmem:[%s2993_s6] ss:$0 sm:$0xff] }
 0x41c   :  { %v410_v40 = vpop.permute.xlu0 %409 }
 0x41d   :  { %v412_v41 = vmul.f32 %v2498_v39, %v410_v40 }
 0x41f   :  { %414 = vrot.lane.b32.xlu1 %v412_v41, %s2561_s3 }
 0x491   :  { %v415_v43 = vpop.permute.xlu1 %414 }
 0x492   :  { %v417_v44 = vadd.f32 %v415_v43, %v406_v42 }
 0x494   :  { %2499 = vtanh.f32 %v417_v44 }
 0x49e   :  { %v2500_v46 = vpop.eup %2499 }
 0x49f   :  { %420 = vrot.lane.b32.xlu0 %v2500_v46, %s2562_s24 }
 0x511   :  { %v421_v47 = vpop.permute.xlu0 %420 }
 0x512   :  { %v423_v48 = vmul.f32 %v2498_v39, %v421_v47 }
 0x514   :  { %425 = vrot.lane.b32.xlu1 %v423_v48, %s2563_s25 }
 0x586   :  { %v2723_v51 = vpop.permute.xlu1 %425 }
 0x587   :  { %2305 = vmatmul.mubr.msk.f32.vlgmr.msra.gmra.mrb[4].mxu0 %vm72_vm2, %v2723_v51 }
 0x588   :  { %2315 = vmatpush3.msra.mxu0 %v2650_v4  ;;  %2316 = vmatprep.mubr.msk.f32.mxu0 %vm2559_vm0, %v2558_v1  ;;  %v2740_v4 = vld [vmem:[%s2989_s0 + $0x18] sm:$0xff] }
 0x589   :  { %2326 = vmatprep.subr.mxu0 %v2558_v1  ;;  %2324 = vmatmul.mubr.msk.f32.vlgmr.msra.gmra.mrb[6].mxu1 %vm146_vm1, %v2740_v4 }
 0x58a   :  { %2335 = vmatprep.mubr.msk.f32.mxu1 %vm2559_vm0, %v2558_v1  ;;  %2444 = vmatpush3.bf16.msra.mxu1 %v2753_v10 }
 0x58b   :  { %2448 = vmatprep.subr.bf16.mxu1 %v2557_v0 }
 0x58d   :  { %2336 = vmatmul.mubr.msk.f32.vlgmr.msra.gmra.mrb[8].mxu1 %vm146_vm1, %v2740_v4 }
 0x58e   :  { %2349 = vmatprep.mubr.msk.f32.mxu1 %vm2559_vm0, %v2558_v1 }
 0x65a   :  { %v495_v52 = vpop.f32.mrb[4].mxu0 }
 0x65b   :  { %v569_v53 = vadd.f32 %v568_v49, %v495_v52  ;;  %v2306_v54 = vpop.f32.mrb[5].mxu0 }
 0x65c   :  { %v741_v13 = vpop.f32.mrb[6].mxu1  ;;  %v57_v54 = vld [vmem:[%s2994_s7 + $0x8] sm:$0xff] }
 0x65d   :  { %v572_v55 = vadd.f32 %v2681_v9, %v569_v53  ;;  %v2325_v14 = vpop.f32.mrb[7].mxu1  ;;  %v56_v53 = vld [vmem:[%s2994_s7] sm:$0xff] }
 0x65f   :  { %2501 = vtanh.f32 %v572_v55  ;;  %v2183_v57 = vmul.f32 -1.442695, %v572_v55  ;;  %v2801_v55 = vpack.c.bf16 %v57_v54, %v56_v53 }
 0x660   :  { %v906_v17 = vpop.f32.mrb[8].mxu1 }
 0x661   :  { %2503 = vpow2.f32 %v2183_v57  ;;  %v2337_v18 = vpop.f32.mrb[9].mxu1 }
 0x662   :  { %v61_v18 = vld [vmem:[%s2996_s11] sm:$0xff] }
 0x669   :  { %v2502_v56 = vpop.eup %2501 }
 0x66a   :  { %582 = vrot.lane.b32.xlu0 %v2502_v56, %s2560_s21 }
 0x66b   :  { %v2504_v58 = vpop.eup %2503 }
 0x66c   :  { %v576_v59 = vadd.f32 1.0, %v2504_v58 }
 0x66e   :  { %2505 = vrcp.f32 %v576_v59 }
 0x678   :  { %v2506_v60 = vpop.eup %2505 }
 0x679   :  { %v579_v63 = vmul.f32 %v2506_v60, %v417_v44 }
 0x6dc   :  { %v583_v61 = vpop.permute.xlu0 %582 }
 0x6dd   :  { %v585_v62 = vmul.f32 %v2506_v60, %v583_v61 }
 0x6df   :  { %587 = vrot.lane.b32.xlu1 %v585_v62, %s2561_s3 }
 0x751   :  { %v588_v2 = vpop.permute.xlu1 %587 }
 0x752   :  { %v2734_v3 = vadd.f32 %v588_v2, %v579_v63  ;;  %v2816_v63 = vld [vmem:[%s2995_s8] ss:$0 sm:$0xff] }
 0x754   :  { %2507 = vtanh.f32 %v2734_v3 }
 0x75e   :  { %v2508_v5 = vpop.eup %2507 }
 0x75f   :  { %593 = vrot.lane.b32.xlu0 %v2508_v5, %s2562_s24 }
 0x7d1   :  { %v594_v11 = vpop.permute.xlu0 %593 }
 0x7d2   :  { %v596_v12 = vmul.f32 %v2506_v60, %v594_v11 }
 0x7d4   :  { %598 = vrot.lane.b32.xlu1 %v596_v12, %s2563_s25 }
 0x846   :  { %v2767_v16 = vpop.permute.xlu1 %598 }
 0x847   :  { %2317 = vmatmul.mubr.msk.f32.vlgmr.msra.gmra.mrb[6].mxu0 %vm72_vm2, %v2767_v16 }
 0x848   :  { %2327 = vmatpush3.msra.mxu0 %v2765_v15  ;;  %2328 = vmatprep.mubr.msk.f32.mxu0 %vm2559_vm0, %v2558_v1 }
 0x849   :  { %2445 = vmatprep.subr.bf16.mxu0 %v2557_v0 }
 0x84b   :  { %2329 = vmatmul.mubr.f32.vlgmr.msra.gmra.mrb[8].mxu0 %v2558_v1 }
 0x84c   :  { %2342 = vmatprep.mubr.msk.f32.mxu0 %vm2559_vm0, %v2558_v1  ;;  %2447 = vmatpush3.bf16.msra.mxu0 %v2801_v55 }
 0x84d   :  { %2352 = vmatprep.subr.mxu0 %v2558_v1 }
 0x91a   :  { %v668_v19 = vpop.f32.mrb[6].mxu0 }
 0x91b   :  { %v742_v20 = vadd.f32 %v741_v13, %v668_v19  ;;  %v2318_v21 = vpop.f32.mrb[7].mxu0  ;;  %v62_v19 = vld [vmem:[%s2996_s11 + $0x8] sm:$0xff] }
 0x91d   :  { %v745_v22 = vadd.f32 %v2681_v9, %v742_v20  ;;  %v2833_v20 = vpack.c.bf16 %v62_v19, %v61_v18 }
 0x91e   :  { %v836_v25 = vpop.f32.mrb[8].mxu0 }
 0x91f   :  { %2509 = vtanh.f32 %v745_v22  ;;  %v907_v26 = vadd.f32 %v906_v17, %v836_v25  ;;  %v2330_v27 = vpop.f32.mrb[9].mxu0  ;;  %v2186_v32 = vmul.f32 -1.442695, %v745_v22  ;;  %2450 = vmatpush3.bf16.msra.mxu1 %v2833_v20 }
 0x920   :  { %2451 = vmatprep.subr.bf16.mxu1 %v2557_v0  ;;  %v2840_v27 = vld [vmem:[%s2997_s9] ss:$0 sm:$0xff] }
 0x921   :  { %v916_v28 = vadd.f32 %v2782_v23, %v907_v26 }
 0x923   :  { %2511 = vtanh.f32 %v916_v28  ;;  %v2189_v9 = vmul.f32 -1.442695, %v916_v28 }
 0x924   :  { %2513 = vpow2.f32 %v2186_v32 }
 0x925   :  { %2515 = vpow2.f32 %v2189_v9  ;;  %v2852_v9 = vstv %s2999_s13 }
 0x929   :  { %v2510_v29 = vpop.eup %2509 }
 0x92a   :  { %755 = vrot.lane.b32.xlu0 %v2510_v29, %s2560_s21  ;;  %v2845_v29 = vld [vmem:[%s2998_s10] ss:$0 sm:$0xff] }
 0x92d   :  { %v2512_v31 = vpop.eup %2511 }
 0x92e   :  { %926 = vrot.lane.b32.xlu1 %v2512_v31, %s2560_s21  ;;  %v2514_v33 = vpop.eup %2513 }
 0x92f   :  { %v749_v34 = vadd.f32 1.0, %v2514_v33  ;;  %v2516_v35 = vpop.eup %2515 }
 0x930   :  { %v920_v36 = vadd.f32 1.0, %v2516_v35 }
 0x931   :  { %2517 = vrcp.f32 %v749_v34 }
 0x932   :  { %2519 = vrcp.f32 %v920_v36 }
 0x93b   :  { %v2518_v37 = vpop.eup %2517 }
 0x93c   :  { %v2520_v40 = vpop.eup %2519  ;;  %v752_v43 = vmul.f32 %v2518_v37, %v2734_v3 }
 0x93d   :  { %v923_v47 = vmul.f32 0.0, %v2520_v40 }
 0x99c   :  { %v756_v38 = vpop.permute.xlu0 %755 }
 0x99d   :  { %v758_v39 = vmul.f32 %v2518_v37, %v756_v38 }
 0x99f   :  { %760 = vrot.lane.b32.xlu0 %v758_v39, %s2561_s3 }
 0x9a0   :  { %v927_v41 = vpop.permute.xlu1 %926 }
 0x9a1   :  { %v929_v42 = vmul.f32 %v2520_v40, %v927_v41 }
 0x9a3   :  { %931 = vrot.lane.b32.xlu1 %v929_v42, %s2561_s3 }
 0xa11   :  { %v761_v44 = vpop.permute.xlu0 %760 }
 0xa12   :  { %v763_v46 = vadd.f32 %v761_v44, %v752_v43 }
 0xa14   :  { %2521 = vtanh.f32 %v763_v46 }
 0xa15   :  { %v932_v48 = vpop.permute.xlu1 %931 }
 0xa16   :  { %v2790_v49 = vadd.f32 %v932_v48, %v923_v47 }
 0xa18   :  { %2523 = vtanh.f32 %v2790_v49 }
 0xa1e   :  { %v2522_v50 = vpop.eup %2521 }
 0xa1f   :  { %766 = vrot.lane.b32.xlu0 %v2522_v50, %s2562_s24 }
 0xa22   :  { %v2524_v52 = vpop.eup %2523 }
 0xa23   :  { %937 = vrot.lane.b32.xlu1 %v2524_v52, %s2562_s24 }
 0xa91   :  { %v767_v56 = vpop.permute.xlu0 %766 }
 0xa92   :  { %v769_v57 = vmul.f32 %v2518_v37, %v767_v56  ;;  %v2870_v37 = vld [vmem:[%s3000_s12] ss:$0 sm:$0xff] }
 0xa94   :  { %942 = vrot.lane.b32.xlu0 %v769_v57, %s2563_s25 }
 0xa95   :  { %v938_v58 = vpop.permute.xlu1 %937 }
 0xa96   :  { %v940_v59 = vmul.f32 %v2520_v40, %v938_v58 }
 0xa98   :  { %946 = vrot.lane.b32.xlu1 %v940_v59, %s2560_s21 }
 0xb06   :  { %v943_v60 = vpop.permute.xlu0 %942 }
 0xb0a   :  { %v947_v61 = vpop.permute.xlu1 %946 }
 0xb0b   :  { %v949_v62 = vsel %vm72_vm2, %v943_v60, %v947_v61 }
 0xb0c   :  { %2343 = vmatmul.mubr.msk.f32.vlgmr.msra.gmra.mrb[10].mxu0 %vm146_vm1, %v949_v62 }
 0xb0d   :  { %2353 = vmatpush3.msra.mxu0 %v2765_v15  ;;  %2354 = vmatprep.mubr.msk.f32.mxu0 %vm2559_vm0, %v2558_v1 }
 0xb0e   :  { %2454 = vmatprep.subr.bf16.mxu0 %v2557_v0 }
 0xbdf   :  { %v1025_v2 = vpop.f32.mrb[10].mxu0 }
 0xbe0   :  { %v1026_v3 = vadd.f32 %v2816_v63, %v1025_v2  ;;  %v2344_v5 = vpop.f32.mrb[11].mxu0 }
 0xbe2   :  { %v1029_v7 = vsel %vm146_vm1, %v1026_v3, 0.0 }
 0xbe3   :  { %1030 = vadd.xlane.f32.xlu0 %v1029_v7 }
 0xbf9   :  { %1143 = vrot.lane.b32.xlu0 %v940_v59, %s2563_s25 }
 0xc70   :  { %v1031_v8 = vpop.xlane.xlu0 %1030 }
 0xc71   :  { %v1033_v11 = vmul.f32 0.0625, %v1031_v8 }
 0xc73   :  { %v1034_v12 = vsub.f32 %v1026_v3, %v1033_v11 }
 0xc74   :  { %v1144_v13 = vpop.permute.xlu0 %1143 }
 0xc75   :  { %2355 = vmatmul.mubr.msk.f32.vlgmr.msra.gmra.mrb[12].mxu0 %vm72_vm2, %v1144_v13  ;;  %v1035_v14 = vmul.f32 %v1034_v12, %v1034_v12 }
 0xc76   :  { %2456 = vmatpush3.bf16.msra.mxu0 %v2801_v55  ;;  %2368 = vmatprep.mubr.msk.f32.mxu0 %vm2559_vm0, %v2558_v1 }
 0xc77   :  { %v1036_v17 = vsel %vm146_vm1, %v1035_v14, 0.0  ;;  %2378 = vmatprep.subr.mxu0 %v2558_v1 }
 0xc78   :  { %1037 = vadd.xlane.f32.xlu1 %v1036_v17 }
 0xd05   :  { %v1038_v21 = vpop.xlane.xlu1 %1037 }
 0xd06   :  { %v1039_v22 = vmul.f32 0.0625, %v1038_v21 }
 0xd08   :  { %v1040_v25 = vadd.f32 1e-05, %v1039_v22 }
 0xd0a   :  { %2525 = vrsqrt.f32 %v1040_v25 }
 0xd14   :  { %v2526_v26 = vpop.eup %2525 }
 0xd15   :  { %v1042_v28 = vmul.f32 %v2526_v26, %v1034_v12 }
 0xd17   :  { %v1049_v31 = vmul.f32 %v2840_v27, %v1042_v28 }
 0xd19   :  { %v1056_v32 = vadd.f32 %v2845_v29, %v1049_v31 }
 0xd1b   :  { %v1057_v33 = vadd.f32 %v2740_v4, %v1056_v32 }
 0xd1d   :  { %vm1058_vm3 = vcmp.ge.f32.partialorder %v1057_v33, 0.0  ;;  %v1060_v34 = vmul.f32 %v2852_v9, %v1057_v33 }
 0xd1f   :  { %v1061_v35 = vsel %vm1058_vm3, %v1057_v33, %v1060_v34 }
 0xd20   :  { %2350 = vmatmul.mubr.msk.f32.vlgmr.msra.gmra.mrb[10].mxu1 %vm146_vm1, %v1061_v35 }
 0xd21   :  { %2453 = vmatpush3.bf16.msra.mxu1 %v2753_v10  ;;  %2361 = vmatprep.mubr.msk.f32.mxu1 %vm2559_vm0, %v2558_v1 }
 0xd22   :  { %2457 = vmatprep.subr.bf16.mxu1 %v2557_v0 }
 0xd24   :  { %2362 = vmatmul.mubr.msk.f32.vlgmr.msra.gmra.mrb[12].mxu1 %vm146_vm1, %v2713_v45 }
 0xd25   :  { %2459 = vmatpush3.bf16.msra.mxu1 %v2833_v20  ;;  %2375 = vmatprep.mubr.msk.f32.mxu1 %vm2559_vm0, %v2558_v1 }
 0xd26   :  { %2460 = vmatprep.subr.bf16.mxu1 %v2557_v0 }
 0xd48   :  { %v1213_v4 = vpop.f32.mrb[12].mxu0 }
 0xd49   :  { %v2356_v36 = vpop.f32.mrb[13].mxu0 }
 0xdf3   :  { %v1137_v38 = vpop.f32.mrb[10].mxu1 }
 0xdf4   :  { %v1138_v39 = vadd.f32 %v2870_v37, %v1137_v38  ;;  %v2351_v40 = vpop.f32.mrb[11].mxu1 }
 0xdf6   :  { %2196 = vst.msk [vmem:[%s3001_s14 + $0x18] sm:$0xff] %vm146_vm1, %v1138_v39 }
 0xdf7   :  { %v1283_v41 = vpop.f32.mrb[12].mxu1 }
 0xdf8   :  { %v1284_v42 = vadd.f32 %v1283_v41, %v1213_v4  ;;  %v2363_v43 = vpop.f32.mrb[13].mxu1 }
 0xdfa   :  { %v1287_v44 = vadd.f32 %v2782_v23, %v1284_v42 }
 0xdfc   :  { %2527 = vtanh.f32 %v1287_v44  ;;  %v2199_v47 = vmul.f32 -1.442695, %v1287_v44 }
 0xdfe   :  { %2529 = vpow2.f32 %v2199_v47 }
 0xe06   :  { %v2528_v46 = vpop.eup %2527 }
 0xe07   :  { %1297 = vrot.lane.b32.xlu1 %v2528_v46, %s2560_s21 }
 0xe08   :  { %v2530_v48 = vpop.eup %2529 }
 0xe09   :  { %v1291_v50 = vadd.f32 1.0, %v2530_v48 }
 0xe0b   :  { %2531 = vrcp.f32 %v1291_v50 }
 0xe15   :  { %v2532_v52 = vpop.eup %2531 }
 0xe16   :  { %v1294_v56 = vmul.f32 %v2532_v52, %v2790_v49 }
 0xe79   :  { %v1298_v53 = vpop.permute.xlu1 %1297 }
 0xe7a   :  { %v1300_v54 = vmul.f32 %v2532_v52, %v1298_v53 }
 0xe7c   :  { %1302 = vrot.lane.b32.xlu0 %v1300_v54, %s2561_s3 }
 0xeee   :  { %v1303_v57 = vpop.permute.xlu0 %1302 }
 0xeef   :  { %v2881_v58 = vadd.f32 %v1303_v57, %v1294_v56 }
 0xef1   :  { %2533 = vtanh.f32 %v2881_v58 }
 0xefb   :  { %v2534_v59 = vpop.eup %2533 }
 0xefc   :  { %1308 = vrot.lane.b32.xlu1 %v2534_v59, %s2562_s24 }
 0xf6e   :  { %v1309_v60 = vpop.permute.xlu1 %1308 }
 0xf6f   :  { %v1311_v61 = vmul.f32 %v2532_v52, %v1309_v60 }
 0xf71   :  { %1314 = vrot.lane.b32.xlu0 %v1311_v61, %s2560_s21 }
 0xfe3   :  { %v1315_v62 = vpop.permute.xlu0 %1314 }
 0xfe4   :  { %v1317_v2 = vsel %vm72_vm2, %v2767_v16, %v1315_v62 }
 0xfe5   :  { %2369 = vmatmul.mubr.msk.f32.vlgmr.msra.gmra.mrb[14].mxu0 %vm146_vm1, %v1317_v2 }
 0xfe6   :  { %2379 = vmatpush3.msra.mxu0 %v2765_v15  ;;  %2380 = vmatprep.mubr.msk.f32.mxu0 %vm2559_vm0, %v2558_v1 }
 0xfe7   :  { %2463 = vmatprep.subr.bf16.mxu0 %v2557_v0 }
0x10b8   :  { %v1387_v49 = vpop.f32.mrb[14].mxu0 }
0x10b9   :  { %v1388_v3 = vadd.f32 %v2816_v63, %v1387_v49  ;;  %v2370_v5 = vpop.f32.mrb[15].mxu0 }
0x10bb   :  { %v1391_v7 = vsel %vm146_vm1, %v1388_v3, 0.0 }
0x10bc   :  { %1392 = vadd.xlane.f32.xlu1 %v1391_v7 }
0x1149   :  { %v1393_v8 = vpop.xlane.xlu1 %1392 }
0x114a   :  { %v1394_v11 = vmul.f32 0.0625, %v1393_v8 }
0x114c   :  { %v1395_v12 = vsub.f32 %v1388_v3, %v1394_v11 }
0x114e   :  { %v1396_v16 = vmul.f32 %v1395_v12, %v1395_v12 }
0x1150   :  { %v1397_v13 = vsel %vm146_vm1, %v1396_v16, 0.0 }
0x1151   :  { %1398 = vadd.xlane.f32.xlu0 %v1397_v13 }
0x1167   :  { %1485 = vrot.lane.b32.xlu0 %v1311_v61, %s2563_s25 }
0x11de   :  { %v1399_v14 = vpop.xlane.xlu0 %1398 }
0x11df   :  { %v1400_v17 = vmul.f32 0.0625, %v1399_v14 }
0x11e1   :  { %v1401_v18 = vadd.f32 1e-05, %v1400_v17 }
0x11e2   :  { %v1486_v19 = vpop.permute.xlu0 %1485 }
0x11e3   :  { %2535 = vrsqrt.f32 %v1401_v18  ;;  %2381 = vmatmul.mubr.msk.f32.vlgmr.msra.gmra.mrb[16].mxu0 %vm72_vm2, %v1486_v19 }
0x11e4   :  { %2465 = vmatpush3.bf16.msra.mxu0 %v2801_v55  ;;  %2394 = vmatprep.mubr.msk.f32.mxu0 %vm2559_vm0, %v2558_v1 }
0x11e5   :  { %2404 = vmatprep.subr.mxu0 %v2558_v1 }
0x11ed   :  { %v2536_v21 = vpop.eup %2535 }
0x11ee   :  { %v1403_v22 = vmul.f32 %v2536_v21, %v1395_v12 }
0x11f0   :  { %v1404_v25 = vmul.f32 %v2840_v27, %v1403_v22 }
0x11f2   :  { %v1405_v26 = vadd.f32 %v2845_v29, %v1404_v25 }
0x11f4   :  { %v1406_v28 = vadd.f32 %v2713_v45, %v1405_v26 }
0x11f6   :  { %vm1407_vm4 = vcmp.ge.f32.partialorder %v1406_v28, 0.0  ;;  %v1408_v31 = vmul.f32 %v1406_v28, %v2852_v9 }
0x11f8   :  { %v1409_v32 = vsel %vm1407_vm4, %v1406_v28, %v1408_v31 }
0x11f9   :  { %2376 = vmatmul.mubr.msk.f32.vlgmr.msra.gmra.mrb[14].mxu1 %vm146_vm1, %v1409_v32 }
0x11fa   :  { %2462 = vmatpush3.bf16.msra.mxu1 %v2753_v10  ;;  %2387 = vmatprep.mubr.msk.f32.mxu1 %vm2559_vm0, %v2558_v1 }
0x11fb   :  { %2466 = vmatprep.subr.bf16.mxu1 %v2557_v0 }
0x11fd   :  { %2388 = vmatmul.mubr.msk.f32.vlgmr.msra.gmra.mrb[16].mxu1 %vm146_vm1, %v2689_v24 }
0x11fe   :  { %2468 = vmatpush3.bf16.msra.mxu1 %v2833_v20  ;;  %2401 = vmatprep.mubr.msk.f32.mxu1 %vm2559_vm0, %v2558_v1 }
0x11ff   :  { %2469 = vmatprep.subr.bf16.mxu1 %v2557_v0 }
0x12b6   :  { %v1555_v45 = vpop.f32.mrb[16].mxu0 }
0x12b7   :  { %v2382_v33 = vpop.f32.mrb[17].mxu0 }
0x12cc   :  { %v1479_v34 = vpop.f32.mrb[14].mxu1 }
0x12cd   :  { %v1480_v35 = vadd.f32 %v2870_v37, %v1479_v34  ;;  %v2377_v4 = vpop.f32.mrb[15].mxu1 }
0x12cf   :  { %2202 = vst.msk [vmem:[%s3001_s14 + $0x10] sm:$0xff] %vm146_vm1, %v1480_v35 }
0x12d0   :  { %v1625_v36 = vpop.f32.mrb[16].mxu1 }
0x12d1   :  { %v1626_v38 = vadd.f32 %v1625_v36, %v1555_v45  ;;  %v2389_v39 = vpop.f32.mrb[17].mxu1 }
0x12d3   :  { %v1629_v40 = vadd.f32 %v2782_v23, %v1626_v38 }
0x12d5   :  { %2537 = vtanh.f32 %v1629_v40  ;;  %v2205_v42 = vmul.f32 -1.442695, %v1629_v40 }
0x12d7   :  { %2539 = vpow2.f32 %v2205_v42 }
0x12df   :  { %v2538_v41 = vpop.eup %2537 }
0x12e0   :  { %1639 = vrot.lane.b32.xlu1 %v2538_v41, %s2560_s21 }
0x12e1   :  { %v2540_v43 = vpop.eup %2539 }
0x12e2   :  { %v1633_v44 = vadd.f32 1.0, %v2540_v43 }
0x12e4   :  { %2541 = vrcp.f32 %v1633_v44 }
0x12ee   :  { %v2542_v46 = vpop.eup %2541 }
0x12ef   :  { %v1636_v50 = vmul.f32 %v2542_v46, %v2881_v58 }
0x1352   :  { %v1640_v47 = vpop.permute.xlu1 %1639 }
0x1353   :  { %v1642_v48 = vmul.f32 %v2542_v46, %v1640_v47 }
0x1355   :  { %1644 = vrot.lane.b32.xlu1 %v1642_v48, %s2561_s3 }
0x13c7   :  { %v1645_v52 = vpop.permute.xlu1 %1644 }
0x13c8   :  { %v2926_v53 = vadd.f32 %v1645_v52, %v1636_v50 }
0x13ca   :  { %2543 = vtanh.f32 %v2926_v53 }
0x13d4   :  { %v2544_v54 = vpop.eup %2543 }
0x13d5   :  { %1650 = vrot.lane.b32.xlu0 %v2544_v54, %s2562_s24 }
0x1447   :  { %v1651_v56 = vpop.permute.xlu0 %1650 }
0x1448   :  { %v1653_v57 = vmul.f32 %v2542_v46, %v1651_v56 }
0x144a   :  { %1656 = vrot.lane.b32.xlu1 %v1653_v57, %s2560_s21 }
0x14bc   :  { %v1657_v59 = vpop.permute.xlu1 %1656 }
0x14bd   :  { %v1659_v60 = vsel %vm72_vm2, %v2723_v51, %v1657_v59 }
0x14be   :  { %2395 = vmatmul.mubr.msk.f32.vlgmr.msra.gmra.mrb[18].mxu0 %vm146_vm1, %v1659_v60 }
0x14bf   :  { %2405 = vmatpush3.msra.mxu0 %v2765_v15  ;;  %2406 = vmatprep.mubr.msk.f32.mxu0 %vm2559_vm0, %v2558_v1 }
0x14c0   :  { %2472 = vmatprep.subr.bf16.mxu0 %v2557_v0 }
0x1591   :  { %v1729_v58 = vpop.f32.mrb[18].mxu0 }
0x1592   :  { %v1730_v61 = vadd.f32 %v2816_v63, %v1729_v58  ;;  %v2396_v62 = vpop.f32.mrb[19].mxu0 }
0x1594   :  { %v1733_v2 = vsel %vm146_vm1, %v1730_v61, 0.0 }
0x1595   :  { %1734 = vadd.xlane.f32.xlu0 %v1733_v2 }
0x15ab   :  { %1827 = vrot.lane.b32.xlu0 %v1653_v57, %s2563_s25 }
0x1622   :  { %v1735_v49 = vpop.xlane.xlu0 %1734 }
0x1623   :  { %v1736_v51 = vmul.f32 0.0625, %v1735_v49 }
0x1625   :  { %v1737_v3 = vsub.f32 %v1730_v61, %v1736_v51 }
0x1626   :  { %v1828_v5 = vpop.permute.xlu0 %1827 }
0x1627   :  { %2407 = vmatmul.mubr.msk.f32.vlgmr.msra.gmra.mrb[20].mxu0 %vm72_vm2, %v1828_v5  ;;  %v1738_v15 = vmul.f32 %v1737_v3, %v1737_v3 }
0x1628   :  { %2474 = vmatpush3.bf16.msra.mxu0 %v2801_v55  ;;  %2420 = vmatprep.mubr.msk.f32.mxu0 %vm2559_vm0, %v2558_v1 }
0x1629   :  { %v1739_v7 = vsel %vm146_vm1, %v1738_v15, 0.0 }
0x162a   :  { %1740 = vadd.xlane.f32.xlu1 %v1739_v7 }
0x16b7   :  { %v1741_v8 = vpop.xlane.xlu1 %1740 }
0x16b8   :  { %v1742_v11 = vmul.f32 0.0625, %v1741_v8 }
0x16ba   :  { %v1743_v12 = vadd.f32 1e-05, %v1742_v11 }
0x16bc   :  { %2545 = vrsqrt.f32 %v1743_v12 }
0x16c6   :  { %v2546_v16 = vpop.eup %2545 }
0x16c7   :  { %v1745_v13 = vmul.f32 %v2546_v16, %v1737_v3 }
0x16c9   :  { %v1746_v14 = vmul.f32 %v2840_v27, %v1745_v13 }
0x16cb   :  { %v1747_v17 = vadd.f32 %v2845_v29, %v1746_v14 }
0x16cd   :  { %v1748_v18 = vadd.f32 %v2689_v24, %v1747_v17 }
0x16cf   :  { %vm1749_vm5 = vcmp.ge.f32.partialorder %v1748_v18, 0.0  ;;  %v1750_v55 = vmul.f32 %v1748_v18, %v2852_v9 }
0x16d1   :  { %v1751_v19 = vsel %vm1749_vm5, %v1748_v18, %v1750_v55 }
0x16d2   :  { %2402 = vmatmul.mubr.msk.f32.vlgmr.msra.gmra.mrb[18].mxu1 %vm146_vm1, %v1751_v19 }
0x16d3   :  { %2471 = vmatpush3.bf16.msra.mxu1 %v2753_v10  ;;  %2413 = vmatprep.mubr.msk.f32.mxu1 %vm2559_vm0, %v2558_v1 }
0x16d4   :  { %2475 = vmatprep.subr.bf16.mxu1 %v2557_v0 }
0x16d6   :  { %2414 = vmatmul.mubr.msk.f32.vlgmr.msra.gmra.mrb[20].mxu1 %vm146_vm1, %v2664_v6 }
0x16d7   :  { %2477 = vmatpush3.bf16.msra.mxu1 %v2833_v20  ;;  %2427 = vmatprep.mubr.msk.f32.mxu1 %vm2559_vm0, %v2558_v1 }
0x16fa   :  { %v1897_v24 = vpop.f32.mrb[20].mxu0 }
0x16fb   :  { %v2408_v21 = vpop.f32.mrb[21].mxu0 }
0x17a5   :  { %v1821_v22 = vpop.f32.mrb[18].mxu1 }
0x17a6   :  { %v1822_v25 = vadd.f32 %v2870_v37, %v1821_v22  ;;  %v2403_v26 = vpop.f32.mrb[19].mxu1 }
0x17a8   :  { %2208 = vst.msk [vmem:[%s3001_s14 + $0x8] sm:$0xff] %vm146_vm1, %v1822_v25 }
0x17a9   :  { %v1967_v0 = vpop.f32.mrb[20].mxu1 }
0x17aa   :  { %v1968_v10 = vadd.f32 %v1967_v0, %v1897_v24  ;;  %v2415_v28 = vpop.f32.mrb[21].mxu1 }
0x17ac   :  { %v1971_v31 = vadd.f32 %v2782_v23, %v1968_v10 }
0x17ae   :  { %2547 = vtanh.f32 %v1971_v31  ;;  %v2211_v1 = vmul.f32 -1.442695, %v1971_v31 }
0x17b0   :  { %2549 = vpow2.f32 %v2211_v1 }
0x17b8   :  { %v2548_v20 = vpop.eup %2547 }
0x17b9   :  { %1981 = vrot.lane.b32.xlu1 %v2548_v20, %s2560_s21 }
0x17ba   :  { %v2550_v32 = vpop.eup %2549 }
0x17bb   :  { %v1975_v45 = vadd.f32 1.0, %v2550_v32 }
0x17bd   :  { %2551 = vrcp.f32 %v1975_v45 }
0x17c7   :  { %v2552_v33 = vpop.eup %2551 }
0x17c8   :  { %v1978_v4 = vmul.f32 %v2552_v33, %v2926_v53 }
0x182b   :  { %v1982_v34 = vpop.permute.xlu1 %1981 }
0x182c   :  { %v1984_v35 = vmul.f32 %v2552_v33, %v1982_v34 }
0x182e   :  { %1986 = vrot.lane.b32.xlu0 %v1984_v35, %s2561_s3 }
0x18a0   :  { %v1987_v36 = vpop.permute.xlu0 %1986 }
0x18a1   :  { %v1989_v38 = vadd.f32 %v1987_v36, %v1978_v4 }
0x18a3   :  { %2553 = vtanh.f32 %v1989_v38 }
0x18ad   :  { %v2554_v23 = vpop.eup %2553 }
0x18ae   :  { %1992 = vrot.lane.b32.xlu1 %v2554_v23, %s2562_s24 }
0x1920   :  { %v1993_v39 = vpop.permute.xlu1 %1992 }
0x1921   :  { %v1995_v40 = vmul.f32 %v2552_v33, %v1993_v39 }
0x1923   :  { %1998 = vrot.lane.b32.xlu0 %v1995_v40, %s2560_s21 }
0x1995   :  { %v1999_v41 = vpop.permute.xlu0 %1998 }
0x1996   :  { %v2001_v42 = vsel %vm72_vm2, %v2699_v30, %v1999_v41 }
0x1997   :  { %2421 = vmatmul.mubr.msk.f32.vlgmr.msra.gmra.mrb[22].mxu0 %vm146_vm1, %v2001_v42 }
0x1a6a   :  { %v2071_v43 = vpop.f32.mrb[22].mxu0 }
0x1a6b   :  { %v2072_v44 = vadd.f32 %v2816_v63, %v2071_v43  ;;  %v2422_v46 = vpop.f32.mrb[23].mxu0 }
0x1a6d   :  { %v2075_v47 = vsel %vm146_vm1, %v2072_v44, 0.0 }
0x1a6e   :  { %2076 = vadd.xlane.f32.xlu1 %v2075_v47 }
0x1afb   :  { %v2077_v48 = vpop.xlane.xlu1 %2076 }
0x1afc   :  { %v2078_v50 = vmul.f32 0.0625, %v2077_v48 }
0x1afe   :  { %v2079_v52 = vsub.f32 %v2072_v44, %v2078_v50 }
0x1b00   :  { %v2080_v53 = vmul.f32 %v2079_v52, %v2079_v52 }
0x1b02   :  { %v2081_v54 = vsel %vm146_vm1, %v2080_v53, 0.0 }
0x1b03   :  { %2082 = vadd.xlane.f32.xlu0 %v2081_v54 }
0x1b90   :  { %v2083_v56 = vpop.xlane.xlu0 %2082 }
0x1b91   :  { %v2084_v57 = vmul.f32 0.0625, %v2083_v56 }
0x1b93   :  { %v2085_v59 = vadd.f32 1e-05, %v2084_v57 }
0x1b95   :  { %2555 = vrsqrt.f32 %v2085_v59 }
0x1b9f   :  { %v2556_v30 = vpop.eup %2555 }
0x1ba0   :  { %v2087_v60 = vmul.f32 %v2556_v30, %v2079_v52 }
0x1ba2   :  { %v2088_v58 = vmul.f32 %v2840_v27, %v2087_v60 }
0x1ba4   :  { %v2089_v63 = vadd.f32 %v2845_v29, %v2088_v58 }
0x1ba6   :  { %v2090_v61 = vadd.f32 %v2089_v63, %v2664_v6 }
0x1ba8   :  { %vm2091_vm6 = vcmp.ge.f32.partialorder %v2090_v61, 0.0  ;;  %v2092_v62 = vmul.f32 %v2090_v61, %v2852_v9 }
0x1baa   :  { %v2093_v2 = vsel %vm2091_vm6, %v2090_v61, %v2092_v62 }
0x1bab   :  { %2428 = vmatmul.mubr.msk.f32.vlgmr.msra.gmra.mrb[22].mxu1 %vm146_vm1, %v2093_v2 }
0x1c7e   :  { %v2163_v49 = vpop.f32.mrb[22].mxu1 }
0x1c7f   :  { %v2164_v51 = vadd.f32 %v2870_v37, %v2163_v49  ;;  %v2429_v3 = vpop.f32.mrb[23].mxu1 }
0x1c81   :  { %2167 = vst.msk [vmem:[%s3001_s14] sm:$0xff] %vm146_vm1, %v2164_v51 }

// kernel: spex_plus_dprnn_forward.9
= control target key start
LH: loop header
LB: loop body
LE: loop exit
PB: predicated region body
PF: predicated region fallthrough
CT: control target
= control target key end

     0   :  { %v4267_v0 = vmov 0.0|0.0   ;;  %v4268_v1 = vmov 0.0   ;;  %vm4269_vm0 = vmmov 0   ;;  %vm140_vm1 = vcmask 130048   ;;  %s4270_s25 = smov 112   ;;  %s4272_s28 = smov 16   ;;  %s4920_s1 = inlined_call_operand.vmem [shape: f32[16,32], index: 1, kind: input, shape index: {}]   ;;  %s4921_s2 = inlined_call_operand.vmem [shape: f32[8,32], index: 2, kind: input, shape index: {}]   ;;  %s4922_s0 = inlined_call_operand.vmem [shape: f32[8,4,16], index: 0, kind: input, shape index: {}]   ;;  %s4923_s3 = inlined_call_operand.vmem [shape: f32[1,32], index: 3, kind: input, shape index: {}]   ;;  %s4924_s4 = inlined_call_operand.vmem [shape: f32[16,32], index: 4, kind: input, shape index: {}]   ;;  %s4925_s5 = inlined_call_operand.vmem [shape: f32[8,32], index: 5, kind: input, shape index: {}]   ;;  %s4926_s6 = inlined_call_operand.vmem [shape: f32[1,32], index: 6, kind: input, shape index: {}]   ;;  %s4927_s7 = inlined_call_operand.vmem [shape: f32[16,16], index: 7, kind: input, shape index: {}]   ;;  %s4928_s8 = inlined_call_operand.vmem [shape: f32[1,16], index: 8, kind: input, shape index: {}]   ;;  %s4929_s9 = inlined_call_operand.vmem [shape: f32[1,16], index: 9, kind: input, shape index: {}]   ;;  %s4930_s10 = inlined_call_operand.vmem [shape: f32[1,16], index: 10, kind: input, shape index: {}]   ;;  %s4931_s11 = inlined_call_operand.vmem [shape: f32[8,4,16], index: 11, kind: output, shape index: {}]  }
   0x1   :  { %4037 = vmatprep.subr.bf16.mxu1 %v4267_v0  ;;  %3789 = vmatprep.subr.mxu0 %v4268_v1  ;;  %v38_v2 = vld [vmem:[%s4920_s1] sm:$0xff]  ;;  %v39_v3 = vld [vmem:[%s4920_s1 + $0x8] sm:$0xff]  ;;  %s4273_s29 = smov 104   ;;  %vm66_vm2 = vcmask 64512   ;;  %vm1715_vm3 = vcmask 125952  }
   0x2   :  { %v4345_v4 = vld [vmem:[%s4921_s2] sm:$0xff]  ;;  %v4347_v5 = vpack.c.bf16 %v39_v3, %v38_v2  ;;  %3791 = vmatprep.mubr.msk.f32.mxu0 %vm4269_vm0, %v4268_v1  ;;  %3798 = vmatprep.mubr.msk.f32.mxu1 %vm4269_vm0, %v4268_v1  ;;  %v4402_v45 = vld [vmem:[%s4922_s0 + $0x8] sm:$0xf] }
   0x3   :  { %3790 = vmatpush3.msra.mxu0 %v4345_v4  ;;  %v51_v6 = vld [vmem:[%s4922_s0] sm:$0xf]  ;;  %v3612_v24 = vld [vmem:[%s4922_s0 + $0x4] sm:$0xf] }
   0x4   :  { %3792 = vmatmul.mubr.f32.vlgmr.msra.gmra.mrb[0].mxu0 %v4268_v1  ;;  %4039 = vmatpush3.bf16.msra.mxu1 %v4347_v5  ;;  %v4373_v9 = vld [vmem:[%s4923_s3] ss:$0 sm:$0xff]  ;;  %s4271_s3 = smov 8  }
   0x5   :  { %3801 = vmatprep.subr.mxu0 %v4268_v1  ;;  %4040 = vmatprep.subr.bf16.mxu1 %v4267_v0 }
   0x6   :  { %3802 = vmatpush3.msra.mxu0 %v4345_v4  ;;  %3803 = vmatprep.mubr.msk.f32.mxu0 %vm4269_vm0, %v4268_v1 }
   0x7   :  { %3813 = vmatprep.subr.mxu0 %v4268_v1  ;;  %3799 = vmatmul.mubr.msk.f32.vlgmr.msra.gmra.mrb[0].mxu1 %vm140_vm1, %v51_v6  ;;  %v4426_v6 = vld [vmem:[%s4922_s0 + $0xc] sm:$0xf] }
   0x8   :  { %4042 = vmatpush3.bf16.msra.mxu1 %v4347_v5  ;;  %3810 = vmatprep.mubr.msk.f32.mxu1 %vm4269_vm0, %v4268_v1 }
   0x9   :  { %4043 = vmatprep.subr.bf16.mxu1 %v4267_v0 }
   0xb   :  { %3811 = vmatmul.mubr.msk.f32.vlgmr.msra.gmra.mrb[2].mxu1 %vm140_vm1, %v3612_v24 }
   0xc   :  { %4045 = vmatpush3.bf16.msra.mxu1 %v4347_v5  ;;  %3822 = vmatprep.mubr.msk.f32.mxu1 %vm4269_vm0, %v4268_v1 }
   0xd   :  { %4046 = vmatprep.subr.bf16.mxu1 %v4267_v0 }
   0xf   :  { %3823 = vmatmul.mubr.msk.f32.vlgmr.msra.gmra.mrb[4].mxu1 %vm140_vm1, %v4402_v45 }
  0x10   :  { %4048 = vmatpush3.bf16.msra.mxu1 %v4347_v5  ;;  %3834 = vmatprep.mubr.msk.f32.mxu1 %vm4269_vm0, %v4268_v1 }
  0x11   :  { %4049 = vmatprep.subr.bf16.mxu1 %v4267_v0 }
  0x13   :  { %3835 = vmatmul.mubr.msk.f32.vlgmr.msra.gmra.mrb[6].mxu1 %vm140_vm1, %v4426_v6 }
  0x14   :  { %4051 = vmatpush3.bf16.msra.mxu1 %v4347_v5  ;;  %3846 = vmatprep.mubr.msk.f32.mxu1 %vm4269_vm0, %v4268_v1 }
  0x15   :  { %4052 = vmatprep.subr.bf16.mxu1 %v4267_v0 }
  0xd7   :  { %v136_v7 = vpop.f32.mrb[0].mxu0 }
  0xd8   :  { %v3793_v8 = vpop.f32.mrb[1].mxu0 }
  0xda   :  { %v210_v10 = vpop.f32.mrb[0].mxu1 }
  0xdb   :  { %v211_v11 = vadd.f32 %v210_v10, %v136_v7  ;;  %v3800_v12 = vpop.f32.mrb[1].mxu1 }
  0xdd   :  { %v220_v13 = vadd.f32 %v4373_v9, %v211_v11 }
  0xde   :  { %v389_v28 = vpop.f32.mrb[2].mxu1 }
  0xdf   :  { %4116 = vtanh.f32 %v220_v13  ;;  %v3621_v15 = vmul.f32 -1.442695, %v220_v13  ;;  %v3812_v29 = vpop.f32.mrb[3].mxu1 }
  0xe1   :  { %4118 = vpow2.f32 %v3621_v15 }
  0xe2   :  { %v562_v49 = vpop.f32.mrb[4].mxu1 }
  0xe3   :  { %v3824_v50 = vpop.f32.mrb[5].mxu1 }
  0xe6   :  { %v735_v11 = vpop.f32.mrb[6].mxu1 }
  0xe7   :  { %v3836_v12 = vpop.f32.mrb[7].mxu1 }
  0xe9   :  { %v4117_v14 = vpop.eup %4116 }
  0xea   :  { %230 = vrot.lane.b32.xlu0 %v4117_v14, %s4270_s25 }
  0xeb   :  { %v4119_v16 = vpop.eup %4118 }
  0xec   :  { %v224_v17 = vadd.f32 1.0, %v4119_v16 }
  0xee   :  { %4120 = vrcp.f32 %v224_v17 }
  0xf8   :  { %v4121_v18 = vpop.eup %4120 }
  0xf9   :  { %v227_v21 = vmul.f32 0.0, %v4121_v18 }
 0x15c   :  { %v231_v19 = vpop.permute.xlu0 %230 }
 0x15d   :  { %v233_v20 = vmul.f32 %v4121_v18, %v231_v19 }
 0x15f   :  { %235 = vrot.lane.b32.xlu0 %v233_v20, %s4271_s3 }
 0x1d1   :  { %v236_v22 = vpop.permute.xlu0 %235 }
 0x1d2   :  { %v238_v23 = vadd.f32 %v236_v22, %v227_v21 }
 0x1d4   :  { %4122 = vtanh.f32 %v238_v23 }
 0x1de   :  { %v4123_v25 = vpop.eup %4122 }
 0x1df   :  { %241 = vrot.lane.b32.xlu1 %v4123_v25, %s4272_s28 }
 0x251   :  { %v242_v26 = vpop.permute.xlu1 %241 }
 0x252   :  { %v244_v27 = vmul.f32 %v4121_v18, %v242_v26 }
 0x254   :  { %246 = vrot.lane.b32.xlu1 %v244_v27, %s4273_s29 }
 0x2c6   :  { %v4388_v30 = vpop.permute.xlu1 %246 }
 0x2c7   :  { %3804 = vmatmul.mubr.msk.f32.vlgmr.msra.gmra.mrb[2].mxu0 %vm66_vm2, %v4388_v30 }
 0x2c8   :  { %3814 = vmatpush3.msra.mxu0 %v4345_v4  ;;  %3815 = vmatprep.mubr.msk.f32.mxu0 %vm4269_vm0, %v4268_v1 }
 0x2c9   :  { %3825 = vmatprep.subr.mxu0 %v4268_v1 }
 0x39a   :  { %v316_v31 = vpop.f32.mrb[2].mxu0 }
 0x39b   :  { %v390_v32 = vadd.f32 %v389_v28, %v316_v31  ;;  %v3805_v33 = vpop.f32.mrb[3].mxu0  ;;  %v4450_v28 = vld [vmem:[%s4922_s0 + $0x10] sm:$0xf] }
 0x39c   :  { %3847 = vmatmul.mubr.msk.f32.vlgmr.msra.gmra.mrb[8].mxu1 %vm140_vm1, %v4450_v28 }
 0x39d   :  { %v393_v34 = vadd.f32 %v4373_v9, %v390_v32  ;;  %4054 = vmatpush3.bf16.msra.mxu1 %v4347_v5  ;;  %3858 = vmatprep.mubr.msk.f32.mxu1 %vm4269_vm0, %v4268_v1 }
 0x39e   :  { %4055 = vmatprep.subr.bf16.mxu1 %v4267_v0 }
 0x39f   :  { %4124 = vtanh.f32 %v393_v34  ;;  %v3624_v36 = vmul.f32 -1.442695, %v393_v34 }
 0x3a1   :  { %4126 = vpow2.f32 %v3624_v36 }
 0x3a9   :  { %v4125_v35 = vpop.eup %4124 }
 0x3aa   :  { %403 = vrot.lane.b32.xlu0 %v4125_v35, %s4270_s25 }
 0x3ab   :  { %v4127_v37 = vpop.eup %4126 }
 0x3ac   :  { %v397_v38 = vadd.f32 1.0, %v4127_v37 }
 0x3ae   :  { %4128 = vrcp.f32 %v397_v38 }
 0x3b8   :  { %v4129_v39 = vpop.eup %4128 }
 0x3b9   :  { %v400_v42 = vmul.f32 %v4129_v39, %v238_v23 }
 0x41c   :  { %v404_v40 = vpop.permute.xlu0 %403 }
 0x41d   :  { %v406_v41 = vmul.f32 %v4129_v39, %v404_v40 }
 0x41f   :  { %408 = vrot.lane.b32.xlu1 %v406_v41, %s4271_s3 }
 0x46f   :  { %v908_v33 = vpop.f32.mrb[8].mxu1 }
 0x470   :  { %v3848_v34 = vpop.f32.mrb[9].mxu1 }
 0x491   :  { %v409_v43 = vpop.permute.xlu1 %408 }
 0x492   :  { %v411_v44 = vadd.f32 %v409_v43, %v400_v42 }
 0x494   :  { %4130 = vtanh.f32 %v411_v44 }
 0x49e   :  { %v4131_v46 = vpop.eup %4130 }
 0x49f   :  { %414 = vrot.lane.b32.xlu0 %v4131_v46, %s4272_s28 }
 0x511   :  { %v415_v47 = vpop.permute.xlu0 %414 }
 0x512   :  { %v417_v48 = vmul.f32 %v4129_v39, %v415_v47 }
 0x514   :  { %419 = vrot.lane.b32.xlu1 %v417_v48, %s4273_s29 }
 0x586   :  { %v4412_v51 = vpop.permute.xlu1 %419 }
 0x587   :  { %3816 = vmatmul.mubr.msk.f32.vlgmr.msra.gmra.mrb[4].mxu0 %vm66_vm2, %v4412_v51 }
 0x588   :  { %3826 = vmatpush3.msra.mxu0 %v4345_v4  ;;  %3827 = vmatprep.mubr.msk.f32.mxu0 %vm4269_vm0, %v4268_v1 }
 0x589   :  { %3837 = vmatprep.subr.mxu0 %v4268_v1 }
 0x65a   :  { %v489_v52 = vpop.f32.mrb[4].mxu0 }
 0x65b   :  { %v563_v53 = vadd.f32 %v562_v49, %v489_v52  ;;  %v3817_v54 = vpop.f32.mrb[5].mxu0  ;;  %v4474_v52 = vld [vmem:[%s4922_s0 + $0x14] sm:$0xf] }
 0x65c   :  { %3859 = vmatmul.mubr.msk.f32.vlgmr.msra.gmra.mrb[10].mxu1 %vm140_vm1, %v4474_v52 }
 0x65d   :  { %v566_v55 = vadd.f32 %v4373_v9, %v563_v53  ;;  %4057 = vmatpush3.bf16.msra.mxu1 %v4347_v5  ;;  %3870 = vmatprep.mubr.msk.f32.mxu1 %vm4269_vm0, %v4268_v1 }
 0x65e   :  { %4058 = vmatprep.subr.bf16.mxu1 %v4267_v0 }
 0x65f   :  { %4132 = vtanh.f32 %v566_v55  ;;  %v3627_v57 = vmul.f32 -1.442695, %v566_v55 }
 0x661   :  { %4134 = vpow2.f32 %v3627_v57 }
 0x669   :  { %v4133_v56 = vpop.eup %4132 }
 0x66a   :  { %576 = vrot.lane.b32.xlu0 %v4133_v56, %s4270_s25 }
 0x66b   :  { %v4135_v58 = vpop.eup %4134 }
 0x66c   :  { %v570_v59 = vadd.f32 1.0, %v4135_v58 }
 0x66e   :  { %4136 = vrcp.f32 %v570_v59 }
 0x678   :  { %v4137_v60 = vpop.eup %4136 }
 0x679   :  { %v573_v63 = vmul.f32 %v4137_v60, %v411_v44 }
 0x6dc   :  { %v577_v61 = vpop.permute.xlu0 %576 }
 0x6dd   :  { %v579_v62 = vmul.f32 %v4137_v60, %v577_v61 }
 0x6df   :  { %581 = vrot.lane.b32.xlu1 %v579_v62, %s4271_s3 }
 0x72f   :  { %v1081_v56 = vpop.f32.mrb[10].mxu1 }
 0x730   :  { %v3860_v57 = vpop.f32.mrb[11].mxu1 }
 0x751   :  { %v582_v2 = vpop.permute.xlu1 %581 }
 0x752   :  { %v584_v3 = vadd.f32 %v582_v2, %v573_v63 }
 0x754   :  { %4138 = vtanh.f32 %v584_v3 }
 0x75e   :  { %v4139_v7 = vpop.eup %4138 }
 0x75f   :  { %587 = vrot.lane.b32.xlu0 %v4139_v7, %s4272_s28 }
 0x7d1   :  { %v588_v8 = vpop.permute.xlu0 %587 }
 0x7d2   :  { %v590_v10 = vmul.f32 %v4137_v60, %v588_v8 }
 0x7d4   :  { %592 = vrot.lane.b32.xlu1 %v590_v10, %s4273_s29 }
 0x846   :  { %v4436_v13 = vpop.permute.xlu1 %592 }
 0x847   :  { %3828 = vmatmul.mubr.msk.f32.vlgmr.msra.gmra.mrb[6].mxu0 %vm66_vm2, %v4436_v13 }
 0x848   :  { %3838 = vmatpush3.msra.mxu0 %v4345_v4  ;;  %3839 = vmatprep.mubr.msk.f32.mxu0 %vm4269_vm0, %v4268_v1 }
 0x849   :  { %3849 = vmatprep.subr.mxu0 %v4268_v1 }
 0x91a   :  { %v662_v14 = vpop.f32.mrb[6].mxu0 }
 0x91b   :  { %v736_v15 = vadd.f32 %v735_v11, %v662_v14  ;;  %v3829_v16 = vpop.f32.mrb[7].mxu0 }
 0x91c   :  { %v4498_v16 = vld [vmem:[%s4922_s0 + $0x18] sm:$0xf] }
 0x91d   :  { %v739_v17 = vadd.f32 %v4373_v9, %v736_v15  ;;  %3871 = vmatmul.mubr.msk.f32.vlgmr.msra.gmra.mrb[12].mxu1 %vm140_vm1, %v4498_v16 }
 0x91e   :  { %4060 = vmatpush3.bf16.msra.mxu1 %v4347_v5  ;;  %3882 = vmatprep.mubr.msk.f32.mxu1 %vm4269_vm0, %v4268_v1 }
 0x91f   :  { %4140 = vtanh.f32 %v739_v17  ;;  %v3630_v19 = vmul.f32 -1.442695, %v739_v17  ;;  %4061 = vmatprep.subr.bf16.mxu1 %v4267_v0 }
 0x921   :  { %4142 = vpow2.f32 %v3630_v19 }
 0x929   :  { %v4141_v18 = vpop.eup %4140 }
 0x92a   :  { %749 = vrot.lane.b32.xlu0 %v4141_v18, %s4270_s25 }
 0x92b   :  { %v4143_v20 = vpop.eup %4142 }
 0x92c   :  { %v743_v21 = vadd.f32 1.0, %v4143_v20 }
 0x92e   :  { %4144 = vrcp.f32 %v743_v21 }
 0x938   :  { %v4145_v22 = vpop.eup %4144 }
 0x939   :  { %v746_v25 = vmul.f32 %v4145_v22, %v584_v3 }
 0x99c   :  { %v750_v23 = vpop.permute.xlu0 %749 }
 0x99d   :  { %v752_v24 = vmul.f32 %v4145_v22, %v750_v23 }
 0x99f   :  { %754 = vrot.lane.b32.xlu1 %v752_v24, %s4271_s3 }
 0x9f0   :  { %v1254_v20 = vpop.f32.mrb[12].mxu1 }
 0x9f1   :  { %v3872_v21 = vpop.f32.mrb[13].mxu1 }
 0xa11   :  { %v755_v26 = vpop.permute.xlu1 %754 }
 0xa12   :  { %v757_v27 = vadd.f32 %v755_v26, %v746_v25 }
 0xa14   :  { %4146 = vtanh.f32 %v757_v27 }
 0xa1e   :  { %v4147_v29 = vpop.eup %4146 }
 0xa1f   :  { %760 = vrot.lane.b32.xlu0 %v4147_v29, %s4272_s28 }
 0xa91   :  { %v761_v31 = vpop.permute.xlu0 %760 }
 0xa92   :  { %v763_v32 = vmul.f32 %v4145_v22, %v761_v31 }
 0xa94   :  { %765 = vrot.lane.b32.xlu1 %v763_v32, %s4273_s29 }
 0xb06   :  { %v4460_v35 = vpop.permute.xlu1 %765 }
 0xb07   :  { %3840 = vmatmul.mubr.msk.f32.vlgmr.msra.gmra.mrb[8].mxu0 %vm66_vm2, %v4460_v35 }
 0xb08   :  { %3850 = vmatpush3.msra.mxu0 %v4345_v4  ;;  %3851 = vmatprep.mubr.msk.f32.mxu0 %vm4269_vm0, %v4268_v1 }
 0xb09   :  { %3861 = vmatprep.subr.mxu0 %v4268_v1 }
 0xbda   :  { %v835_v36 = vpop.f32.mrb[8].mxu0 }
 0xbdb   :  { %v909_v37 = vadd.f32 %v908_v33, %v835_v36  ;;  %v3841_v38 = vpop.f32.mrb[9].mxu0 }
 0xbdc   :  { %v4525_v38 = vld [vmem:[%s4922_s0 + $0x1c] sm:$0xf] }
 0xbdd   :  { %v912_v39 = vadd.f32 %v4373_v9, %v909_v37  ;;  %3883 = vmatmul.mubr.msk.f32.vlgmr.msra.gmra.mrb[14].mxu1 %vm140_vm1, %v4525_v38 }
 0xbde   :  { %3894 = vmatprep.mubr.msk.f32.mxu1 %vm4269_vm0, %v4268_v1 }
 0xbdf   :  { %4148 = vtanh.f32 %v912_v39  ;;  %v3633_v41 = vmul.f32 -1.442695, %v912_v39 }
 0xbe1   :  { %4150 = vpow2.f32 %v3633_v41  ;;  %v43_v41 = vld [vmem:[%s4924_s4 + $0x8] sm:$0xff] }
 0xbe9   :  { %v4149_v40 = vpop.eup %4148 }
 0xbea   :  { %922 = vrot.lane.b32.xlu0 %v4149_v40, %s4270_s25  ;;  %v42_v40 = vld [vmem:[%s4924_s4] sm:$0xff] }
 0xbeb   :  { %v4151_v42 = vpop.eup %4150 }
 0xbec   :  { %v916_v43 = vadd.f32 1.0, %v4151_v42  ;;  %v4538_v42 = vpack.c.bf16 %v43_v41, %v42_v40 }
 0xbee   :  { %4152 = vrcp.f32 %v916_v43  ;;  %4063 = vmatpush3.bf16.msra.mxu1 %v4538_v42  ;;  %v4545_v43 = vld [vmem:[%s4925_s5] sm:$0xff] }
 0xbef   :  { %3904 = vmatprep.subr.mxu1 %v4268_v1 }
 0xbf1   :  { %3895 = vmatmul.mubr.msk.f32.vlgmr.msra.gmra.mrb[16].mxu1 %vm140_vm1, %v4525_v38 }
 0xbf2   :  { %3905 = vmatpush3.msra.mxu1 %v4545_v43  ;;  %3906 = vmatprep.mubr.msk.f32.mxu1 %vm4269_vm0, %v4268_v1 }
 0xbf3   :  { %4070 = vmatprep.subr.bf16.mxu1 %v4267_v0 }
 0xbf8   :  { %v4153_v44 = vpop.eup %4152 }
 0xbf9   :  { %v919_v48 = vmul.f32 %v4153_v44, %v757_v27 }
 0xc5c   :  { %v923_v46 = vpop.permute.xlu0 %922 }
 0xc5d   :  { %v925_v47 = vmul.f32 %v4153_v44, %v923_v46 }
 0xc5f   :  { %927 = vrot.lane.b32.xlu1 %v925_v47, %s4271_s3 }
 0xcb0   :  { %v1427_v47 = vpop.f32.mrb[14].mxu1 }
 0xcd1   :  { %v928_v49 = vpop.permute.xlu1 %927 }
 0xcd2   :  { %v930_v50 = vadd.f32 %v928_v49, %v919_v48  ;;  %v3884_v48 = vpop.f32.mrb[15].mxu1 }
 0xcd4   :  { %4154 = vtanh.f32 %v930_v50 }
 0xcde   :  { %v4155_v53 = vpop.eup %4154 }
 0xcdf   :  { %933 = vrot.lane.b32.xlu0 %v4155_v53, %s4272_s28 }
 0xd51   :  { %v934_v54 = vpop.permute.xlu0 %933 }
 0xd52   :  { %v936_v55 = vmul.f32 %v4153_v44, %v934_v54 }
 0xd54   :  { %938 = vrot.lane.b32.xlu1 %v936_v55, %s4273_s29 }
 0xdc6   :  { %v4484_v58 = vpop.permute.xlu1 %938 }
 0xdc7   :  { %3852 = vmatmul.mubr.msk.f32.vlgmr.msra.gmra.mrb[10].mxu0 %vm66_vm2, %v4484_v58 }
 0xdc8   :  { %3862 = vmatpush3.msra.mxu0 %v4345_v4  ;;  %3863 = vmatprep.mubr.msk.f32.mxu0 %vm4269_vm0, %v4268_v1 }
 0xdc9   :  { %3873 = vmatprep.subr.mxu0 %v4268_v1 }
 0xe9a   :  { %v1008_v59 = vpop.f32.mrb[10].mxu0 }
 0xe9b   :  { %v1082_v60 = vadd.f32 %v1081_v56, %v1008_v59  ;;  %v3853_v61 = vpop.f32.mrb[11].mxu0  ;;  %v4569_v59 = vld [vmem:[%s4926_s6] ss:$0 sm:$0xff] }
 0xe9d   :  { %v1085_v62 = vadd.f32 %v4373_v9, %v1082_v60 }
 0xe9f   :  { %4156 = vtanh.f32 %v1085_v62  ;;  %v3636_v2 = vmul.f32 -1.442695, %v1085_v62 }
 0xea1   :  { %4158 = vpow2.f32 %v3636_v2 }
 0xea9   :  { %v4157_v63 = vpop.eup %4156 }
 0xeaa   :  { %1095 = vrot.lane.b32.xlu0 %v4157_v63, %s4270_s25 }
 0xeab   :  { %v4159_v3 = vpop.eup %4158 }
 0xeac   :  { %v1089_v7 = vadd.f32 1.0, %v4159_v3 }
 0xeae   :  { %4160 = vrcp.f32 %v1089_v7 }
 0xeb8   :  { %v4161_v8 = vpop.eup %4160 }
 0xeb9   :  { %v1092_v12 = vmul.f32 %v4161_v8, %v930_v50  ;;  %v1592_v50 = vpop.f32.mrb[16].mxu1 }
 0xeba   :  { %v3896_v53 = vpop.f32.mrb[17].mxu1 }
 0xf1c   :  { %v1096_v10 = vpop.permute.xlu0 %1095 }
 0xf1d   :  { %v1098_v11 = vmul.f32 %v4161_v8, %v1096_v10 }
 0xf1f   :  { %1100 = vrot.lane.b32.xlu1 %v1098_v11, %s4271_s3 }
 0xf91   :  { %v1101_v14 = vpop.permute.xlu1 %1100 }
 0xf92   :  { %v1103_v15 = vadd.f32 %v1101_v14, %v1092_v12 }
 0xf94   :  { %4162 = vtanh.f32 %v1103_v15 }
 0xf9e   :  { %v4163_v17 = vpop.eup %4162 }
 0xf9f   :  { %1106 = vrot.lane.b32.xlu0 %v4163_v17, %s4272_s28 }
0x1011   :  { %v1107_v18 = vpop.permute.xlu0 %1106 }
0x1012   :  { %v1109_v19 = vmul.f32 %v4161_v8, %v1107_v18 }
0x1014   :  { %1111 = vrot.lane.b32.xlu1 %v1109_v19, %s4273_s29 }
0x1086   :  { %v4508_v22 = vpop.permute.xlu1 %1111 }
0x1087   :  { %3864 = vmatmul.mubr.msk.f32.vlgmr.msra.gmra.mrb[12].mxu0 %vm66_vm2, %v4508_v22 }
0x1088   :  { %3874 = vmatpush3.msra.mxu0 %v4345_v4  ;;  %3875 = vmatprep.mubr.msk.f32.mxu0 %vm4269_vm0, %v4268_v1 }
0x1089   :  { %3885 = vmatprep.subr.mxu0 %v4268_v1 }
0x115a   :  { %v1181_v5 = vpop.f32.mrb[12].mxu0 }
0x115b   :  { %v1255_v23 = vadd.f32 %v1254_v20, %v1181_v5  ;;  %v3865_v24 = vpop.f32.mrb[13].mxu0 }
0x115d   :  { %v1258_v25 = vadd.f32 %v4373_v9, %v1255_v23 }
0x115f   :  { %4164 = vtanh.f32 %v1258_v25  ;;  %v3639_v27 = vmul.f32 -1.442695, %v1258_v25 }
0x1161   :  { %4166 = vpow2.f32 %v3639_v27 }
0x1169   :  { %v4165_v26 = vpop.eup %4164 }
0x116a   :  { %1268 = vrot.lane.b32.xlu0 %v4165_v26, %s4270_s25 }
0x116b   :  { %v4167_v29 = vpop.eup %4166 }
0x116c   :  { %v1262_v31 = vadd.f32 1.0, %v4167_v29 }
0x116e   :  { %4168 = vrcp.f32 %v1262_v31  ;;  %v46_v31 = vld [vmem:[%s4927_s7] sm:$0xff] }
0x1178   :  { %v4169_v4 = vpop.eup %4168 }
0x1179   :  { %v1265_v34 = vmul.f32 %v4169_v4, %v1103_v15 }
0x11dc   :  { %v1269_v32 = vpop.permute.xlu0 %1268 }
0x11dd   :  { %v1271_v33 = vmul.f32 %v4169_v4, %v1269_v32 }
0x11df   :  { %1273 = vrot.lane.b32.xlu1 %v1271_v33, %s4271_s3 }
0x1251   :  { %v1274_v36 = vpop.permute.xlu1 %1273 }
0x1252   :  { %v4519_v37 = vadd.f32 %v1274_v36, %v1265_v34 }
0x1254   :  { %4170 = vtanh.f32 %v4519_v37 }
0x125e   :  { %v4171_v39 = vpop.eup %4170 }
0x125f   :  { %1279 = vrot.lane.b32.xlu0 %v4171_v39, %s4272_s28 }
0x12d1   :  { %v1280_v44 = vpop.permute.xlu0 %1279 }
0x12d2   :  { %v1282_v46 = vmul.f32 %v4169_v4, %v1280_v44  ;;  %v47_v4 = vld [vmem:[%s4927_s7 + $0x8] sm:$0xff] }
0x12d3   :  { %v4585_v32 = vpack.c.bf16 %v47_v4, %v46_v31 }
0x12d4   :  { %1284 = vrot.lane.b32.xlu1 %v1282_v46, %s4273_s29 }
0x1346   :  { %v4554_v49 = vpop.permute.xlu1 %1284 }
0x1347   :  { %3876 = vmatmul.mubr.msk.f32.vlgmr.msra.gmra.mrb[14].mxu0 %vm66_vm2, %v4554_v49 }
0x1348   :  { %3886 = vmatpush3.msra.mxu0 %v4545_v43  ;;  %3887 = vmatprep.mubr.msk.f32.mxu0 %vm4269_vm0, %v4268_v1 }
0x1349   :  { %4064 = vmatprep.subr.bf16.mxu0 %v4267_v0 }
0x134b   :  { %3888 = vmatmul.mubr.f32.vlgmr.msra.gmra.mrb[16].mxu0 %v4268_v1 }
0x134c   :  { %3901 = vmatprep.mubr.msk.f32.mxu0 %vm4269_vm0, %v4268_v1  ;;  %4066 = vmatpush3.bf16.msra.mxu0 %v4585_v32 }
0x134d   :  { %4067 = vmatprep.subr.bf16.mxu0 %v4267_v0 }
0x141a   :  { %v1354_v54 = vpop.f32.mrb[14].mxu0 }
0x141b   :  { %v1428_v55 = vadd.f32 %v1427_v47, %v1354_v54  ;;  %v3877_v56 = vpop.f32.mrb[15].mxu0 }
0x141d   :  { %v1431_v57 = vadd.f32 %v4373_v9, %v1428_v55 }
0x141e   :  { %v1522_v60 = vpop.f32.mrb[16].mxu0 }
0x141f   :  { %4172 = vtanh.f32 %v1431_v57  ;;  %v1593_v61 = vadd.f32 %v1592_v50, %v1522_v60  ;;  %v3889_v62 = vpop.f32.mrb[17].mxu0  ;;  %v3642_v7 = vmul.f32 -1.442695, %v1431_v57 }
0x1421   :  { %v1602_v63 = vadd.f32 %v4569_v59, %v1593_v61 }
0x1423   :  { %4174 = vtanh.f32 %v1602_v63  ;;  %v3645_v9 = vmul.f32 -1.442695, %v1602_v63 }
0x1424   :  { %4176 = vpow2.f32 %v3642_v7 }
0x1425   :  { %4178 = vpow2.f32 %v3645_v9 }
0x1429   :  { %v4173_v2 = vpop.eup %4172 }
0x142a   :  { %1441 = vrot.lane.b32.xlu0 %v4173_v2, %s4270_s25 }
0x142d   :  { %v4175_v3 = vpop.eup %4174 }
0x142e   :  { %1612 = vrot.lane.b32.xlu1 %v4175_v3, %s4270_s25  ;;  %v4177_v8 = vpop.eup %4176 }
0x142f   :  { %v1435_v10 = vadd.f32 1.0, %v4177_v8  ;;  %v4179_v11 = vpop.eup %4178 }
0x1430   :  { %v1606_v12 = vadd.f32 1.0, %v4179_v11 }
0x1431   :  { %4180 = vrcp.f32 %v1435_v10 }
0x1432   :  { %4182 = vrcp.f32 %v1606_v12 }
0x143b   :  { %v4181_v14 = vpop.eup %4180 }
0x143c   :  { %v4183_v18 = vpop.eup %4182  ;;  %v1438_v21 = vmul.f32 %v4181_v14, %v4519_v37 }
0x143d   :  { %v1609_v24 = vmul.f32 0.0, %v4183_v18 }
0x149c   :  { %v1442_v15 = vpop.permute.xlu0 %1441 }
0x149d   :  { %v1444_v17 = vmul.f32 %v4181_v14, %v1442_v15 }
0x149f   :  { %1446 = vrot.lane.b32.xlu0 %v1444_v17, %s4271_s3 }
0x14a0   :  { %v1613_v19 = vpop.permute.xlu1 %1612 }
0x14a1   :  { %v1615_v20 = vmul.f32 %v4183_v18, %v1613_v19 }
0x14a3   :  { %1617 = vrot.lane.b32.xlu1 %v1615_v20, %s4271_s3 }
0x1511   :  { %v1447_v5 = vpop.permute.xlu0 %1446 }
0x1512   :  { %v1449_v23 = vadd.f32 %v1447_v5, %v1438_v21 }
0x1514   :  { %4184 = vtanh.f32 %v1449_v23 }
0x1515   :  { %v1618_v25 = vpop.permute.xlu1 %1617 }
0x1516   :  { %v1620_v26 = vadd.f32 %v1618_v25, %v1609_v24 }
0x1518   :  { %4186 = vtanh.f32 %v1620_v26 }
0x151e   :  { %v4185_v27 = vpop.eup %4184 }
0x151f   :  { %1452 = vrot.lane.b32.xlu0 %v4185_v27, %s4272_s28 }
0x1522   :  { %v4187_v29 = vpop.eup %4186 }
0x1523   :  { %1623 = vrot.lane.b32.xlu1 %v4187_v29, %s4272_s28 }
0x1591   :  { %v1453_v33 = vpop.permute.xlu0 %1452 }
0x1592   :  { %v1455_v34 = vmul.f32 %v4181_v14, %v1453_v33 }
0x1594   :  { %1628 = vrot.lane.b32.xlu0 %v1455_v34, %s4273_s29 }
0x1595   :  { %v1624_v36 = vpop.permute.xlu1 %1623 }
0x1596   :  { %v1626_v37 = vmul.f32 %v4183_v18, %v1624_v36 }
0x1598   :  { %1747 = vrot.lane.b32.xlu0 %v1626_v37, %s4273_s29  ;;  %1632 = vrot.lane.b32.xlu1 %v1626_v37, %s4270_s25 }
0x1606   :  { %v1629_v39 = vpop.permute.xlu0 %1628 }
0x160a   :  { %v1748_v40 = vpop.permute.xlu0 %1747  ;;  %v1633_v41 = vpop.permute.xlu1 %1632 }
0x160b   :  { %v1635_v44 = vsel %vm66_vm2, %v1629_v39, %v1633_v41  ;;  %3907 = vmatmul.mubr.msk.f32.vlgmr.msra.gmra.mrb[18].mxu1 %vm66_vm2, %v1748_v40 }
0x160c   :  { %3902 = vmatmul.mubr.msk.f32.vlgmr.msra.gmra.mrb[18].mxu0 %vm140_vm1, %v1635_v44  ;;  %4072 = vmatpush3.bf16.msra.mxu1 %v4585_v32 }
0x160d   :  { %4069 = vmatpush3.bf16.msra.mxu0 %v4538_v42  ;;  %3913 = vmatprep.mubr.msk.f32.mxu0 %vm4269_vm0, %v4268_v1 }
0x160e   :  { %3923 = vmatprep.subr.mxu0 %v4268_v1  ;;  %3920 = vmatprep.mubr.msk.f32.mxu1 %vm4269_vm0, %v4268_v1 }
0x160f   :  { %4073 = vmatprep.subr.bf16.mxu1 %v4267_v0 }
0x1610   :  { %3914 = vmatmul.mubr.msk.f32.vlgmr.msra.gmra.mrb[20].mxu0 %vm140_vm1, %v4498_v16 }
0x1611   :  { %3924 = vmatpush3.msra.mxu0 %v4545_v43  ;;  %3925 = vmatprep.mubr.msk.f32.mxu0 %vm4269_vm0, %v4268_v1 }
0x1612   :  { %4076 = vmatprep.subr.bf16.mxu0 %v4267_v0 }
0x16de   :  { %v1817_v46 = vpop.f32.mrb[18].mxu1 }
0x16df   :  { %v4609_v47 = vpop.f32.mrb[18].mxu0  ;;  %v3908_v48 = vpop.f32.mrb[19].mxu1 }
0x16e0   :  { %v3903_v50 = vpop.f32.mrb[19].mxu0 }
0x16e3   :  { %v1887_v53 = vpop.f32.mrb[20].mxu0 }
0x16e4   :  { %v1888_v54 = vadd.f32 %v1887_v53, %v1817_v46  ;;  %v3915_v55 = vpop.f32.mrb[21].mxu0 }
0x16e6   :  { %v1891_v56 = vadd.f32 %v4569_v59, %v1888_v54 }
0x16e8   :  { %4188 = vtanh.f32 %v1891_v56  ;;  %v3653_v16 = vmul.f32 -1.442695, %v1891_v56 }
0x16ea   :  { %4190 = vpow2.f32 %v3653_v16 }
0x16f2   :  { %v4189_v57 = vpop.eup %4188 }
0x16f3   :  { %1901 = vrot.lane.b32.xlu1 %v4189_v57, %s4270_s25 }
0x16f4   :  { %v4191_v60 = vpop.eup %4190 }
0x16f5   :  { %v1895_v61 = vadd.f32 1.0, %v4191_v60 }
0x16f7   :  { %4192 = vrcp.f32 %v1895_v61 }
0x1701   :  { %v4193_v62 = vpop.eup %4192 }
0x1702   :  { %v1898_v3 = vmul.f32 %v4193_v62, %v1620_v26 }
0x1765   :  { %v1902_v63 = vpop.permute.xlu1 %1901 }
0x1766   :  { %v1904_v2 = vmul.f32 %v4193_v62, %v1902_v63 }
0x1768   :  { %1906 = vrot.lane.b32.xlu0 %v1904_v2, %s4271_s3 }
0x17da   :  { %v1907_v7 = vpop.permute.xlu0 %1906 }
0x17db   :  { %v1909_v9 = vadd.f32 %v1907_v7, %v1898_v3 }
0x17dd   :  { %4194 = vtanh.f32 %v1909_v9 }
0x17e7   :  { %v4195_v8 = vpop.eup %4194 }
0x17e8   :  { %1912 = vrot.lane.b32.xlu1 %v4195_v8, %s4272_s28 }
0x185a   :  { %v1913_v10 = vpop.permute.xlu1 %1912 }
0x185b   :  { %v1915_v11 = vmul.f32 %v4193_v62, %v1913_v10 }
0x185d   :  { %2013 = vrot.lane.b32.xlu1 %v1915_v11, %s4273_s29  ;;  %1918 = vrot.lane.b32.xlu0 %v1915_v11, %s4270_s25 }
0x18cf   :  { %v2014_v12 = vpop.permute.xlu1 %2013  ;;  %v1919_v14 = vpop.permute.xlu0 %1918 }
0x18d0   :  { %v1921_v15 = vsel %vm66_vm2, %v4554_v49, %v1919_v14  ;;  %3926 = vmatmul.mubr.msk.f32.vlgmr.msra.gmra.mrb[22].mxu0 %vm66_vm2, %v2014_v12 }
0x18d1   :  { %3921 = vmatmul.mubr.msk.f32.vlgmr.msra.gmra.mrb[20].mxu1 %vm140_vm1, %v1921_v15  ;;  %4078 = vmatpush3.bf16.msra.mxu0 %v4585_v32 }
0x18d2   :  { %4075 = vmatpush3.bf16.msra.mxu1 %v4538_v42  ;;  %3932 = vmatprep.mubr.msk.f32.mxu1 %vm4269_vm0, %v4268_v1 }
0x18d3   :  { %3942 = vmatprep.subr.mxu1 %v4268_v1  ;;  %3939 = vmatprep.mubr.msk.f32.mxu0 %vm4269_vm0, %v4268_v1 }
0x18d4   :  { %4079 = vmatprep.subr.bf16.mxu0 %v4267_v0 }
0x18d5   :  { %3933 = vmatmul.mubr.msk.f32.vlgmr.msra.gmra.mrb[22].mxu1 %vm140_vm1, %v4474_v52 }
0x18d6   :  { %3943 = vmatpush3.msra.mxu1 %v4545_v43  ;;  %3944 = vmatprep.mubr.msk.f32.mxu1 %vm4269_vm0, %v4268_v1 }
0x18d7   :  { %4082 = vmatprep.subr.bf16.mxu1 %v4267_v0 }
0x19a3   :  { %v2083_v49 = vpop.f32.mrb[22].mxu0 }
0x19a4   :  { %v4635_v17 = vpop.f32.mrb[20].mxu1  ;;  %v3927_v18 = vpop.f32.mrb[23].mxu0 }
0x19a5   :  { %v3922_v19 = vpop.f32.mrb[21].mxu1 }
0x19a8   :  { %v2153_v20 = vpop.f32.mrb[22].mxu1 }
0x19a9   :  { %v2154_v21 = vadd.f32 %v2153_v20, %v2083_v49  ;;  %v3934_v5 = vpop.f32.mrb[23].mxu1 }
0x19ab   :  { %v2157_v23 = vadd.f32 %v4569_v59, %v2154_v21 }
0x19ad   :  { %4196 = vtanh.f32 %v2157_v23  ;;  %v3658_v52 = vmul.f32 -1.442695, %v2157_v23 }
0x19af   :  { %4198 = vpow2.f32 %v3658_v52 }
0x19b7   :  { %v4197_v24 = vpop.eup %4196 }
0x19b8   :  { %2167 = vrot.lane.b32.xlu0 %v4197_v24, %s4270_s25 }
0x19b9   :  { %v4199_v25 = vpop.eup %4198 }
0x19ba   :  { %v2161_v26 = vadd.f32 1.0, %v4199_v25 }
0x19bc   :  { %4200 = vrcp.f32 %v2161_v26 }
0x19c6   :  { %v4201_v27 = vpop.eup %4200 }
0x19c7   :  { %v2164_v4 = vmul.f32 %v4201_v27, %v1909_v9 }
0x1a2a   :  { %v2168_v29 = vpop.permute.xlu0 %2167 }
0x1a2b   :  { %v2170_v31 = vmul.f32 %v4201_v27, %v2168_v29 }
0x1a2d   :  { %2172 = vrot.lane.b32.xlu1 %v2170_v31, %s4271_s3 }
0x1a9f   :  { %v2173_v33 = vpop.permute.xlu1 %2172 }
0x1aa0   :  { %v2175_v34 = vadd.f32 %v2173_v33, %v2164_v4 }
0x1aa2   :  { %4202 = vtanh.f32 %v2175_v34 }
0x1aac   :  { %v4203_v36 = vpop.eup %4202 }
0x1aad   :  { %2178 = vrot.lane.b32.xlu0 %v4203_v36, %s4272_s28 }
0x1b1f   :  { %v2179_v37 = vpop.permute.xlu0 %2178 }
0x1b20   :  { %v2181_v39 = vmul.f32 %v4201_v27, %v2179_v37 }
0x1b22   :  { %2279 = vrot.lane.b32.xlu0 %v2181_v39, %s4273_s29  ;;  %2184 = vrot.lane.b32.xlu1 %v2181_v39, %s4270_s25 }
0x1b94   :  { %v2280_v40 = vpop.permute.xlu0 %2279  ;;  %v2185_v41 = vpop.permute.xlu1 %2184 }
0x1b95   :  { %v2187_v44 = vsel %vm66_vm2, %v4508_v22, %v2185_v41  ;;  %3945 = vmatmul.mubr.msk.f32.vlgmr.msra.gmra.mrb[24].mxu1 %vm66_vm2, %v2280_v40 }
0x1b96   :  { %3940 = vmatmul.mubr.msk.f32.vlgmr.msra.gmra.mrb[24].mxu0 %vm140_vm1, %v2187_v44  ;;  %4084 = vmatpush3.bf16.msra.mxu1 %v4585_v32 }
0x1b97   :  { %4081 = vmatpush3.bf16.msra.mxu0 %v4538_v42  ;;  %3951 = vmatprep.mubr.msk.f32.mxu0 %vm4269_vm0, %v4268_v1 }
0x1b98   :  { %3961 = vmatprep.subr.mxu0 %v4268_v1  ;;  %3958 = vmatprep.mubr.msk.f32.mxu1 %vm4269_vm0, %v4268_v1 }
0x1b99   :  { %4085 = vmatprep.subr.bf16.mxu1 %v4267_v0 }
0x1b9a   :  { %3952 = vmatmul.mubr.msk.f32.vlgmr.msra.gmra.mrb[26].mxu0 %vm140_vm1, %v4450_v28 }
0x1b9b   :  { %3962 = vmatpush3.msra.mxu0 %v4545_v43  ;;  %3963 = vmatprep.mubr.msk.f32.mxu0 %vm4269_vm0, %v4268_v1 }
0x1b9c   :  { %4088 = vmatprep.subr.bf16.mxu0 %v4267_v0 }
0x1c68   :  { %v2349_v22 = vpop.f32.mrb[24].mxu1 }
0x1c69   :  { %v4661_v46 = vpop.f32.mrb[24].mxu0  ;;  %v3946_v48 = vpop.f32.mrb[25].mxu1 }
0x1c6a   :  { %v3941_v50 = vpop.f32.mrb[25].mxu0 }
0x1c6d   :  { %v2419_v53 = vpop.f32.mrb[26].mxu0 }
0x1c6e   :  { %v2420_v54 = vadd.f32 %v2419_v53, %v2349_v22  ;;  %v3953_v55 = vpop.f32.mrb[27].mxu0 }
0x1c70   :  { %v2423_v56 = vadd.f32 %v4569_v59, %v2420_v54 }
0x1c72   :  { %4204 = vtanh.f32 %v2423_v56  ;;  %v3663_v28 = vmul.f32 -1.442695, %v2423_v56 }
0x1c74   :  { %4206 = vpow2.f32 %v3663_v28 }
0x1c7c   :  { %v4205_v57 = vpop.eup %4204 }
0x1c7d   :  { %2433 = vrot.lane.b32.xlu1 %v4205_v57, %s4270_s25 }
0x1c7e   :  { %v4207_v16 = vpop.eup %4206 }
0x1c7f   :  { %v2427_v60 = vadd.f32 1.0, %v4207_v16 }
0x1c81   :  { %4208 = vrcp.f32 %v2427_v60 }
0x1c8b   :  { %v4209_v61 = vpop.eup %4208 }
0x1c8c   :  { %v2430_v2 = vmul.f32 %v4209_v61, %v2175_v34 }
0x1cef   :  { %v2434_v62 = vpop.permute.xlu1 %2433 }
0x1cf0   :  { %v2436_v63 = vmul.f32 %v4209_v61, %v2434_v62 }
0x1cf2   :  { %2438 = vrot.lane.b32.xlu0 %v2436_v63, %s4271_s3 }
0x1d64   :  { %v2439_v3 = vpop.permute.xlu0 %2438 }
0x1d65   :  { %v2441_v7 = vadd.f32 %v2439_v3, %v2430_v2 }
0x1d67   :  { %4210 = vtanh.f32 %v2441_v7 }
0x1d71   :  { %v4211_v9 = vpop.eup %4210 }
0x1d72   :  { %2444 = vrot.lane.b32.xlu1 %v4211_v9, %s4272_s28 }
0x1de4   :  { %v2445_v8 = vpop.permute.xlu1 %2444 }
0x1de5   :  { %v2447_v10 = vmul.f32 %v4209_v61, %v2445_v8 }
0x1de7   :  { %2545 = vrot.lane.b32.xlu1 %v2447_v10, %s4273_s29  ;;  %2450 = vrot.lane.b32.xlu0 %v2447_v10, %s4270_s25 }
0x1e59   :  { %v2546_v11 = vpop.permute.xlu1 %2545  ;;  %v2451_v12 = vpop.permute.xlu0 %2450 }
0x1e5a   :  { %v2453_v14 = vsel %vm66_vm2, %v4484_v58, %v2451_v12  ;;  %3964 = vmatmul.mubr.msk.f32.vlgmr.msra.gmra.mrb[28].mxu0 %vm66_vm2, %v2546_v11 }
0x1e5b   :  { %3959 = vmatmul.mubr.msk.f32.vlgmr.msra.gmra.mrb[26].mxu1 %vm140_vm1, %v2453_v14  ;;  %4090 = vmatpush3.bf16.msra.mxu0 %v4585_v32 }
0x1e5c   :  { %4087 = vmatpush3.bf16.msra.mxu1 %v4538_v42  ;;  %3970 = vmatprep.mubr.msk.f32.mxu1 %vm4269_vm0, %v4268_v1 }
0x1e5d   :  { %3980 = vmatprep.subr.mxu1 %v4268_v1  ;;  %3977 = vmatprep.mubr.msk.f32.mxu0 %vm4269_vm0, %v4268_v1 }
0x1e5e   :  { %4091 = vmatprep.subr.bf16.mxu0 %v4267_v0 }
0x1e5f   :  { %3971 = vmatmul.mubr.msk.f32.vlgmr.msra.gmra.mrb[28].mxu1 %vm140_vm1, %v4426_v6 }
0x1e60   :  { %3981 = vmatpush3.msra.mxu1 %v4545_v43  ;;  %3982 = vmatprep.mubr.msk.f32.mxu1 %vm4269_vm0, %v4268_v1 }
0x1e61   :  { %4094 = vmatprep.subr.bf16.mxu1 %v4267_v0 }
0x1f2d   :  { %v2615_v58 = vpop.f32.mrb[28].mxu0 }
0x1f2e   :  { %v4687_v15 = vpop.f32.mrb[26].mxu1  ;;  %v3965_v49 = vpop.f32.mrb[29].mxu0 }
0x1f2f   :  { %v3960_v18 = vpop.f32.mrb[27].mxu1 }
0x1f32   :  { %v2685_v19 = vpop.f32.mrb[28].mxu1 }
0x1f33   :  { %v2686_v20 = vadd.f32 %v2685_v19, %v2615_v58  ;;  %v3972_v21 = vpop.f32.mrb[29].mxu1 }
0x1f35   :  { %v2689_v5 = vadd.f32 %v4569_v59, %v2686_v20 }
0x1f37   :  { %4212 = vtanh.f32 %v2689_v5  ;;  %v3668_v6 = vmul.f32 -1.442695, %v2689_v5 }
0x1f39   :  { %4214 = vpow2.f32 %v3668_v6 }
0x1f41   :  { %v4213_v23 = vpop.eup %4212 }
0x1f42   :  { %2699 = vrot.lane.b32.xlu0 %v4213_v23, %s4270_s25 }
0x1f43   :  { %v4215_v24 = vpop.eup %4214 }
0x1f44   :  { %v2693_v52 = vadd.f32 1.0, %v4215_v24 }
0x1f46   :  { %4216 = vrcp.f32 %v2693_v52 }
0x1f50   :  { %v4217_v25 = vpop.eup %4216 }
0x1f51   :  { %v2696_v29 = vmul.f32 %v4217_v25, %v2441_v7 }
0x1fb4   :  { %v2700_v26 = vpop.permute.xlu0 %2699 }
0x1fb5   :  { %v2702_v27 = vmul.f32 %v4217_v25, %v2700_v26 }
0x1fb7   :  { %2704 = vrot.lane.b32.xlu1 %v2702_v27, %s4271_s3 }
0x2029   :  { %v2705_v31 = vpop.permute.xlu1 %2704 }
0x202a   :  { %v2707_v4 = vadd.f32 %v2705_v31, %v2696_v29 }
0x202c   :  { %4218 = vtanh.f32 %v2707_v4 }
0x2036   :  { %v4219_v33 = vpop.eup %4218 }
0x2037   :  { %2710 = vrot.lane.b32.xlu0 %v4219_v33, %s4272_s28 }
0x20a9   :  { %v2711_v34 = vpop.permute.xlu0 %2710 }
0x20aa   :  { %v2713_v36 = vmul.f32 %v4217_v25, %v2711_v34 }
0x20ac   :  { %2811 = vrot.lane.b32.xlu0 %v2713_v36, %s4273_s29  ;;  %2716 = vrot.lane.b32.xlu1 %v2713_v36, %s4270_s25  ;;  %v4765_v36 = vld [vmem:[%s4922_s0] sm:$0xf] }
0x211e   :  { %v2812_v37 = vpop.permute.xlu0 %2811  ;;  %v2717_v39 = vpop.permute.xlu1 %2716 }
0x211f   :  { %v2719_v40 = vsel %vm66_vm2, %v4460_v35, %v2717_v39  ;;  %3983 = vmatmul.mubr.msk.f32.vlgmr.msra.gmra.mrb[30].mxu1 %vm66_vm2, %v2812_v37 }
0x2120   :  { %3978 = vmatmul.mubr.msk.f32.vlgmr.msra.gmra.mrb[30].mxu0 %vm140_vm1, %v2719_v40  ;;  %4096 = vmatpush3.bf16.msra.mxu1 %v4585_v32 }
0x2121   :  { %4093 = vmatpush3.bf16.msra.mxu0 %v4538_v42  ;;  %3989 = vmatprep.mubr.msk.f32.mxu0 %vm4269_vm0, %v4268_v1 }
0x2122   :  { %3999 = vmatprep.subr.mxu0 %v4268_v1  ;;  %3996 = vmatprep.mubr.msk.f32.mxu1 %vm4269_vm0, %v4268_v1 }
0x2123   :  { %4097 = vmatprep.subr.bf16.mxu1 %v4267_v0 }
0x2124   :  { %3990 = vmatmul.mubr.msk.f32.vlgmr.msra.gmra.mrb[32].mxu0 %vm140_vm1, %v4402_v45 }
0x2125   :  { %4000 = vmatpush3.msra.mxu0 %v4545_v43  ;;  %4001 = vmatprep.mubr.msk.f32.mxu0 %vm4269_vm0, %v4268_v1 }
0x2126   :  { %4100 = vmatprep.subr.bf16.mxu0 %v4267_v0 }
0x21f2   :  { %v2881_v35 = vpop.f32.mrb[30].mxu1 }
0x21f3   :  { %v4713_v41 = vpop.f32.mrb[30].mxu0  ;;  %v3984_v44 = vpop.f32.mrb[31].mxu1 }
0x21f4   :  { %v3979_v22 = vpop.f32.mrb[31].mxu0 }
0x21f7   :  { %v2951_v48 = vpop.f32.mrb[32].mxu0 }
0x21f8   :  { %v2952_v50 = vadd.f32 %v2951_v48, %v2881_v35  ;;  %v3991_v53 = vpop.f32.mrb[33].mxu0 }
0x21fa   :  { %v2955_v54 = vadd.f32 %v4569_v59, %v2952_v50 }
0x21fc   :  { %4220 = vtanh.f32 %v2955_v54  ;;  %v3673_v45 = vmul.f32 -1.442695, %v2955_v54 }
0x21fe   :  { %4222 = vpow2.f32 %v3673_v45 }
0x2206   :  { %v4221_v55 = vpop.eup %4220 }
0x2207   :  { %2965 = vrot.lane.b32.xlu1 %v4221_v55, %s4270_s25 }
0x2208   :  { %v4223_v56 = vpop.eup %4222 }
0x2209   :  { %v2959_v57 = vadd.f32 1.0, %v4223_v56 }
0x220b   :  { %4224 = vrcp.f32 %v2959_v57 }
0x2215   :  { %v4225_v28 = vpop.eup %4224 }
0x2216   :  { %v2962_v61 = vmul.f32 %v4225_v28, %v2707_v4 }
0x2279   :  { %v2966_v16 = vpop.permute.xlu1 %2965 }
0x227a   :  { %v2968_v60 = vmul.f32 %v4225_v28, %v2966_v16 }
0x227c   :  { %2970 = vrot.lane.b32.xlu0 %v2968_v60, %s4271_s3 }
0x22ee   :  { %v2971_v62 = vpop.permute.xlu0 %2970 }
0x22ef   :  { %v2973_v63 = vadd.f32 %v2971_v62, %v2962_v61 }
0x22f1   :  { %4226 = vtanh.f32 %v2973_v63 }
0x22fb   :  { %v4227_v2 = vpop.eup %4226 }
0x22fc   :  { %2976 = vrot.lane.b32.xlu1 %v4227_v2, %s4272_s28 }
0x236e   :  { %v2977_v3 = vpop.permute.xlu1 %2976 }
0x236f   :  { %v2979_v7 = vmul.f32 %v4225_v28, %v2977_v3 }
0x2371   :  { %3077 = vrot.lane.b32.xlu1 %v2979_v7, %s4273_s29  ;;  %2982 = vrot.lane.b32.xlu0 %v2979_v7, %s4270_s25 }
0x23e3   :  { %v3078_v9 = vpop.permute.xlu1 %3077  ;;  %v2983_v8 = vpop.permute.xlu0 %2982 }
0x23e4   :  { %v2985_v10 = vsel %vm66_vm2, %v4436_v13, %v2983_v8  ;;  %4002 = vmatmul.mubr.msk.f32.vlgmr.msra.gmra.mrb[34].mxu0 %vm66_vm2, %v3078_v9  ;;  %v4736_v13 = vld [vmem:[%s4922_s0 + $0x4] sm:$0xf] }
0x23e5   :  { %3997 = vmatmul.mubr.msk.f32.vlgmr.msra.gmra.mrb[32].mxu1 %vm140_vm1, %v2985_v10  ;;  %4102 = vmatpush3.bf16.msra.mxu0 %v4585_v32 }
0x23e6   :  { %4099 = vmatpush3.bf16.msra.mxu1 %v4538_v42  ;;  %4008 = vmatprep.mubr.msk.f32.mxu1 %vm4269_vm0, %v4268_v1 }
0x23e7   :  { %4018 = vmatprep.subr.mxu1 %v4268_v1  ;;  %4015 = vmatprep.mubr.msk.f32.mxu0 %vm4269_vm0, %v4268_v1 }
0x23e8   :  { %4103 = vmatprep.subr.bf16.mxu0 %v4267_v0 }
0x23e9   :  { %4009 = vmatmul.mubr.msk.f32.vlgmr.msra.gmra.mrb[34].mxu1 %vm140_vm1, %v4736_v13 }
0x23ea   :  { %4019 = vmatpush3.msra.mxu1 %v4545_v43  ;;  %4020 = vmatprep.mubr.msk.f32.mxu1 %vm4269_vm0, %v4268_v1 }
0x23eb   :  { %4106 = vmatprep.subr.bf16.mxu1 %v4267_v0 }
0x24b7   :  { %v3147_v11 = vpop.f32.mrb[34].mxu0 }
0x24b8   :  { %v4744_v12 = vpop.f32.mrb[32].mxu1  ;;  %v4003_v14 = vpop.f32.mrb[35].mxu0 }
0x24b9   :  { %v3998_v58 = vpop.f32.mrb[33].mxu1 }
0x24bc   :  { %v3217_v49 = vpop.f32.mrb[34].mxu1 }
0x24bd   :  { %v3218_v18 = vadd.f32 %v3217_v49, %v3147_v11  ;;  %v4010_v19 = vpop.f32.mrb[35].mxu1 }
0x24bf   :  { %v3221_v20 = vadd.f32 %v4569_v59, %v3218_v18 }
0x24c1   :  { %4228 = vtanh.f32 %v3221_v20  ;;  %v3678_v43 = vmul.f32 -1.442695, %v3221_v20 }
0x24c3   :  { %4230 = vpow2.f32 %v3678_v43 }
0x24cb   :  { %v4229_v21 = vpop.eup %4228 }
0x24cc   :  { %3231 = vrot.lane.b32.xlu0 %v4229_v21, %s4270_s25 }
0x24cd   :  { %v4231_v5 = vpop.eup %4230 }
0x24ce   :  { %v3225_v23 = vadd.f32 1.0, %v4231_v5 }
0x24d0   :  { %4232 = vrcp.f32 %v3225_v23 }
0x24da   :  { %v4233_v0 = vpop.eup %4232 }
0x24db   :  { %v3228_v52 = vmul.f32 %v4233_v0, %v2973_v63 }
0x253e   :  { %v3232_v6 = vpop.permute.xlu0 %3231 }
0x253f   :  { %v3234_v24 = vmul.f32 %v4233_v0, %v3232_v6 }
0x2541   :  { %3236 = vrot.lane.b32.xlu1 %v3234_v24, %s4271_s3 }
0x25b3   :  { %v3237_v25 = vpop.permute.xlu1 %3236 }
0x25b4   :  { %v3239_v26 = vadd.f32 %v3237_v25, %v3228_v52 }
0x25b6   :  { %4234 = vtanh.f32 %v3239_v26 }
0x25c0   :  { %v4235_v27 = vpop.eup %4234 }
0x25c1   :  { %3242 = vrot.lane.b32.xlu0 %v4235_v27, %s4272_s28 }
0x2633   :  { %v3243_v29 = vpop.permute.xlu0 %3242 }
0x2634   :  { %v3245_v31 = vmul.f32 %v4233_v0, %v3243_v29  ;;  %v4815_v29 = vld [vmem:[%s4929_s9] ss:$0 sm:$0xff] }
0x2636   :  { %3343 = vrot.lane.b32.xlu0 %v3245_v31, %s4273_s29  ;;  %3248 = vrot.lane.b32.xlu1 %v3245_v31, %s4270_s25 }
0x26a8   :  { %v3344_v4 = vpop.permute.xlu0 %3343  ;;  %v3249_v33 = vpop.permute.xlu1 %3248 }
0x26a9   :  { %v3251_v34 = vsel %vm66_vm2, %v4412_v51, %v3249_v33  ;;  %4021 = vmatmul.mubr.msk.f32.vlgmr.msra.gmra.mrb[36].mxu1 %vm66_vm2, %v3344_v4 }
0x26aa   :  { %4016 = vmatmul.mubr.msk.f32.vlgmr.msra.gmra.mrb[36].mxu0 %vm140_vm1, %v3251_v34  ;;  %4108 = vmatpush3.bf16.msra.mxu1 %v4585_v32 }
0x26ab   :  { %4105 = vmatpush3.bf16.msra.mxu0 %v4538_v42  ;;  %4027 = vmatprep.mubr.msk.f32.mxu0 %vm4269_vm0, %v4268_v1 }
0x26ac   :  { %4034 = vmatprep.mubr.msk.f32.mxu1 %vm4269_vm0, %v4268_v1 }
0x26ae   :  { %4028 = vmatmul.mubr.msk.f32.vlgmr.msra.gmra.mrb[38].mxu0 %vm140_vm1, %v4765_v36 }
0x277c   :  { %v3413_v51 = vpop.f32.mrb[36].mxu1 }
0x277d   :  { %v4769_v37 = vpop.f32.mrb[36].mxu0  ;;  %v4022_v32 = vpop.f32.mrb[37].mxu1 }
0x277e   :  { %v4017_v39 = vpop.f32.mrb[37].mxu0 }
0x2781   :  { %v3483_v42 = vpop.f32.mrb[38].mxu0 }
0x2782   :  { %v3484_v40 = vadd.f32 %v3483_v42, %v3413_v51  ;;  %v4029_v35 = vpop.f32.mrb[39].mxu0  ;;  %v4823_v51 = vld [vmem:[%s4930_s10] ss:$0 sm:$0xff] }
0x2784   :  { %v3487_v44 = vadd.f32 %v4569_v59, %v3484_v40  ;;  %v4778_v59 = vld [vmem:[%s4928_s8] ss:$0 sm:$0xff] }
0x2785   :  { %v1712_v16 = vadd.f32 %v4778_v59, %v4609_v47  ;;  %v1992_v9 = vadd.f32 %v4778_v59, %v4635_v17  ;;  %v2258_v47 = vadd.f32 %v4778_v59, %v4661_v46  ;;  %v2524_v11 = vadd.f32 %v4778_v59, %v4687_v15 }
0x2786   :  { %4236 = vtanh.f32 %v3487_v44  ;;  %v3683_v22 = vmul.f32 -1.442695, %v3487_v44  ;;  %v2790_v58 = vadd.f32 %v4778_v59, %v4713_v41  ;;  %v3056_v49 = vadd.f32 %v4778_v59, %v4744_v12 }
0x2787   :  { %v1716_v60 = vsel %vm1715_vm3, %v1712_v16, 0.0  ;;  %v1995_v10 = vsel %vm1715_vm3, %v1992_v9, 0.0  ;;  %v2261_v14 = vsel %vm1715_vm3, %v2258_v47, 0.0  ;;  %v2527_v17 = vsel %vm1715_vm3, %v2524_v11, 0.0 }
0x2788   :  { %4238 = vpow2.f32 %v3683_v22  ;;  %v2793_v46 = vsel %vm1715_vm3, %v2790_v58, 0.0  ;;  %v3059_v18 = vsel %vm1715_vm3, %v3056_v49, 0.0 }
0x2790   :  { %v4237_v1 = vpop.eup %4236 }
0x2791   :  { %3497 = vrot.lane.b32.xlu1 %v4237_v1, %s4270_s25 }
0x2792   :  { %v4239_v48 = vpop.eup %4238 }
0x2793   :  { %v3491_v50 = vadd.f32 1.0, %v4239_v48 }
0x2795   :  { %4240 = vrcp.f32 %v3491_v50 }
0x279f   :  { %v4241_v53 = vpop.eup %4240 }
0x27a0   :  { %v3494_v45 = vmul.f32 %v4241_v53, %v3239_v26 }
0x2803   :  { %v3498_v54 = vpop.permute.xlu1 %3497 }
0x2804   :  { %v3500_v55 = vmul.f32 %v4241_v53, %v3498_v54 }
0x2806   :  { %3502 = vrot.lane.b32.xlu0 %v3500_v55, %s4271_s3 }
0x2878   :  { %v3503_v56 = vpop.permute.xlu0 %3502 }
0x2879   :  { %v3505_v57 = vadd.f32 %v3503_v56, %v3494_v45 }
0x287b   :  { %4242 = vtanh.f32 %v3505_v57 }
0x2885   :  { %v4243_v28 = vpop.eup %4242 }
0x2886   :  { %3508 = vrot.lane.b32.xlu1 %v4243_v28, %s4272_s28 }
0x28aa   :  { %1717 = vadd.xlane.f32.xlu1 %v1716_v60 }
0x28f8   :  { %v3509_v61 = vpop.permute.xlu1 %3508 }
0x28f9   :  { %v3511_v62 = vmul.f32 %v4241_v53, %v3509_v61  ;;  %v3322_v53 = vadd.f32 %v4778_v59, %v4769_v37 }
0x28fb   :  { %3514 = vrot.lane.b32.xlu0 %v3511_v62, %s4270_s25  ;;  %v3325_v45 = vsel %vm1715_vm3, %v3322_v53, 0.0 }
0x2937   :  { %v1718_v63 = vpop.xlane.xlu1 %1717 }
0x2938   :  { %v1720_v2 = vmul.f32 0.0625, %v1718_v63 }
0x293a   :  { %v1721_v3 = vsub.f32 %v1712_v16, %v1720_v2 }
0x293c   :  { %v1722_v7 = vmul.f32 %v1721_v3, %v1721_v3 }
0x293e   :  { %v1723_v8 = vsel %vm1715_vm3, %v1722_v7, 0.0 }
0x293f   :  { %1724 = vadd.xlane.f32.xlu0 %v1723_v8 }
0x2943   :  { %1996 = vadd.xlane.f32.xlu0 %v1995_v10 }
0x2947   :  { %2262 = vadd.xlane.f32.xlu0 %v2261_v14 }
0x294b   :  { %2528 = vadd.xlane.f32.xlu0 %v2527_v17 }
0x294f   :  { %2794 = vadd.xlane.f32.xlu0 %v2793_v46 }
0x2953   :  { %3060 = vadd.xlane.f32.xlu0 %v3059_v18 }
0x296d   :  { %v3515_v19 = vpop.permute.xlu0 %3514 }
0x296e   :  { %v3517_v15 = vsel %vm66_vm2, %v4388_v30, %v3515_v19 }
0x296f   :  { %4035 = vmatmul.mubr.msk.f32.vlgmr.msra.gmra.mrb[38].mxu1 %vm140_vm1, %v3517_v15 }
0x29cc   :  { %v1725_v20 = vpop.xlane.xlu0 %1724 }
0x29cd   :  { %v1726_v41 = vmul.f32 0.0625, %v1725_v20 }
0x29cf   :  { %v1727_v21 = vadd.f32 1e-05, %v1726_v41 }
0x29d0   :  { %v1997_v43 = vpop.xlane.xlu0 %1996 }
0x29d1   :  { %4244 = vrsqrt.f32 %v1727_v21  ;;  %v1998_v5 = vmul.f32 0.0625, %v1997_v43  ;;  %v4262_v43 = vld [vmem:[%s4922_s0 + $0x18] sm:$0xf] }
0x29d3   :  { %v4803_v23 = vsub.f32 %v1992_v9, %v1998_v5 }
0x29d4   :  { %v2263_v12 = vpop.xlane.xlu0 %2262 }
0x29d5   :  { %v2264_v0 = vmul.f32 0.0625, %v2263_v12  ;;  %v2000_v6 = vmul.f32 %v4803_v23, %v4803_v23 }
0x29d7   :  { %v4807_v24 = vsub.f32 %v2258_v47, %v2264_v0  ;;  %v2001_v52 = vsel %vm1715_vm3, %v2000_v6, 0.0 }
0x29d8   :  { %2002 = vadd.xlane.f32.xlu1 %v2001_v52  ;;  %v2529_v30 = vpop.xlane.xlu0 %2528 }
0x29d9   :  { %v2530_v25 = vmul.f32 0.0625, %v2529_v30  ;;  %v2266_v26 = vmul.f32 %v4807_v24, %v4807_v24  ;;  %v4263_v30 = vld [vmem:[%s4922_s0 + $0x14] sm:$0xf] }
0x29db   :  { %v4245_v27 = vpop.eup %4244  ;;  %v4817_v31 = vsub.f32 %v2524_v11, %v2530_v25  ;;  %v2267_v4 = vsel %vm1715_vm3, %v2266_v26, 0.0 }
0x29dc   :  { %v1729_v33 = vmul.f32 %v4245_v27, %v1721_v3  ;;  %2268 = vadd.xlane.f32.xlu1 %v2267_v4  ;;  %v2795_v34 = vpop.xlane.xlu0 %2794 }
0x29dd   :  { %v2796_v32 = vmul.f32 0.0625, %v2795_v34  ;;  %v2532_v39 = vmul.f32 %v4817_v31, %v4817_v31 }
0x29de   :  { %v1736_v42 = vmul.f32 %v4815_v29, %v1729_v33 }
0x29df   :  { %v4828_v40 = vsub.f32 %v2790_v58, %v2796_v32  ;;  %v2533_v35 = vsel %vm1715_vm3, %v2532_v39, 0.0 }
0x29e0   :  { %v1743_v44 = vadd.f32 %v4823_v51, %v1736_v42  ;;  %2534 = vadd.xlane.f32.xlu1 %v2533_v35  ;;  %v3061_v1 = vpop.xlane.xlu0 %3060  ;;  %v4265_v42 = vld [vmem:[%s4922_s0 + $0xc] sm:$0xf] }
0x29e1   :  { %v3062_v22 = vmul.f32 0.0625, %v3061_v1  ;;  %v2798_v48 = vmul.f32 %v4828_v40, %v4828_v40 }
0x29e2   :  { %v1744_v50 = vadd.f32 %v4525_v38, %v1743_v44 }
0x29e3   :  { %v4837_v54 = vsub.f32 %v3056_v49, %v3062_v22  ;;  %v2799_v55 = vsel %vm1715_vm3, %v2798_v48, 0.0  ;;  %v4266_v48 = vld [vmem:[%s4922_s0 + $0x8] sm:$0xf] }
0x29e4   :  { %3650 = vst.msk [vmem:[%s4931_s11 + $0x1c] sm:$0xf] %vm1715_vm3, %v1744_v50  ;;  %2800 = vadd.xlane.f32.xlu1 %v2799_v55 }
0x29e5   :  { %v3064_v56 = vmul.f32 %v4837_v54, %v4837_v54 }
0x29e7   :  { %v3065_v38 = vsel %vm1715_vm3, %v3064_v56, 0.0 }
0x29e8   :  { %3326 = vadd.xlane.f32.xlu1 %v3325_v45 }
0x29ec   :  { %3066 = vadd.xlane.f32.xlu1 %v3065_v38 }
0x2a42   :  { %v3587_v37 = vpop.f32.mrb[38].mxu1 }
0x2a43   :  { %v4849_v57 = vadd.f32 %v4778_v59, %v3587_v37  ;;  %v4036_v28 = vpop.f32.mrb[39].mxu1 }
0x2a45   :  { %v3591_v16 = vsel %vm1715_vm3, %v4849_v57, 0.0 }
0x2a46   :  { %3592 = vadd.xlane.f32.xlu0 %v3591_v16 }
0x2a65   :  { %v2003_v60 = vpop.xlane.xlu1 %2002 }
0x2a66   :  { %v2004_v61 = vmul.f32 0.0625, %v2003_v60 }
0x2a68   :  { %v2005_v62 = vadd.f32 1e-05, %v2004_v61 }
0x2a69   :  { %v2269_v63 = vpop.xlane.xlu1 %2268 }
0x2a6a   :  { %4246 = vrsqrt.f32 %v2005_v62  ;;  %v2270_v2 = vmul.f32 0.0625, %v2269_v63 }
0x2a6c   :  { %v2271_v3 = vadd.f32 1e-05, %v2270_v2 }
0x2a6d   :  { %v2535_v7 = vpop.xlane.xlu1 %2534 }
0x2a6e   :  { %4248 = vrsqrt.f32 %v2271_v3  ;;  %v2536_v9 = vmul.f32 0.0625, %v2535_v7 }
0x2a70   :  { %v2537_v8 = vadd.f32 1e-05, %v2536_v9 }
0x2a71   :  { %v2801_v47 = vpop.xlane.xlu1 %2800 }
0x2a72   :  { %4250 = vrsqrt.f32 %v2537_v8  ;;  %v2802_v59 = vmul.f32 0.0625, %v2801_v47 }
0x2a74   :  { %v4247_v10 = vpop.eup %4246  ;;  %v2803_v11 = vadd.f32 1e-05, %v2802_v59 }
0x2a75   :  { %v2007_v14 = vmul.f32 %v4247_v10, %v4803_v23  ;;  %v3327_v58 = vpop.xlane.xlu1 %3326 }
0x2a76   :  { %4252 = vrsqrt.f32 %v2803_v11  ;;  %v3328_v17 = vmul.f32 0.0625, %v3327_v58 }
0x2a77   :  { %v2008_v49 = vmul.f32 %v4815_v29, %v2007_v14 }
0x2a78   :  { %v4249_v46 = vpop.eup %4248  ;;  %v3329_v18 = vsub.f32 %v3322_v53, %v3328_v17 }
0x2a79   :  { %v2009_v19 = vadd.f32 %v4823_v51, %v2008_v49  ;;  %v2273_v15 = vmul.f32 %v4249_v46, %v4807_v24  ;;  %v3067_v20 = vpop.xlane.xlu1 %3066 }
0x2a7a   :  { %v3068_v41 = vmul.f32 0.0625, %v3067_v20  ;;  %v3330_v21 = vmul.f32 %v3329_v18, %v3329_v18 }
0x2a7b   :  { %v2010_v5 = vadd.f32 %v4262_v43, %v2009_v19  ;;  %v2274_v23 = vmul.f32 %v4815_v29, %v2273_v15 }
0x2a7c   :  { %v4251_v12 = vpop.eup %4250  ;;  %v3069_v0 = vadd.f32 1e-05, %v3068_v41  ;;  %v3331_v6 = vsel %vm1715_vm3, %v3330_v21, 0.0 }
0x2a7d   :  { %3655 = vst.msk [vmem:[%s4931_s11 + $0x18] sm:$0xf] %vm1715_vm3, %v2010_v5  ;;  %v2275_v24 = vadd.f32 %v4823_v51, %v2274_v23  ;;  %v2539_v52 = vmul.f32 %v4251_v12, %v4817_v31  ;;  %3332 = vadd.xlane.f32.xlu0 %v3331_v6  ;;  %v4264_v31 = vld [vmem:[%s4922_s0 + $0x10] sm:$0xf] }
0x2a7e   :  { %4254 = vrsqrt.f32 %v3069_v0 }
0x2a7f   :  { %v2276_v25 = vadd.f32 %v4263_v30, %v2275_v24  ;;  %v2540_v26 = vmul.f32 %v4815_v29, %v2539_v52 }
0x2a80   :  { %v4253_v27 = vpop.eup %4252 }
0x2a81   :  { %3660 = vst.msk [vmem:[%s4931_s11 + $0x14] sm:$0xf] %vm1715_vm3, %v2276_v25  ;;  %v2541_v4 = vadd.f32 %v4823_v51, %v2540_v26  ;;  %v2805_v33 = vmul.f32 %v4253_v27, %v4828_v40 }
0x2a83   :  { %v2542_v34 = vadd.f32 %v4264_v31, %v2541_v4  ;;  %v2806_v32 = vmul.f32 %v4815_v29, %v2805_v33 }
0x2a85   :  { %3665 = vst.msk [vmem:[%s4931_s11 + $0x10] sm:$0xf] %vm1715_vm3, %v2542_v34  ;;  %v2807_v39 = vadd.f32 %v4823_v51, %v2806_v32 }
0x2a87   :  { %v2808_v35 = vadd.f32 %v4265_v42, %v2807_v39 }
0x2a88   :  { %v4255_v40 = vpop.eup %4254 }
0x2a89   :  { %3670 = vst.msk [vmem:[%s4931_s11 + $0xc] sm:$0xf] %vm1715_vm3, %v2808_v35  ;;  %v3071_v44 = vmul.f32 %v4255_v40, %v4837_v54 }
0x2a8b   :  { %v3072_v1 = vmul.f32 %v4815_v29, %v3071_v44 }
0x2a8d   :  { %v3073_v22 = vadd.f32 %v4823_v51, %v3072_v1 }
0x2a8f   :  { %v3074_v50 = vadd.f32 %v4266_v48, %v3073_v22 }
0x2a91   :  { %3675 = vst.msk [vmem:[%s4931_s11 + $0x8] sm:$0xf] %vm1715_vm3, %v3074_v50 }
0x2ad3   :  { %v3593_v53 = vpop.xlane.xlu0 %3592 }
0x2ad4   :  { %v3594_v55 = vmul.f32 0.0625, %v3593_v53 }
0x2ad6   :  { %v3595_v45 = vsub.f32 %v4849_v57, %v3594_v55 }
0x2ad8   :  { %v3596_v56 = vmul.f32 %v3595_v45, %v3595_v45 }
0x2ada   :  { %v3597_v54 = vsel %vm1715_vm3, %v3596_v56, 0.0 }
0x2adb   :  { %3598 = vadd.xlane.f32.xlu1 %v3597_v54 }
0x2b0a   :  { %v3333_v38 = vpop.xlane.xlu0 %3332 }
0x2b0b   :  { %v3334_v37 = vmul.f32 0.0625, %v3333_v38 }
0x2b0d   :  { %v3335_v28 = vadd.f32 1e-05, %v3334_v37 }
0x2b0f   :  { %4256 = vrsqrt.f32 %v3335_v28 }
0x2b19   :  { %v4257_v16 = vpop.eup %4256 }
0x2b1a   :  { %v3337_v60 = vmul.f32 %v4257_v16, %v3329_v18 }
0x2b1c   :  { %v3338_v61 = vmul.f32 %v4815_v29, %v3337_v60 }
0x2b1e   :  { %v3339_v62 = vadd.f32 %v4823_v51, %v3338_v61 }
0x2b20   :  { %v3340_v63 = vadd.f32 %v4736_v13, %v3339_v62 }
0x2b22   :  { %3680 = vst.msk [vmem:[%s4931_s11 + $0x4] sm:$0xf] %vm1715_vm3, %v3340_v63 }
0x2b68   :  { %v3599_v57 = vpop.xlane.xlu1 %3598 }
0x2b69   :  { %v3600_v2 = vmul.f32 0.0625, %v3599_v57 }
0x2b6b   :  { %v3601_v3 = vadd.f32 1e-05, %v3600_v2 }
0x2b6d   :  { %4258 = vrsqrt.f32 %v3601_v3 }
0x2b77   :  { %v4259_v7 = vpop.eup %4258 }
0x2b78   :  { %v3603_v9 = vmul.f32 %v4259_v7, %v3595_v45 }
0x2b7a   :  { %v3604_v8 = vmul.f32 %v4815_v29, %v3603_v9 }
0x2b7c   :  { %v3605_v47 = vadd.f32 %v4823_v51, %v3604_v8 }
0x2b7e   :  { %v3606_v59 = vadd.f32 %v4765_v36, %v3605_v47 }
0x2b80   :  { %3607 = vst.msk [vmem:[%s4931_s11] sm:$0xf] %vm1715_vm3, %v3606_v59 }

</bundles_post_ra>
